<compile_context>
chip_gen: v5e
topology: v5e:2x2
jax: 0.10.0
libtpu: 0.0.40
codegen_flags: <defaults>
</compile_context>

<pallas_src>
import jax
import jax.numpy as jnp
from jax.experimental import pallas as pl
from jax.experimental.pallas import tpu as pltpu

LEAKY_SLOPE = 0.2
DROPOUT_P = 0.3


def _round_up(x, m):
    return (x + m - 1) // m * m


# ------------------------------ Pallas kernel ------------------------------

def _mlp_kernel(x_ref,
                w1_ref, b1_ref, u1_ref,
                w2_ref, b2_ref, u2_ref,
                w3_ref, b3_ref, u3_ref,
                w4_ref, b4_ref,
                o_ref):
    """Fused 4-layer discriminator MLP; everything resident in VMEM.

    x_ref:  (Mp, K)  bf16          w{1,2,3}_ref: (K_i, N_i) bf16
    b{1,2,3}_ref: (1, N_i) f32     u{1,2,3}_ref: (Mp, N_i) f32 uniforms
    w4_ref: (1, 256) f32 (row)     b4_ref: (1, 1) f32
    o_ref:  (Mp, 1) f32
    """
    inv_keep = 1.0 / (1.0 - DROPOUT_P)

    def hidden(h_bf16, w_ref, b_ref, u_ref):
        # bf16 MXU matmul, f32 accumulate; f32 epilogue (bias + act + dropout).
        y = jnp.dot(h_bf16, w_ref[...],
                    preferred_element_type=jnp.float32) + b_ref[...]
        y = jnp.where(y >= 0.0, y, LEAKY_SLOPE * y)          # LeakyReLU(0.2)
        keep = u_ref[...] >= DROPOUT_P                       # P(keep) = 1 - p
        y = jnp.where(keep, y * inv_keep, 0.0)               # inverted dropout
        return y.astype(jnp.bfloat16)                        # feed next MXU op

    h = hidden(x_ref[...], w1_ref, b1_ref, u1_ref)           # (Mp, 1024)
    h = hidden(h, w2_ref, b2_ref, u2_ref)                    # (Mp, 512)
    h = hidden(h, w3_ref, b3_ref, u3_ref)                    # (Mp, 256)

    # Head: (Mp,256) x (256,1) as a VPU multiply + cross-lane sum (no 1-column
    # MXU pass), then sigmoid.  exp goes to the EUP; the tile is 1 lane wide.
    h_f32 = h.astype(jnp.float32)
    y = jnp.sum(h_f32 * w4_ref[...], axis=-1, keepdims=True) + b4_ref[...]
    o_ref[...] = 1.0 / (1.0 + jnp.exp(-y))


# ------------------------------- forward pass ------------------------------

def discriminator_forward(x, params, rng_key):
    """x: (M, K) f32 -> (M, 1) f32.  Dropout is active (training mode),
    matching F.dropout's default in the PyTorch forward."""
    M, _ = x.shape
    Mp = max(_round_up(M, 8), 8)           # pad batch to sublane minimum only
    if Mp != M:
        x = jnp.pad(x, ((0, Mp - M), (0, 0)))
    x_bf = x.astype(jnp.bfloat16)

    n1 = params["fc1"]["w"].shape[1]
    n2 = params["fc2"]["w"].shape[1]
    n3 = params["fc3"]["w"].shape[1]
    k1, k2, k3 = jax.random.split(rng_key, 3)
    u1 = jax.random.uniform(k1, (Mp, n1), jnp.float32)
    u2 = jax.random.uniform(k2, (Mp, n2), jnp.float32)
    u3 = jax.random.uniform(k3, (Mp, n3), jnp.float32)

    out = pl.pallas_call(
        _mlp_kernel,
        out_shape=jax.ShapeDtypeStruct((Mp, 1), jnp.float32),
        # No grid: every operand is a full-array VMEM block (~3.3 MB total),
        # well under the scoped limit on v5e/v6e/v7x.
        compiler_params=pltpu.CompilerParams(
            vmem_limit_bytes=32 * 1024 * 1024),
    )(x_bf,
      params["fc1"]["w"], params["fc1"]["b"], u1,
      params["fc2"]["w"], params["fc2"]["b"], u2,
      params["fc3"]["w"], params["fc3"]["b"], u3,
      params["fc4"]["w"], params["fc4"]["b"])

    return out[:M] if Mp != M else out


# ----------------------------- parameter init ------------------------------

def _init_linear(key, fan_in, fan_out, head=False):
    # nn.Linear default init: U(-1/sqrt(fan_in), 1/sqrt(fan_in)) for W and b.
    kw, kb = jax.random.split(key)
    bound = fan_in ** -0.5
    w = jax.random.uniform(kw, (fan_in, fan_out), jnp.float32, -bound, bound)
    b = jax.random.uniform(kb, (fan_out,), jnp.float32, -bound, bound)
    if head:
        # Head weight stored as an f32 row (1, fan_in) for the VPU reduction.
        return {"w": w.reshape(1, fan_in) if fan_out == 1 else w.T,
                "b": b.reshape(1, fan_out)}
    # Hidden-layer weights are kept persistently in bf16 (cast once here, not
    # per forward call); biases stay f32 and are added in the f32 epilogue.
    return {"w": w.astype(jnp.bfloat16), "b": b.reshape(1, fan_out)}


def init_discriminator(key, d_input_dim):
    k1, k2, k3, k4 = jax.random.split(key, 4)
    return {
        "fc1": _init_linear(k1, d_input_dim, 1024),
        "fc2": _init_linear(k2, 1024, 512),
        "fc3": _init_linear(k3, 512, 256),
        "fc4": _init_linear(k4, 256, 1, head=True),
    }


# ----------------------------------- main -----------------------------------

if __name__ == "__main__":
    key = jax.random.PRNGKey(0)
    kp, kx, kd = jax.random.split(key, 3)

    D_INPUT = 784          # e.g. flattened 28x28 images
    BATCH = 32

    params = init_discriminator(kp, D_INPUT)
    x = jax.random.normal(kx, (BATCH, D_INPUT), jnp.float32)

    fwd = jax.jit(discriminator_forward)
    out = jax.block_until_ready(fwd(x, params, kd))

    assert out.shape == (BATCH, 1), out.shape
    assert bool(jnp.all(jnp.isfinite(out)))
    assert bool(jnp.all((out >= 0.0) & (out <= 1.0)))   # sigmoid output range
    print("KERNEL_OK")
</pallas_src>

<mosaic_0001>
module attributes {stable_mosaic.version = 11 : i64} {
  func.func @_mlp_kernel(%arg0: memref<32x784xbf16, #tpu.memory_space<vmem>>, %arg1: memref<784x1024xbf16, #tpu.memory_space<vmem>>, %arg2: memref<1x1024xf32, #tpu.memory_space<vmem>>, %arg3: memref<32x1024xf32, #tpu.memory_space<vmem>>, %arg4: memref<1024x512xbf16, #tpu.memory_space<vmem>>, %arg5: memref<1x512xf32, #tpu.memory_space<vmem>>, %arg6: memref<32x512xf32, #tpu.memory_space<vmem>>, %arg7: memref<512x256xbf16, #tpu.memory_space<vmem>>, %arg8: memref<1x256xf32, #tpu.memory_space<vmem>>, %arg9: memref<32x256xf32, #tpu.memory_space<vmem>>, %arg10: memref<1x256xf32, #tpu.memory_space<vmem>>, %arg11: memref<1x1xf32, #tpu.memory_space<vmem>>, %arg12: memref<32x1xf32, #tpu.memory_space<vmem>>) attributes {dimension_semantics = [], scalar_prefetch = 0 : i64, scratch_operands = 0 : i64, tpu.core_type = #tpu.core_type<tc>} {
    %c0 = arith.constant 0 : index
    %c0_0 = arith.constant 0 : index
    %0 = vector.load %arg0[%c0, %c0_0] : memref<32x784xbf16, #tpu.memory_space<vmem>>, vector<32x784xbf16>
    %c0_1 = arith.constant 0 : index
    %c0_2 = arith.constant 0 : index
    %1 = vector.load %arg1[%c0_1, %c0_2] : memref<784x1024xbf16, #tpu.memory_space<vmem>>, vector<784x1024xbf16>
    %cst = arith.constant dense<0.000000e+00> : vector<32x1024xf32>
    %2 = tpu.matmul %0, %1, %cst {dimension_numbers = #tpu.dot_dimension_numbers<[1], [0], [0], [1], [0, 0, 1, 1], [], []>} : vector<32x784xbf16>, vector<784x1024xbf16>, vector<32x1024xf32> -> vector<32x1024xf32>
    %c0_3 = arith.constant 0 : index
    %c0_4 = arith.constant 0 : index
    %3 = vector.load %arg2[%c0_3, %c0_4] : memref<1x1024xf32, #tpu.memory_space<vmem>>, vector<1x1024xf32>
    %4 = vector.broadcast %3 : vector<1x1024xf32> to vector<32x1024xf32>
    %5 = arith.addf %2, %4 : vector<32x1024xf32>
    %cst_5 = arith.constant 0.000000e+00 : f32
    %6 = vector.broadcast %cst_5 : f32 to vector<32x1024xf32>
    %7 = arith.cmpf oge, %5, %6 : vector<32x1024xf32>
    %cst_6 = arith.constant 2.000000e-01 : f32
    %8 = vector.broadcast %cst_6 : f32 to vector<32x1024xf32>
    %9 = arith.mulf %8, %5 : vector<32x1024xf32>
    %10 = arith.select %7, %5, %9 : vector<32x1024xi1>, vector<32x1024xf32>
    %c0_7 = arith.constant 0 : index
    %c0_8 = arith.constant 0 : index
    %11 = vector.load %arg3[%c0_7, %c0_8] : memref<32x1024xf32, #tpu.memory_space<vmem>>, vector<32x1024xf32>
    %cst_9 = arith.constant 3.000000e-01 : f32
    %12 = vector.broadcast %cst_9 : f32 to vector<32x1024xf32>
    %13 = arith.cmpf oge, %11, %12 : vector<32x1024xf32>
    %cst_10 = arith.constant 1.42857146 : f32
    %14 = vector.broadcast %cst_10 : f32 to vector<32x1024xf32>
    %15 = arith.mulf %10, %14 : vector<32x1024xf32>
    %cst_11 = arith.constant 0.000000e+00 : f32
    %16 = vector.broadcast %cst_11 : f32 to vector<32x1024xf32>
    %17 = arith.select %13, %15, %16 : vector<32x1024xi1>, vector<32x1024xf32>
    %18 = arith.truncf %17 : vector<32x1024xf32> to vector<32x1024xbf16>
    %c0_12 = arith.constant 0 : index
    %c0_13 = arith.constant 0 : index
    %19 = vector.load %arg4[%c0_12, %c0_13] : memref<1024x512xbf16, #tpu.memory_space<vmem>>, vector<1024x512xbf16>
    %cst_14 = arith.constant dense<0.000000e+00> : vector<32x512xf32>
    %20 = tpu.matmul %18, %19, %cst_14 {dimension_numbers = #tpu.dot_dimension_numbers<[1], [0], [0], [1], [0, 0, 1, 1], [], []>} : vector<32x1024xbf16>, vector<1024x512xbf16>, vector<32x512xf32> -> vector<32x512xf32>
    %c0_15 = arith.constant 0 : index
    %c0_16 = arith.constant 0 : index
    %21 = vector.load %arg5[%c0_15, %c0_16] : memref<1x512xf32, #tpu.memory_space<vmem>>, vector<1x512xf32>
    %22 = vector.broadcast %21 : vector<1x512xf32> to vector<32x512xf32>
    %23 = arith.addf %20, %22 : vector<32x512xf32>
    %cst_17 = arith.constant 0.000000e+00 : f32
    %24 = vector.broadcast %cst_17 : f32 to vector<32x512xf32>
    %25 = arith.cmpf oge, %23, %24 : vector<32x512xf32>
    %cst_18 = arith.constant 2.000000e-01 : f32
    %26 = vector.broadcast %cst_18 : f32 to vector<32x512xf32>
    %27 = arith.mulf %26, %23 : vector<32x512xf32>
    %28 = arith.select %25, %23, %27 : vector<32x512xi1>, vector<32x512xf32>
    %c0_19 = arith.constant 0 : index
    %c0_20 = arith.constant 0 : index
    %29 = vector.load %arg6[%c0_19, %c0_20] : memref<32x512xf32, #tpu.memory_space<vmem>>, vector<32x512xf32>
    %cst_21 = arith.constant 3.000000e-01 : f32
    %30 = vector.broadcast %cst_21 : f32 to vector<32x512xf32>
    %31 = arith.cmpf oge, %29, %30 : vector<32x512xf32>
    %cst_22 = arith.constant 1.42857146 : f32
    %32 = vector.broadcast %cst_22 : f32 to vector<32x512xf32>
    %33 = arith.mulf %28, %32 : vector<32x512xf32>
    %cst_23 = arith.constant 0.000000e+00 : f32
    %34 = vector.broadcast %cst_23 : f32 to vector<32x512xf32>
    %35 = arith.select %31, %33, %34 : vector<32x512xi1>, vector<32x512xf32>
    %36 = arith.truncf %35 : vector<32x512xf32> to vector<32x512xbf16>
    %c0_24 = arith.constant 0 : index
    %c0_25 = arith.constant 0 : index
    %37 = vector.load %arg7[%c0_24, %c0_25] : memref<512x256xbf16, #tpu.memory_space<vmem>>, vector<512x256xbf16>
    %cst_26 = arith.constant dense<0.000000e+00> : vector<32x256xf32>
    %38 = tpu.matmul %36, %37, %cst_26 {dimension_numbers = #tpu.dot_dimension_numbers<[1], [0], [0], [1], [0, 0, 1, 1], [], []>} : vector<32x512xbf16>, vector<512x256xbf16>, vector<32x256xf32> -> vector<32x256xf32>
    %c0_27 = arith.constant 0 : index
    %c0_28 = arith.constant 0 : index
    %39 = vector.load %arg8[%c0_27, %c0_28] : memref<1x256xf32, #tpu.memory_space<vmem>>, vector<1x256xf32>
    %40 = vector.broadcast %39 : vector<1x256xf32> to vector<32x256xf32>
    %41 = arith.addf %38, %40 : vector<32x256xf32>
    %cst_29 = arith.constant 0.000000e+00 : f32
    %42 = vector.broadcast %cst_29 : f32 to vector<32x256xf32>
    %43 = arith.cmpf oge, %41, %42 : vector<32x256xf32>
    %cst_30 = arith.constant 2.000000e-01 : f32
    %44 = vector.broadcast %cst_30 : f32 to vector<32x256xf32>
    %45 = arith.mulf %44, %41 : vector<32x256xf32>
    %46 = arith.select %43, %41, %45 : vector<32x256xi1>, vector<32x256xf32>
    %c0_31 = arith.constant 0 : index
    %c0_32 = arith.constant 0 : index
    %47 = vector.load %arg9[%c0_31, %c0_32] : memref<32x256xf32, #tpu.memory_space<vmem>>, vector<32x256xf32>
    %cst_33 = arith.constant 3.000000e-01 : f32
    %48 = vector.broadcast %cst_33 : f32 to vector<32x256xf32>
    %49 = arith.cmpf oge, %47, %48 : vector<32x256xf32>
    %cst_34 = arith.constant 1.42857146 : f32
    %50 = vector.broadcast %cst_34 : f32 to vector<32x256xf32>
    %51 = arith.mulf %46, %50 : vector<32x256xf32>
    %cst_35 = arith.constant 0.000000e+00 : f32
    %52 = vector.broadcast %cst_35 : f32 to vector<32x256xf32>
    %53 = arith.select %49, %51, %52 : vector<32x256xi1>, vector<32x256xf32>
    %54 = arith.truncf %53 : vector<32x256xf32> to vector<32x256xbf16>
    %55 = arith.extf %54 : vector<32x256xbf16> to vector<32x256xf32>
    %c0_36 = arith.constant 0 : index
    %c0_37 = arith.constant 0 : index
    %56 = vector.load %arg10[%c0_36, %c0_37] : memref<1x256xf32, #tpu.memory_space<vmem>>, vector<1x256xf32>
    %57 = vector.broadcast %56 : vector<1x256xf32> to vector<32x256xf32>
    %58 = arith.mulf %55, %57 : vector<32x256xf32>
    %cst_38 = arith.constant dense<0.000000e+00> : vector<32xf32>
    %59 = vector.multi_reduction <add>, %58, %cst_38 [1] : vector<32x256xf32> to vector<32xf32>
    %60 = vector.shape_cast %59 : vector<32xf32> to vector<32x1xf32>
    %c0_39 = arith.constant 0 : index
    %c0_40 = arith.constant 0 : index
    %61 = vector.load %arg11[%c0_39, %c0_40] : memref<1x1xf32, #tpu.memory_space<vmem>>, vector<1x1xf32>
    %62 = vector.broadcast %61 : vector<1x1xf32> to vector<32x1xf32>
    %63 = arith.addf %60, %62 : vector<32x1xf32>
    %cst_41 = arith.constant 0.000000e+00 : f32
    %64 = vector.broadcast %cst_41 : f32 to vector<32x1xf32>
    %65 = arith.subf %64, %63 : vector<32x1xf32>
    %66 = math.exp %65 : vector<32x1xf32>
    %cst_42 = arith.constant 1.000000e+00 : f32
    %67 = vector.broadcast %cst_42 : f32 to vector<32x1xf32>
    %68 = arith.addf %67, %66 : vector<32x1xf32>
    %cst_43 = arith.constant 1.000000e+00 : f32
    %69 = vector.broadcast %cst_43 : f32 to vector<32x1xf32>
    %70 = arith.divf %69, %68 : vector<32x1xf32>
    %c0_44 = arith.constant 0 : index
    %c0_45 = arith.constant 0 : index
    %71 = vector.load %arg12[%c0_44, %c0_45] : memref<32x1xf32, #tpu.memory_space<vmem>>, vector<32x1xf32>
    tpu.vector_store %arg12[%c0_44, %c0_45], %70 {strides = array<i32>} : memref<32x1xf32, #tpu.memory_space<vmem>>, vector<32x1xf32>,
    return
  }
}

</mosaic_0001>

<bundles_post_ra>
// kernel: discriminator_forward.3
= control target key start
LH: loop header
LB: loop body
LE: loop exit
PB: predicated region body
PF: predicated region fallthrough
CT: control target
= control target key end

     0   :  { %s12576_s0 = inlined_call_operand.vmem [shape: bf16[32,784], index: 0, kind: input, shape index: {}]   ;;  %s12577_s1 = inlined_call_operand.hbm [shape: bf16[784,1024], index: 1, kind: input, shape index: {}]   ;;  %s12578_s2 = inlined_call_operand.hbm [shape: f32[1,1024], index: 2, kind: input, shape index: {}]   ;;  %s12579_s3 = inlined_call_operand.vmem [shape: f32[32,1024], index: 3, kind: input, shape index: {}]   ;;  %s12580_s4 = inlined_call_operand.hbm [shape: bf16[1024,512], index: 4, kind: input, shape index: {}]   ;;  %s12581_s5 = inlined_call_operand.hbm [shape: f32[1,512], index: 5, kind: input, shape index: {}]   ;;  %s12582_s6 = inlined_call_operand.vmem [shape: f32[32,512], index: 6, kind: input, shape index: {}]   ;;  %s12583_s7 = inlined_call_operand.hbm [shape: bf16[512,256], index: 7, kind: input, shape index: {}]   ;;  %s12584_s8 = inlined_call_operand.hbm [shape: f32[1,256], index: 8, kind: input, shape index: {}]   ;;  %s12585_s9 = inlined_call_operand.vmem [shape: f32[32,256], index: 9, kind: input, shape index: {}]   ;;  %s12586_s10 = inlined_call_operand.hbm [shape: f32[1,256], index: 10, kind: input, shape index: {}]   ;;  %s12587_s11 = inlined_call_operand.<no memory space> [shape: f32[1,1], index: 11, kind: input, shape index: {}]   ;;  %s12588_s12 = inlined_call_operand.vmem [shape: f32[32,1], index: 12, kind: output, shape index: {}]  }
   0x1   :  { %v17_v0 = vstv %s12587_s11 }
   0x2   :  { %18 = vst [vmem:[#allocation2] sm:$0x1] %v17_v0 }
   0x3   :  { %19 = vsyncpa [#allocation4], 0 }
   0x4   :  { %20 = vsyncpa [#allocation6], 0 }
   0x5   :  { %21 = vsyncpa [#allocation9], 0  ;;  %s43_s25 = sshll.u32 %s12578_s2, 4  ;;  %s44_s25 = int_to_ptr.hbm [resolvable:$true] %s43_s25 }
   0x6   :  { %22 = vsyncpa [#allocation12], 0  ;;  %s11015_s26 = smov [#allocation5]   ;;  %s69_s30 = sshll.u32 %s12581_s5, 4  ;;  %s70_s30 = int_to_ptr.hbm [resolvable:$true] %s69_s30 }
   0x7   :  { %s45_s27 = sshll.u32 %s11015_s26, 4  ;;  %s11016_s11 = smov [#allocation8]   ;;  %s46_s27 = int_to_ptr.vmem [resolvable:$true] %s45_s27 }
   0x8   :  { %48 = dma.hbm_to_vmem [thread:$0]  %s44_s25, 128, %s46_s27, [#allocation6]  }
   0x9   :  { %s71_s13 = sshll.u32 %s11016_s11, 4  ;;  %s95_s16 = sshll.u32 %s12584_s8, 4  ;;  %s72_s13 = int_to_ptr.vmem [resolvable:$true] %s71_s13  ;;  %s96_s16 = int_to_ptr.hbm [resolvable:$true] %s95_s16 }
   0xa   :  { %74 = dma.hbm_to_vmem [thread:$0]  %s70_s30, 64, %s72_s13, [#allocation9]  }
   0xb   :  { %s29_s18 = sshll.u32 %s12577_s1, 4  ;;  %s11017_s19 = smov [#allocation11]   ;;  %s30_s18 = int_to_ptr.hbm [resolvable:$true] %s29_s18 }
   0xc   :  { %s97_s20 = sshll.u32 %s11017_s19, 4  ;;  %s11018_s5 = smov [#allocation3]   ;;  %s98_s20 = int_to_ptr.vmem [resolvable:$true] %s97_s20 }
   0xd   :  { %100 = dma.hbm_to_vmem [thread:$0]  %s96_s16, 32, %s98_s20, [#allocation12]  }
   0xe   :  { %s31_s21 = sshll.u32 %s11018_s5, 4  ;;  %s11019_s22 = smov 512   ;;  %s32_s21 = int_to_ptr.vmem [resolvable:$true] %s31_s21 }
   0xf   :  { %s11020_s23 = smov 32   ;;  %s55_s25 = sshll.u32 %s12580_s4, 4  ;;  %s56_s25 = int_to_ptr.hbm [resolvable:$true] %s55_s25 }
  0x10   :  { %37 = dma.hbm_to_vmem [thread:$0]  %s30_s18, 50176, %s32_s21, [#allocation4], %s11019_s22, %s11019_s22, %s11020_s23  }
  0x11   :  { %s11021_s26 = smov [#allocation7]   ;;  %s81_s29 = sshll.u32 %s12583_s7, 4  ;;  %s82_s29 = int_to_ptr.hbm [resolvable:$true] %s81_s29 }
  0x12   :  { %s57_s27 = sshll.u32 %s11021_s26, 4  ;;  %s11022_s30 = smov 256   ;;  %s58_s27 = int_to_ptr.vmem [resolvable:$true] %s57_s27 }
  0x13   :  { %s11023_s11 = smov 16   ;;  %s11024_s13 = smov [#allocation10]  }
  0x14   :  { %63 = dma.hbm_to_vmem [thread:$0]  %s56_s25, 32768, %s58_s27, [#allocation6], %s11022_s30, %s11022_s30, %s11023_s11  }
  0x15   :  { %s83_s14 = sshll.u32 %s11024_s13, 4  ;;  %s11025_s15 = smov 128   ;;  %s84_s14 = int_to_ptr.vmem [resolvable:$true] %s83_s14 }
  0x16   :  { %s11026_s16 = smov 8   ;;  %s108_s17 = sshll.u32 %s12586_s10, 4  ;;  %s109_s17 = int_to_ptr.hbm [resolvable:$true] %s108_s17 }
  0x17   :  { %89 = dma.hbm_to_vmem [thread:$0]  %s82_s29, 8192, %s84_s14, [#allocation9], %s11025_s15, %s11025_s15, %s11026_s16  }
  0x18   :  { %s11027_s18 = smov [#allocation13]  }
  0x19   :  { %s110_s19 = sshll.u32 %s11027_s18, 4  ;;  %s111_s19 = int_to_ptr.vmem [resolvable:$true] %s110_s19 }
  0x1a   :  { %113 = dma.hbm_to_vmem [thread:$0]  %s109_s17, 32, %s111_s19, [#allocation12]  }
  0x1b   :  { %11007 = dma.done.wait [#allocation4], 50176  }
  0x1c   :  { %11008 = vsyncadd [#allocation4], 4294917120 }
  0x1d   :  { %11009 = dma.done.wait [#allocation6], 32896  }
  0x1e   :  { %11010 = vsyncadd [#allocation6], 4294934400 }
  0x1f   :  { %11011 = dma.done.wait [#allocation9], 8256  }
  0x20   :  { %11012 = vsyncadd [#allocation9], 4294959040 }
  0x21   :  { %11013 = dma.done.wait [#allocation12], 64  }
  0x22   :  { %11014 = vsyncadd [#allocation12], 4294967232  ;;  %v7201_v1 = vld [vmem:[#allocation3 + $0x1c0] sm:$0xf]  ;;  %vm2601_vm0 = vcmask 130048  }
  0x23   :  { %v10153_v2 = vld [vmem:[#allocation3 + $0x1dc] sm:$0xf0] }
  0x24   :  { %v7457_v3 = vld [vmem:[#allocation3 + $0x3c0] sm:$0xf]  ;;  %v7202_v4 = vor.u32 %v10153_v2, %v7201_v1 }
  0x25   :  { %v10217_v5 = vld [vmem:[#allocation3 + $0x3dc] sm:$0xf0] }
  0x26   :  { %v7713_v6 = vld [vmem:[#allocation3 + $0x5c0] sm:$0xf]  ;;  %v7458_v8 = vor.u32 %v10217_v5, %v7457_v3  ;;  %2608 = vmatpush.bf16.msra.mxu0 %v7202_v4 }
  0x27   :  { %v10281_v7 = vld [vmem:[#allocation3 + $0x5dc] sm:$0xf0] }
  0x28   :  { %v7714_v9 = vor.u32 %v10281_v7, %v7713_v6  ;;  %v7969_v10 = vld [vmem:[#allocation3 + $0x7c0] sm:$0xf]  ;;  %2627 = vmatpush.bf16.msra.mxu1 %v7458_v8 }
  0x29   :  { %v10345_v11 = vld [vmem:[#allocation3 + $0x7dc] sm:$0xf0] }
  0x2a   :  { %v7169_v12 = vld [vmem:[#allocation3 + $0x180] sm:$0xf]  ;;  %v7970_v13 = vor.u32 %v10345_v11, %v7969_v10  ;;  %2646 = vmatpush.bf16.msra.mxu2 %v7714_v9 }
  0x2b   :  { %v10145_v14 = vld [vmem:[#allocation3 + $0x19c] sm:$0xf0] }
  0x2c   :  { %v7425_v15 = vld [vmem:[#allocation3 + $0x380] sm:$0xf]  ;;  %v7170_v17 = vor.u32 %v10145_v14, %v7169_v12  ;;  %2665 = vmatpush.bf16.msra.mxu3 %v7970_v13 }
  0x2d   :  { %v10209_v16 = vld [vmem:[#allocation3 + $0x39c] sm:$0xf0] }
  0x2e   :  { %v7426_v18 = vor.u32 %v10209_v16, %v7425_v15  ;;  %v7681_v19 = vld [vmem:[#allocation3 + $0x580] sm:$0xf]  ;;  %2609 = vmatpush.bf16.msra.mxu0 %v7170_v17 }
  0x2f   :  { %v10273_v20 = vld [vmem:[#allocation3 + $0x59c] sm:$0xf0] }
  0x30   :  { %v7937_v21 = vld [vmem:[#allocation3 + $0x780] sm:$0xf]  ;;  %v7682_v22 = vor.u32 %v10273_v20, %v7681_v19  ;;  %2628 = vmatpush.bf16.msra.mxu1 %v7426_v18 }
  0x31   :  { %v10337_v23 = vld [vmem:[#allocation3 + $0x79c] sm:$0xf0] }
  0x32   :  { %v7137_v24 = vld [vmem:[#allocation3 + $0x140] sm:$0xf]  ;;  %v7938_v26 = vor.u32 %v10337_v23, %v7937_v21  ;;  %2647 = vmatpush.bf16.msra.mxu2 %v7682_v22 }
  0x33   :  { %v10137_v25 = vld [vmem:[#allocation3 + $0x15c] sm:$0xf0] }
  0x34   :  { %v7393_v27 = vld [vmem:[#allocation3 + $0x340] sm:$0xf]  ;;  %v7138_v30 = vor.u32 %v10137_v25, %v7137_v24  ;;  %2666 = vmatpush.bf16.msra.mxu3 %v7938_v26 }
  0x35   :  { %v10201_v28 = vld [vmem:[#allocation3 + $0x35c] sm:$0xf0] }
  0x36   :  { %v7649_v29 = vld [vmem:[#allocation3 + $0x540] sm:$0xf]  ;;  %v7394_v34 = vor.u32 %v10201_v28, %v7393_v27  ;;  %2610 = vmatpush.bf16.msra.mxu0 %v7138_v30  ;;  %v10082_v30 = vld [vmem:[%s12576_s0 + $0x18] sm:$0xf0] }
  0x37   :  { %v10265_v31 = vld [vmem:[#allocation3 + $0x55c] sm:$0xf0] }
  0x38   :  { %v7905_v32 = vld [vmem:[#allocation3 + $0x740] sm:$0xf]  ;;  %v7650_v35 = vor.u32 %v10265_v31, %v7649_v29  ;;  %2629 = vmatpush.bf16.msra.mxu1 %v7394_v34 }
  0x39   :  { %v10329_v33 = vld [vmem:[#allocation3 + $0x75c] sm:$0xf0] }
  0x3a   :  { %v7105_v36 = vld [vmem:[#allocation3 + $0x100] sm:$0xf]  ;;  %v7906_v39 = vor.u32 %v10329_v33, %v7905_v32  ;;  %2648 = vmatpush.bf16.msra.mxu2 %v7650_v35 }
  0x3b   :  { %v10129_v37 = vld [vmem:[#allocation3 + $0x11c] sm:$0xf0] }
  0x3c   :  { %v7361_v38 = vld [vmem:[#allocation3 + $0x300] sm:$0xf]  ;;  %v7106_v45 = vor.u32 %v10129_v37, %v7105_v36  ;;  %2667 = vmatpush.bf16.msra.mxu3 %v7906_v39 }
  0x3d   :  { %v10193_v40 = vld [vmem:[#allocation3 + $0x31c] sm:$0xf0] }
  0x3e   :  { %v7617_v41 = vld [vmem:[#allocation3 + $0x500] sm:$0xf]  ;;  %v7362_v46 = vor.u32 %v10193_v40, %v7361_v38  ;;  %2611 = vmatpush.bf16.msra.mxu0 %v7106_v45  ;;  %v6929_v40 = vld [vmem:[%s12576_s0 + $0x8] sm:$0xf] }
  0x3f   :  { %v10257_v42 = vld [vmem:[#allocation3 + $0x51c] sm:$0xf0] }
  0x40   :  { %v7873_v43 = vld [vmem:[#allocation3 + $0x700] sm:$0xf]  ;;  %v7618_v47 = vor.u32 %v10257_v42, %v7617_v41  ;;  %2630 = vmatpush.bf16.msra.mxu1 %v7362_v46  ;;  %v10080_v42 = vld [vmem:[%s12576_s0 + $0xc] sm:$0xf] }
  0x41   :  { %v10321_v44 = vld [vmem:[#allocation3 + $0x71c] sm:$0xf0] }
  0x42   :  { %v7073_v48 = vld [vmem:[#allocation3 + $0xc0] sm:$0xf]  ;;  %v7874_v51 = vor.u32 %v10321_v44, %v7873_v43  ;;  %2649 = vmatpush.bf16.msra.mxu2 %v7618_v47  ;;  %v6931_v44 = vld [vmem:[%s12576_s0 + $0x24] sm:$0xf0] }
  0x43   :  { %v10121_v49 = vld [vmem:[#allocation3 + $0xdc] sm:$0xf0] }
  0x44   :  { %v7329_v50 = vld [vmem:[#allocation3 + $0x2c0] sm:$0xf]  ;;  %v7074_v57 = vor.u32 %v10121_v49, %v7073_v48  ;;  %2668 = vmatpush.bf16.msra.mxu3 %v7874_v51  ;;  %v7203_v51 = vld [vmem:[#allocation3 + $0x1e0] sm:$0xf0] }
  0x45   :  { %v10185_v52 = vld [vmem:[#allocation3 + $0x2dc] sm:$0xf0] }
  0x46   :  { %v7585_v53 = vld [vmem:[#allocation3 + $0x4c0] sm:$0xf]  ;;  %v7330_v58 = vor.u32 %v10185_v52, %v7329_v50  ;;  %2612 = vmatpush.bf16.msra.mxu0 %v7074_v57  ;;  %v10149_v50 = vld [vmem:[#allocation3 + $0x1c4] sm:$0xf] }
  0x47   :  { %v10249_v54 = vld [vmem:[#allocation3 + $0x4dc] sm:$0xf0] }
  0x48   :  { %v7841_v55 = vld [vmem:[#allocation3 + $0x6c0] sm:$0xf]  ;;  %v7586_v59 = vor.u32 %v10249_v54, %v7585_v53  ;;  %2631 = vmatpush.bf16.msra.mxu1 %v7330_v58  ;;  %v7206_v58 = vor.u32 %v10149_v50, %v7203_v51 }
  0x49   :  { %v10313_v56 = vld [vmem:[#allocation3 + $0x6dc] sm:$0xf0] }
  0x4a   :  { %v7041_v60 = vld [vmem:[#allocation3 + $0x80] sm:$0xf]  ;;  %v7842_v63 = vor.u32 %v10313_v56, %v7841_v55  ;;  %2650 = vmatpush.bf16.msra.mxu2 %v7586_v59  ;;  %v11147_v56 = vor.u32 %v10080_v42, %v6931_v44 }
  0x4b   :  { %v10113_v61 = vld [vmem:[#allocation3 + $0x9c] sm:$0xf0] }
  0x4c   :  { %v7297_v62 = vld [vmem:[#allocation3 + $0x280] sm:$0xf]  ;;  %v7042_v5 = vor.u32 %v10113_v61, %v7041_v60  ;;  %2669 = vmatpush.bf16.msra.mxu3 %v7842_v63  ;;  %v7171_v63 = vld [vmem:[#allocation3 + $0x1a0] sm:$0xf0] }
  0x4d   :  { %v10177_v0 = vld [vmem:[#allocation3 + $0x29c] sm:$0xf0] }
  0x4e   :  { %v7553_v1 = vld [vmem:[#allocation3 + $0x480] sm:$0xf]  ;;  %v7298_v6 = vor.u32 %v10177_v0, %v7297_v62  ;;  %2613 = vmatpush.bf16.msra.mxu0 %v7042_v5  ;;  %v10141_v62 = vld [vmem:[#allocation3 + $0x184] sm:$0xf] }
  0x4f   :  { %v10241_v2 = vld [vmem:[#allocation3 + $0x49c] sm:$0xf0] }
  0x50   :  { %v7809_v3 = vld [vmem:[#allocation3 + $0x680] sm:$0xf]  ;;  %v7554_v7 = vor.u32 %v10241_v2, %v7553_v1  ;;  %2632 = vmatpush.bf16.msra.mxu1 %v7298_v6 }
  0x51   :  { %v10305_v4 = vld [vmem:[#allocation3 + $0x69c] sm:$0xf0] }
  0x52   :  { %v7009_v8 = vld [vmem:[#allocation3 + $0x40] sm:$0xf]  ;;  %v7810_v11 = vor.u32 %v10305_v4, %v7809_v3  ;;  %2651 = vmatpush.bf16.msra.mxu2 %v7554_v7  ;;  %v7174_v3 = vor.u32 %v10141_v62, %v7171_v63  ;;  %v10133_v7 = vld [vmem:[#allocation3 + $0x144] sm:$0xf] }
  0x53   :  { %v10105_v9 = vld [vmem:[#allocation3 + $0x5c] sm:$0xf0] }
  0x54   :  { %v7265_v10 = vld [vmem:[#allocation3 + $0x240] sm:$0xf]  ;;  %v7010_v18 = vor.u32 %v10105_v9, %v7009_v8  ;;  %2670 = vmatpush.bf16.msra.mxu3 %v7810_v11  ;;  %v7139_v8 = vld [vmem:[#allocation3 + $0x160] sm:$0xf0] }
  0x55   :  { %v10169_v12 = vld [vmem:[#allocation3 + $0x25c] sm:$0xf0] }
  0x56   :  { %v7521_v13 = vld [vmem:[#allocation3 + $0x440] sm:$0xf]  ;;  %v7266_v22 = vor.u32 %v10169_v12, %v7265_v10  ;;  %2614 = vmatpush.bf16.msra.mxu0 %v7010_v18 }
  0x57   :  { %v10233_v14 = vld [vmem:[#allocation3 + $0x45c] sm:$0xf0] }
  0x58   :  { %v7777_v15 = vld [vmem:[#allocation3 + $0x640] sm:$0xf]  ;;  %v7522_v23 = vor.u32 %v10233_v14, %v7521_v13  ;;  %2633 = vmatpush.bf16.msra.mxu1 %v7266_v22  ;;  %v7142_v14 = vor.u32 %v10133_v7, %v7139_v8  ;;  %v7875_v7 = vld [vmem:[#allocation3 + $0x720] sm:$0xf0] }
  0x59   :  { %v10297_v16 = vld [vmem:[#allocation3 + $0x65c] sm:$0xf0] }
  0x5a   :  { %v6977_v17 = vld [vmem:[#allocation3] sm:$0xf]  ;;  %v7778_v27 = vor.u32 %v10297_v16, %v7777_v15  ;;  %2652 = vmatpush.bf16.msra.mxu2 %v7522_v23  ;;  %v10125_v15 = vld [vmem:[#allocation3 + $0x104] sm:$0xf] }
  0x5b   :  { %v10097_v19 = vld [vmem:[#allocation3 + $0x1c] sm:$0xf0]  ;;  %v7107_v16 = vld [vmem:[#allocation3 + $0x120] sm:$0xf0] }
  0x5c   :  { %v7233_v20 = vld [vmem:[#allocation3 + $0x200] sm:$0xf]  ;;  %v6978_v34 = vor.u32 %v10097_v19, %v6977_v17  ;;  %2671 = vmatpush.bf16.msra.mxu3 %v7778_v27  ;;  %v6949_v17 = vld [vmem:[%s12576_s0 + $0x38] sm:$0xf]  ;;  %v10089_v19 = vld [vmem:[%s12576_s0 + $0x50] sm:$0xf0] }
  0x5d   :  { %v10161_v21 = vld [vmem:[#allocation3 + $0x21c] sm:$0xf0] }
  0x5e   :  { %v7489_v24 = vld [vmem:[#allocation3 + $0x400] sm:$0xf]  ;;  %v7234_v38 = vor.u32 %v10161_v21, %v7233_v20  ;;  %2615 = vmatpush.bf16.msra.mxu0 %v6978_v34  ;;  %v10086_v20 = vld [vmem:[%s12576_s0 + $0x3c] sm:$0xf]  ;;  %v6951_v21 = vld [vmem:[%s12576_s0 + $0x54] sm:$0xf0] }
  0x5f   :  { %v10225_v25 = vld [vmem:[#allocation3 + $0x41c] sm:$0xf0] }
  0x60   :  { %v7745_v26 = vld [vmem:[#allocation3 + $0x600] sm:$0xf]  ;;  %v7490_v39 = vor.u32 %v10225_v25, %v7489_v24  ;;  %2634 = vmatpush.bf16.msra.mxu1 %v7234_v38  ;;  %v11179_v38 = vor.u32 %v10086_v20, %v6951_v21  ;;  %v6937_v20 = vld [vmem:[%s12576_s0 + $0x10] sm:$0xf]  ;;  %v10084_v21 = vld [vmem:[%s12576_s0 + $0x28] sm:$0xf0] }
  0x61   :  { %v10289_v28 = vld [vmem:[#allocation3 + $0x61c] sm:$0xf0] }
  0x62   :  { %v6921_v29 = vld [vmem:[%s12576_s0] sm:$0xf]  ;;  %v10079_v31 = vld [vmem:[%s12576_s0 + $0x4] sm:$0xf]  ;;  %v7746_v43 = vor.u32 %v10289_v28, %v7745_v26  ;;  %2653 = vmatpush.bf16.msra.mxu2 %v7490_v39  ;;  %v10090_v26 = vld [vmem:[%s12576_s0 + $0x58] sm:$0xf0] }
  0x63   :  { %v8513_v32 = vld [vmem:[#allocation3 + $0xc00] sm:$0xf]  ;;  %v11141_v48 = vor.u32 %v10082_v30, %v6921_v29  ;;  %v7110_v29 = vor.u32 %v10125_v15, %v7107_v16  ;;  %v10093_v16 = vld [vmem:[#allocation3 + $0x4] sm:$0xf] }
  0x64   :  { %v10481_v33 = vld [vmem:[#allocation3 + $0xc1c] sm:$0xf0]  ;;  %2672 = vmatpush.bf16.msra.mxu3 %v7746_v43 }
  0x65   :  { %v6923_v35 = vld [vmem:[%s12576_s0 + $0x1c] sm:$0xf0]  ;;  %v10083_v41 = vld [vmem:[%s12576_s0 + $0x20] sm:$0xf0]  ;;  %v8514_v45 = vor.u32 %v10481_v33, %v8513_v32  ;;  %2616 = vmatmul.bf16.vlgmr.msra.gmra.mxu0 %v11141_v48  ;;  %v11177_v33 = vor.u32 %v10089_v19, %v6949_v17 }
  0x66   :  { %v8481_v36 = vld [vmem:[#allocation3 + $0xbc0] sm:$0xf]  ;;  %v11143_v52 = vor.u32 %v10079_v31, %v6923_v35  ;;  %v11145_v53 = vor.u32 %v10083_v41, %v6929_v40  ;;  %v10341_v32 = vld [vmem:[#allocation3 + $0x7c4] sm:$0xf] }
  0x67   :  { %v10473_v37 = vld [vmem:[#allocation3 + $0xbdc] sm:$0xf0]  ;;  %2729 = vmatpush.bf16.msrb.mxu2 %v8514_v45  ;;  %2673 = vmatmul.bf16.vlgmr.msra.gmra.mxu3 %v11147_v56  ;;  %v10117_v35 = vld [vmem:[#allocation3 + $0xc4] sm:$0xf] }
  0x68   :  { %v8225_v46 = vld [vmem:[#allocation3 + $0x9c0] sm:$0xf]  ;;  %v8482_v49 = vor.u32 %v10473_v37, %v8481_v36  ;;  %2635 = vmatmul.bf16.vlgmr.msra.gmra.mxu1 %v11143_v52  ;;  %2654 = vmatmul.bf16.vlgmr.msra.gmra.mxu2 %v11145_v53  ;;  %v7075_v36 = vld [vmem:[#allocation3 + $0xe0] sm:$0xf0] }
  0x69   :  { %v10409_v47 = vld [vmem:[#allocation3 + $0x9dc] sm:$0xf0]  ;;  %2741 = vmatpush.bf16.msrb.mxu3 %v7206_v58  ;;  %v7971_v37 = vld [vmem:[#allocation3 + $0x7e0] sm:$0xf0] }
  0x6a   :  { %v8449_v54 = vld [vmem:[#allocation3 + $0xb80] sm:$0xf]  ;;  %v8226_v57 = vor.u32 %v10409_v47, %v8225_v46  ;;  %2703 = vmatpush.bf16.msrb.mxu1 %v8482_v49  ;;  %v7974_v42 = vor.u32 %v10341_v32, %v7971_v37  ;;  %v10333_v45 = vld [vmem:[#allocation3 + $0x784] sm:$0xf]  ;;  %v7078_v47 = vor.u32 %v10117_v35, %v7075_v36  ;;  %v6945_v32 = vld [vmem:[%s12576_s0 + $0x18] sm:$0xf] }
  0x6b   :  { %v10465_v55 = vld [vmem:[#allocation3 + $0xb9c] sm:$0xf0]  ;;  %v7939_v46 = vld [vmem:[#allocation3 + $0x7a0] sm:$0xf0]  ;;  %v10085_v35 = vld [vmem:[%s12576_s0 + $0x30] sm:$0xf0] }
  0x6c   :  { %v8193_v59 = vld [vmem:[#allocation3 + $0x980] sm:$0xf]  ;;  %v8450_v61 = vor.u32 %v10465_v55, %v8449_v54  ;;  %2684 = vmatpush.bf16.msrb.mxu0 %v8226_v57  ;;  %2798 = vmatpush.bf16.msra.mxu2 %v7974_v42  ;;  %v7942_v51 = vor.u32 %v10333_v45, %v7939_v46  ;;  %v10109_v55 = vld [vmem:[#allocation3 + $0x84] sm:$0xf] }
  0x6d   :  { %v10401_v60 = vld [vmem:[#allocation3 + $0x99c] sm:$0xf0]  ;;  %2742 = vmatpush.bf16.msrb.mxu3 %v7174_v3  ;;  %v7043_v57 = vld [vmem:[#allocation3 + $0xa0] sm:$0xf0] }
  0x6e   :  { %v8417_v0 = vld [vmem:[#allocation3 + $0xb40] sm:$0xf]  ;;  %v8194_v2 = vor.u32 %v10401_v60, %v8193_v59  ;;  %2704 = vmatpush.bf16.msrb.mxu1 %v8450_v61  ;;  %v10325_v60 = vld [vmem:[#allocation3 + $0x744] sm:$0xf]  ;;  %v7046_v63 = vor.u32 %v10109_v55, %v7043_v57  ;;  %v11211_v55 = vor.u32 %v10085_v35, %v6945_v32  ;;  %v6973_v35 = vld [vmem:[%s12576_s0 + $0x50] sm:$0xf] }
  0x6f   :  { %v10457_v1 = vld [vmem:[#allocation3 + $0xb5c] sm:$0xf0]  ;;  %v7907_v61 = vld [vmem:[#allocation3 + $0x760] sm:$0xf0] }
  0x70   :  { %v8161_v4 = vld [vmem:[#allocation3 + $0x940] sm:$0xf]  ;;  %v8418_v6 = vor.u32 %v10457_v1, %v8417_v0  ;;  %2685 = vmatpush.bf16.msrb.mxu0 %v8194_v2  ;;  %v10101_v2 = vld [vmem:[#allocation3 + $0x44] sm:$0xf]  ;;  %2799 = vmatpush.bf16.msra.mxu2 %v7942_v51  ;;  %v7910_v3 = vor.u32 %v10325_v60, %v7907_v61 }
  0x71   :  { %v10393_v5 = vld [vmem:[#allocation3 + $0x95c] sm:$0xf0]  ;;  %2743 = vmatpush.bf16.msrb.mxu3 %v7142_v14  ;;  %v6979_v17 = vld [vmem:[#allocation3 + $0x20] sm:$0xf0] }
  0x72   :  { %v8385_v9 = vld [vmem:[#allocation3 + $0xb00] sm:$0xf]  ;;  %v8162_v11 = vor.u32 %v10393_v5, %v8161_v4  ;;  %2705 = vmatpush.bf16.msrb.mxu1 %v8418_v6  ;;  %v7011_v5 = vld [vmem:[#allocation3 + $0x60] sm:$0xf0] }
  0x73   :  { %v10449_v10 = vld [vmem:[#allocation3 + $0xb1c] sm:$0xf0]  ;;  %v10317_v6 = vld [vmem:[#allocation3 + $0x704] sm:$0xf]  ;;  %v7014_v14 = vor.u32 %v10101_v2, %v7011_v5 }
  0x74   :  { %v8129_v12 = vld [vmem:[#allocation3 + $0x900] sm:$0xf]  ;;  %v8386_v18 = vor.u32 %v10449_v10, %v8385_v9  ;;  %2686 = vmatpush.bf16.msrb.mxu0 %v8162_v11  ;;  %2800 = vmatpush.bf16.msra.mxu2 %v7910_v3  ;;  %v10205_v37 = vld [vmem:[#allocation3 + $0x384] sm:$0xf] }
  0x75   :  { %v10385_v13 = vld [vmem:[#allocation3 + $0x91c] sm:$0xf0]  ;;  %2744 = vmatpush.bf16.msrb.mxu3 %v7110_v29  ;;  %2621 = vmatmul.bf16.gmra.mxu0 %v11177_v33  ;;  %v10269_v42 = vld [vmem:[#allocation3 + $0x584] sm:$0xf] }
  0x76   :  { %v6957_v22 = vld [vmem:[%s12576_s0 + $0x40] sm:$0xf]  ;;  %v8130_v25 = vor.u32 %v10385_v13, %v8129_v12  ;;  %v10087_v27 = vld [vmem:[%s12576_s0 + $0x44] sm:$0xf]  ;;  %2706 = vmatpush.bf16.msrb.mxu1 %v8386_v18  ;;  %v7878_v18 = vor.u32 %v10317_v6, %v7875_v7 }
  0x77   :  { %v8353_v23 = vld [vmem:[#allocation3 + $0xac0] sm:$0xf]  ;;  %v11181_v39 = vor.u32 %v10090_v26, %v6957_v22  ;;  %v10277_v12 = vld [vmem:[#allocation3 + $0x5c4] sm:$0xf] }
  0x78   :  { %v10441_v24 = vld [vmem:[#allocation3 + $0xadc] sm:$0xf0]  ;;  %2687 = vmatpush.bf16.msrb.mxu0 %v8130_v25  ;;  %2640 = vmatmul.bf16.gmra.mxu1 %v11179_v38  ;;  %v7715_v13 = vld [vmem:[#allocation3 + $0x5e0] sm:$0xf0] }
  0x79   :  { %v6959_v28 = vld [vmem:[%s12576_s0 + $0x5c] sm:$0xf0]  ;;  %v8354_v34 = vor.u32 %v10441_v24, %v8353_v23  ;;  %2659 = vmatmul.bf16.gmra.mxu2 %v11181_v39  ;;  %2745 = vmatpush.bf16.msrb.mxu3 %v7078_v47  ;;  %v10213_v22 = vld [vmem:[#allocation3 + $0x3c4] sm:$0xf]  ;;  %v7718_v25 = vor.u32 %v10277_v12, %v7715_v13  ;;  %v11207_v47 = vor.u32 %v10084_v21, %v6937_v20 }
  0x7a   :  { %v8097_v30 = vld [vmem:[#allocation3 + $0x8c0] sm:$0xf]  ;;  %v11183_v43 = vor.u32 %v10087_v27, %v6959_v28  ;;  %v7459_v23 = vld [vmem:[#allocation3 + $0x3e0] sm:$0xf0]  ;;  %2801 = vmatpush.bf16.msra.mxu2 %v7878_v18  ;;  %v10154_v18 = vld [vmem:[#allocation3 + $0x1e4] sm:$0xf0] }
  0x7b   :  { %v10377_v31 = vld [vmem:[#allocation3 + $0x8dc] sm:$0xf0]  ;;  %2707 = vmatpush.bf16.msrb.mxu1 %v8354_v34  ;;  %v10405_v24 = vld [vmem:[#allocation3 + $0x9c4] sm:$0xf]  ;;  %v6982_v34 = vor.u32 %v10093_v16, %v6979_v17  ;;  %v7462_v36 = vor.u32 %v10213_v22, %v7459_v23  ;;  %v7209_v17 = vld [vmem:[#allocation3 + $0x1c8] sm:$0xf] }
  0x7c   :  { %v8321_v40 = vld [vmem:[#allocation3 + $0xa80] sm:$0xf]  ;;  %v8098_v44 = vor.u32 %v10377_v31, %v8097_v30  ;;  %2678 = vmatmul.bf16.gmra.mxu3 %v11183_v43  ;;  %v8227_v26 = vld [vmem:[#allocation3 + $0x9e0] sm:$0xf0]  ;;  %v10081_v30 = vld [vmem:[%s12576_s0 + $0x14] sm:$0xf]  ;;  %v7210_v32 = vor.u32 %v10154_v18, %v7209_v17 }
  0x7d   :  { %v10433_v41 = vld [vmem:[#allocation3 + $0xa9c] sm:$0xf0]  ;;  %2746 = vmatpush.bf16.msrb.mxu3 %v7046_v63  ;;  %v10309_v27 = vld [vmem:[#allocation3 + $0x6c4] sm:$0xf]  ;;  %v6939_v31 = vld [vmem:[%s12576_s0 + $0x2c] sm:$0xf0] }
  0x7e   :  { %v8065_v49 = vld [vmem:[#allocation3 + $0x880] sm:$0xf]  ;;  %v8322_v54 = vor.u32 %v10433_v41, %v8321_v40  ;;  %2688 = vmatpush.bf16.msrb.mxu0 %v8098_v44  ;;  %v7843_v28 = vld [vmem:[#allocation3 + $0x6e0] sm:$0xf0]  ;;  %v8230_v41 = vor.u32 %v10405_v24, %v8227_v26 }
  0x7f   :  { %v10369_v50 = vld [vmem:[#allocation3 + $0x89c] sm:$0xf0]  ;;  %v7427_v40 = vld [vmem:[#allocation3 + $0x3a0] sm:$0xf0]  ;;  %v7846_v46 = vor.u32 %v10309_v27, %v7843_v28 }
  0x80   :  { %v8289_v58 = vld [vmem:[#allocation3 + $0xa40] sm:$0xf]  ;;  %v8066_v62 = vor.u32 %v10369_v50, %v8065_v49  ;;  %2708 = vmatpush.bf16.msrb.mxu1 %v8322_v54  ;;  %v7683_v44 = vld [vmem:[#allocation3 + $0x5a0] sm:$0xf0]  ;;  %v11209_v49 = vor.u32 %v10081_v30, %v6939_v31  ;;  %v7430_v57 = vor.u32 %v10205_v37, %v7427_v40 }
  0x81   :  { %v10425_v59 = vld [vmem:[#allocation3 + $0xa5c] sm:$0xf0]  ;;  %2747 = vmatpush.bf16.msrb.mxu3 %v7014_v14  ;;  %v10397_v45 = vld [vmem:[#allocation3 + $0x984] sm:$0xf]  ;;  %2802 = vmatpush.bf16.msra.mxu2 %v7846_v46 }
  0x82   :  { %v8033_v0 = vld [vmem:[#allocation3 + $0x840] sm:$0xf]  ;;  %v8290_v4 = vor.u32 %v10425_v59, %v8289_v58  ;;  %2689 = vmatpush.bf16.msrb.mxu0 %v8066_v62  ;;  %v8195_v50 = vld [vmem:[#allocation3 + $0x9a0] sm:$0xf0]  ;;  %v7686_v58 = vor.u32 %v10269_v42, %v7683_v44 }
  0x83   :  { %v10361_v1 = vld [vmem:[#allocation3 + $0x85c] sm:$0xf0]  ;;  %v10301_v51 = vld [vmem:[#allocation3 + $0x684] sm:$0xf]  ;;  %v8198_v61 = vor.u32 %v10397_v45, %v8195_v50 }
  0x84   :  { %v8257_v8 = vld [vmem:[#allocation3 + $0xa00] sm:$0xf]  ;;  %v8034_v10 = vor.u32 %v10361_v1, %v8033_v0  ;;  %2709 = vmatpush.bf16.msrb.mxu1 %v8290_v4  ;;  %v7811_v54 = vld [vmem:[#allocation3 + $0x6a0] sm:$0xf0] }
  0x85   :  { %v10417_v9 = vld [vmem:[#allocation3 + $0xa1c] sm:$0xf0]  ;;  %2748 = vmatpush.bf16.msrb.mxu3 %v6982_v34  ;;  %v10197_v59 = vld [vmem:[#allocation3 + $0x344] sm:$0xf]  ;;  %v7814_v1 = vor.u32 %v10301_v51, %v7811_v54 }
  0x86   :  { %v8001_v11 = vld [vmem:[#allocation3 + $0x800] sm:$0xf]  ;;  %v8258_v19 = vor.u32 %v10417_v9, %v8257_v8  ;;  %2690 = vmatpush.bf16.msrb.mxu0 %v8034_v10  ;;  %v7395_v60 = vld [vmem:[#allocation3 + $0x360] sm:$0xf0] }
  0x87   :  { %v10353_v15 = vld [vmem:[#allocation3 + $0x81c] sm:$0xf0]  ;;  %v10261_v62 = vld [vmem:[#allocation3 + $0x544] sm:$0xf]  ;;  %v7398_v5 = vor.u32 %v10197_v59, %v7395_v60  ;;  %2803 = vmatpush.bf16.msra.mxu2 %v7814_v1  ;;  %v10146_v59 = vld [vmem:[#allocation3 + $0x1a4] sm:$0xf0] }
  0x88   :  { %v8002_v29 = vor.u32 %v10353_v15, %v8001_v11  ;;  %2710 = vmatpush.bf16.msrb.mxu1 %v8258_v19  ;;  %v7651_v63 = vld [vmem:[#allocation3 + $0x560] sm:$0xf0] }
  0x89   :  { %2817 = vmatpush.bf16.msra.mxu3 %v8230_v41  ;;  %v10389_v0 = vld [vmem:[#allocation3 + $0x944] sm:$0xf]  ;;  %8543 = vmatmul.msk.bf16.vlgmr.msrb.gmra.mxu2 %vm2601_vm0, %v11211_v55  ;;  %v7654_v6 = vor.u32 %v10261_v62, %v7651_v63 }
  0x8a   :  { %2691 = vmatpush.bf16.msrb.mxu0 %v8002_v29  ;;  %v8163_v2 = vld [vmem:[#allocation3 + $0x960] sm:$0xf0]  ;;  %v10088_v29 = vld [vmem:[%s12576_s0 + $0x4c] sm:$0xf] }
  0x8b   :  { %2711 = vmatmul.bf16.vlgmr.msrb.gmra.mxu1 %v11209_v49  ;;  %v10293_v3 = vld [vmem:[#allocation3 + $0x644] sm:$0xf]  ;;  %v8166_v9 = vor.u32 %v10389_v0, %v8163_v2 }
  0x8c   :  { %2779 = vmatpush.bf16.msra.mxu1 %v7718_v25  ;;  %v7779_v4 = vld [vmem:[#allocation3 + $0x660] sm:$0xf0]  ;;  %2749 = vmatmul.bf16.vlgmr.msrb.gmra.mxu3 %v11141_v48 }
  0x8d   :  { %2692 = vmatmul.bf16.vlgmr.msrb.gmra.mxu0 %v11207_v47  ;;  %v10189_v7 = vld [vmem:[#allocation3 + $0x304] sm:$0xf]  ;;  %2818 = vmatpush.bf16.msra.mxu3 %v8198_v61  ;;  %v7782_v13 = vor.u32 %v10293_v3, %v7779_v4 }
  0x8e   :  { %2760 = vmatpush.bf16.msra.mxu0 %v7462_v36  ;;  %v7363_v8 = vld [vmem:[#allocation3 + $0x320] sm:$0xf0]  ;;  %v10092_v36 = vld [vmem:[%s12576_s0 + $0x68] sm:$0xf0] }
  0x8f   :  { %v10253_v10 = vld [vmem:[#allocation3 + $0x504] sm:$0xf]  ;;  %v7366_v19 = vor.u32 %v10189_v7, %v7363_v8  ;;  %2804 = vmatpush.bf16.msra.mxu2 %v7782_v13  ;;  %v11240_v60 = vor.u32 %v10092_v36, %v6973_v35  ;;  %v7145_v7 = vld [vmem:[#allocation3 + $0x148] sm:$0xf] }
  0x90   :  { %2780 = vmatpush.bf16.msra.mxu1 %v7686_v58  ;;  %v7619_v11 = vld [vmem:[#allocation3 + $0x520] sm:$0xf0]  ;;  %v7177_v58 = vld [vmem:[#allocation3 + $0x188] sm:$0xf] }
  0x91   :  { %v10381_v12 = vld [vmem:[#allocation3 + $0x904] sm:$0xf]  ;;  %v7622_v20 = vor.u32 %v10253_v10, %v7619_v11  ;;  %2819 = vmatpush.bf16.msra.mxu3 %v8166_v9  ;;  %v10138_v8 = vld [vmem:[#allocation3 + $0x164] sm:$0xf0] }
  0x92   :  { %2761 = vmatpush.bf16.msra.mxu0 %v7430_v57  ;;  %v8131_v14 = vld [vmem:[#allocation3 + $0x920] sm:$0xf0]  ;;  %v7146_v18 = vor.u32 %v10138_v8, %v7145_v7  ;;  %v10194_v7 = vld [vmem:[#allocation3 + $0x324] sm:$0xf0] }
  0x93   :  { %v10285_v15 = vld [vmem:[#allocation3 + $0x604] sm:$0xf]  ;;  %v8134_v22 = vor.u32 %v10381_v12, %v8131_v14 }
  0x94   :  { %v7747_v16 = vld [vmem:[#allocation3 + $0x620] sm:$0xf0]  ;;  %2781 = vmatpush.bf16.msra.mxu1 %v7654_v6 }
  0x95   :  { %v10181_v21 = vld [vmem:[#allocation3 + $0x2c4] sm:$0xf]  ;;  %v7750_v28 = vor.u32 %v10285_v15, %v7747_v16  ;;  %2820 = vmatpush.bf16.msra.mxu3 %v8134_v22  ;;  %v10218_v22 = vld [vmem:[#allocation3 + $0x3e4] sm:$0xf0] }
  0x96   :  { %2762 = vmatpush.bf16.msra.mxu0 %v7398_v5  ;;  %v6965_v23 = vld [vmem:[%s12576_s0 + $0x48] sm:$0xf]  ;;  %v10091_v24 = vld [vmem:[%s12576_s0 + $0x60] sm:$0xf0]  ;;  %v7178_v5 = vor.u32 %v10146_v59, %v7177_v58 }
  0x97   :  { %v7331_v25 = vld [vmem:[#allocation3 + $0x2e0] sm:$0xf0]  ;;  %2805 = vmatpush.bf16.msra.mxu2 %v7750_v28  ;;  %v11236_v51 = vor.u32 %v10091_v24, %v6965_v23  ;;  %v10130_v28 = vld [vmem:[#allocation3 + $0x124] sm:$0xf0] }
  0x98   :  { %v10245_v26 = vld [vmem:[#allocation3 + $0x4c4] sm:$0xf]  ;;  %2782 = vmatpush.bf16.msra.mxu1 %v7622_v20  ;;  %v7334_v37 = vor.u32 %v10181_v21, %v7331_v25  ;;  %v7465_v21 = vld [vmem:[#allocation3 + $0x3c8] sm:$0xf] }
  0x99   :  { %v7587_v27 = vld [vmem:[#allocation3 + $0x4e0] sm:$0xf0]  ;;  %8544 = vmatmul.msk.bf16.gmra.mxu2 %vm2601_vm0, %v11240_v60  ;;  %v10202_v58 = vld [vmem:[#allocation3 + $0x364] sm:$0xf0] }
  0x9a   :  { %v10373_v30 = vld [vmem:[#allocation3 + $0x8c4] sm:$0xf]  ;;  %2763 = vmatpush.bf16.msra.mxu0 %v7366_v19  ;;  %v7590_v40 = vor.u32 %v10245_v26, %v7587_v27  ;;  %v7113_v27 = vld [vmem:[#allocation3 + $0x108] sm:$0xf] }
  0x9b   :  { %v8099_v31 = vld [vmem:[#allocation3 + $0x8e0] sm:$0xf0]  ;;  %2874 = vmatpush.bf16.msrb.mxu2 %v7210_v32  ;;  %v7114_v36 = vor.u32 %v10130_v28, %v7113_v27 }
  0x9c   :  { %v6967_v34 = vld [vmem:[%s12576_s0 + $0x64] sm:$0xf0]  ;;  %v8102_v44 = vor.u32 %v10373_v30, %v8099_v31  ;;  %2783 = vmatpush.bf16.msra.mxu1 %v7590_v40  ;;  %2754 = vmatmul.bf16.gmra.mxu3 %v11177_v33  ;;  %v7466_v31 = vor.u32 %v10218_v22, %v7465_v21 }
  0x9d   :  { %v10173_v41 = vld [vmem:[#allocation3 + $0x284] sm:$0xf]  ;;  %v11238_v54 = vor.u32 %v10088_v29, %v6967_v34  ;;  %2697 = vmatmul.bf16.gmra.mxu0 %v11236_v51  ;;  %v10330_v22 = vld [vmem:[#allocation3 + $0x764] sm:$0xf0] }
  0x9e   :  { %v7299_v42 = vld [vmem:[#allocation3 + $0x2a0] sm:$0xf0]  ;;  %2764 = vmatpush.bf16.msra.mxu0 %v7334_v37  ;;  %2821 = vmatpush.bf16.msra.mxu3 %v8102_v44  ;;  %v7433_v37 = vld [vmem:[#allocation3 + $0x388] sm:$0xf] }
  0x9f   :  { %v10237_v45 = vld [vmem:[#allocation3 + $0x484] sm:$0xf]  ;;  %v7302_v61 = vor.u32 %v10173_v41, %v7299_v42  ;;  %2716 = vmatmul.bf16.gmra.mxu1 %v11238_v54  ;;  %2875 = vmatpush.bf16.msrb.mxu2 %v7178_v5  ;;  %v10210_v41 = vld [vmem:[#allocation3 + $0x3a4] sm:$0xf0] }
  0xa0   :  { %v7555_v46 = vld [vmem:[#allocation3 + $0x4a0] sm:$0xf0]  ;;  %v7081_v42 = vld [vmem:[#allocation3 + $0xc8] sm:$0xf] }
  0xa1   :  { %v10365_v50 = vld [vmem:[#allocation3 + $0x884] sm:$0xf]  ;;  %v7558_v62 = vor.u32 %v10237_v45, %v7555_v46  ;;  %v10122_v44 = vld [vmem:[#allocation3 + $0xe4] sm:$0xf0] }
  0xa2   :  { %v8067_v57 = vld [vmem:[#allocation3 + $0x8a0] sm:$0xf0]  ;;  %2765 = vmatpush.bf16.msra.mxu0 %v7302_v61  ;;  %v7082_v59 = vor.u32 %v10122_v44, %v7081_v42  ;;  %v10322_v42 = vld [vmem:[#allocation3 + $0x724] sm:$0xf0] }
  0xa3   :  { %v10165_v63 = vld [vmem:[#allocation3 + $0x244] sm:$0xf]  ;;  %v8070_v1 = vor.u32 %v10365_v50, %v8067_v57  ;;  %2784 = vmatpush.bf16.msra.mxu1 %v7558_v62  ;;  %2876 = vmatpush.bf16.msrb.mxu2 %v7146_v18  ;;  %v7434_v50 = vor.u32 %v10210_v41, %v7433_v37  ;;  %v7401_v57 = vld [vmem:[#allocation3 + $0x348] sm:$0xf] }
  0xa4   :  { %v7267_v0 = vld [vmem:[#allocation3 + $0x260] sm:$0xf0]  ;;  %v7402_v5 = vor.u32 %v10202_v58, %v7401_v57  ;;  %v7881_v41 = vld [vmem:[#allocation3 + $0x708] sm:$0xf] }
  0xa5   :  { %v10229_v2 = vld [vmem:[#allocation3 + $0x444] sm:$0xf]  ;;  %v7270_v9 = vor.u32 %v10165_v63, %v7267_v0  ;;  %2822 = vmatpush.bf16.msra.mxu3 %v8070_v1  ;;  %v7049_v63 = vld [vmem:[#allocation3 + $0x88] sm:$0xf] }
  0xa6   :  { %v7523_v3 = vld [vmem:[#allocation3 + $0x460] sm:$0xf0]  ;;  %v10114_v0 = vld [vmem:[#allocation3 + $0xa4] sm:$0xf0] }
  0xa7   :  { %v10357_v4 = vld [vmem:[#allocation3 + $0x844] sm:$0xf]  ;;  %v7526_v10 = vor.u32 %v10229_v2, %v7523_v3  ;;  %2766 = vmatpush.bf16.msra.mxu0 %v7270_v9  ;;  %2877 = vmatpush.bf16.msrb.mxu2 %v7114_v36  ;;  %v7977_v2 = vld [vmem:[#allocation3 + $0x7c8] sm:$0xf]  ;;  %v7050_v8 = vor.u32 %v10114_v0, %v7049_v63 }
  0xa8   :  { %v8035_v6 = vld [vmem:[#allocation3 + $0x860] sm:$0xf0]  ;;  %v10346_v3 = vld [vmem:[#allocation3 + $0x7e4] sm:$0xf0] }
  0xa9   :  { %v10157_v11 = vld [vmem:[#allocation3 + $0x204] sm:$0xf]  ;;  %v8038_v14 = vor.u32 %v10357_v4, %v8035_v6  ;;  %2785 = vmatpush.bf16.msra.mxu1 %v7526_v10  ;;  %2806 = vmatmul.bf16.vlgmr.msra.gmra.mxu2 %v11147_v56  ;;  %v7978_v4 = vor.u32 %v10346_v3, %v7977_v2  ;;  %v7369_v6 = vld [vmem:[#allocation3 + $0x308] sm:$0xf] }
  0xaa   :  { %v7235_v12 = vld [vmem:[#allocation3 + $0x220] sm:$0xf0]  ;;  %v7017_v9 = vld [vmem:[#allocation3 + $0x48] sm:$0xf]  ;;  %v7370_v18 = vor.u32 %v10194_v7, %v7369_v6 }
  0xab   :  { %v10221_v13 = vld [vmem:[#allocation3 + $0x404] sm:$0xf]  ;;  %v7238_v25 = vor.u32 %v10157_v11, %v7235_v12  ;;  %2823 = vmatpush.bf16.msra.mxu3 %v8038_v14  ;;  %2878 = vmatpush.bf16.msrb.mxu2 %v7082_v59  ;;  %v10106_v11 = vld [vmem:[#allocation3 + $0x64] sm:$0xf0]  ;;  %v7882_v59 = vor.u32 %v10322_v42, %v7881_v41 }
  0xac   :  { %v7491_v15 = vld [vmem:[#allocation3 + $0x420] sm:$0xf0]  ;;  %v7945_v12 = vld [vmem:[#allocation3 + $0x788] sm:$0xf]  ;;  %v7018_v21 = vor.u32 %v10106_v11, %v7017_v9 }
  0xad   :  { %v10349_v16 = vld [vmem:[#allocation3 + $0x804] sm:$0xf]  ;;  %v7494_v26 = vor.u32 %v10221_v13, %v7491_v15  ;;  %2767 = vmatpush.bf16.msra.mxu0 %v7238_v25  ;;  %v10338_v13 = vld [vmem:[#allocation3 + $0x7a4] sm:$0xf0] }
  0xae   :  { %v8003_v17 = vld [vmem:[#allocation3 + $0x820] sm:$0xf0]  ;;  %v6985_v25 = vld [vmem:[#allocation3 + $0x8] sm:$0xf] }
  0xaf   :  { %v10469_v19 = vld [vmem:[#allocation3 + $0xbc4] sm:$0xf]  ;;  %v8006_v29 = vor.u32 %v10349_v16, %v8003_v17  ;;  %2786 = vmatpush.bf16.msra.mxu1 %v7494_v26  ;;  %v7946_v16 = vor.u32 %v10338_v13, %v7945_v12  ;;  %v7913_v17 = vld [vmem:[#allocation3 + $0x748] sm:$0xf]  ;;  %2879 = vmatpush.bf16.msrb.mxu2 %v7050_v8 }
  0xb0   :  { %v8483_v20 = vld [vmem:[#allocation3 + $0xbe0] sm:$0xf0]  ;;  %2768 = vmatmul.bf16.vlgmr.msra.gmra.mxu0 %v11143_v52  ;;  %v10098_v26 = vld [vmem:[#allocation3 + $0x24] sm:$0xf0]  ;;  %v7914_v27 = vor.u32 %v10330_v22, %v7913_v17 }
  0xb1   :  { %v10477_v23 = vld [vmem:[#allocation3 + $0xc04] sm:$0xf]  ;;  %v8486_v30 = vor.u32 %v10469_v19, %v8483_v20  ;;  %2824 = vmatpush.bf16.msra.mxu3 %v8006_v29  ;;  %v7337_v19 = vld [vmem:[#allocation3 + $0x2c8] sm:$0xf] }
  0xb2   :  { %v8515_v24 = vld [vmem:[#allocation3 + $0xc20] sm:$0xf0]  ;;  %2787 = vmatmul.bf16.vlgmr.msra.gmra.mxu1 %v11145_v53  ;;  %v10186_v20 = vld [vmem:[#allocation3 + $0x2e4] sm:$0xf0] }
  0xb3   :  { %v8518_v32 = vor.u32 %v10477_v23, %v8515_v24  ;;  %v10461_v34 = vld [vmem:[#allocation3 + $0xb84] sm:$0xf]  ;;  %2836 = vmatpush.bf16.msrb.mxu0 %v8486_v30  ;;  %v8233_v29 = vld [vmem:[#allocation3 + $0x9c8] sm:$0xf]  ;;  %2880 = vmatpush.bf16.msrb.mxu2 %v7018_v21 }
  0xb4   :  { %v8451_v35 = vld [vmem:[#allocation3 + $0xba0] sm:$0xf0]  ;;  %2825 = vmatmul.bf16.vlgmr.msra.gmra.mxu3 %v11207_v47  ;;  %v10410_v30 = vld [vmem:[#allocation3 + $0x9e4] sm:$0xf0] }
  0xb5   :  { %v8454_v40 = vor.u32 %v10461_v34, %v8451_v35  ;;  %2893 = vmatpush.bf16.msrb.mxu3 %v7466_v31  ;;  %2862 = vmatpush.bf16.msrb.mxu1 %v8518_v32  ;;  %v10453_v45 = vld [vmem:[#allocation3 + $0xb44] sm:$0xf]  ;;  %v7338_v31 = vor.u32 %v10186_v20, %v7337_v19  ;;  %v7305_v32 = vld [vmem:[#allocation3 + $0x288] sm:$0xf]  ;;  %v6986_v35 = vor.u32 %v10098_v26, %v6985_v25 }
  0xb6   :  { %v8419_v46 = vld [vmem:[#allocation3 + $0xb60] sm:$0xf0]  ;;  %v10178_v34 = vld [vmem:[#allocation3 + $0x2a4] sm:$0xf0] }
  0xb7   :  { %2837 = vmatpush.bf16.msrb.mxu0 %v8454_v40  ;;  %v8422_v61 = vor.u32 %v10453_v45, %v8419_v46  ;;  %v10445_v62 = vld [vmem:[#allocation3 + $0xb04] sm:$0xf]  ;;  %v8234_v40 = vor.u32 %v10410_v30, %v8233_v29  ;;  %v8201_v45 = vld [vmem:[#allocation3 + $0x988] sm:$0xf]  ;;  %2881 = vmatpush.bf16.msrb.mxu2 %v6986_v35 }
  0xb8   :  { %v8387_v1 = vld [vmem:[#allocation3 + $0xb20] sm:$0xf0]  ;;  %v10402_v46 = vld [vmem:[#allocation3 + $0x9a4] sm:$0xf0] }
  0xb9   :  { %2894 = vmatpush.bf16.msrb.mxu3 %v7434_v50  ;;  %v8390_v10 = vor.u32 %v10445_v62, %v8387_v1  ;;  %2931 = vmatpush.bf16.msra.mxu1 %v7978_v4  ;;  %v10437_v14 = vld [vmem:[#allocation3 + $0xac4] sm:$0xf]  ;;  %v7306_v50 = vor.u32 %v10178_v34, %v7305_v32  ;;  %v7273_v57 = vld [vmem:[#allocation3 + $0x248] sm:$0xf]  ;;  %v8202_v0 = vor.u32 %v10402_v46, %v8201_v45 }
  0xba   :  { %v8355_v15 = vld [vmem:[#allocation3 + $0xae0] sm:$0xf0]  ;;  %v10170_v58 = vld [vmem:[#allocation3 + $0x264] sm:$0xf0]  ;;  %2811 = vmatmul.bf16.gmra.mxu2 %v11183_v43 }
  0xbb   :  { %2838 = vmatpush.bf16.msrb.mxu0 %v8422_v61  ;;  %v8358_v23 = vor.u32 %v10437_v14, %v8355_v15  ;;  %v10429_v24 = vld [vmem:[#allocation3 + $0xa84] sm:$0xf]  ;;  %2950 = vmatpush.bf16.msra.mxu2 %v8234_v40  ;;  %v8169_v1 = vld [vmem:[#allocation3 + $0x948] sm:$0xf]  ;;  %v7274_v7 = vor.u32 %v10170_v58, %v7273_v57 }
  0xbc   :  { %v8323_v28 = vld [vmem:[#allocation3 + $0xaa0] sm:$0xf0]  ;;  %v10394_v2 = vld [vmem:[#allocation3 + $0x964] sm:$0xf0] }
  0xbd   :  { %2895 = vmatpush.bf16.msrb.mxu3 %v7402_v5  ;;  %2932 = vmatpush.bf16.msra.mxu1 %v7946_v16  ;;  %v8326_v36 = vor.u32 %v10429_v24, %v8323_v28  ;;  %v10421_v37 = vld [vmem:[#allocation3 + $0xa44] sm:$0xf]  ;;  %v7849_v3 = vld [vmem:[#allocation3 + $0x6c8] sm:$0xf]  ;;  %v8170_v13 = vor.u32 %v10394_v2, %v8169_v1  ;;  %v10150_v2 = vld [vmem:[#allocation3 + $0x1cc] sm:$0xf] }
  0xbe   :  { %v8291_v44 = vld [vmem:[#allocation3 + $0xa60] sm:$0xf0]  ;;  %v10314_v4 = vld [vmem:[#allocation3 + $0x6e4] sm:$0xf0] }
  0xbf   :  { %2839 = vmatpush.bf16.msrb.mxu0 %v8390_v10  ;;  %v8294_v61 = vor.u32 %v10421_v37, %v8291_v44  ;;  %v10413_v62 = vld [vmem:[#allocation3 + $0xa04] sm:$0xf]  ;;  %v7721_v5 = vld [vmem:[#allocation3 + $0x5c8] sm:$0xf]  ;;  %v7850_v10 = vor.u32 %v10314_v4, %v7849_v3  ;;  %2951 = vmatpush.bf16.msra.mxu2 %v8202_v0 }
  0xc0   :  { %v8259_v63 = vld [vmem:[#allocation3 + $0xa20] sm:$0xf0]  ;;  %2773 = vmatmul.bf16.gmra.mxu0 %v11179_v38  ;;  %v10282_v6 = vld [vmem:[#allocation3 + $0x5e4] sm:$0xf0] }
  0xc1   :  { %2896 = vmatpush.bf16.msrb.mxu3 %v7370_v18  ;;  %2933 = vmatpush.bf16.msra.mxu1 %v7914_v27  ;;  %v7241_v8 = vld [vmem:[#allocation3 + $0x208] sm:$0xf]  ;;  %v8262_v11 = vor.u32 %v10413_v62, %v8259_v63  ;;  %v7722_v16 = vor.u32 %v10282_v6, %v7721_v5  ;;  %v7211_v5 = vld [vmem:[#allocation3 + $0x1e8] sm:$0xf0] }
  0xc2   :  { %2792 = vmatmul.bf16.gmra.mxu1 %v11181_v39  ;;  %v10162_v9 = vld [vmem:[#allocation3 + $0x224] sm:$0xf0]  ;;  %v7214_v6 = vor.u32 %v10150_v2, %v7211_v5  ;;  %v10278_v2 = vld [vmem:[#allocation3 + $0x5cc] sm:$0xf] }
  0xc3   :  { %2840 = vmatpush.bf16.msrb.mxu0 %v8358_v23  ;;  %v8489_v12 = vld [vmem:[#allocation3 + $0xbc8] sm:$0xf]  ;;  %v7242_v22 = vor.u32 %v10162_v9, %v7241_v8  ;;  %2952 = vmatpush.bf16.msra.mxu2 %v8170_v13  ;;  %v7723_v5 = vld [vmem:[#allocation3 + $0x5e8] sm:$0xf0] }
  0xc4   :  { %2830 = vmatmul.bf16.gmra.mxu3 %v11236_v51  ;;  %v7817_v14 = vld [vmem:[#allocation3 + $0x688] sm:$0xf] }
  0xc5   :  { %2897 = vmatpush.bf16.msrb.mxu3 %v7338_v31  ;;  %2934 = vmatpush.bf16.msra.mxu1 %v7882_v59  ;;  %v10306_v15 = vld [vmem:[#allocation3 + $0x6a4] sm:$0xf0] }
  0xc6   :  { %v10474_v17 = vld [vmem:[#allocation3 + $0xbe4] sm:$0xf0]  ;;  %v7818_v23 = vor.u32 %v10306_v15, %v7817_v14  ;;  %v10142_v14 = vld [vmem:[#allocation3 + $0x18c] sm:$0xf] }
  0xc7   :  { %2841 = vmatpush.bf16.msrb.mxu0 %v8326_v36  ;;  %v8137_v18 = vld [vmem:[#allocation3 + $0x908] sm:$0xf]  ;;  %v8490_v24 = vor.u32 %v10474_v17, %v8489_v12  ;;  %v7179_v17 = vld [vmem:[#allocation3 + $0x1a8] sm:$0xf0] }
  0xc8   :  { %v10386_v19 = vld [vmem:[#allocation3 + $0x924] sm:$0xf0] }
  0xc9   :  { %2898 = vmatpush.bf16.msrb.mxu3 %v7306_v50  ;;  %v7689_v20 = vld [vmem:[#allocation3 + $0x588] sm:$0xf]  ;;  %2935 = vmatpush.bf16.msra.mxu1 %v7850_v10  ;;  %v8138_v26 = vor.u32 %v10386_v19, %v8137_v18  ;;  %v10214_v18 = vld [vmem:[#allocation3 + $0x3cc] sm:$0xf] }
  0xca   :  { %v10274_v21 = vld [vmem:[#allocation3 + $0x5a4] sm:$0xf0]  ;;  %2882 = vmatmul.bf16.vlgmr.msrb.gmra.mxu2 %v11141_v48  ;;  %v7467_v19 = vld [vmem:[#allocation3 + $0x3e8] sm:$0xf0] }
  0xcb   :  { %2842 = vmatpush.bf16.msrb.mxu0 %v8294_v61  ;;  %v8457_v25 = vld [vmem:[#allocation3 + $0xb88] sm:$0xf]  ;;  %v7690_v29 = vor.u32 %v10274_v21, %v7689_v20  ;;  %2953 = vmatpush.bf16.msra.mxu2 %v8138_v26  ;;  %v7182_v20 = vor.u32 %v10142_v14, %v7179_v17  ;;  %v10134_v26 = vld [vmem:[#allocation3 + $0x14c] sm:$0xf]  ;;  %v7726_v14 = vor.u32 %v10278_v2, %v7723_v5 }
  0xcc   :  { %v7785_v27 = vld [vmem:[#allocation3 + $0x648] sm:$0xf]  ;;  %v7691_v17 = vld [vmem:[#allocation3 + $0x5a8] sm:$0xf0] }
  0xcd   :  { %2899 = vmatpush.bf16.msrb.mxu3 %v7274_v7  ;;  %v10298_v28 = vld [vmem:[#allocation3 + $0x664] sm:$0xf0]  ;;  %2936 = vmatpush.bf16.msra.mxu1 %v7818_v23 }
  0xce   :  { %v10466_v30 = vld [vmem:[#allocation3 + $0xba4] sm:$0xf0]  ;;  %v7786_v36 = vor.u32 %v10298_v28, %v7785_v27 }
  0xcf   :  { %2843 = vmatpush.bf16.msrb.mxu0 %v8262_v11  ;;  %v8105_v31 = vld [vmem:[#allocation3 + $0x8c8] sm:$0xf]  ;;  %v8458_v37 = vor.u32 %v10466_v30, %v8457_v25  ;;  %v7147_v30 = vld [vmem:[#allocation3 + $0x168] sm:$0xf0] }
  0xd0   :  { %v10378_v32 = vld [vmem:[#allocation3 + $0x8e4] sm:$0xf0] }
  0xd1   :  { %2900 = vmatpush.bf16.msrb.mxu3 %v7242_v22  ;;  %v7657_v34 = vld [vmem:[#allocation3 + $0x548] sm:$0xf]  ;;  %v8106_v42 = vor.u32 %v10378_v32, %v8105_v31  ;;  %2937 = vmatpush.bf16.msra.mxu1 %v7786_v36  ;;  %v7150_v31 = vor.u32 %v10134_v26, %v7147_v30  ;;  %v10174_v30 = vld [vmem:[#allocation3 + $0x28c] sm:$0xf] }
  0xd2   :  { %v10266_v35 = vld [vmem:[#allocation3 + $0x564] sm:$0xf0]  ;;  %2844 = vmatmul.bf16.vlgmr.msrb.gmra.mxu0 %v11209_v49  ;;  %8545 = vmatmul.msk.bf16.vlgmr.msrb.gmra.mxu1 %vm2601_vm0, %v11211_v55 }
  0xd3   :  { %2912 = vmatpush.bf16.msra.mxu0 %v7722_v16  ;;  %v8425_v40 = vld [vmem:[#allocation3 + $0xb48] sm:$0xf]  ;;  %v7658_v57 = vor.u32 %v10266_v35, %v7657_v34  ;;  %2954 = vmatpush.bf16.msra.mxu2 %v8106_v42 }
  0xd4   :  { %v10458_v41 = vld [vmem:[#allocation3 + $0xb64] sm:$0xf0]  ;;  %2901 = vmatmul.bf16.vlgmr.msrb.gmra.mxu3 %v11143_v52 }
  0xd5   :  { %2969 = vmatpush.bf16.msra.mxu3 %v8490_v24  ;;  %v7753_v44 = vld [vmem:[#allocation3 + $0x608] sm:$0xf]  ;;  %v8426_v62 = vor.u32 %v10458_v41, %v8425_v40  ;;  %v10206_v40 = vld [vmem:[#allocation3 + $0x38c] sm:$0xf] }
  0xd6   :  { %v8073_v45 = vld [vmem:[#allocation3 + $0x888] sm:$0xf]  ;;  %v7435_v41 = vld [vmem:[#allocation3 + $0x3a8] sm:$0xf0] }
  0xd7   :  { %2913 = vmatpush.bf16.msra.mxu0 %v7690_v29  ;;  %v10370_v46 = vld [vmem:[#allocation3 + $0x8a4] sm:$0xf0]  ;;  %v7470_v29 = vor.u32 %v10214_v18, %v7467_v19  ;;  %v10110_v18 = vld [vmem:[#allocation3 + $0x8c] sm:$0xf] }
  0xd8   :  { %v10290_v50 = vld [vmem:[#allocation3 + $0x624] sm:$0xf0]  ;;  %v8074_v1 = vor.u32 %v10370_v46, %v8073_v45  ;;  %v7115_v45 = vld [vmem:[#allocation3 + $0x128] sm:$0xf0] }
  0xd9   :  { %v7625_v58 = vld [vmem:[#allocation3 + $0x508] sm:$0xf]  ;;  %v7754_v61 = vor.u32 %v10290_v50, %v7753_v44  ;;  %2970 = vmatpush.bf16.msra.mxu3 %v8458_v37  ;;  %v10126_v44 = vld [vmem:[#allocation3 + $0x10c] sm:$0xf] }
  0xda   :  { %v10258_v59 = vld [vmem:[#allocation3 + $0x524] sm:$0xf0]  ;;  %2955 = vmatpush.bf16.msra.mxu2 %v8074_v1  ;;  %v7118_v1 = vor.u32 %v10126_v44, %v7115_v45  ;;  %v7051_v19 = vld [vmem:[#allocation3 + $0xa8] sm:$0xf0] }
  0xdb   :  { %v8393_v63 = vld [vmem:[#allocation3 + $0xb08] sm:$0xf]  ;;  %2914 = vmatpush.bf16.msra.mxu0 %v7658_v57  ;;  %v7626_v7 = vor.u32 %v10258_v59, %v7625_v58  ;;  %2938 = vmatpush.bf16.msra.mxu1 %v7754_v61  ;;  %v7438_v59 = vor.u32 %v10206_v40, %v7435_v41  ;;  %v10254_v41 = vld [vmem:[#allocation3 + $0x50c] sm:$0xf] }
  0xdc   :  { %v10450_v0 = vld [vmem:[#allocation3 + $0xb24] sm:$0xf0]  ;;  %2887 = vmatmul.bf16.gmra.mxu2 %v11177_v33 }
  0xdd   :  { %v8041_v3 = vld [vmem:[#allocation3 + $0x848] sm:$0xf]  ;;  %2971 = vmatpush.bf16.msra.mxu3 %v8426_v62  ;;  %v8394_v10 = vor.u32 %v10450_v0, %v8393_v63  ;;  %v10198_v63 = vld [vmem:[#allocation3 + $0x34c] sm:$0xf] }
  0xde   :  { %v10362_v4 = vld [vmem:[#allocation3 + $0x864] sm:$0xf0]  ;;  %v7403_v0 = vld [vmem:[#allocation3 + $0x368] sm:$0xf0] }
  0xdf   :  { %v7593_v8 = vld [vmem:[#allocation3 + $0x4c8] sm:$0xf]  ;;  %v8042_v13 = vor.u32 %v10362_v4, %v8041_v3  ;;  %3007 = vmatpush.bf16.msrb.mxu1 %v7214_v6  ;;  %2915 = vmatpush.bf16.msra.mxu0 %v7626_v7  ;;  %v10118_v6 = vld [vmem:[#allocation3 + $0xcc] sm:$0xf] }
  0xe0   :  { %v10250_v9 = vld [vmem:[#allocation3 + $0x4e4] sm:$0xf0]  ;;  %v7083_v7 = vld [vmem:[#allocation3 + $0xe8] sm:$0xf0] }
  0xe1   :  { %v8361_v11 = vld [vmem:[#allocation3 + $0xac8] sm:$0xf]  ;;  %v7594_v21 = vor.u32 %v10250_v9, %v7593_v8  ;;  %2972 = vmatpush.bf16.msra.mxu3 %v8394_v10  ;;  %2956 = vmatpush.bf16.msra.mxu2 %v8042_v13  ;;  %v7406_v9 = vor.u32 %v10198_v63, %v7403_v0  ;;  %v7371_v13 = vld [vmem:[#allocation3 + $0x328] sm:$0xf0] }
  0xe2   :  { %v10442_v12 = vld [vmem:[#allocation3 + $0xae4] sm:$0xf0]  ;;  %2849 = vmatmul.bf16.gmra.mxu0 %v11238_v54  ;;  %8546 = vmatmul.msk.bf16.gmra.mxu1 %vm2601_vm0, %v11240_v60  ;;  %v10406_v0 = vld [vmem:[#allocation3 + $0x9cc] sm:$0xf] }
  0xe3   :  { %v8009_v15 = vld [vmem:[#allocation3 + $0x808] sm:$0xf]  ;;  %v8362_v22 = vor.u32 %v10442_v12, %v8361_v11  ;;  %3008 = vmatpush.bf16.msrb.mxu1 %v7182_v20  ;;  %2916 = vmatpush.bf16.msra.mxu0 %v7594_v21  ;;  %v10190_v12 = vld [vmem:[#allocation3 + $0x30c] sm:$0xf]  ;;  %v11265_v20 = vld [vmem:[#allocation5] sm:$0xff] }
  0xe4   :  { %v10354_v16 = vld [vmem:[#allocation3 + $0x824] sm:$0xf0]  ;;  %2906 = vmatmul.bf16.gmra.mxu3 %v11179_v38  ;;  %v7374_v21 = vor.u32 %v10190_v12, %v7371_v13  ;;  %v11268_v26 = vperm.slane %v11265_v20, 0 }
  0xe5   :  { %v7561_v23 = vld [vmem:[#allocation3 + $0x488] sm:$0xf]  ;;  %v8010_v25 = vor.u32 %v10354_v16, %v8009_v15  ;;  %2973 = vmatpush.bf16.msra.mxu3 %v8362_v22  ;;  %v10270_v15 = vld [vmem:[#allocation3 + $0x58c] sm:$0xf]  ;;  %v7086_v16 = vor.u32 %v10118_v6, %v7083_v7 }
  0xe6   :  { %v10242_v24 = vld [vmem:[#allocation3 + $0x4a4] sm:$0xf0]  ;;  %v10182_v22 = vld [vmem:[#allocation3 + $0x2cc] sm:$0xf] }
  0xe7   :  { %v8329_v27 = vld [vmem:[#allocation3 + $0xa88] sm:$0xf]  ;;  %v7562_v32 = vor.u32 %v10242_v24, %v7561_v23  ;;  %2957 = vmatpush.bf16.msra.mxu2 %v8010_v25  ;;  %3009 = vmatpush.bf16.msrb.mxu1 %v7150_v31  ;;  %v7339_v23 = vld [vmem:[#allocation3 + $0x2e8] sm:$0xf0]  ;;  %v7694_v24 = vor.u32 %v10270_v15, %v7691_v17  ;;  %v7054_v25 = vor.u32 %v10110_v18, %v7051_v19 }
  0xe8   :  { %v10434_v28 = vld [vmem:[#allocation3 + $0xaa4] sm:$0xf0]  ;;  %v7307_v31 = vld [vmem:[#allocation3 + $0x2a8] sm:$0xf0] }
  0xe9   :  { %v7529_v34 = vld [vmem:[#allocation3 + $0x448] sm:$0xf]  ;;  %v8330_v36 = vor.u32 %v10434_v28, %v8329_v27  ;;  %2917 = vmatpush.bf16.msra.mxu0 %v7562_v32  ;;  %v10262_v27 = vld [vmem:[#allocation3 + $0x54c] sm:$0xf]  ;;  %v7342_v28 = vor.u32 %v10182_v22, %v7339_v23  ;;  %v2617_v32 = vpop.f32.mrf.mxu0  ;;  %v7310_v44 = vor.u32 %v10174_v30, %v7307_v31 }
  0xea   :  { %v10234_v35 = vld [vmem:[#allocation3 + $0x464] sm:$0xf0]  ;;  %v10158_v7 = vld [vmem:[#allocation3 + $0x20c] sm:$0xf]  ;;  %v2674_v12 = vpop.f32.mrf.mxu3 }
  0xeb   :  { %v8297_v37 = vld [vmem:[#allocation3 + $0xa48] sm:$0xf]  ;;  %3026 = vmatpush.bf16.msrb.mxu2 %v7470_v29  ;;  %v7530_v46 = vor.u32 %v10234_v35, %v7529_v34  ;;  %2974 = vmatpush.bf16.msra.mxu3 %v8330_v36  ;;  %v7659_v29 = vld [vmem:[#allocation3 + $0x568] sm:$0xf0]  ;;  %v2618_v36 = vadd.f32 %v2617_v32, %v11268_v26  ;;  %v2655_v6 = vpop.f32.mrf.mxu2 }
  0xec   :  { %v10426_v42 = vld [vmem:[#allocation3 + $0xa64] sm:$0xf0]  ;;  %3010 = vmatpush.bf16.msrb.mxu1 %v7118_v1  ;;  %v10102_v34 = vld [vmem:[#allocation3 + $0x4c] sm:$0xf]  ;;  %v7662_v40 = vor.u32 %v10262_v27, %v7659_v29  ;;  %2958 = vmatmul.bf16.vlgmr.msra.gmra.mxu2 %v11207_v47 }
  0xed   :  { %v7497_v50 = vld [vmem:[#allocation3 + $0x408] sm:$0xf]  ;;  %v8298_v61 = vor.u32 %v10426_v42, %v8297_v37  ;;  %2918 = vmatpush.bf16.msra.mxu0 %v7530_v46  ;;  %v7019_v35 = vld [vmem:[#allocation3 + $0x68] sm:$0xf0]  ;;  %v2636_v37 = vpop.f32.mrf.mxu1 }
  0xee   :  { %v10226_v57 = vld [vmem:[#allocation3 + $0x424] sm:$0xf0]  ;;  %v7627_v42 = vld [vmem:[#allocation3 + $0x528] sm:$0xf0]  ;;  %v2637_v45 = vadd.f32 %v2636_v37, %v2618_v36 }
  0xef   :  { %v8265_v58 = vld [vmem:[#allocation3 + $0xa08] sm:$0xf]  ;;  %v7498_v8 = vor.u32 %v10226_v57, %v7497_v50  ;;  %3027 = vmatpush.bf16.msrb.mxu2 %v7438_v59  ;;  %2975 = vmatpush.bf16.msra.mxu3 %v8298_v61  ;;  %v10166_v46 = vld [vmem:[#allocation3 + $0x24c] sm:$0xf]  ;;  %v7022_v57 = vor.u32 %v10102_v34, %v7019_v35  ;;  %v7630_v2 = vor.u32 %v10254_v41, %v7627_v42 }
  0xf0   :  { %v10418_v62 = vld [vmem:[#allocation3 + $0xa24] sm:$0xf0]  ;;  %3011 = vmatpush.bf16.msrb.mxu1 %v7086_v16  ;;  %v7275_v50 = vld [vmem:[#allocation3 + $0x268] sm:$0xf0] }
  0xf1   :  { %v8521_v3 = vld [vmem:[#allocation3 + $0xc08] sm:$0xf]  ;;  %v8266_v10 = vor.u32 %v10418_v62, %v8265_v58  ;;  %2919 = vmatpush.bf16.msra.mxu0 %v7498_v8  ;;  %v10342_v58 = vld [vmem:[#allocation3 + $0x7cc] sm:$0xf]  ;;  %v7278_v5 = vor.u32 %v10166_v46, %v7275_v50  ;;  %v2619_v13 = vpop.f32.mrf.mxu0 }
  0xf2   :  { %v10482_v4 = vld [vmem:[#allocation3 + $0xc24] sm:$0xf0]  ;;  %2939 = vmatmul.bf16.vlgmr.msra.gmra.mxu1 %v11147_v56  ;;  %v10094_v59 = vld [vmem:[#allocation3 + $0xc] sm:$0xf]  ;;  %v2620_v18 = vadd.f32 %v2619_v13, %v11268_v26 }
  0xf3   :  { %v8522_v11 = vor.u32 %v10482_v4, %v8521_v3  ;;  %3028 = vmatpush.bf16.msrb.mxu2 %v7406_v9  ;;  %2976 = vmatpush.bf16.msra.mxu3 %v8266_v10  ;;  %v6987_v61 = vld [vmem:[#allocation3 + $0x28] sm:$0xf0] }
  0xf4   :  { %3012 = vmatpush.bf16.msrb.mxu1 %v7054_v25  ;;  %2920 = vmatmul.bf16.vlgmr.msra.gmra.mxu0 %v11145_v53  ;;  %v7979_v62 = vld [vmem:[#allocation3 + $0x7e8] sm:$0xf0]  ;;  %v6990_v9 = vor.u32 %v10094_v59, %v6987_v61  ;;  %v2676_v61 = vpop.f32.mrf.mxu3 }
  0xf5   :  { %2995 = vmatpush.bf16.msrb.mxu0 %v8522_v11  ;;  %v7982_v63 = vor.u32 %v10342_v58, %v7979_v62  ;;  %v8235_v1 = vld [vmem:[#allocation3 + $0x9e8] sm:$0xf0]  ;;  %v2656_v11 = vadd.f32 %v2655_v6, %v2637_v45  ;;  %v2638_v19 = vpop.f32.mrf.mxu1  ;;  %v2657_v45 = vpop.f32.mrf.mxu2 }
  0xf6   :  { %2977 = vmatmul.bf16.vlgmr.msra.gmra.mxu3 %v11209_v49  ;;  %v10246_v3 = vld [vmem:[#allocation3 + $0x4cc] sm:$0xf]  ;;  %v8238_v16 = vor.u32 %v10406_v0, %v8235_v1 }
  0xf7   :  { %3045 = vmatpush.bf16.msrb.mxu3 %v7726_v14  ;;  %3029 = vmatpush.bf16.msrb.mxu2 %v7374_v21  ;;  %v7595_v4 = vld [vmem:[#allocation3 + $0x4e8] sm:$0xf0] }
  0xf8   :  { %3013 = vmatpush.bf16.msrb.mxu1 %v7022_v57  ;;  %v7243_v8 = vld [vmem:[#allocation3 + $0x228] sm:$0xf0]  ;;  %v7598_v25 = vor.u32 %v10246_v3, %v7595_v4 }
  0xf9   :  { %3064 = vmatpush.bf16.msra.mxu0 %v7982_v63  ;;  %v10334_v10 = vld [vmem:[#allocation3 + $0x78c] sm:$0xf]  ;;  %v7246_v27 = vor.u32 %v10158_v7, %v7243_v8  ;;  %v2622_v62 = vpop.f32.mrf.mxu0 }
  0xfa   :  { %v10470_v14 = vld [vmem:[#allocation3 + $0xbcc] sm:$0xf] }
  0xfb   :  { %3046 = vmatpush.bf16.msrb.mxu3 %v7694_v24  ;;  %3030 = vmatpush.bf16.msrb.mxu2 %v7342_v28  ;;  %v8491_v15 = vld [vmem:[#allocation3 + $0xbe8] sm:$0xf0]  ;;  %v11276_v24 = vadd.f32 %v2674_v12, %v2656_v11  ;;  %v2639_v28 = vadd.f32 %v2638_v19, %v2620_v18 }
  0xfc   :  { %v7947_v17 = vld [vmem:[#allocation3 + $0x7a8] sm:$0xf0]  ;;  %3014 = vmatpush.bf16.msrb.mxu1 %v6990_v9  ;;  %v8494_v31 = vor.u32 %v10470_v14, %v8491_v15  ;;  %2963 = vmatmul.bf16.gmra.mxu2 %v11236_v51 }
  0xfd   :  { %v7950_v21 = vor.u32 %v10334_v10, %v7947_v17  ;;  %v10398_v22 = vld [vmem:[#allocation3 + $0x98c] sm:$0xf]  ;;  %v2658_v59 = vadd.f32 %v2657_v45, %v2639_v28  ;;  %v2641_v3 = vpop.f32.mrf.mxu1 }
  0xfe   :  { %v8203_v23 = vld [vmem:[#allocation3 + $0x9a8] sm:$0xf0] }
  0xff   :  { %3047 = vmatpush.bf16.msrb.mxu3 %v7662_v40  ;;  %3031 = vmatpush.bf16.msrb.mxu2 %v7310_v44  ;;  %v10238_v29 = vld [vmem:[#allocation3 + $0x48c] sm:$0xf]  ;;  %v8206_v36 = vor.u32 %v10398_v22, %v8203_v23  ;;  %v11279_v6 = vadd.f32 %v2676_v61, %v2658_v59 }
 0x100   :  { %v7563_v30 = vld [vmem:[#allocation3 + $0x4a8] sm:$0xf0]  ;;  %3065 = vmatpush.bf16.msra.mxu0 %v7950_v21  ;;  %3083 = vmatpush.bf16.msra.mxu1 %v8238_v16 }
 0x101   :  { %v10326_v32 = vld [vmem:[#allocation3 + $0x74c] sm:$0xf]  ;;  %v7566_v41 = vor.u32 %v10238_v29, %v7563_v30 }
 0x102   :  { %v10462_v34 = vld [vmem:[#allocation3 + $0xb8c] sm:$0xf]  ;;  %2944 = vmatmul.bf16.gmra.mxu1 %v11183_v43 }
 0x103   :  { %3048 = vmatpush.bf16.msrb.mxu3 %v7630_v2  ;;  %3032 = vmatpush.bf16.msrb.mxu2 %v7278_v5  ;;  %v8459_v35 = vld [vmem:[#allocation3 + $0xba8] sm:$0xf0]  ;;  %v2623_v2 = vadd.f32 %v2622_v62, %v11268_v26 }
 0x104   :  { %v7915_v37 = vld [vmem:[#allocation3 + $0x768] sm:$0xf0]  ;;  %v8462_v46 = vor.u32 %v10462_v34, %v8459_v35  ;;  %3084 = vmatpush.bf16.msra.mxu1 %v8206_v36  ;;  %2925 = vmatmul.bf16.gmra.mxu0 %v11181_v39  ;;  %v2679_v34 = vpop.f32.mrf.mxu3  ;;  %v2624_v35 = vpop.f32.mrf.mxu0 }
 0x105   :  { %v7918_v40 = vor.u32 %v10326_v32, %v7915_v37  ;;  %v10230_v42 = vld [vmem:[#allocation3 + $0x44c] sm:$0xf]  ;;  %v2642_v12 = vadd.f32 %v2641_v3, %v2623_v2 }
 0x106   :  { %v7531_v44 = vld [vmem:[#allocation3 + $0x468] sm:$0xf0]  ;;  %2982 = vmatmul.bf16.gmra.mxu3 %v11238_v54 }
 0x107   :  { %3049 = vmatpush.bf16.msrb.mxu3 %v7598_v25  ;;  %3033 = vmatpush.bf16.msrb.mxu2 %v7246_v27  ;;  %v10390_v50 = vld [vmem:[#allocation3 + $0x94c] sm:$0xf]  ;;  %v7534_v7 = vor.u32 %v10230_v42, %v7531_v44  ;;  %v2660_v25 = vpop.f32.mrf.mxu2  ;;  %v2643_v42 = vpop.f32.mrf.mxu1 }
 0x108   :  { %3066 = vmatpush.bf16.msra.mxu0 %v7918_v40  ;;  %v8171_v57 = vld [vmem:[#allocation3 + $0x968] sm:$0xf0]  ;;  %v2661_v32 = vadd.f32 %v2660_v25, %v2642_v12 }
 0x109   :  { %v10318_v58 = vld [vmem:[#allocation3 + $0x70c] sm:$0xf]  ;;  %v8174_v11 = vor.u32 %v10390_v50, %v8171_v57 }
 0x10a   :  { %v10454_v63 = vld [vmem:[#allocation3 + $0xb4c] sm:$0xf]  ;;  %v11286_v45 = vadd.f32 %v2679_v34, %v2661_v32  ;;  %v10283_v32 = vld [vmem:[#allocation3 + $0x5ec] sm:$0xf0] }
 0x10b   :  { %3102 = vmatpush.bf16.msra.mxu2 %v8494_v31  ;;  %v8427_v0 = vld [vmem:[#allocation3 + $0xb68] sm:$0xf0]  ;;  %3050 = vmatpush.bf16.msrb.mxu3 %v7566_v41  ;;  %v2625_v41 = vadd.f32 %v2624_v35, %v11268_v26  ;;  %v7985_v35 = vld [vmem:[#allocation3 + $0x7d0] sm:$0xf] }
 0x10c   :  { %v7883_v1 = vld [vmem:[#allocation3 + $0x728] sm:$0xf0]  ;;  %v8430_v13 = vor.u32 %v10454_v63, %v8427_v0  ;;  %3085 = vmatpush.bf16.msra.mxu1 %v8174_v11  ;;  %3034 = vmatmul.bf16.vlgmr.msrb.gmra.mxu2 %v11143_v52 }
 0x10d   :  { %v10222_v4 = vld [vmem:[#allocation3 + $0x40c] sm:$0xf]  ;;  %v7886_v5 = vor.u32 %v10318_v58, %v7883_v1  ;;  %v2644_v50 = vadd.f32 %v2643_v42, %v2625_v41 }
 0x10e   :  { %v7499_v8 = vld [vmem:[#allocation3 + $0x428] sm:$0xf0] }
 0x10f   :  { %v10478_v9 = vld [vmem:[#allocation3 + $0xc0c] sm:$0xf]  ;;  %3103 = vmatpush.bf16.msra.mxu2 %v8462_v46  ;;  %3067 = vmatpush.bf16.msra.mxu0 %v7886_v5  ;;  %v7502_v22 = vor.u32 %v10222_v4, %v7499_v8  ;;  %v2662_v2 = vpop.f32.mrf.mxu2 }
 0x110   :  { %v8523_v10 = vld [vmem:[#allocation3 + $0xc28] sm:$0xf0]  ;;  %3051 = vmatpush.bf16.msrb.mxu3 %v7534_v7  ;;  %v2663_v8 = vadd.f32 %v2662_v2, %v2644_v50 }
 0x111   :  { %v10382_v14 = vld [vmem:[#allocation3 + $0x90c] sm:$0xf]  ;;  %v8526_v27 = vor.u32 %v10478_v9, %v8523_v10  ;;  %v2681_v9 = vpop.f32.mrf.mxu3 }
 0x112   :  { %v8139_v15 = vld [vmem:[#allocation3 + $0x928] sm:$0xf0]  ;;  %3015 = vmatmul.bf16.vlgmr.msrb.gmra.mxu1 %v11141_v48 }
 0x113   :  { %v10310_v16 = vld [vmem:[#allocation3 + $0x6cc] sm:$0xf]  ;;  %v8142_v23 = vor.u32 %v10382_v14, %v8139_v15  ;;  %3104 = vmatpush.bf16.msra.mxu2 %v8430_v13  ;;  %v2693_v13 = vpop.f32.mrf.mxu0  ;;  %v2712_v14 = vpop.f32.mrf.mxu1  ;;  %v11288_v15 = vadd.f32 %v2681_v9, %v2663_v8 }
 0x114   :  { %v10446_v17 = vld [vmem:[#allocation3 + $0xb0c] sm:$0xf]  ;;  %3052 = vmatpush.bf16.msrb.mxu3 %v7502_v22  ;;  %8547 = vmatmul.msk.bf16.vlgmr.msrb.gmra.mxu0 %vm2601_vm0, %v11211_v55 }
 0x115   :  { %v8395_v18 = vld [vmem:[#allocation3 + $0xb28] sm:$0xf0]  ;;  %3086 = vmatpush.bf16.msra.mxu1 %v8142_v23 }
 0x116   :  { %v7851_v19 = vld [vmem:[#allocation3 + $0x6e8] sm:$0xf0]  ;;  %v8398_v28 = vor.u32 %v10446_v17, %v8395_v18 }
 0x117   :  { %v7854_v21 = vor.u32 %v10310_v16, %v7851_v19  ;;  %v10374_v29 = vld [vmem:[#allocation3 + $0x8cc] sm:$0xf]  ;;  %v2694_v16 = vadd.f32 %v2693_v13, %v11276_v24  ;;  %v10219_v24 = vld [vmem:[#allocation3 + $0x3ec] sm:$0xf0]  ;;  %3053 = vmatmul.bf16.vlgmr.msrb.gmra.mxu3 %v11145_v53  ;;  %v2731_v50 = vpop.f32.mrf.mxu2 }
 0x118   :  { %v8107_v30 = vld [vmem:[#allocation3 + $0x8e8] sm:$0xf0]  ;;  %3128 = vmatpush.bf16.msra.mxu3 %v8526_v27  ;;  %3105 = vmatpush.bf16.msra.mxu2 %v8398_v28  ;;  %v7729_v27 = vld [vmem:[#allocation3 + $0x5d0] sm:$0xf] }
 0x119   :  { %3068 = vmatpush.bf16.msra.mxu0 %v7854_v21  ;;  %v10302_v31 = vld [vmem:[#allocation3 + $0x68c] sm:$0xf]  ;;  %v8110_v46 = vor.u32 %v10374_v29, %v8107_v30  ;;  %v7217_v28 = vld [vmem:[#allocation3 + $0x1d0] sm:$0xf]  ;;  %v2713_v29 = vadd.f32 %v2712_v14, %v2694_v16 }
 0x11a   :  { %v10438_v36 = vld [vmem:[#allocation3 + $0xacc] sm:$0xf]  ;;  %v10155_v30 = vld [vmem:[#allocation3 + $0x1ec] sm:$0xf0] }
 0x11b   :  { %v8363_v37 = vld [vmem:[#allocation3 + $0xae8] sm:$0xf0]  ;;  %3087 = vmatpush.bf16.msra.mxu1 %v8110_v46  ;;  %v7218_v34 = vor.u32 %v10155_v30, %v7217_v28  ;;  %v7185_v46 = vld [vmem:[#allocation3 + $0x190] sm:$0xf] }
 0x11c   :  { %v7819_v40 = vld [vmem:[#allocation3 + $0x6a8] sm:$0xf0]  ;;  %v8366_v57 = vor.u32 %v10438_v36, %v8363_v37  ;;  %v10347_v36 = vld [vmem:[#allocation3 + $0x7ec] sm:$0xf0]  ;;  %3039 = vmatmul.bf16.gmra.mxu2 %v11179_v38 }
 0x11d   :  { %v7822_v44 = vor.u32 %v10302_v31, %v7819_v40  ;;  %v10366_v58 = vld [vmem:[#allocation3 + $0x88c] sm:$0xf]  ;;  %v7473_v31 = vld [vmem:[#allocation3 + $0x3d0] sm:$0xf]  ;;  %v7986_v40 = vor.u32 %v10347_v36, %v7985_v35 }
 0x11e   :  { %v8075_v59 = vld [vmem:[#allocation3 + $0x8a8] sm:$0xf0]  ;;  %3106 = vmatpush.bf16.msra.mxu2 %v8366_v57  ;;  %v7474_v42 = vor.u32 %v10219_v24, %v7473_v31  ;;  %v11296_v57 = vpop.f32.mrf.mxu3  ;;  %v7409_v14 = vld [vmem:[#allocation3 + $0x350] sm:$0xf] }
 0x11f   :  { %v10294_v61 = vld [vmem:[#allocation3 + $0x64c] sm:$0xf]  ;;  %3069 = vmatpush.bf16.msra.mxu0 %v7822_v44  ;;  %v8078_v26 = vor.u32 %v10366_v58, %v8075_v59  ;;  %v7697_v44 = vld [vmem:[#allocation3 + $0x590] sm:$0xf]  ;;  %v7730_v58 = vor.u32 %v10283_v32, %v7729_v27  ;;  %3197 = vmatpush.bf16.msrb.mxu3 %v7986_v40  ;;  %v2733_v27 = vpop.f32.mrf.mxu2 }
 0x120   :  { %v10430_v62 = vld [vmem:[#allocation3 + $0xa8c] sm:$0xf]  ;;  %v10147_v59 = vld [vmem:[#allocation3 + $0x1ac] sm:$0xf0] }
 0x121   :  { %v8331_v63 = vld [vmem:[#allocation3 + $0xaa8] sm:$0xf0]  ;;  %3088 = vmatpush.bf16.msra.mxu1 %v8078_v26  ;;  %v10275_v26 = vld [vmem:[#allocation3 + $0x5ac] sm:$0xf0]  ;;  %v7186_v2 = vor.u32 %v10147_v59, %v7185_v46 }
 0x122   :  { %v7787_v0 = vld [vmem:[#allocation3 + $0x668] sm:$0xf0]  ;;  %v8334_v3 = vor.u32 %v10430_v62, %v8331_v63  ;;  %v10211_v62 = vld [vmem:[#allocation3 + $0x3ac] sm:$0xf0]  ;;  %v2732_v63 = vadd.f32 %v2731_v50, %v2713_v29  ;;  %3020 = vmatmul.bf16.gmra.mxu1 %v11177_v33 }
 0x123   :  { %v7790_v1 = vor.u32 %v10294_v61, %v7787_v0  ;;  %v10358_v4 = vld [vmem:[#allocation3 + $0x84c] sm:$0xf]  ;;  %v7441_v61 = vld [vmem:[#allocation3 + $0x390] sm:$0xf]  ;;  %v2695_v0 = vpop.f32.mrf.mxu0 }
 0x124   :  { %v8043_v5 = vld [vmem:[#allocation3 + $0x868] sm:$0xf0]  ;;  %3107 = vmatpush.bf16.msra.mxu2 %v8334_v3  ;;  %v7953_v3 = vld [vmem:[#allocation3 + $0x790] sm:$0xf]  ;;  %v7442_v8 = vor.u32 %v10211_v62, %v7441_v61  ;;  %vm3672_vm1 = vcmp.ge.f32.partialorder %v2732_v63, 0.0  ;;  %8548 = vmatmul.msk.bf16.gmra.mxu0 %vm2601_vm0, %v11240_v60 }
 0x125   :  { %v10286_v7 = vld [vmem:[#allocation3 + $0x60c] sm:$0xf]  ;;  %3070 = vmatpush.bf16.msra.mxu0 %v7790_v1  ;;  %v8046_v17 = vor.u32 %v10358_v4, %v8043_v5  ;;  %v2714_v1 = vpop.f32.mrf.mxu1  ;;  %v10339_v4 = vld [vmem:[#allocation3 + $0x7ac] sm:$0xf0]  ;;  %v2696_v5 = vadd.f32 %v2695_v0, %v11279_v6 }
 0x126   :  { %v10422_v10 = vld [vmem:[#allocation3 + $0xa4c] sm:$0xf]  ;;  %v10203_v16 = vld [vmem:[#allocation3 + $0x36c] sm:$0xf0]  ;;  %v11299_v28 = vpop.f32.mrf.mxu3 }
 0x127   :  { %v8299_v11 = vld [vmem:[#allocation3 + $0xa68] sm:$0xf0]  ;;  %3089 = vmatpush.bf16.msra.mxu1 %v8046_v17  ;;  %v2715_v9 = vadd.f32 %v2714_v1, %v2696_v5  ;;  %v7921_v17 = vld [vmem:[#allocation3 + $0x750] sm:$0xf]  ;;  %3058 = vmatmul.bf16.gmra.mxu3 %v11181_v39 }
 0x128   :  { %v7755_v12 = vld [vmem:[#allocation3 + $0x628] sm:$0xf0]  ;;  %v8302_v23 = vor.u32 %v10422_v10, %v8299_v11  ;;  %v7698_v10 = vor.u32 %v10275_v26, %v7697_v44  ;;  %v7153_v11 = vld [vmem:[#allocation3 + $0x150] sm:$0xf] }
 0x129   :  { %v10414_v18 = vld [vmem:[#allocation3 + $0xa0c] sm:$0xf]  ;;  %v7758_v21 = vor.u32 %v10286_v7, %v7755_v12  ;;  %v7954_v7 = vor.u32 %v10339_v4, %v7953_v3  ;;  %v10139_v12 = vld [vmem:[#allocation3 + $0x16c] sm:$0xf0]  ;;  %v2734_v24 = vadd.f32 %v2733_v27, %v2715_v9 }
 0x12a   :  { %v8267_v19 = vld [vmem:[#allocation3 + $0xa28] sm:$0xf0]  ;;  %3108 = vmatpush.bf16.msra.mxu2 %v8302_v23  ;;  %v7154_v13 = vor.u32 %v10139_v12, %v7153_v11  ;;  %v7665_v6 = vld [vmem:[#allocation3 + $0x550] sm:$0xf] }
 0x12b   :  { %v10350_v22 = vld [vmem:[#allocation3 + $0x80c] sm:$0xf]  ;;  %3071 = vmatpush.bf16.msra.mxu0 %v7758_v21  ;;  %v8270_v41 = vor.u32 %v10414_v18, %v8267_v19  ;;  %3198 = vmatpush.bf16.msrb.mxu3 %v7954_v7  ;;  %v3704_v18 = vmul.f32 0.2, %v2732_v63  ;;  %v10331_v19 = vld [vmem:[#allocation3 + $0x76c] sm:$0xf0]  ;;  %v2698_v32 = vpop.f32.mrf.mxu0 }
 0x12c   :  { %v8011_v25 = vld [vmem:[#allocation3 + $0x828] sm:$0xf0]  ;;  %v10267_v21 = vld [vmem:[#allocation3 + $0x56c] sm:$0xf0]  ;;  %v7922_v23 = vor.u32 %v10331_v19, %v7921_v17  ;;  %v2699_v40 = vadd.f32 %v2698_v32, %v11286_v45  ;;  %vm3680_vm2 = vcmp.ge.f32.partialorder %v2734_v24, 0.0 }
 0x12d   :  { %v8014_v37 = vor.u32 %v10350_v22, %v8011_v25  ;;  %v7410_v22 = vor.u32 %v10203_v16, %v7409_v14  ;;  %v7121_v25 = vld [vmem:[#allocation3 + $0x110] sm:$0xf]  ;;  %v3712_v46 = vmul.f32 0.2, %v2734_v24  ;;  %v2736_v14 = vpop.f32.mrf.mxu2 }
 0x12e   :  { %3109 = vmatpush.bf16.msra.mxu2 %v8270_v41  ;;  %v10131_v29 = vld [vmem:[#allocation3 + $0x12c] sm:$0xf0]  ;;  %v7666_v41 = vor.u32 %v10267_v21, %v7665_v6  ;;  %v11310_v16 = vpop.f32.mrf.mxu3 }
 0x12f   :  { %3140 = vmatpush.bf16.msrb.mxu0 %v7218_v34  ;;  %3090 = vmatpush.bf16.msra.mxu1 %v8014_v37  ;;  %v7377_v30 = vld [vmem:[#allocation3 + $0x310] sm:$0xf]  ;;  %v2717_v34 = vpop.f32.mrf.mxu1  ;;  %v3736_v37 = vsel %vm3672_vm1, %v2732_v63, %v3704_v18  ;;  %v7122_v44 = vor.u32 %v10131_v29, %v7121_v25  ;;  %v3744_v63 = vsel %vm3680_vm2, %v2734_v24, %v3712_v46 }
 0x130   :  { %v10195_v31 = vld [vmem:[#allocation3 + $0x32c] sm:$0xf0]  ;;  %3199 = vmatpush.bf16.msrb.mxu3 %v7922_v23  ;;  %v2718_v61 = vadd.f32 %v2717_v34, %v2699_v40  ;;  %v3840_v3 = vmul.f32 1.4285715, %v3744_v63 }
 0x131   :  { %v7889_v35 = vld [vmem:[#allocation3 + $0x710] sm:$0xf]  ;;  %3110 = vmatmul.bf16.vlgmr.msra.gmra.mxu2 %v11209_v49 }
 0x132   :  { %3178 = vmatpush.bf16.msrb.mxu2 %v7730_v58  ;;  %v10323_v36 = vld [vmem:[#allocation3 + $0x72c] sm:$0xf0]  ;;  %v7378_v58 = vor.u32 %v10195_v31, %v7377_v30  ;;  %v2737_v6 = vadd.f32 %v2736_v14, %v2718_v61  ;;  %v11314_v31 = vperm.slane %v11265_v20, 1  ;;  %3091 = vmatmul.bf16.vlgmr.msra.gmra.mxu1 %v11207_v47 }
 0x133   :  { %3159 = vmatpush.bf16.msrb.mxu1 %v7474_v42  ;;  %3141 = vmatpush.bf16.msrb.mxu0 %v7186_v2  ;;  %v7633_v42 = vld [vmem:[#allocation3 + $0x510] sm:$0xf]  ;;  %v7890_v59 = vor.u32 %v10323_v36, %v7889_v35  ;;  %v3832_v2 = vmul.f32 1.4285715, %v3736_v37  ;;  %v2700_v21 = vpop.f32.mrf.mxu0 }
 0x134   :  { %v10259_v50 = vld [vmem:[#allocation3 + $0x52c] sm:$0xf0]  ;;  %v2701_v27 = vadd.f32 %v2700_v21, %v11288_v15  ;;  %v3720_v36 = vmul.f32 0.2, %v2737_v6  ;;  %vm3688_vm3 = vcmp.ge.f32.partialorder %v2737_v6, 0.0  ;;  %v2751_v63 = vadd.f32 %v11296_v57, %v11314_v31  ;;  %3072 = vmatmul.bf16.vlgmr.msra.gmra.mxu0 %v11147_v56 }
 0x135   :  { %v7089_v62 = vld [vmem:[#allocation3 + $0xd0] sm:$0xf]  ;;  %v7634_v4 = vor.u32 %v10259_v50, %v7633_v42  ;;  %3200 = vmatpush.bf16.msrb.mxu3 %v7890_v59 }
 0x136   :  { %3179 = vmatpush.bf16.msrb.mxu2 %v7698_v10  ;;  %v10123_v0 = vld [vmem:[#allocation3 + $0xec] sm:$0xf0] }
 0x137   :  { %3160 = vmatpush.bf16.msrb.mxu1 %v7442_v8  ;;  %3142 = vmatpush.bf16.msrb.mxu0 %v7154_v13  ;;  %v7345_v45 = vld [vmem:[#allocation3 + $0x2d0] sm:$0xf]  ;;  %v7090_v5 = vor.u32 %v10123_v0, %v7089_v62  ;;  %v11308_v13 = vpack.c.bf16 %v3840_v3, %v3832_v2 }
 0x138   :  { %v10187_v1 = vld [vmem:[#allocation3 + $0x2ec] sm:$0xf0]  ;;  %8549 = vmatmul.msk.bf16.vlgmr.msra.gmra.mxu3 %vm2601_vm0, %v11211_v55 }
 0x139   :  { %v7857_v26 = vld [vmem:[#allocation3 + $0x6d0] sm:$0xf]  ;;  %v7346_v10 = vor.u32 %v10187_v1, %v7345_v45  ;;  %v2738_v45 = vpop.f32.mrf.mxu2  ;;  %v11318_v1 = vpop.f32.mrf.mxu3 }
 0x13a   :  { %3180 = vmatpush.bf16.msrb.mxu2 %v7666_v41  ;;  %v10315_v7 = vld [vmem:[#allocation3 + $0x6ec] sm:$0xf0] }
 0x13b   :  { %3161 = vmatpush.bf16.msrb.mxu1 %v7410_v22  ;;  %3143 = vmatpush.bf16.msrb.mxu0 %v7122_v44  ;;  %v7601_v8 = vld [vmem:[#allocation3 + $0x4d0] sm:$0xf]  ;;  %v7858_v11 = vor.u32 %v10315_v7, %v7857_v26  ;;  %v2719_v22 = vpop.f32.mrf.mxu1  ;;  %v2769_v7 = vpop.f32.mrf.mxu0 }
 0x13c   :  { %v10251_v9 = vld [vmem:[#allocation3 + $0x4ec] sm:$0xf0]  ;;  %v2720_v37 = vadd.f32 %v2719_v22, %v2701_v27 }
 0x13d   :  { %v7057_v12 = vld [vmem:[#allocation3 + $0x90] sm:$0xf]  ;;  %v7602_v29 = vor.u32 %v10251_v9, %v7601_v8  ;;  %3201 = vmatpush.bf16.msrb.mxu3 %v7858_v11  ;;  %v2770_v11 = vadd.f32 %v2769_v7, %v2751_v63 }
 0x13e   :  { %v10115_v17 = vld [vmem:[#allocation3 + $0xac] sm:$0xf0]  ;;  %3181 = vmatpush.bf16.msrb.mxu2 %v7634_v4  ;;  %v3752_v4 = vsel %vm3688_vm3, %v2737_v6, %v3720_v36 }
 0x13f   :  { %3162 = vmatpush.bf16.msrb.mxu1 %v7378_v58  ;;  %v7313_v18 = vld [vmem:[#allocation3 + $0x290] sm:$0xf]  ;;  %3144 = vmatpush.bf16.msrb.mxu0 %v7090_v5  ;;  %v7058_v30 = vor.u32 %v10115_v17, %v7057_v12  ;;  %v2739_v5 = vadd.f32 %v2738_v45, %v2720_v37 }
 0x140   :  { %v10179_v19 = vld [vmem:[#allocation3 + $0x2ac] sm:$0xf0] }
 0x141   :  { %v7825_v23 = vld [vmem:[#allocation3 + $0x690] sm:$0xf]  ;;  %v7314_v34 = vor.u32 %v10179_v19, %v7313_v18  ;;  %vm3696_vm4 = vcmp.ge.f32.partialorder %v2739_v5, 0.0  ;;  %v3728_v18 = vmul.f32 0.2, %v2739_v5  ;;  %3115 = vmatmul.bf16.gmra.mxu2 %v11238_v54 }
 0x142   :  { %v10307_v25 = vld [vmem:[#allocation3 + $0x6ac] sm:$0xf0]  ;;  %3182 = vmatpush.bf16.msrb.mxu2 %v7602_v29  ;;  %3096 = vmatmul.bf16.gmra.mxu1 %v11236_v51 }
 0x143   :  { %3163 = vmatpush.bf16.msrb.mxu1 %v7346_v10  ;;  %v7569_v24 = vld [vmem:[#allocation3 + $0x490] sm:$0xf]  ;;  %v7826_v35 = vor.u32 %v10307_v25, %v7825_v23  ;;  %3145 = vmatpush.bf16.msrb.mxu0 %v7058_v30  ;;  %v2788_v8 = vpop.f32.mrf.mxu1  ;;  %v3760_v29 = vsel %vm3696_vm4, %v2739_v5, %v3728_v18 }
 0x144   :  { %v10243_v32 = vld [vmem:[#allocation3 + $0x4ac] sm:$0xf0]  ;;  %v2789_v6 = vadd.f32 %v2788_v8, %v2770_v11  ;;  %v3856_v36 = vmul.f32 1.4285715, %v3760_v29  ;;  %3077 = vmatmul.bf16.gmra.mxu0 %v11183_v43 }
 0x145   :  { %v7025_v40 = vld [vmem:[#allocation3 + $0x50] sm:$0xf]  ;;  %v7570_v46 = vor.u32 %v10243_v32, %v7569_v24  ;;  %3202 = vmatpush.bf16.msrb.mxu3 %v7826_v35  ;;  %v10151_v32 = vld [vmem:[#allocation3 + $0x1d4] sm:$0xf]  ;;  %v3848_v35 = vmul.f32 1.4285715, %v3752_v4 }
 0x146   :  { %v10107_v41 = vld [vmem:[#allocation3 + $0x6c] sm:$0xf0] }
 0x147   :  { %v7281_v42 = vld [vmem:[#allocation3 + $0x250] sm:$0xf]  ;;  %v7026_v50 = vor.u32 %v10107_v41, %v7025_v40  ;;  %3164 = vmatpush.bf16.msrb.mxu1 %v7314_v34  ;;  %3183 = vmatpush.bf16.msrb.mxu2 %v7570_v46  ;;  %v7219_v34 = vld [vmem:[#allocation3 + $0x1f0] sm:$0xf0]  ;;  %v2826_v46 = vpop.f32.mrf.mxu3 }
 0x148   :  { %v10171_v44 = vld [vmem:[#allocation3 + $0x26c] sm:$0xf0]  ;;  %v7222_v40 = vor.u32 %v10151_v32, %v7219_v34  ;;  %8550 = vmatmul.msk.bf16.gmra.mxu3 %vm2601_vm0, %v11240_v60 }
 0x149   :  { %v7793_v15 = vld [vmem:[#allocation3 + $0x650] sm:$0xf]  ;;  %v7282_v61 = vor.u32 %v10171_v44, %v7281_v42  ;;  %3146 = vmatpush.bf16.msrb.mxu0 %v7026_v50  ;;  %v2753_v44 = vadd.f32 %v11299_v28, %v11314_v31 }
 0x14a   :  { %v10299_v20 = vld [vmem:[#allocation3 + $0x66c] sm:$0xf0] }
 0x14b   :  { %v7537_v58 = vld [vmem:[#allocation3 + $0x450] sm:$0xf]  ;;  %v7794_v62 = vor.u32 %v10299_v20, %v7793_v15  ;;  %3165 = vmatpush.bf16.msrb.mxu1 %v7282_v61  ;;  %v2807_v15 = vpop.f32.mrf.mxu2  ;;  %v11328_v61 = vpack.c.bf16 %v3856_v36, %v3848_v35  ;;  %v2790_v63 = vpop.f32.mrf.mxu1 }
 0x14c   :  { %v10235_v59 = vld [vmem:[#allocation3 + $0x46c] sm:$0xf0] }
 0x14d   :  { %v6993_v0 = vld [vmem:[#allocation3 + $0x10] sm:$0xf]  ;;  %v7538_v12 = vor.u32 %v10235_v59, %v7537_v58  ;;  %3203 = vmatpush.bf16.msrb.mxu3 %v7794_v62  ;;  %v10143_v59 = vld [vmem:[#allocation3 + $0x194] sm:$0xf]  ;;  %v2808_v62 = vadd.f32 %v2807_v15, %v2789_v6 }
 0x14e   :  { %v10099_v26 = vld [vmem:[#allocation3 + $0x2c] sm:$0xf0] }
 0x14f   :  { %v7249_v2 = vld [vmem:[#allocation3 + $0x210] sm:$0xf]  ;;  %v6994_v57 = vor.u32 %v10099_v26, %v6993_v0  ;;  %3184 = vmatpush.bf16.msrb.mxu2 %v7538_v12  ;;  %v2771_v0 = vpop.f32.mrf.mxu0  ;;  %v11330_v7 = vadd.f32 %v2826_v46, %v2808_v62 }
 0x150   :  { %v10163_v3 = vld [vmem:[#allocation3 + $0x22c] sm:$0xf0]  ;;  %v2772_v4 = vadd.f32 %v2771_v0, %v2753_v44 }
 0x151   :  { %v7761_v9 = vld [vmem:[#allocation3 + $0x610] sm:$0xf]  ;;  %v7250_v19 = vor.u32 %v10163_v3, %v7249_v2  ;;  %3147 = vmatpush.bf16.msrb.mxu0 %v6994_v57  ;;  %v7187_v3 = vld [vmem:[#allocation3 + $0x1b0] sm:$0xf0] }
 0x152   :  { %v10291_v10 = vld [vmem:[#allocation3 + $0x62c] sm:$0xf0]  ;;  %v7190_v5 = vor.u32 %v10143_v59, %v7187_v3  ;;  %v2791_v11 = vadd.f32 %v2790_v63, %v2772_v4  ;;  %v7155_v57 = vld [vmem:[#allocation3 + $0x170] sm:$0xf0] }
 0x153   :  { %v7505_v14 = vld [vmem:[#allocation3 + $0x410] sm:$0xf]  ;;  %v7762_v21 = vor.u32 %v10291_v10, %v7761_v9  ;;  %3166 = vmatpush.bf16.msrb.mxu1 %v7250_v19  ;;  %v2793_v35 = vpop.f32.mrf.mxu1 }
 0x154   :  { %v10227_v17 = vld [vmem:[#allocation3 + $0x42c] sm:$0xf0]  ;;  %3148 = vmatmul.bf16.vlgmr.msrb.gmra.mxu0 %v11141_v48 }
 0x155   :  { %v8241_v22 = vld [vmem:[#allocation3 + $0x9d0] sm:$0xf]  ;;  %v7506_v37 = vor.u32 %v10227_v17, %v7505_v14  ;;  %3204 = vmatpush.bf16.msrb.mxu3 %v7762_v21  ;;  %v10135_v17 = vld [vmem:[#allocation3 + $0x154] sm:$0xf] }
 0x156   :  { %v10411_v23 = vld [vmem:[#allocation3 + $0x9ec] sm:$0xf0]  ;;  %v7158_v19 = vor.u32 %v10135_v17, %v7155_v57  ;;  %3167 = vmatmul.bf16.vlgmr.msrb.gmra.mxu1 %v11143_v52 }
 0x157   :  { %v8497_v25 = vld [vmem:[#allocation3 + $0xbd0] sm:$0xf]  ;;  %v8242_v30 = vor.u32 %v10411_v23, %v8241_v22  ;;  %3185 = vmatpush.bf16.msrb.mxu2 %v7506_v37  ;;  %v2756_v23 = vadd.f32 %v11310_v16, %v11314_v31  ;;  %v2774_v34 = vpop.f32.mrf.mxu0 }
 0x158   :  { %v10475_v27 = vld [vmem:[#allocation3 + $0xbec] sm:$0xf0]  ;;  %3205 = vmatmul.bf16.vlgmr.msrb.gmra.mxu3 %v11147_v56 }
 0x159   :  { %v8498_v24 = vor.u32 %v10475_v27, %v8497_v25  ;;  %v8209_v41 = vld [vmem:[#allocation3 + $0x990] sm:$0xf]  ;;  %3216 = vmatpush.bf16.msra.mxu0 %v8242_v30  ;;  %3273 = vmatpush.bf16.msra.mxu3 %v7222_v40  ;;  %v2809_v25 = vpop.f32.mrf.mxu2  ;;  %v2828_v27 = vpop.f32.mrf.mxu3  ;;  %v10127_v30 = vld [vmem:[#allocation3 + $0x114] sm:$0xf]  ;;  %v2775_v36 = vadd.f32 %v2774_v34, %v2756_v23 }
 0x15a   :  { %v10403_v42 = vld [vmem:[#allocation3 + $0x9ac] sm:$0xf0]  ;;  %v2810_v32 = vadd.f32 %v2809_v25, %v2791_v11  ;;  %v7027_v23 = vld [vmem:[#allocation3 + $0x70] sm:$0xf0]  ;;  %3186 = vmatmul.bf16.vlgmr.msrb.gmra.mxu2 %v11145_v53 }
 0x15b   :  { %3235 = vmatpush.bf16.msra.mxu1 %v8498_v24  ;;  %v8210_v50 = vor.u32 %v10403_v42, %v8209_v41  ;;  %v8465_v20 = vld [vmem:[#allocation3 + $0xb90] sm:$0xf]  ;;  %v7123_v24 = vld [vmem:[#allocation3 + $0x130] sm:$0xf0]  ;;  %v2794_v46 = vadd.f32 %v2793_v35, %v2775_v36  ;;  %v2795_v11 = vpop.f32.mrf.mxu1 }
 0x15c   :  { %v10467_v58 = vld [vmem:[#allocation3 + $0xbac] sm:$0xf0]  ;;  %v11334_v41 = vadd.f32 %v2828_v27, %v2810_v32  ;;  %v7126_v42 = vor.u32 %v10127_v30, %v7123_v24 }
 0x15d   :  { %v8529_v45 = vld [vmem:[#allocation3 + $0xc10] sm:$0xf]  ;;  %v8466_v2 = vor.u32 %v10467_v58, %v8465_v20  ;;  %3217 = vmatpush.bf16.msra.mxu0 %v8210_v50  ;;  %3274 = vmatpush.bf16.msra.mxu3 %v7190_v5  ;;  %v10119_v20 = vld [vmem:[#allocation3 + $0xd4] sm:$0xf] }
 0x15e   :  { %v10483_v26 = vld [vmem:[#allocation3 + $0xc2c] sm:$0xf0]  ;;  %v7091_v58 = vld [vmem:[#allocation3 + $0xf0] sm:$0xf0] }
 0x15f   :  { %v8530_v28 = vor.u32 %v10483_v26, %v8529_v45  ;;  %v8177_v8 = vld [vmem:[#allocation3 + $0x950] sm:$0xf]  ;;  %3236 = vmatpush.bf16.msra.mxu1 %v8466_v2  ;;  %v7094_v0 = vor.u32 %v10119_v20, %v7091_v58  ;;  %v2758_v2 = vadd.f32 %v11318_v1, %v11314_v31  ;;  %v10111_v5 = vld [vmem:[#allocation3 + $0x94] sm:$0xf] }
 0x160   :  { %v10395_v9 = vld [vmem:[#allocation3 + $0x96c] sm:$0xf0] }
 0x161   :  { %v8433_v10 = vld [vmem:[#allocation3 + $0xb50] sm:$0xf]  ;;  %3261 = vmatpush.bf16.msra.mxu2 %v8530_v28  ;;  %v8178_v12 = vor.u32 %v10395_v9, %v8177_v8  ;;  %3275 = vmatpush.bf16.msra.mxu3 %v7158_v19  ;;  %v2812_v3 = vpop.f32.mrf.mxu2  ;;  %v2831_v4 = vpop.f32.mrf.mxu3  ;;  %v7059_v8 = vld [vmem:[#allocation3 + $0xb0] sm:$0xf0] }
 0x162   :  { %v10459_v14 = vld [vmem:[#allocation3 + $0xb6c] sm:$0xf0]  ;;  %v2813_v9 = vadd.f32 %v2812_v3, %v2794_v46  ;;  %v11352_v3 = vld [vmem:[#allocation5] sm:$0xff] }
 0x163   :  { %v8434_v18 = vor.u32 %v10459_v14, %v8433_v10  ;;  %v8145_v21 = vld [vmem:[#allocation3 + $0x910] sm:$0xf]  ;;  %3218 = vmatpush.bf16.msra.mxu0 %v8178_v12  ;;  %v2776_v10 = vpop.f32.mrf.mxu0 }
 0x164   :  { %v10387_v22 = vld [vmem:[#allocation3 + $0x92c] sm:$0xf0]  ;;  %v2777_v12 = vadd.f32 %v2776_v10, %v2758_v2  ;;  %v11343_v57 = vadd.f32 %v2831_v4, %v2813_v9  ;;  %v10279_v2 = vld [vmem:[#allocation3 + $0x5d4] sm:$0xf]  ;;  %v11355_v4 = vperm.slane %v11352_v3, 2  ;;  %3153 = vmatmul.bf16.gmra.mxu0 %v11177_v33 }
 0x165   :  { %v8401_v6 = vld [vmem:[#allocation3 + $0xb10] sm:$0xf]  ;;  %3237 = vmatpush.bf16.msra.mxu1 %v8434_v18  ;;  %v8146_v37 = vor.u32 %v10387_v22, %v8145_v21  ;;  %3276 = vmatpush.bf16.msra.mxu3 %v7126_v42  ;;  %v7062_v18 = vor.u32 %v10111_v5, %v7059_v8  ;;  %v10407_v8 = vld [vmem:[#allocation3 + $0x9d4] sm:$0xf] }
 0x166   :  { %v10451_v29 = vld [vmem:[#allocation3 + $0xb2c] sm:$0xf0]  ;;  %v2796_v1 = vadd.f32 %v2795_v11, %v2777_v12  ;;  %v8243_v9 = vld [vmem:[#allocation3 + $0x9f0] sm:$0xf0]  ;;  %3172 = vmatmul.bf16.gmra.mxu1 %v11179_v38 }
 0x167   :  { %v8402_v40 = vor.u32 %v10451_v29, %v8401_v6  ;;  %v8113_v44 = vld [vmem:[#allocation3 + $0x8d0] sm:$0xf]  ;;  %3219 = vmatpush.bf16.msra.mxu0 %v8146_v37  ;;  %v10103_v6 = vld [vmem:[#allocation3 + $0x54] sm:$0xf]  ;;  %v8246_v11 = vor.u32 %v10407_v8, %v8243_v9 }
 0x168   :  { %v10379_v15 = vld [vmem:[#allocation3 + $0x8ec] sm:$0xf0]  ;;  %v7030_v29 = vor.u32 %v10103_v6, %v7027_v23  ;;  %v10095_v37 = vld [vmem:[#allocation3 + $0x14] sm:$0xf]  ;;  %3210 = vmatmul.bf16.gmra.mxu3 %v11183_v43 }
 0x169   :  { %v8369_v16 = vld [vmem:[#allocation3 + $0xad0] sm:$0xf]  ;;  %3238 = vmatpush.bf16.msra.mxu1 %v8402_v40  ;;  %v8114_v59 = vor.u32 %v10379_v15, %v8113_v44  ;;  %3277 = vmatpush.bf16.msra.mxu3 %v7094_v0  ;;  %v2814_v34 = vpop.f32.mrf.mxu2  ;;  %v2833_v35 = vpop.f32.mrf.mxu3  ;;  %v6995_v40 = vld [vmem:[#allocation3 + $0x30] sm:$0xf0] }
 0x16a   :  { %v10443_v50 = vld [vmem:[#allocation3 + $0xaec] sm:$0xf0]  ;;  %v2815_v42 = vadd.f32 %v2814_v34, %v2796_v1  ;;  %v2864_v15 = vpop.f32.mrf.mxu1  ;;  %v6998_v58 = vor.u32 %v10095_v37, %v6995_v40  ;;  %v10215_v0 = vld [vmem:[#allocation3 + $0x3d4] sm:$0xf]  ;;  %3191 = vmatmul.bf16.gmra.mxu2 %v11181_v39 }
 0x16b   :  { %v8370_v62 = vor.u32 %v10443_v50, %v8369_v16  ;;  %v8081_v63 = vld [vmem:[#allocation3 + $0x890] sm:$0xf]  ;;  %3220 = vmatpush.bf16.msra.mxu0 %v8114_v59  ;;  %v2845_v44 = vpop.f32.mrf.mxu0  ;;  %v10343_v59 = vld [vmem:[#allocation3 + $0x7d4] sm:$0xf] }
 0x16c   :  { %v10371_v45 = vld [vmem:[#allocation3 + $0x8ac] sm:$0xf0]  ;;  %v2846_v16 = vadd.f32 %v2845_v44, %v11330_v7  ;;  %v11346_v20 = vadd.f32 %v2833_v35, %v2815_v42  ;;  %v7731_v7 = vld [vmem:[#allocation3 + $0x5f0] sm:$0xf0] }
 0x16d   :  { %v8337_v26 = vld [vmem:[#allocation3 + $0xa90] sm:$0xf]  ;;  %3239 = vmatpush.bf16.msra.mxu1 %v8370_v62  ;;  %v8082_v14 = vor.u32 %v10371_v45, %v8081_v63  ;;  %3278 = vmatpush.bf16.msra.mxu3 %v7062_v18  ;;  %v7987_v62 = vld [vmem:[#allocation3 + $0x7f0] sm:$0xf0]  ;;  %v7734_v5 = vor.u32 %v10279_v2, %v7731_v7 }
 0x16e   :  { %v10435_v28 = vld [vmem:[#allocation3 + $0xaac] sm:$0xf0]  ;;  %v2865_v63 = vadd.f32 %v2864_v15, %v2846_v16  ;;  %v7990_v45 = vor.u32 %v10343_v59, %v7987_v62  ;;  %v10335_v12 = vld [vmem:[#allocation3 + $0x794] sm:$0xf] }
 0x16f   :  { %v8338_v17 = vor.u32 %v10435_v28, %v8337_v26  ;;  %v8049_v19 = vld [vmem:[#allocation3 + $0x850] sm:$0xf]  ;;  %3221 = vmatpush.bf16.msra.mxu0 %v8082_v14  ;;  %v7475_v26 = vld [vmem:[#allocation3 + $0x3f0] sm:$0xf0] }
 0x170   :  { %v10363_v21 = vld [vmem:[#allocation3 + $0x86c] sm:$0xf0]  ;;  %v7478_v28 = vor.u32 %v10215_v0, %v7475_v26  ;;  %vm3673_vm5 = vcmp.ge.f32.partialorder %v2865_v63, 0.0  ;;  %v3705_v10 = vmul.f32 0.2, %v2865_v63  ;;  %3330 = vmatpush.bf16.msrb.mxu2 %v7990_v45 }
 0x171   :  { %v8305_v31 = vld [vmem:[#allocation3 + $0xa50] sm:$0xf]  ;;  %3240 = vmatpush.bf16.msra.mxu1 %v8338_v17  ;;  %v8050_v25 = vor.u32 %v10363_v21, %v8049_v19  ;;  %3279 = vmatpush.bf16.msra.mxu3 %v7030_v29  ;;  %v7955_v14 = vld [vmem:[#allocation3 + $0x7b0] sm:$0xf0]  ;;  %v2883_v18 = vpop.f32.mrf.mxu2  ;;  %v2902_v19 = vpop.f32.mrf.mxu3 }
 0x172   :  { %v10427_v22 = vld [vmem:[#allocation3 + $0xa6c] sm:$0xf0]  ;;  %v10207_v17 = vld [vmem:[#allocation3 + $0x394] sm:$0xf]  ;;  %v7958_v21 = vor.u32 %v10335_v12, %v7955_v14  ;;  %v2884_v6 = vadd.f32 %v2883_v18, %v11355_v4  ;;  %v3737_v35 = vsel %vm3673_vm5, %v2865_v63, %v3705_v10 }
 0x173   :  { %v8306_v27 = vor.u32 %v10427_v22, %v8305_v31  ;;  %v8017_v30 = vld [vmem:[#allocation3 + $0x810] sm:$0xf]  ;;  %3222 = vmatpush.bf16.msra.mxu0 %v8050_v25  ;;  %v7443_v31 = vld [vmem:[#allocation3 + $0x3b0] sm:$0xf0]  ;;  %v2847_v23 = vpop.f32.mrf.mxu0  ;;  %v2866_v25 = vpop.f32.mrf.mxu1  ;;  %v3833_v0 = vmul.f32 1.4285715, %v3737_v35 }
 0x174   :  { %v10355_v24 = vld [vmem:[#allocation3 + $0x82c] sm:$0xf0]  ;;  %v10271_v1 = vld [vmem:[#allocation3 + $0x594] sm:$0xf]  ;;  %3331 = vmatpush.bf16.msrb.mxu2 %v7958_v21 }
 0x175   :  { %v8273_v32 = vld [vmem:[#allocation3 + $0xa10] sm:$0xf]  ;;  %3241 = vmatpush.bf16.msra.mxu1 %v8306_v27  ;;  %v8018_v46 = vor.u32 %v10355_v24, %v8017_v30  ;;  %3280 = vmatpush.bf16.msra.mxu3 %v6998_v58  ;;  %v7699_v22 = vld [vmem:[#allocation3 + $0x5b0] sm:$0xf0]  ;;  %v7446_v27 = vor.u32 %v10207_v17, %v7443_v31 }
 0x176   :  { %v10419_v36 = vld [vmem:[#allocation3 + $0xa2c] sm:$0xf0]  ;;  %v7702_v29 = vor.u32 %v10271_v1, %v7699_v22  ;;  %v10399_v30 = vld [vmem:[#allocation3 + $0x994] sm:$0xf] }
 0x177   :  { %v8274_v50 = vor.u32 %v10419_v36, %v8273_v32  ;;  %3223 = vmatpush.bf16.msra.mxu0 %v8018_v46  ;;  %v8211_v24 = vld [vmem:[#allocation3 + $0x9b0] sm:$0xf0]  ;;  %v2848_v32 = vadd.f32 %v2847_v23, %v11334_v41  ;;  %v11360_v36 = vadd.f32 %v2902_v19, %v2884_v6 }
 0x178   :  { %v8214_v34 = vor.u32 %v10399_v30, %v8211_v24  ;;  %v10327_v37 = vld [vmem:[#allocation3 + $0x754] sm:$0xf]  ;;  %3281 = vmatmul.bf16.vlgmr.msra.gmra.mxu3 %v11141_v48 }
 0x179   :  { %3242 = vmatpush.bf16.msra.mxu1 %v8274_v50  ;;  %3349 = vmatpush.bf16.msrb.mxu3 %v8246_v11  ;;  %v7923_v40 = vld [vmem:[#allocation3 + $0x770] sm:$0xf0]  ;;  %v2867_v44 = vadd.f32 %v2866_v25, %v2848_v32  ;;  %v2904_v8 = vpop.f32.mrf.mxu3 }
 0x17a   :  { %v10199_v42 = vld [vmem:[#allocation3 + $0x354] sm:$0xf]  ;;  %v7926_v15 = vor.u32 %v10327_v37, %v7923_v40  ;;  %3224 = vmatmul.bf16.vlgmr.msra.gmra.mxu0 %v11207_v47  ;;  %8551 = vmatmul.msk.bf16.vlgmr.msra.gmra.mxu2 %vm2601_vm0, %v11211_v55 }
 0x17b   :  { %3292 = vmatpush.bf16.msrb.mxu0 %v7478_v28  ;;  %v7411_v16 = vld [vmem:[#allocation3 + $0x370] sm:$0xf0]  ;;  %vm3681_vm6 = vcmp.ge.f32.partialorder %v2867_v44, 0.0  ;;  %v3713_v63 = vmul.f32 0.2, %v2867_v44  ;;  %v2850_v18 = vpop.f32.mrf.mxu0  ;;  %v2869_v19 = vpop.f32.mrf.mxu1 }
 0x17c   :  { %v10263_v46 = vld [vmem:[#allocation3 + $0x554] sm:$0xf]  ;;  %v7414_v58 = vor.u32 %v10199_v42, %v7411_v16  ;;  %3332 = vmatpush.bf16.msrb.mxu2 %v7926_v15  ;;  %v2851_v1 = vadd.f32 %v2850_v18, %v11343_v57  ;;  %3243 = vmatmul.bf16.vlgmr.msra.gmra.mxu1 %v11209_v49 }
 0x17d   :  { %3311 = vmatpush.bf16.msrb.mxu1 %v7734_v5  ;;  %v7667_v50 = vld [vmem:[#allocation3 + $0x570] sm:$0xf0]  ;;  %3350 = vmatpush.bf16.msrb.mxu3 %v8214_v34  ;;  %v3745_v28 = vsel %vm3681_vm6, %v2867_v44, %v3713_v63  ;;  %v2885_v5 = vpop.f32.mrf.mxu2 }
 0x17e   :  { %v7670_v59 = vor.u32 %v10263_v46, %v7667_v50  ;;  %v10391_v41 = vld [vmem:[#allocation3 + $0x954] sm:$0xf]  ;;  %v3841_v14 = vmul.f32 1.4285715, %v3745_v28  ;;  %v2886_v17 = vadd.f32 %v2885_v5, %v11355_v4  ;;  %v2870_v32 = vadd.f32 %v2869_v19, %v2851_v1 }
 0x17f   :  { %3293 = vmatpush.bf16.msrb.mxu0 %v7446_v27  ;;  %v8179_v62 = vld [vmem:[#allocation3 + $0x970] sm:$0xf0] }
 0x180   :  { %v8182_v45 = vor.u32 %v10391_v41, %v8179_v62  ;;  %v10319_v26 = vld [vmem:[#allocation3 + $0x714] sm:$0xf]  ;;  %v11364_v23 = vpack.c.bf16 %v3841_v14, %v3833_v0  ;;  %v11366_v25 = vadd.f32 %v2904_v8, %v2886_v17  ;;  %vm3689_vm7 = vcmp.ge.f32.partialorder %v2870_v32, 0.0 }
 0x181   :  { %3312 = vmatpush.bf16.msrb.mxu1 %v7702_v29  ;;  %v7891_v2 = vld [vmem:[#allocation3 + $0x730] sm:$0xf0]  ;;  %v3721_v44 = vmul.f32 0.2, %v2870_v32  ;;  %v2907_v62 = vpop.f32.mrf.mxu3 }
 0x182   :  { %v10191_v7 = vld [vmem:[#allocation3 + $0x314] sm:$0xf]  ;;  %v7894_v9 = vor.u32 %v10319_v26, %v7891_v2  ;;  %3351 = vmatpush.bf16.msrb.mxu3 %v8182_v45 }
 0x183   :  { %3294 = vmatpush.bf16.msrb.mxu0 %v7414_v58  ;;  %v7379_v10 = vld [vmem:[#allocation3 + $0x330] sm:$0xf0]  ;;  %v3753_v2 = vsel %vm3689_vm7, %v2870_v32, %v3721_v44  ;;  %v2852_v28 = vpop.f32.mrf.mxu0  ;;  %v2871_v5 = vpop.f32.mrf.mxu1 }
 0x184   :  { %v10255_v11 = vld [vmem:[#allocation3 + $0x514] sm:$0xf]  ;;  %v7382_v22 = vor.u32 %v10191_v7, %v7379_v10  ;;  %3333 = vmatpush.bf16.msrb.mxu2 %v7894_v9  ;;  %v2853_v10 = vadd.f32 %v2852_v28, %v11346_v20 }
 0x185   :  { %3313 = vmatpush.bf16.msrb.mxu1 %v7670_v59  ;;  %v7635_v12 = vld [vmem:[#allocation3 + $0x530] sm:$0xf0]  ;;  %v2888_v41 = vpop.f32.mrf.mxu2 }
 0x186   :  { %v10383_v21 = vld [vmem:[#allocation3 + $0x914] sm:$0xf]  ;;  %v7638_v6 = vor.u32 %v10255_v11, %v7635_v12  ;;  %v2889_v7 = vadd.f32 %v2888_v41, %v11355_v4 }
 0x187   :  { %v8147_v31 = vld [vmem:[#allocation3 + $0x930] sm:$0xf0]  ;;  %3295 = vmatpush.bf16.msrb.mxu0 %v7382_v22 }
 0x188   :  { %v8150_v27 = vor.u32 %v10383_v21, %v8147_v31  ;;  %v10311_v29 = vld [vmem:[#allocation3 + $0x6d4] sm:$0xf]  ;;  %v11375_v14 = vadd.f32 %v2907_v62, %v2889_v7  ;;  %v2872_v31 = vadd.f32 %v2871_v5, %v2853_v10  ;;  %3286 = vmatmul.bf16.gmra.mxu3 %v11177_v33 }
 0x189   :  { %v7859_v30 = vld [vmem:[#allocation3 + $0x6f0] sm:$0xf0]  ;;  %3314 = vmatpush.bf16.msrb.mxu1 %v7638_v6 }
 0x18a   :  { %v10183_v24 = vld [vmem:[#allocation3 + $0x2d4] sm:$0xf]  ;;  %v7862_v34 = vor.u32 %v10311_v29, %v7859_v30  ;;  %3352 = vmatpush.bf16.msrb.mxu3 %v8150_v27  ;;  %v3849_v29 = vmul.f32 1.4285715, %v3753_v2  ;;  %vm3697_vm8 = vcmp.ge.f32.partialorder %v2872_v31, 0.0  ;;  %3229 = vmatmul.bf16.gmra.mxu0 %v11236_v51 }
 0x18b   :  { %v7347_v35 = vld [vmem:[#allocation3 + $0x2f0] sm:$0xf0]  ;;  %v2921_v62 = vpop.f32.mrf.mxu0  ;;  %8552 = vmatmul.msk.bf16.gmra.mxu2 %vm2601_vm0, %v11240_v60 }
 0x18c   :  { %v10247_v37 = vld [vmem:[#allocation3 + $0x4d4] sm:$0xf]  ;;  %v7350_v15 = vor.u32 %v10183_v24, %v7347_v35  ;;  %3334 = vmatpush.bf16.msrb.mxu2 %v7862_v34  ;;  %v3729_v24 = vmul.f32 0.2, %v2872_v31  ;;  %3248 = vmatmul.bf16.gmra.mxu1 %v11238_v54 }
 0x18d   :  { %v7603_v57 = vld [vmem:[#allocation3 + $0x4f0] sm:$0xf0]  ;;  %v2890_v44 = vpop.f32.mrf.mxu2 }
 0x18e   :  { %v10375_v40 = vld [vmem:[#allocation3 + $0x8d4] sm:$0xf]  ;;  %v7606_v16 = vor.u32 %v10247_v37, %v7603_v57  ;;  %3296 = vmatpush.bf16.msrb.mxu0 %v7350_v15  ;;  %v2909_v15 = vpop.f32.mrf.mxu3  ;;  %v2891_v41 = vadd.f32 %v2890_v44, %v11355_v4 }
 0x18f   :  { %v8115_v42 = vld [vmem:[#allocation3 + $0x8f0] sm:$0xf0] }
 0x190   :  { %v8118_v46 = vor.u32 %v10375_v40, %v8115_v42  ;;  %v10303_v50 = vld [vmem:[#allocation3 + $0x694] sm:$0xf]  ;;  %3315 = vmatpush.bf16.msrb.mxu1 %v7606_v16  ;;  %v3761_v42 = vsel %vm3697_vm8, %v2872_v31, %v3729_v24  ;;  %v11379_v28 = vadd.f32 %v2909_v15, %v2891_v41  ;;  %v7193_v31 = vld [vmem:[#allocation3 + $0x198] sm:$0xf] }
 0x191   :  { %v7827_v58 = vld [vmem:[#allocation3 + $0x6b0] sm:$0xf0]  ;;  %v10212_v24 = vld [vmem:[#allocation3 + $0x3b4] sm:$0xf0] }
 0x192   :  { %v10175_v59 = vld [vmem:[#allocation3 + $0x294] sm:$0xf]  ;;  %v7830_v0 = vor.u32 %v10303_v50, %v7827_v58  ;;  %3353 = vmatpush.bf16.msrb.mxu3 %v8118_v46 }
 0x193   :  { %v7315_v63 = vld [vmem:[#allocation3 + $0x2b0] sm:$0xf0] }
 0x194   :  { %v10239_v45 = vld [vmem:[#allocation3 + $0x494] sm:$0xf]  ;;  %v7318_v11 = vor.u32 %v10175_v59, %v7315_v63  ;;  %3335 = vmatpush.bf16.msrb.mxu2 %v7830_v0  ;;  %v3857_v59 = vmul.f32 1.4285715, %v3761_v42  ;;  %v2940_v0 = vpop.f32.mrf.mxu1 }
 0x195   :  { %v7571_v26 = vld [vmem:[#allocation3 + $0x4b0] sm:$0xf0] }
 0x196   :  { %v10367_v8 = vld [vmem:[#allocation3 + $0x894] sm:$0xf]  ;;  %v7574_v12 = vor.u32 %v10239_v45, %v7571_v26  ;;  %3297 = vmatpush.bf16.msrb.mxu0 %v7318_v11  ;;  %v2922_v26 = vadd.f32 %v2921_v62, %v11360_v36  ;;  %v11381_v11 = vpack.c.bf16 %v3857_v59, %v3849_v29 }
 0x197   :  { %v8083_v9 = vld [vmem:[#allocation3 + $0x8b0] sm:$0xf0] }
 0x198   :  { %v8086_v17 = vor.u32 %v10367_v8, %v8083_v9  ;;  %v10295_v18 = vld [vmem:[#allocation3 + $0x654] sm:$0xf]  ;;  %3316 = vmatpush.bf16.msrb.mxu1 %v7574_v12  ;;  %v7225_v8 = vld [vmem:[#allocation3 + $0x1d8] sm:$0xf]  ;;  %v2941_v4 = vadd.f32 %v2940_v0, %v2922_v26 }
 0x199   :  { %v7795_v19 = vld [vmem:[#allocation3 + $0x670] sm:$0xf0]  ;;  %v10156_v9 = vld [vmem:[#allocation3 + $0x1f4] sm:$0xf0] }
 0x19a   :  { %v10167_v21 = vld [vmem:[#allocation3 + $0x254] sm:$0xf]  ;;  %v7798_v1 = vor.u32 %v10295_v18, %v7795_v19  ;;  %3354 = vmatpush.bf16.msrb.mxu3 %v8086_v17  ;;  %v7226_v36 = vor.u32 %v10156_v9, %v7225_v8  ;;  %v7481_v17 = vld [vmem:[#allocation3 + $0x3d8] sm:$0xf] }
 0x19b   :  { %v7283_v22 = vld [vmem:[#allocation3 + $0x270] sm:$0xf0]  ;;  %v10220_v18 = vld [vmem:[#allocation3 + $0x3f4] sm:$0xf0] }
 0x19c   :  { %v10231_v6 = vld [vmem:[#allocation3 + $0x454] sm:$0xf]  ;;  %v7286_v32 = vor.u32 %v10167_v21, %v7283_v22  ;;  %3336 = vmatpush.bf16.msrb.mxu2 %v7798_v1  ;;  %v7482_v21 = vor.u32 %v10220_v18, %v7481_v17  ;;  %v10148_v1 = vld [vmem:[#allocation3 + $0x1b4] sm:$0xf0] }
 0x19d   :  { %v7539_v27 = vld [vmem:[#allocation3 + $0x470] sm:$0xf0]  ;;  %v7194_v29 = vor.u32 %v10148_v1, %v7193_v31 }
 0x19e   :  { %v10359_v30 = vld [vmem:[#allocation3 + $0x854] sm:$0xf]  ;;  %v7542_v34 = vor.u32 %v10231_v6, %v7539_v27  ;;  %3298 = vmatpush.bf16.msrb.mxu0 %v7286_v32  ;;  %v2959_v6 = vpop.f32.mrf.mxu2  ;;  %v2978_v27 = vpop.f32.mrf.mxu3 }
 0x19f   :  { %v8051_v20 = vld [vmem:[#allocation3 + $0x870] sm:$0xf0]  ;;  %v2960_v32 = vadd.f32 %v2959_v6, %v2941_v4  ;;  %v7385_v4 = vld [vmem:[#allocation3 + $0x318] sm:$0xf] }
 0x1a0   :  { %v8054_v35 = vor.u32 %v10359_v30, %v8051_v20  ;;  %v10287_v37 = vld [vmem:[#allocation3 + $0x614] sm:$0xf]  ;;  %3317 = vmatpush.bf16.msrb.mxu1 %v7542_v34  ;;  %v7449_v20 = vld [vmem:[#allocation3 + $0x398] sm:$0xf]  ;;  %v2923_v34 = vpop.f32.mrf.mxu0 }
 0x1a1   :  { %v7763_v57 = vld [vmem:[#allocation3 + $0x630] sm:$0xf0]  ;;  %v11389_v42 = vadd.f32 %v2978_v27, %v2960_v32  ;;  %v10124_v6 = vld [vmem:[#allocation3 + $0xf4] sm:$0xf0] }
 0x1a2   :  { %v10159_v40 = vld [vmem:[#allocation3 + $0x214] sm:$0xf]  ;;  %v7766_v16 = vor.u32 %v10287_v37, %v7763_v57  ;;  %3355 = vmatpush.bf16.msrb.mxu3 %v8054_v35  ;;  %v2942_v35 = vpop.f32.mrf.mxu1  ;;  %v7450_v57 = vor.u32 %v10212_v24, %v7449_v20  ;;  %v7353_v24 = vld [vmem:[#allocation3 + $0x2d8] sm:$0xf] }
 0x1a3   :  { %v7251_v46 = vld [vmem:[#allocation3 + $0x230] sm:$0xf0]  ;;  %v10188_v32 = vld [vmem:[#allocation3 + $0x2f4] sm:$0xf0] }
 0x1a4   :  { %v10223_v50 = vld [vmem:[#allocation3 + $0x414] sm:$0xf]  ;;  %v7254_v2 = vor.u32 %v10159_v40, %v7251_v46  ;;  %3337 = vmatpush.bf16.msrb.mxu2 %v7766_v16  ;;  %v2924_v40 = vadd.f32 %v2923_v34, %v11366_v25  ;;  %v7161_v16 = vld [vmem:[#allocation3 + $0x158] sm:$0xf]  ;;  %v7354_v34 = vor.u32 %v10188_v32, %v7353_v24 }
 0x1a5   :  { %v7507_v58 = vld [vmem:[#allocation3 + $0x430] sm:$0xf0]  ;;  %v7129_v25 = vld [vmem:[#allocation3 + $0x118] sm:$0xf] }
 0x1a6   :  { %v10351_v63 = vld [vmem:[#allocation3 + $0x814] sm:$0xf]  ;;  %v7510_v7 = vor.u32 %v10223_v50, %v7507_v58  ;;  %3299 = vmatpush.bf16.msrb.mxu0 %v7254_v2  ;;  %v2943_v46 = vadd.f32 %v2942_v35, %v2924_v40  ;;  %v10140_v58 = vld [vmem:[#allocation3 + $0x174] sm:$0xf0]  ;;  %v2980_v8 = vpop.f32.mrf.mxu3 }
 0x1a7   :  { %v8019_v45 = vld [vmem:[#allocation3 + $0x830] sm:$0xf0]  ;;  %v7162_v62 = vor.u32 %v10140_v58, %v7161_v16  ;;  %v10132_v2 = vld [vmem:[#allocation3 + $0x134] sm:$0xf0]  ;;  %3338 = vmatmul.bf16.vlgmr.msrb.gmra.mxu2 %v11147_v56 }
 0x1a8   :  { %v8022_v5 = vor.u32 %v10351_v63, %v8019_v45  ;;  %v10471_v10 = vld [vmem:[#allocation3 + $0xbd4] sm:$0xf]  ;;  %3318 = vmatpush.bf16.msrb.mxu1 %v7510_v7  ;;  %3406 = vmatpush.bf16.msra.mxu2 %v7226_v36  ;;  %v7417_v63 = vld [vmem:[#allocation3 + $0x358] sm:$0xf]  ;;  %v7130_v9 = vor.u32 %v10132_v2, %v7129_v25  ;;  %v2926_v17 = vpop.f32.mrf.mxu0 }
 0x1a9   :  { %v8499_v12 = vld [vmem:[#allocation3 + $0xbf0] sm:$0xf0]  ;;  %v10204_v45 = vld [vmem:[#allocation3 + $0x374] sm:$0xf0]  ;;  %3300 = vmatmul.bf16.vlgmr.msrb.gmra.mxu0 %v11143_v52 }
 0x1aa   :  { %v8502_v19 = vor.u32 %v10471_v10, %v8499_v12  ;;  %3356 = vmatpush.bf16.msrb.mxu3 %v8022_v5  ;;  %v10463_v22 = vld [vmem:[#allocation3 + $0xb94] sm:$0xf]  ;;  %v7418_v26 = vor.u32 %v10204_v45, %v7417_v63  ;;  %v2961_v5 = vpop.f32.mrf.mxu2  ;;  %v10196_v36 = vld [vmem:[#allocation3 + $0x334] sm:$0xf0]  ;;  %v2945_v18 = vpop.f32.mrf.mxu1 }
 0x1ab   :  { %v8467_v30 = vld [vmem:[#allocation3 + $0xbb0] sm:$0xf0]  ;;  %v2962_v12 = vadd.f32 %v2961_v5, %v2943_v46  ;;  %v7386_v31 = vor.u32 %v10196_v36, %v7385_v4  ;;  %v7065_v35 = vld [vmem:[#allocation3 + $0x98] sm:$0xf]  ;;  %3319 = vmatmul.bf16.vlgmr.msrb.gmra.mxu1 %v11145_v53 }
 0x1ac   :  { %3368 = vmatpush.bf16.msra.mxu0 %v8502_v19  ;;  %v8470_v37 = vor.u32 %v10463_v22, %v8467_v30  ;;  %v10479_v44 = vld [vmem:[#allocation3 + $0xc14] sm:$0xf]  ;;  %3407 = vmatpush.bf16.msra.mxu2 %v7194_v29  ;;  %v2927_v19 = vadd.f32 %v2926_v17, %v11375_v14  ;;  %v7097_v22 = vld [vmem:[#allocation3 + $0xd8] sm:$0xf] }
 0x1ad   :  { %v8531_v15 = vld [vmem:[#allocation3 + $0xc30] sm:$0xf0]  ;;  %v11392_v1 = vadd.f32 %v2980_v8, %v2962_v12  ;;  %v7098_v30 = vor.u32 %v10124_v6, %v7097_v22  ;;  %v7321_v46 = vld [vmem:[#allocation3 + $0x298] sm:$0xf]  ;;  %3357 = vmatmul.bf16.vlgmr.msrb.gmra.mxu3 %v11207_v47 }
 0x1ae   :  { %3425 = vmatpush.bf16.msra.mxu3 %v7482_v21  ;;  %v8534_v50 = vor.u32 %v10479_v44, %v8531_v15  ;;  %v10455_v59 = vld [vmem:[#allocation3 + $0xb54] sm:$0xf]  ;;  %v2946_v29 = vadd.f32 %v2945_v18, %v2927_v19  ;;  %v2983_v44 = vpop.f32.mrf.mxu3  ;;  %v10108_v25 = vld [vmem:[#allocation3 + $0x74] sm:$0xf0] }
 0x1af   :  { %v8435_v41 = vld [vmem:[#allocation3 + $0xb70] sm:$0xf0]  ;;  %v10100_v12 = vld [vmem:[#allocation3 + $0x34] sm:$0xf0] }
 0x1b0   :  { %3369 = vmatpush.bf16.msra.mxu0 %v8470_v37  ;;  %v8438_v0 = vor.u32 %v10455_v59, %v8435_v41  ;;  %3394 = vmatpush.bf16.msra.mxu1 %v8534_v50  ;;  %v10447_v7 = vld [vmem:[#allocation3 + $0xb14] sm:$0xf]  ;;  %v10116_v37 = vld [vmem:[#allocation3 + $0xb4] sm:$0xf0]  ;;  %v2928_v59 = vpop.f32.mrf.mxu0 }
 0x1b1   :  { %3408 = vmatpush.bf16.msra.mxu2 %v7162_v62  ;;  %v8403_v10 = vld [vmem:[#allocation3 + $0xb30] sm:$0xf0]  ;;  %v7066_v15 = vor.u32 %v10116_v37, %v7065_v35  ;;  %v10180_v50 = vld [vmem:[#allocation3 + $0x2b4] sm:$0xf0]  ;;  %v2929_v62 = vadd.f32 %v2928_v59, %v11379_v28 }
 0x1b2   :  { %3426 = vmatpush.bf16.msra.mxu3 %v7450_v57  ;;  %v8406_v21 = vor.u32 %v10447_v7, %v8403_v10  ;;  %v10439_v27 = vld [vmem:[#allocation3 + $0xad4] sm:$0xf]  ;;  %v2964_v40 = vpop.f32.mrf.mxu2  ;;  %v2947_v41 = vpop.f32.mrf.mxu1  ;;  %v7322_v63 = vor.u32 %v10180_v50, %v7321_v46  ;;  %v10172_v10 = vld [vmem:[#allocation3 + $0x274] sm:$0xf0] }
 0x1b3   :  { %v8371_v20 = vld [vmem:[#allocation3 + $0xaf0] sm:$0xf0]  ;;  %v2965_v58 = vadd.f32 %v2964_v40, %v2946_v29  ;;  %v2948_v7 = vadd.f32 %v2947_v41, %v2929_v62  ;;  %v7001_v28 = vld [vmem:[#allocation3 + $0x18] sm:$0xf] }
 0x1b4   :  { %3370 = vmatpush.bf16.msra.mxu0 %v8438_v0  ;;  %v8374_v14 = vor.u32 %v10439_v27, %v8371_v20  ;;  %v10431_v57 = vld [vmem:[#allocation3 + $0xa94] sm:$0xf]  ;;  %v7257_v22 = vld [vmem:[#allocation3 + $0x218] sm:$0xf] }
 0x1b5   :  { %3409 = vmatpush.bf16.msra.mxu2 %v7130_v9  ;;  %v8339_v16 = vld [vmem:[#allocation3 + $0xab0] sm:$0xf0]  ;;  %v11400_v45 = vadd.f32 %v2983_v44, %v2965_v58  ;;  %v7289_v9 = vld [vmem:[#allocation3 + $0x258] sm:$0xf] }
 0x1b6   :  { %3427 = vmatpush.bf16.msra.mxu3 %v7418_v26  ;;  %v8342_v0 = vor.u32 %v10431_v57, %v8339_v16  ;;  %v7033_v26 = vld [vmem:[#allocation3 + $0x58] sm:$0xf]  ;;  %v10423_v2 = vld [vmem:[#allocation3 + $0xa54] sm:$0xf]  ;;  %v7290_v36 = vor.u32 %v10172_v10, %v7289_v9  ;;  %v2985_v19 = vpop.f32.mrf.mxu3 }
 0x1b7   :  { %v7034_v5 = vor.u32 %v10108_v25, %v7033_v26  ;;  %v8307_v8 = vld [vmem:[#allocation3 + $0xa70] sm:$0xf0]  ;;  %v10164_v6 = vld [vmem:[#allocation3 + $0x234] sm:$0xf0]  ;;  %3343 = vmatmul.bf16.gmra.mxu2 %v11183_v43 }
 0x1b8   :  { %3371 = vmatpush.bf16.msra.mxu0 %v8406_v21  ;;  %v8310_v4 = vor.u32 %v10423_v2, %v8307_v8  ;;  %v10415_v17 = vld [vmem:[#allocation3 + $0xa14] sm:$0xf]  ;;  %v7002_v21 = vor.u32 %v10100_v12, %v7001_v28  ;;  %v2997_v29 = vpop.f32.mrf.mxu0  ;;  %v8249_v35 = vld [vmem:[#allocation3 + $0x9d8] sm:$0xf] }
 0x1b9   :  { %3410 = vmatpush.bf16.msra.mxu2 %v7098_v30  ;;  %v11403_v30 = vperm.slane %v11352_v3, 3  ;;  %v2998_v24 = vadd.f32 %v2997_v29, %v11389_v42  ;;  %v10412_v37 = vld [vmem:[#allocation3 + $0x9f4] sm:$0xf0]  ;;  %3305 = vmatmul.bf16.gmra.mxu0 %v11179_v38 }
 0x1ba   :  { %3428 = vmatpush.bf16.msra.mxu3 %v7386_v31  ;;  %v2966_v18 = vpop.f32.mrf.mxu2  ;;  %v8275_v31 = vld [vmem:[#allocation3 + $0xa30] sm:$0xf0]  ;;  %v3016_v20 = vpop.f32.mrf.mxu1  ;;  %v7737_v57 = vld [vmem:[#allocation3 + $0x5d8] sm:$0xf]  ;;  %v8250_v40 = vor.u32 %v10412_v37, %v8249_v35 }
 0x1bb   :  { %v2967_v27 = vadd.f32 %v2966_v18, %v2948_v7  ;;  %v8278_v32 = vor.u32 %v10415_v17, %v8275_v31  ;;  %v10284_v3 = vld [vmem:[#allocation3 + $0x5f4] sm:$0xf0]  ;;  %v3017_v44 = vadd.f32 %v3016_v20, %v11403_v30  ;;  %vm3674_vm9 = vcmp.ge.f32.partialorder %v2998_v24, 0.0  ;;  %3324 = vmatmul.bf16.gmra.mxu1 %v11181_v39 }
 0x1bc   :  { %3372 = vmatpush.bf16.msra.mxu0 %v8374_v14  ;;  %v7258_v14 = vor.u32 %v10164_v6, %v7257_v22  ;;  %v7738_v42 = vor.u32 %v10284_v3, %v7737_v57  ;;  %v10348_v16 = vld [vmem:[#allocation3 + $0x7f4] sm:$0xf0]  ;;  %v3706_v59 = vmul.f32 0.2, %v2998_v24 }
 0x1bd   :  { %3411 = vmatpush.bf16.msra.mxu2 %v7066_v15  ;;  %v7993_v15 = vld [vmem:[#allocation3 + $0x7d8] sm:$0xf]  ;;  %3362 = vmatmul.bf16.gmra.mxu3 %v11236_v51 }
 0x1be   :  { %3429 = vmatpush.bf16.msra.mxu3 %v7354_v34  ;;  %v11406_v34 = vadd.f32 %v2985_v19, %v2967_v27  ;;  %v8505_v46 = vld [vmem:[#allocation3 + $0xbd8] sm:$0xf]  ;;  %v7994_v50 = vor.u32 %v10348_v16, %v7993_v15  ;;  %v3054_v26 = vpop.f32.mrf.mxu3 }
 0x1bf   :  { %v10476_v58 = vld [vmem:[#allocation3 + $0xbf4] sm:$0xf0] }
 0x1c0   :  { %3373 = vmatpush.bf16.msra.mxu0 %v8342_v0  ;;  %v8506_v41 = vor.u32 %v10476_v58, %v8505_v46  ;;  %v8217_v62 = vld [vmem:[#allocation3 + $0x998] sm:$0xf]  ;;  %3463 = vmatpush.bf16.msrb.mxu1 %v7994_v50  ;;  %v2999_v9 = vpop.f32.mrf.mxu0 }
 0x1c1   :  { %3412 = vmatpush.bf16.msra.mxu2 %v7034_v5  ;;  %v10404_v0 = vld [vmem:[#allocation3 + $0x9b4] sm:$0xf0]  ;;  %v3000_v17 = vadd.f32 %v2999_v9, %v11392_v1 }
 0x1c2   :  { %3430 = vmatpush.bf16.msra.mxu3 %v7322_v63  ;;  %v3035_v63 = vpop.f32.mrf.mxu2  ;;  %v8218_v25 = vor.u32 %v10404_v0, %v8217_v62  ;;  %v7705_v2 = vld [vmem:[#allocation3 + $0x598] sm:$0xf]  ;;  %v3018_v10 = vpop.f32.mrf.mxu1 }
 0x1c3   :  { %v10276_v7 = vld [vmem:[#allocation3 + $0x5b4] sm:$0xf0]  ;;  %v3036_v8 = vadd.f32 %v3035_v63, %v3017_v44  ;;  %vm3682_vm10 = vcmp.ge.f32.partialorder %v3000_v17, 0.0  ;;  %v3714_v29 = vmul.f32 0.2, %v3000_v17 }
 0x1c4   :  { %3374 = vmatpush.bf16.msra.mxu0 %v8310_v4  ;;  %v7961_v5 = vld [vmem:[#allocation3 + $0x798] sm:$0xf]  ;;  %v7706_v4 = vor.u32 %v10276_v7, %v7705_v2 }
 0x1c5   :  { %3413 = vmatpush.bf16.msra.mxu2 %v7002_v21  ;;  %v8473_v28 = vld [vmem:[#allocation3 + $0xb98] sm:$0xf]  ;;  %v3738_v21 = vsel %vm3674_vm9, %v2998_v24, %v3706_v59  ;;  %v11415_v31 = vadd.f32 %v3054_v26, %v3036_v8 }
 0x1c6   :  { %3431 = vmatpush.bf16.msra.mxu3 %v7290_v36  ;;  %v10340_v36 = vld [vmem:[#allocation3 + $0x7b4] sm:$0xf0]  ;;  %v3834_v57 = vmul.f32 1.4285715, %v3738_v21  ;;  %v3056_v58 = vpop.f32.mrf.mxu3 }
 0x1c7   :  { %v10468_v12 = vld [vmem:[#allocation3 + $0xbb4] sm:$0xf0]  ;;  %v7962_v18 = vor.u32 %v10340_v36, %v7961_v5 }
 0x1c8   :  { %3375 = vmatpush.bf16.msra.mxu0 %v8278_v32  ;;  %v8474_v19 = vor.u32 %v10468_v12, %v8473_v28  ;;  %v8185_v22 = vld [vmem:[#allocation3 + $0x958] sm:$0xf]  ;;  %3414 = vmatmul.bf16.vlgmr.msra.gmra.mxu2 %v11141_v48 }
 0x1c9   :  { %3482 = vmatpush.bf16.msrb.mxu2 %v8250_v40  ;;  %v10396_v6 = vld [vmem:[#allocation3 + $0x974] sm:$0xf0]  ;;  %3464 = vmatpush.bf16.msrb.mxu1 %v7962_v18  ;;  %v3746_v40 = vsel %vm3682_vm10, %v3000_v17, %v3714_v29 }
 0x1ca   :  { %3432 = vmatpush.bf16.msra.mxu3 %v7258_v14  ;;  %v7673_v27 = vld [vmem:[#allocation3 + $0x558] sm:$0xf]  ;;  %v8186_v20 = vor.u32 %v10396_v6, %v8185_v22  ;;  %v3842_v44 = vmul.f32 1.4285715, %v3746_v40  ;;  %v3037_v50 = vpop.f32.mrf.mxu2  ;;  %v3021_v2 = vpop.f32.mrf.mxu1 }
 0x1cb   :  { %v10268_v32 = vld [vmem:[#allocation3 + $0x574] sm:$0xf0]  ;;  %v3022_v22 = vadd.f32 %v3021_v2, %v11403_v30  ;;  %3376 = vmatmul.bf16.vlgmr.msra.gmra.mxu0 %v11209_v49  ;;  %8553 = vmatmul.msk.bf16.vlgmr.msra.gmra.mxu1 %vm2601_vm0, %v11211_v55 }
 0x1cc   :  { %3444 = vmatpush.bf16.msrb.mxu0 %v7738_v42  ;;  %v7674_v14 = vor.u32 %v10268_v32, %v7673_v27  ;;  %v7929_v35 = vld [vmem:[#allocation3 + $0x758] sm:$0xf]  ;;  %v3019_v42 = vadd.f32 %v3018_v10, %v11403_v30  ;;  %v11418_v63 = vpack.c.bf16 %v3842_v44, %v3834_v57 }
 0x1cd   :  { %3483 = vmatpush.bf16.msrb.mxu2 %v8218_v25  ;;  %v10332_v1 = vld [vmem:[#allocation3 + $0x774] sm:$0xf0]  ;;  %v3002_v25 = vpop.f32.mrf.mxu0  ;;  %3433 = vmatmul.bf16.vlgmr.msra.gmra.mxu3 %v11143_v52 }
 0x1ce   :  { %3501 = vmatpush.bf16.msrb.mxu3 %v8506_v41  ;;  %v8441_v37 = vld [vmem:[#allocation3 + $0xb58] sm:$0xf]  ;;  %v7930_v24 = vor.u32 %v10332_v1, %v7929_v35  ;;  %v3038_v26 = vadd.f32 %v3037_v50, %v3019_v42  ;;  %v3003_v10 = vadd.f32 %v3002_v25, %v11400_v45  ;;  %v3059_v40 = vpop.f32.mrf.mxu3 }
 0x1cf   :  { %v10460_v3 = vld [vmem:[#allocation3 + $0xb74] sm:$0xf0] }
 0x1d0   :  { %3445 = vmatpush.bf16.msrb.mxu0 %v7706_v4  ;;  %v8442_v15 = vor.u32 %v10460_v3, %v8441_v37  ;;  %v8153_v16 = vld [vmem:[#allocation3 + $0x918] sm:$0xf]  ;;  %3465 = vmatpush.bf16.msrb.mxu1 %v7930_v24  ;;  %v11421_v28 = vadd.f32 %v3056_v58, %v3038_v26  ;;  %vm3690_vm11 = vcmp.ge.f32.partialorder %v3003_v10, 0.0 }
 0x1d1   :  { %3484 = vmatpush.bf16.msrb.mxu2 %v8186_v20  ;;  %v10388_v46 = vld [vmem:[#allocation3 + $0x934] sm:$0xf0] }
 0x1d2   :  { %3502 = vmatpush.bf16.msrb.mxu3 %v8474_v19  ;;  %v8154_v59 = vor.u32 %v10388_v46, %v8153_v16  ;;  %v7641_v41 = vld [vmem:[#allocation3 + $0x518] sm:$0xf]  ;;  %v3040_v57 = vpop.f32.mrf.mxu2  ;;  %v3023_v46 = vpop.f32.mrf.mxu1 }
 0x1d3   :  { %v10260_v62 = vld [vmem:[#allocation3 + $0x534] sm:$0xf0] }
 0x1d4   :  { %3446 = vmatpush.bf16.msrb.mxu0 %v7674_v14  ;;  %v7897_v0 = vld [vmem:[#allocation3 + $0x718] sm:$0xf]  ;;  %v7642_v7 = vor.u32 %v10260_v62, %v7641_v41  ;;  %v3722_v14 = vmul.f32 0.2, %v3003_v10 }
 0x1d5   :  { %v10324_v5 = vld [vmem:[#allocation3 + $0x734] sm:$0xf0]  ;;  %3485 = vmatpush.bf16.msrb.mxu2 %v8154_v59  ;;  %v3004_v16 = vpop.f32.mrf.mxu0 }
 0x1d6   :  { %3503 = vmatpush.bf16.msrb.mxu3 %v8442_v15  ;;  %v8409_v8 = vld [vmem:[#allocation3 + $0xb18] sm:$0xf]  ;;  %v7898_v4 = vor.u32 %v10324_v5, %v7897_v0  ;;  %v3041_v15 = vadd.f32 %v3040_v57, %v3022_v22  ;;  %v3005_v62 = vadd.f32 %v3004_v16, %v11406_v34  ;;  %v3754_v26 = vsel %vm3690_vm11, %v3003_v10, %v3722_v14  ;;  %v3061_v14 = vpop.f32.mrf.mxu3 }
 0x1d7   :  { %v10452_v9 = vld [vmem:[#allocation3 + $0xb34] sm:$0xf0] }
 0x1d8   :  { %v8410_v36 = vor.u32 %v10452_v9, %v8409_v8  ;;  %3447 = vmatpush.bf16.msrb.mxu0 %v7642_v7  ;;  %v8121_v12 = vld [vmem:[#allocation3 + $0x8d8] sm:$0xf]  ;;  %3466 = vmatpush.bf16.msrb.mxu1 %v7898_v4  ;;  %v11430_v25 = vadd.f32 %v3059_v40, %v3041_v15  ;;  %vm3698_vm12 = vcmp.ge.f32.partialorder %v3005_v62, 0.0  ;;  %v3730_v9 = vmul.f32 0.2, %v3005_v62 }
 0x1d9   :  { %v10380_v17 = vld [vmem:[#allocation3 + $0x8f4] sm:$0xf0]  ;;  %3419 = vmatmul.bf16.gmra.mxu2 %v11177_v33 }
 0x1da   :  { %v7609_v18 = vld [vmem:[#allocation3 + $0x4d8] sm:$0xf]  ;;  %v8122_v19 = vor.u32 %v10380_v17, %v8121_v12  ;;  %3504 = vmatpush.bf16.msrb.mxu3 %v8410_v36 }
 0x1db   :  { %v10252_v21 = vld [vmem:[#allocation3 + $0x4f4] sm:$0xf0]  ;;  %3381 = vmatmul.bf16.gmra.mxu0 %v11238_v54  ;;  %8554 = vmatmul.msk.bf16.gmra.mxu1 %vm2601_vm0, %v11240_v60 }
 0x1dc   :  { %v7610_v45 = vor.u32 %v10252_v21, %v7609_v18  ;;  %v7865_v6 = vld [vmem:[#allocation3 + $0x6d8] sm:$0xf]  ;;  %3486 = vmatpush.bf16.msrb.mxu2 %v8122_v19  ;;  %v3850_v19 = vmul.f32 1.4285715, %v3754_v26  ;;  %v3762_v21 = vsel %vm3698_vm12, %v3005_v62, %v3730_v9  ;;  %v7483_v62 = vld [vmem:[#allocation3 + $0x3f8] sm:$0xf0] }
 0x1dd   :  { %v10316_v27 = vld [vmem:[#allocation3 + $0x6f4] sm:$0xf0]  ;;  %3438 = vmatmul.bf16.gmra.mxu3 %v11179_v38 }
 0x1de   :  { %v8377_v29 = vld [vmem:[#allocation3 + $0xad8] sm:$0xf]  ;;  %v7866_v20 = vor.u32 %v10316_v27, %v7865_v6  ;;  %3448 = vmatpush.bf16.msrb.mxu0 %v7610_v45  ;;  %v3858_v45 = vmul.f32 1.4285715, %v3762_v21  ;;  %v3024_v6 = vadd.f32 %v3023_v46, %v11403_v30 }
 0x1df   :  { %v10444_v32 = vld [vmem:[#allocation3 + $0xaf4] sm:$0xf0] }
 0x1e0   :  { %v8378_v35 = vor.u32 %v10444_v32, %v8377_v29  ;;  %v8089_v1 = vld [vmem:[#allocation3 + $0x898] sm:$0xf]  ;;  %3467 = vmatpush.bf16.msrb.mxu1 %v7866_v20  ;;  %v3042_v32 = vpop.f32.mrf.mxu2 }
 0x1e1   :  { %v10372_v37 = vld [vmem:[#allocation3 + $0x8b4] sm:$0xf0]  ;;  %v3043_v40 = vadd.f32 %v3042_v32, %v3024_v6  ;;  %v7707_v32 = vld [vmem:[#allocation3 + $0x5b8] sm:$0xf0] }
 0x1e2   :  { %v8090_v24 = vor.u32 %v10372_v37, %v8089_v1  ;;  %v7577_v3 = vld [vmem:[#allocation3 + $0x498] sm:$0xf]  ;;  %3505 = vmatpush.bf16.msrb.mxu3 %v8378_v35 }
 0x1e3   :  { %v10244_v44 = vld [vmem:[#allocation3 + $0x4b4] sm:$0xf0] }
 0x1e4   :  { %v7833_v42 = vld [vmem:[#allocation3 + $0x698] sm:$0xf]  ;;  %v7578_v50 = vor.u32 %v10244_v44, %v7577_v3  ;;  %3487 = vmatpush.bf16.msrb.mxu2 %v8090_v24  ;;  %v3073_v24 = vpop.f32.mrf.mxu0  ;;  %v3092_v3 = vpop.f32.mrf.mxu1 }
 0x1e5   :  { %v10308_v58 = vld [vmem:[#allocation3 + $0x6b4] sm:$0xf0]  ;;  %v3074_v30 = vadd.f32 %v3073_v24, %v11415_v31  ;;  %v10280_v31 = vld [vmem:[#allocation3 + $0x5dc] sm:$0xf] }
 0x1e6   :  { %v8345_v59 = vld [vmem:[#allocation3 + $0xa98] sm:$0xf]  ;;  %v7834_v0 = vor.u32 %v10308_v58, %v7833_v42  ;;  %3449 = vmatpush.bf16.msrb.mxu0 %v7578_v50  ;;  %v11433_v50 = vpack.c.bf16 %v3858_v45, %v3850_v19 }
 0x1e7   :  { %v10436_v41 = vld [vmem:[#allocation3 + $0xab4] sm:$0xf0] }
 0x1e8   :  { %v8346_v2 = vor.u32 %v10436_v41, %v8345_v59  ;;  %v8057_v7 = vld [vmem:[#allocation3 + $0x858] sm:$0xf]  ;;  %3468 = vmatpush.bf16.msrb.mxu1 %v7834_v0  ;;  %v11436_v59 = vadd.f32 %v3061_v14, %v3043_v40  ;;  %v10216_v41 = vld [vmem:[#allocation3 + $0x3dc] sm:$0xf]  ;;  %v3093_v0 = vadd.f32 %v3092_v3, %v3074_v30 }
 0x1e9   :  { %v10364_v5 = vld [vmem:[#allocation3 + $0x874] sm:$0xf0]  ;;  %v7486_v26 = vor.u32 %v10216_v41, %v7483_v62  ;;  %v10136_v40 = vld [vmem:[#allocation3 + $0x15c] sm:$0xf] }
 0x1ea   :  { %v7545_v8 = vld [vmem:[#allocation3 + $0x458] sm:$0xf]  ;;  %v8058_v4 = vor.u32 %v10364_v5, %v8057_v7  ;;  %3506 = vmatpush.bf16.msrb.mxu3 %v8346_v2  ;;  %v10152_v2 = vld [vmem:[#allocation3 + $0x1dc] sm:$0xf] }
 0x1eb   :  { %v10236_v36 = vld [vmem:[#allocation3 + $0x474] sm:$0xf0]  ;;  %v7227_v7 = vld [vmem:[#allocation3 + $0x1f8] sm:$0xf0] }
 0x1ec   :  { %v7546_v12 = vor.u32 %v10236_v36, %v7545_v8  ;;  %v7801_v17 = vld [vmem:[#allocation3 + $0x658] sm:$0xf]  ;;  %3488 = vmatpush.bf16.msrb.mxu2 %v8058_v4  ;;  %v7230_v5 = vor.u32 %v10152_v2, %v7227_v7  ;;  %v7739_v8 = vld [vmem:[#allocation3 + $0x5f8] sm:$0xf0]  ;;  %v3075_v45 = vpop.f32.mrf.mxu0  ;;  %v3094_v6 = vpop.f32.mrf.mxu1 }
 0x1ed   :  { %v10300_v34 = vld [vmem:[#allocation3 + $0x674] sm:$0xf0]  ;;  %v7742_v9 = vor.u32 %v10280_v31, %v7739_v8  ;;  %v10208_v4 = vld [vmem:[#allocation3 + $0x39c] sm:$0xf]  ;;  %v3076_v14 = vadd.f32 %v3075_v45, %v11421_v28 }
 0x1ee   :  { %v8313_v18 = vld [vmem:[#allocation3 + $0xa58] sm:$0xf]  ;;  %v7802_v10 = vor.u32 %v10300_v34, %v7801_v17  ;;  %3450 = vmatpush.bf16.msrb.mxu0 %v7546_v12  ;;  %v7451_v36 = vld [vmem:[#allocation3 + $0x3b8] sm:$0xf0]  ;;  %v3111_v17 = vpop.f32.mrf.mxu2  ;;  %v3130_v34 = vpop.f32.mrf.mxu3 }
 0x1ef   :  { %v10428_v22 = vld [vmem:[#allocation3 + $0xa74] sm:$0xf0]  ;;  %v10144_v12 = vld [vmem:[#allocation3 + $0x19c] sm:$0xf]  ;;  %v7454_v21 = vor.u32 %v10208_v4, %v7451_v36  ;;  %v3095_v24 = vadd.f32 %v3094_v6, %v3076_v14 }
 0x1f0   :  { %v8314_v27 = vor.u32 %v10428_v22, %v8313_v18  ;;  %v8025_v29 = vld [vmem:[#allocation3 + $0x818] sm:$0xf]  ;;  %3469 = vmatpush.bf16.msrb.mxu1 %v7802_v10  ;;  %v7195_v10 = vld [vmem:[#allocation3 + $0x1b8] sm:$0xf0]  ;;  %v3112_v22 = vadd.f32 %v3111_v17, %v3093_v0 }
 0x1f1   :  { %v10356_v20 = vld [vmem:[#allocation3 + $0x834] sm:$0xf0]  ;;  %v7387_v28 = vld [vmem:[#allocation3 + $0x338] sm:$0xf0] }
 0x1f2   :  { %v8026_v35 = vor.u32 %v10356_v20, %v8025_v29  ;;  %v7513_v1 = vld [vmem:[#allocation3 + $0x418] sm:$0xf]  ;;  %3507 = vmatpush.bf16.msrb.mxu3 %v8314_v27  ;;  %v7198_v29 = vor.u32 %v10144_v12, %v7195_v10  ;;  %v10272_v20 = vld [vmem:[#allocation3 + $0x59c] sm:$0xf] }
 0x1f3   :  { %v10228_v37 = vld [vmem:[#allocation3 + $0x434] sm:$0xf0]  ;;  %v10128_v41 = vld [vmem:[#allocation3 + $0x11c] sm:$0xf] }
 0x1f4   :  { %v7769_v57 = vld [vmem:[#allocation3 + $0x618] sm:$0xf]  ;;  %v7514_v44 = vor.u32 %v10228_v37, %v7513_v1  ;;  %3489 = vmatpush.bf16.msrb.mxu2 %v8026_v35  ;;  %v7710_v35 = vor.u32 %v10272_v20, %v7707_v32  ;;  %v3131_v1 = vadd.f32 %v3130_v34, %v3112_v22  ;;  %v10200_v37 = vld [vmem:[#allocation3 + $0x35c] sm:$0xf]  ;;  %v3097_v8 = vpop.f32.mrf.mxu1 }
 0x1f5   :  { %v10292_v42 = vld [vmem:[#allocation3 + $0x634] sm:$0xf0]  ;;  %v7131_v2 = vld [vmem:[#allocation3 + $0x138] sm:$0xf0] }
 0x1f6   :  { %v8281_v15 = vld [vmem:[#allocation3 + $0xa18] sm:$0xf]  ;;  %v7770_v46 = vor.u32 %v10292_v42, %v7769_v57  ;;  %3451 = vmatpush.bf16.msrb.mxu0 %v7514_v44  ;;  %v7419_v57 = vld [vmem:[#allocation3 + $0x378] sm:$0xf0]  ;;  %vm3675_vm13 = vcmp.ge.f32.partialorder %v3131_v1, 0.0  ;;  %v3113_v62 = vpop.f32.mrf.mxu2  ;;  %v3132_v0 = vpop.f32.mrf.mxu3  ;;  %v7134_v36 = vor.u32 %v10128_v41, %v7131_v2 }
 0x1f7   :  { %v10420_v16 = vld [vmem:[#allocation3 + $0xa34] sm:$0xf0]  ;;  %v7422_v3 = vor.u32 %v10200_v37, %v7419_v57  ;;  %v7163_v44 = vld [vmem:[#allocation3 + $0x178] sm:$0xf0]  ;;  %v3114_v31 = vadd.f32 %v3113_v62, %v3095_v24  ;;  %3490 = vmatmul.bf16.vlgmr.msrb.gmra.mxu2 %v11207_v47 }
 0x1f8   :  { %v8282_v58 = vor.u32 %v10420_v16, %v8281_v15  ;;  %3470 = vmatpush.bf16.msrb.mxu1 %v7770_v46  ;;  %3558 = vmatpush.bf16.msra.mxu2 %v7486_v26  ;;  %v8537_v18 = vld [vmem:[#allocation3 + $0xc18] sm:$0xf]  ;;  %v10264_v42 = vld [vmem:[#allocation3 + $0x55c] sm:$0xf]  ;;  %v7166_v16 = vor.u32 %v10136_v40, %v7163_v44  ;;  %v3707_v46 = vmul.f32 0.2, %v3131_v1 }
 0x1f9   :  { %v10484_v19 = vld [vmem:[#allocation3 + $0xc34] sm:$0xf0]  ;;  %v7675_v15 = vld [vmem:[#allocation3 + $0x578] sm:$0xf0]  ;;  %v3133_v34 = vadd.f32 %v3132_v0, %v3114_v31  ;;  %3452 = vmatmul.bf16.vlgmr.msrb.gmra.mxu0 %v11145_v53 }
 0x1fa   :  { %3508 = vmatpush.bf16.msrb.mxu3 %v8282_v58  ;;  %v8538_v27 = vor.u32 %v10484_v19, %v8537_v18  ;;  %v7678_v30 = vor.u32 %v10264_v42, %v7675_v15  ;;  %v10192_v58 = vld [vmem:[#allocation3 + $0x31c] sm:$0xf]  ;;  %v3739_v17 = vsel %vm3675_vm13, %v3131_v1, %v3707_v46 }
 0x1fb   :  { %v7390_v26 = vor.u32 %v10192_v58, %v7387_v28  ;;  %v10256_v7 = vld [vmem:[#allocation3 + $0x51c] sm:$0xf]  ;;  %vm3683_vm14 = vcmp.ge.f32.partialorder %v3133_v34, 0.0  ;;  %3471 = vmatmul.bf16.vlgmr.msrb.gmra.mxu1 %v11147_v56 }
 0x1fc   :  { %3539 = vmatpush.bf16.msra.mxu1 %v7230_v5  ;;  %3527 = vmatpush.bf16.msra.mxu0 %v8538_v27  ;;  %v3078_v5 = vpop.f32.mrf.mxu0  ;;  %v10184_v18 = vld [vmem:[#allocation3 + $0x2dc] sm:$0xf] }
 0x1fd   :  { %3559 = vmatpush.bf16.msra.mxu2 %v7454_v21  ;;  %v3079_v4 = vadd.f32 %v3078_v5, %v11430_v25  ;;  %v7355_v19 = vld [vmem:[#allocation3 + $0x2f8] sm:$0xf0]  ;;  %v3715_v25 = vmul.f32 0.2, %v3133_v34  ;;  %3509 = vmatmul.bf16.vlgmr.msrb.gmra.mxu3 %v11209_v49 }
 0x1fe   :  { %3577 = vmatpush.bf16.msra.mxu3 %v7742_v9  ;;  %v7643_v9 = vld [vmem:[#allocation3 + $0x538] sm:$0xf0]  ;;  %v7358_v22 = vor.u32 %v10184_v18, %v7355_v19  ;;  %v3116_v40 = vpop.f32.mrf.mxu2  ;;  %v3135_v24 = vpop.f32.mrf.mxu3 }
 0x1ff   :  { %v7646_v12 = vor.u32 %v10256_v7, %v7643_v9  ;;  %v10120_v21 = vld [vmem:[#allocation3 + $0xdc] sm:$0xf]  ;;  %v3098_v10 = vadd.f32 %v3097_v8, %v3079_v4  ;;  %v3747_v14 = vsel %vm3683_vm14, %v3133_v34, %v3715_v25 }
 0x200   :  { %3540 = vmatpush.bf16.msra.mxu1 %v7198_v29  ;;  %v7099_v45 = vld [vmem:[#allocation3 + $0xf8] sm:$0xf0]  ;;  %v3835_v29 = vmul.f32 1.4285715, %v3739_v17  ;;  %v3843_v57 = vmul.f32 1.4285715, %v3747_v14 }
 0x201   :  { %3560 = vmatpush.bf16.msra.mxu2 %v7422_v3  ;;  %v10248_v6 = vld [vmem:[#allocation3 + $0x4dc] sm:$0xf]  ;;  %v7102_v20 = vor.u32 %v10120_v21, %v7099_v45  ;;  %v3117_v15 = vadd.f32 %v3116_v40, %v3098_v10 }
 0x202   :  { %3578 = vmatpush.bf16.msra.mxu3 %v7710_v35  ;;  %v7611_v27 = vld [vmem:[#allocation3 + $0x4f8] sm:$0xf0]  ;;  %v11450_v28 = vpack.c.bf16 %v3843_v57, %v3835_v29 }
 0x203   :  { %v7614_v32 = vor.u32 %v10248_v6, %v7611_v27  ;;  %v10176_v35 = vld [vmem:[#allocation3 + $0x29c] sm:$0xf]  ;;  %v3136_v0 = vadd.f32 %v3135_v24, %v3117_v15 }
 0x204   :  { %3541 = vmatpush.bf16.msra.mxu1 %v7166_v16  ;;  %v7323_v1 = vld [vmem:[#allocation3 + $0x2b8] sm:$0xf0]  ;;  %v3080_v16 = vpop.f32.mrf.mxu0 }
 0x205   :  { %3561 = vmatpush.bf16.msra.mxu2 %v7390_v26  ;;  %v10112_v37 = vld [vmem:[#allocation3 + $0x9c] sm:$0xf]  ;;  %v7326_v3 = vor.u32 %v10176_v35, %v7323_v1  ;;  %v3081_v41 = vadd.f32 %v3080_v16, %v11436_v59  ;;  %vm3691_vm15 = vcmp.ge.f32.partialorder %v3136_v0, 0.0 }
 0x206   :  { %3579 = vmatpush.bf16.msra.mxu3 %v7678_v30  ;;  %v7067_v44 = vld [vmem:[#allocation3 + $0xb8] sm:$0xf0]  ;;  %v3099_v30 = vpop.f32.mrf.mxu1  ;;  %v3118_v10 = vpop.f32.mrf.mxu2 }
 0x207   :  { %v10240_v42 = vld [vmem:[#allocation3 + $0x49c] sm:$0xf]  ;;  %v7070_v46 = vor.u32 %v10112_v37, %v7067_v44  ;;  %v3100_v31 = vadd.f32 %v3099_v30, %v3081_v41  ;;  %3495 = vmatmul.bf16.gmra.mxu2 %v11236_v51 }
 0x208   :  { %3542 = vmatpush.bf16.msra.mxu1 %v7134_v36  ;;  %v7579_v58 = vld [vmem:[#allocation3 + $0x4b8] sm:$0xf0]  ;;  %v3723_v36 = vmul.f32 0.2, %v3136_v0 }
 0x209   :  { %3562 = vmatpush.bf16.msra.mxu2 %v7358_v22  ;;  %v7582_v62 = vor.u32 %v10240_v42, %v7579_v58  ;;  %v10168_v26 = vld [vmem:[#allocation3 + $0x25c] sm:$0xf]  ;;  %v3137_v22 = vpop.f32.mrf.mxu3  ;;  %v3119_v25 = vadd.f32 %v3118_v10, %v3100_v31  ;;  %3457 = vmatmul.bf16.gmra.mxu0 %v11181_v39 }
 0x20a   :  { %3580 = vmatpush.bf16.msra.mxu3 %v7646_v12  ;;  %v7291_v2 = vld [vmem:[#allocation3 + $0x278] sm:$0xf0]  ;;  %v11453_v12 = vld [vmem:[#allocation5] sm:$0xff]  ;;  %v3755_v37 = vsel %vm3691_vm15, %v3136_v0, %v3723_v36 }
 0x20b   :  { %v10104_v7 = vld [vmem:[#allocation3 + $0x5c] sm:$0xf]  ;;  %v7294_v5 = vor.u32 %v10168_v26, %v7291_v2  ;;  %v11456_v17 = vperm.slane %v11453_v12, 4  ;;  %v3138_v57 = vadd.f32 %v3137_v22, %v3119_v25  ;;  %v3851_v0 = vmul.f32 1.4285715, %v3755_v37  ;;  %3476 = vmatmul.bf16.gmra.mxu1 %v11183_v43 }
 0x20c   :  { %3543 = vmatpush.bf16.msra.mxu1 %v7102_v20  ;;  %v7035_v8 = vld [vmem:[#allocation3 + $0x78] sm:$0xf0]  ;;  %v3149_v29 = vpop.f32.mrf.mxu0 }
 0x20d   :  { %3563 = vmatpush.bf16.msra.mxu2 %v7326_v3  ;;  %v10232_v9 = vld [vmem:[#allocation3 + $0x45c] sm:$0xf]  ;;  %v7038_v59 = vor.u32 %v10104_v7, %v7035_v8  ;;  %v3150_v14 = vadd.f32 %v3149_v29, %v11456_v17  ;;  %vm3699_vm1 = vcmp.ge.f32.partialorder %v3138_v57, 0.0  ;;  %3514 = vmatmul.bf16.gmra.mxu3 %v11238_v54 }
 0x20e   :  { %3581 = vmatpush.bf16.msra.mxu3 %v7614_v32  ;;  %v7547_v4 = vld [vmem:[#allocation3 + $0x478] sm:$0xf0]  ;;  %v3168_v20 = vpop.f32.mrf.mxu1 }
 0x20f   :  { %v7550_v34 = vor.u32 %v10232_v9, %v7547_v4  ;;  %v10160_v18 = vld [vmem:[#allocation3 + $0x21c] sm:$0xf]  ;;  %v3169_v44 = vadd.f32 %v3168_v20, %v3150_v14  ;;  %v3187_v4 = vpop.f32.mrf.mxu2 }
 0x210   :  { %3544 = vmatpush.bf16.msra.mxu1 %v7070_v46  ;;  %v7259_v19 = vld [vmem:[#allocation3 + $0x238] sm:$0xf0]  ;;  %v3731_v46 = vmul.f32 0.2, %v3138_v57 }
 0x211   :  { %3564 = vmatpush.bf16.msra.mxu2 %v7294_v5  ;;  %v10096_v21 = vld [vmem:[#allocation3 + $0x1c] sm:$0xf]  ;;  %v7262_v45 = vor.u32 %v10160_v18, %v7259_v19  ;;  %v3206_v36 = vpop.f32.mrf.mxu3  ;;  %v3188_v19 = vadd.f32 %v3187_v4, %v3169_v44 }
 0x212   :  { %3582 = vmatpush.bf16.msra.mxu3 %v7582_v62  ;;  %v7003_v6 = vld [vmem:[#allocation3 + $0x38] sm:$0xf0]  ;;  %v3763_v2 = vsel %vm3699_vm1, %v3138_v57, %v3731_v46 }
 0x213   :  { %v10224_v27 = vld [vmem:[#allocation3 + $0x41c] sm:$0xf]  ;;  %v7006_v35 = vor.u32 %v10096_v21, %v7003_v6  ;;  %v3859_v9 = vmul.f32 1.4285715, %v3763_v2  ;;  %v11466_v29 = vadd.f32 %v3206_v36, %v3188_v19 }
 0x214   :  { %v7515_v32 = vld [vmem:[#allocation3 + $0x438] sm:$0xf0]  ;;  %3545 = vmatpush.bf16.msra.mxu1 %v7038_v59  ;;  %v3151_v21 = vpop.f32.mrf.mxu0 }
 0x215   :  { %v7518_v1 = vor.u32 %v10224_v27, %v7515_v32  ;;  %3565 = vmatpush.bf16.msra.mxu2 %v7262_v45  ;;  %v10472_v40 = vld [vmem:[#allocation3 + $0xbdc] sm:$0xf]  ;;  %v3152_v6 = vadd.f32 %v3151_v21, %v11456_v17  ;;  %v11464_v25 = vpack.c.bf16 %v3859_v9, %v3851_v0 }
 0x216   :  { %3583 = vmatpush.bf16.msra.mxu3 %v7550_v34  ;;  %v8507_v24 = vld [vmem:[#allocation3 + $0xbf8] sm:$0xf0]  ;;  %v3170_v10 = vpop.f32.mrf.mxu1 }
 0x217   :  { %v10344_v3 = vld [vmem:[#allocation3 + $0x7dc] sm:$0xf]  ;;  %v8510_v42 = vor.u32 %v10472_v40, %v8507_v24  ;;  %12602 = vst [vmem:[#allocation18_spill] sm:$0xff] %v11464_v25 }
 0x218   :  { %v7995_v15 = vld [vmem:[#allocation3 + $0x7f8] sm:$0xf0]  ;;  %3546 = vmatpush.bf16.msra.mxu1 %v7006_v35  ;;  %v3171_v35 = vadd.f32 %v3170_v10, %v3152_v6  ;;  %3566 = vmatmul.bf16.vlgmr.msra.gmra.mxu2 %v11143_v52  ;;  %v10543_v52 = vld [vmem:[#allocation7 + $0x1cc] sm:$0xf0] }
 0x219   :  { %v10408_v16 = vld [vmem:[#allocation3 + $0x9dc] sm:$0xf]  ;;  %v7998_v58 = vor.u32 %v10344_v3, %v7995_v15  ;;  %3634 = vmatpush.bf16.msrb.mxu2 %v8510_v42  ;;  %8555 = vmatmul.msk.bf16.vlgmr.msra.gmra.mxu0 %vm2601_vm0, %v11211_v55 }
 0x21a   :  { %v8251_v30 = vld [vmem:[#allocation3 + $0x9f8] sm:$0xf0]  ;;  %3584 = vmatpush.bf16.msra.mxu3 %v7518_v1 }
 0x21b   :  { %v8254_v41 = vor.u32 %v10408_v16, %v8251_v30  ;;  %v10480_v62 = vld [vmem:[#allocation3 + $0xc1c] sm:$0xf]  ;;  %3596 = vmatpush.bf16.msrb.mxu0 %v7998_v58  ;;  %v3189_v16 = vpop.f32.mrf.mxu2  ;;  %v3208_v30 = vpop.f32.mrf.mxu3  ;;  %3547 = vmatmul.bf16.vlgmr.msra.gmra.mxu1 %v11141_v48  ;;  %v8785_v48 = vld [vmem:[#allocation7 + $0x1c0] sm:$0xf] }
 0x21c   :  { %v8539_v26 = vld [vmem:[#allocation3 + $0xc38] sm:$0xf0]  ;;  %v3190_v0 = vadd.f32 %v3189_v16, %v3171_v35 }
 0x21d   :  { %v8542_v7 = vor.u32 %v10480_v62, %v8539_v26  ;;  %v10464_v31 = vld [vmem:[#allocation3 + $0xb9c] sm:$0xf]  ;;  %3615 = vmatpush.bf16.msrb.mxu1 %v8254_v41  ;;  %v3154_v26 = vpop.f32.mrf.mxu0  ;;  %3585 = vmatmul.bf16.vlgmr.msra.gmra.mxu3 %v11145_v53  ;;  %v10575_v53 = vld [vmem:[#allocation7 + $0x2cc] sm:$0xf0] }
 0x21e   :  { %v8475_v5 = vld [vmem:[#allocation3 + $0xbb8] sm:$0xf0]  ;;  %v3173_v2 = vpop.f32.mrf.mxu1 }
 0x21f   :  { %v10336_v8 = vld [vmem:[#allocation3 + $0x79c] sm:$0xf]  ;;  %v8478_v59 = vor.u32 %v10464_v31, %v8475_v5  ;;  %3660 = vmatpush.bf16.msrb.mxu3 %v8542_v7  ;;  %v3155_v31 = vadd.f32 %v3154_v26, %v11456_v17 }
 0x220   :  { %v7963_v34 = vld [vmem:[#allocation3 + $0x7b8] sm:$0xf0] }
 0x221   :  { %v10400_v18 = vld [vmem:[#allocation3 + $0x99c] sm:$0xf]  ;;  %v7966_v22 = vor.u32 %v10336_v8, %v7963_v34  ;;  %3635 = vmatpush.bf16.msrb.mxu2 %v8478_v59  ;;  %v11469_v8 = vadd.f32 %v3208_v30, %v3190_v0  ;;  %v3174_v59 = vadd.f32 %v3173_v2, %v3155_v31 }
 0x222   :  { %v8219_v45 = vld [vmem:[#allocation3 + $0x9b8] sm:$0xf0] }
 0x223   :  { %v8222_v27 = vor.u32 %v10400_v18, %v8219_v45  ;;  %3597 = vmatpush.bf16.msrb.mxu0 %v7966_v22  ;;  %v10456_v20 = vld [vmem:[#allocation3 + $0xb5c] sm:$0xf] }
 0x224   :  { %v8443_v32 = vld [vmem:[#allocation3 + $0xb78] sm:$0xf0] }
 0x225   :  { %v10328_v14 = vld [vmem:[#allocation3 + $0x75c] sm:$0xf]  ;;  %3616 = vmatpush.bf16.msrb.mxu1 %v8222_v27  ;;  %v8446_v1 = vor.u32 %v10456_v20, %v8443_v32  ;;  %v3192_v20 = vpop.f32.mrf.mxu2  ;;  %v3211_v32 = vpop.f32.mrf.mxu3 }
 0x226   :  { %v7931_v37 = vld [vmem:[#allocation3 + $0x778] sm:$0xf0] }
 0x227   :  { %v10392_v57 = vld [vmem:[#allocation3 + $0x95c] sm:$0xf]  ;;  %v7934_v24 = vor.u32 %v10328_v14, %v7931_v37  ;;  %3636 = vmatpush.bf16.msrb.mxu2 %v8446_v1 }
 0x228   :  { %v8187_v40 = vld [vmem:[#allocation3 + $0x978] sm:$0xf0]  ;;  %3571 = vmatmul.bf16.gmra.mxu2 %v11179_v38 }
 0x229   :  { %v8190_v3 = vor.u32 %v10392_v57, %v8187_v40  ;;  %3598 = vmatpush.bf16.msrb.mxu0 %v7934_v24  ;;  %v10448_v44 = vld [vmem:[#allocation3 + $0xb1c] sm:$0xf]  ;;  %v3193_v57 = vadd.f32 %v3192_v20, %v3174_v59  ;;  %v3156_v40 = vpop.f32.mrf.mxu0  ;;  %v3175_v24 = vpop.f32.mrf.mxu1  ;;  %v8673_v20 = vld [vmem:[#allocation7 + $0xe0] sm:$0xf] }
 0x22a   :  { %v8411_v42 = vld [vmem:[#allocation3 + $0xb38] sm:$0xf0]  ;;  %8556 = vmatmul.msk.bf16.gmra.mxu0 %vm2601_vm0, %v11240_v60 }
 0x22b   :  { %v10320_v15 = vld [vmem:[#allocation3 + $0x71c] sm:$0xf]  ;;  %3617 = vmatpush.bf16.msrb.mxu1 %v8190_v3  ;;  %v8414_v46 = vor.u32 %v10448_v44, %v8411_v42  ;;  %v3157_v44 = vadd.f32 %v3156_v40, %v11456_v17  ;;  %v10579_v40 = vld [vmem:[#allocation7 + $0x2ec] sm:$0xf0] }
 0x22c   :  { %v7899_v58 = vld [vmem:[#allocation3 + $0x738] sm:$0xf0]  ;;  %3552 = vmatmul.bf16.gmra.mxu1 %v11177_v33 }
 0x22d   :  { %v10384_v41 = vld [vmem:[#allocation3 + $0x91c] sm:$0xf]  ;;  %v7902_v7 = vor.u32 %v10320_v15, %v7899_v58  ;;  %3637 = vmatpush.bf16.msrb.mxu2 %v8414_v46  ;;  %v11476_v15 = vadd.f32 %v3211_v32, %v3193_v57  ;;  %v3176_v58 = vadd.f32 %v3175_v24, %v3157_v44  ;;  %v10515_v32 = vld [vmem:[#allocation7 + $0xec] sm:$0xf0]  ;;  %v8929_v57 = vld [vmem:[#allocation7 + $0x2e0] sm:$0xf]  ;;  %3590 = vmatmul.bf16.gmra.mxu3 %v11181_v39 }
 0x22e   :  { %v8155_v62 = vld [vmem:[#allocation3 + $0x938] sm:$0xf0]  ;;  %v8930_v24 = vor.u32 %v10579_v40, %v8929_v57  ;;  %v10611_v44 = vld [vmem:[#allocation7 + $0x3ec] sm:$0xf0] }
 0x22f   :  { %v8158_v5 = vor.u32 %v10384_v41, %v8155_v62  ;;  %3599 = vmatpush.bf16.msrb.mxu0 %v7902_v7  ;;  %v10440_v9 = vld [vmem:[#allocation3 + $0xadc] sm:$0xf] }
 0x230   :  { %v8379_v4 = vld [vmem:[#allocation3 + $0xaf8] sm:$0xf0] }
 0x231   :  { %v10312_v36 = vld [vmem:[#allocation3 + $0x6dc] sm:$0xf]  ;;  %v8382_v34 = vor.u32 %v10440_v9, %v8379_v4  ;;  %3618 = vmatpush.bf16.msrb.mxu1 %v8158_v5  ;;  %v3194_v9 = vpop.f32.mrf.mxu2  ;;  %v3213_v4 = vpop.f32.mrf.mxu3 }
 0x232   :  { %v7867_v18 = vld [vmem:[#allocation3 + $0x6f8] sm:$0xf0] }
 0x233   :  { %v10376_v19 = vld [vmem:[#allocation3 + $0x8dc] sm:$0xf]  ;;  %v7870_v10 = vor.u32 %v10312_v36, %v7867_v18  ;;  %3638 = vmatpush.bf16.msrb.mxu2 %v8382_v34 }
 0x234   :  { %v8123_v21 = vld [vmem:[#allocation3 + $0x8f8] sm:$0xf0] }
 0x235   :  { %v8126_v22 = vor.u32 %v10376_v19, %v8123_v21  ;;  %3600 = vmatpush.bf16.msrb.mxu0 %v7870_v10  ;;  %v10432_v45 = vld [vmem:[#allocation3 + $0xa9c] sm:$0xf]  ;;  %v3195_v19 = vadd.f32 %v3194_v9, %v3176_v58  ;;  %v3225_v21 = vpop.f32.mrf.mxu0  ;;  %v3244_v10 = vpop.f32.mrf.mxu1 }
 0x236   :  { %v8347_v6 = vld [vmem:[#allocation3 + $0xab8] sm:$0xf0] }
 0x237   :  { %v10304_v27 = vld [vmem:[#allocation3 + $0x69c] sm:$0xf]  ;;  %v8350_v14 = vor.u32 %v10432_v45, %v8347_v6  ;;  %3619 = vmatpush.bf16.msrb.mxu1 %v8126_v22  ;;  %v3226_v45 = vadd.f32 %v3225_v21, %v11466_v29 }
 0x238   :  { %v7835_v35 = vld [vmem:[#allocation3 + $0x6b8] sm:$0xf0] }
 0x239   :  { %v10368_v1 = vld [vmem:[#allocation3 + $0x89c] sm:$0xf]  ;;  %v7838_v3 = vor.u32 %v10304_v27, %v7835_v35  ;;  %3639 = vmatpush.bf16.msrb.mxu2 %v8350_v14  ;;  %v11479_v27 = vadd.f32 %v3213_v4, %v3195_v19  ;;  %v8801_v14 = vld [vmem:[#allocation7 + $0x1e0] sm:$0xf]  ;;  %v3245_v35 = vadd.f32 %v3244_v10, %v3226_v45  ;;  %v11486_v58 = vpop.f32.mrf.mxu3  ;;  %v10539_v19 = vld [vmem:[#allocation7 + $0x1ac] sm:$0xf0] }
 0x23a   :  { %v8091_v37 = vld [vmem:[#allocation3 + $0x8b8] sm:$0xf0]  ;;  %v10571_v45 = vld [vmem:[#allocation7 + $0x2ac] sm:$0xf0] }
 0x23b   :  { %v8094_v42 = vor.u32 %v10368_v1, %v8091_v37  ;;  %3601 = vmatpush.bf16.msrb.mxu0 %v7838_v3  ;;  %v10424_v16 = vld [vmem:[#allocation3 + $0xa5c] sm:$0xf]  ;;  %v8674_v1 = vor.u32 %v10515_v32, %v8673_v20  ;;  %v10547_v37 = vld [vmem:[#allocation7 + $0x1ec] sm:$0xf0]  ;;  %v9057_v3 = vld [vmem:[#allocation7 + $0x3e0] sm:$0xf] }
 0x23c   :  { %v8315_v30 = vld [vmem:[#allocation3 + $0xa78] sm:$0xf0]  ;;  %v8802_v29 = vor.u32 %v10547_v37, %v8801_v14  ;;  %v10603_v14 = vld [vmem:[#allocation7 + $0x3ac] sm:$0xf0]  ;;  %v8753_v37 = vld [vmem:[#allocation7 + $0x180] sm:$0xf] }
 0x23d   :  { %v10296_v46 = vld [vmem:[#allocation3 + $0x65c] sm:$0xf]  ;;  %v8318_v41 = vor.u32 %v10424_v16, %v8315_v30  ;;  %3620 = vmatpush.bf16.msrb.mxu1 %v8094_v42  ;;  %v9058_v42 = vor.u32 %v10611_v44, %v9057_v3  ;;  %v8657_v16 = vld [vmem:[#allocation7 + $0xc0] sm:$0xf]  ;;  %v10511_v30 = vld [vmem:[#allocation7 + $0xcc] sm:$0xf0]  ;;  %8557 = vmatmul.msk.bf16.vlgmr.msrb.gmra.mxu3 %vm2601_vm0, %v11211_v55 }
 0x23e   :  { %v7803_v62 = vld [vmem:[#allocation3 + $0x678] sm:$0xf0]  ;;  %v8881_v3 = vld [vmem:[#allocation7 + $0x280] sm:$0xf]  ;;  %v10567_v44 = vld [vmem:[#allocation7 + $0x28c] sm:$0xf0] }
 0x23f   :  { %v10360_v0 = vld [vmem:[#allocation3 + $0x85c] sm:$0xf]  ;;  %v7806_v2 = vor.u32 %v10296_v46, %v7803_v62  ;;  %3640 = vmatpush.bf16.msrb.mxu2 %v8318_v41  ;;  %v3263_v46 = vpop.f32.mrf.mxu2  ;;  %5515 = vmatpush.bf16.msra.mxu3 %v9058_v42  ;;  %v8658_v41 = vor.u32 %v10511_v30, %v8657_v16  ;;  %v8913_v62 = vld [vmem:[#allocation7 + $0x2c0] sm:$0xf] }
 0x240   :  { %v8059_v26 = vld [vmem:[#allocation3 + $0x878] sm:$0xf0]  ;;  %v9169_v55 = vld [vmem:[#allocation7 + $0x4c0] sm:$0xf] }
 0x241   :  { %v8062_v7 = vor.u32 %v10360_v0, %v8059_v26  ;;  %3602 = vmatpush.bf16.msrb.mxu0 %v7806_v2  ;;  %v10416_v17 = vld [vmem:[#allocation3 + $0xa1c] sm:$0xf]  ;;  %v3264_v0 = vadd.f32 %v3263_v46, %v3245_v35  ;;  %v3227_v26 = vpop.f32.mrf.mxu0  ;;  %v3246_v2 = vpop.f32.mrf.mxu1  ;;  %v8625_v35 = vld [vmem:[#allocation7 + $0x80] sm:$0xf] }
 0x242   :  { %v8283_v31 = vld [vmem:[#allocation3 + $0xa38] sm:$0xf0]  ;;  %v3228_v9 = vadd.f32 %v3227_v26, %v11469_v8  ;;  %v11489_v40 = vpop.f32.mrf.mxu3  ;;  %v9009_v46 = vld [vmem:[#allocation7 + $0x380] sm:$0xf] }
 0x243   :  { %v10288_v5 = vld [vmem:[#allocation3 + $0x61c] sm:$0xf]  ;;  %v8286_v36 = vor.u32 %v10416_v17, %v8283_v31  ;;  %3621 = vmatpush.bf16.msrb.mxu1 %v8062_v7  ;;  %v8786_v7 = vor.u32 %v10543_v52, %v8785_v48  ;;  %v8914_v17 = vor.u32 %v10575_v53, %v8913_v62  ;;  %v9041_v31 = vld [vmem:[#allocation7 + $0x3c0] sm:$0xf]  ;;  %vm3676_vm2 = vcmp.ge.f32.partialorder %v3264_v0, 0.0 }
 0x244   :  { %v7771_v59 = vld [vmem:[#allocation3 + $0x638] sm:$0xf0]  ;;  %v3708_v20 = vmul.f32 0.2, %v3264_v0  ;;  %v8882_v62 = vor.u32 %v10567_v44, %v8881_v3  ;;  %v10591_v3 = vld [vmem:[#allocation7 + $0x34c] sm:$0xf0] }
 0x245   :  { %v10352_v34 = vld [vmem:[#allocation3 + $0x81c] sm:$0xf]  ;;  %v7774_v22 = vor.u32 %v10288_v5, %v7771_v59  ;;  %3641 = vmatpush.bf16.msrb.mxu2 %v8286_v36  ;;  %v10607_v5 = vld [vmem:[#allocation7 + $0x3cc] sm:$0xf0]  ;;  %v8641_v36 = vld [vmem:[#allocation7 + $0xa0] sm:$0xf]  ;;  %v3247_v59 = vadd.f32 %v3246_v2, %v3228_v9 }
 0x246   :  { %v8027_v18 = vld [vmem:[#allocation3 + $0x838] sm:$0xf0]  ;;  %v9042_v4 = vor.u32 %v10607_v5, %v9041_v31  ;;  %v3740_v26 = vsel %vm3676_vm2, %v3264_v0, %v3708_v20  ;;  %v10499_v31 = vld [vmem:[#allocation7 + $0x6c] sm:$0xf0]  ;;  %v8737_v5 = vld [vmem:[#allocation7 + $0x160] sm:$0xf] }
 0x247   :  { %v8030_v6 = vor.u32 %v10352_v34, %v8027_v18  ;;  %3603 = vmatpush.bf16.msrb.mxu0 %v7774_v22  ;;  %v10507_v34 = vld [vmem:[#allocation7 + $0xac] sm:$0xf0]  ;;  %v8769_v18 = vld [vmem:[#allocation7 + $0x1a0] sm:$0xf]  ;;  %v3265_v57 = vpop.f32.mrf.mxu2 }
 0x248   :  { %5516 = vmatpush.bf16.msra.mxu3 %v9042_v4  ;;  %v8642_v21 = vor.u32 %v10507_v34, %v8641_v36  ;;  %v8770_v10 = vor.u32 %v10539_v19, %v8769_v18  ;;  %v8897_v22 = vld [vmem:[#allocation7 + $0x2a0] sm:$0xf]  ;;  %v3266_v42 = vadd.f32 %v3265_v57, %v3247_v59  ;;  %v10531_v9 = vld [vmem:[#allocation7 + $0x16c] sm:$0xf0]  ;;  %v3836_v18 = vmul.f32 1.4285715, %v3740_v26  ;;  %3642 = vmatmul.bf16.vlgmr.msrb.gmra.mxu2 %v11209_v49 }
 0x249   :  { %3622 = vmatpush.bf16.msrb.mxu1 %v8030_v6  ;;  %5496 = vmatpush.bf16.msra.mxu2 %v8930_v24  ;;  %v9025_v6 = vld [vmem:[#allocation7 + $0x3a0] sm:$0xf]  ;;  %v8898_v32 = vor.u32 %v10571_v45, %v8897_v22  ;;  %v10535_v24 = vld [vmem:[#allocation7 + $0x18c] sm:$0xf0]  ;;  %v3230_v16 = vpop.f32.mrf.mxu0  ;;  %v3249_v30 = vpop.f32.mrf.mxu1  ;;  %v8738_v0 = vor.u32 %v10531_v9, %v8737_v5 }
 0x24a   :  { %v9026_v8 = vor.u32 %v10603_v14, %v9025_v6  ;;  %v8754_v48 = vor.u32 %v10535_v24, %v8753_v37  ;;  %v3231_v52 = vadd.f32 %v3230_v16, %v11476_v15  ;;  %vm3684_vm3 = vcmp.ge.f32.partialorder %v3266_v42, 0.0  ;;  %v8865_v36 = vld [vmem:[#allocation7 + $0x260] sm:$0xf]  ;;  %v10563_v59 = vld [vmem:[#allocation7 + $0x26c] sm:$0xf0]  ;;  %v11500_v20 = vpop.f32.mrf.mxu3  ;;  %3604 = vmatmul.bf16.vlgmr.msrb.gmra.mxu0 %v11147_v56 }
 0x24b   :  { %5458 = vmatpush.bf16.msra.mxu0 %v8674_v1  ;;  %v10503_v1 = vld [vmem:[#allocation7 + $0x8c] sm:$0xf0]  ;;  %v3716_v2 = vmul.f32 0.2, %v3266_v42  ;;  %v8993_v34 = vld [vmem:[#allocation7 + $0x360] sm:$0xf] }
 0x24c   :  { %5517 = vmatpush.bf16.msra.mxu3 %v9026_v8  ;;  %v8593_v22 = vld [vmem:[#allocation7 + $0x40] sm:$0xf]  ;;  %v10495_v45 = vld [vmem:[#allocation7 + $0x4c] sm:$0xf0]  ;;  %3623 = vmatmul.bf16.vlgmr.msrb.gmra.mxu1 %v11207_v47 }
 0x24d   :  { %5477 = vmatpush.bf16.msra.mxu1 %v8802_v29  ;;  %5497 = vmatpush.bf16.msra.mxu2 %v8914_v17  ;;  %v8626_v29 = vor.u32 %v10503_v1, %v8625_v35  ;;  %v3250_v17 = vadd.f32 %v3249_v30, %v3231_v52  ;;  %v3748_v4 = vsel %vm3684_vm3, %v3266_v42, %v3716_v2  ;;  %v8721_v6 = vld [vmem:[#allocation7 + $0x140] sm:$0xf]  ;;  %v10527_v14 = vld [vmem:[#allocation7 + $0x14c] sm:$0xf0] }
 0x24e   :  { %v3844_v19 = vmul.f32 1.4285715, %v3748_v4  ;;  %v8849_v8 = vld [vmem:[#allocation7 + $0x240] sm:$0xf]  ;;  %v10559_v35 = vld [vmem:[#allocation7 + $0x24c] sm:$0xf0]  ;;  %8558 = vmatmul.msk.bf16.gmra.mxu3 %vm2601_vm0, %v11240_v60 }
 0x24f   :  { %5459 = vmatpush.bf16.msra.mxu0 %v8658_v41  ;;  %v10599_v41 = vld [vmem:[#allocation7 + $0x38c] sm:$0xf0]  ;;  %v3268_v39 = vpop.f32.mrf.mxu2  ;;  %v8977_v24 = vld [vmem:[#allocation7 + $0x340] sm:$0xf]  ;;  %v8850_v42 = vor.u32 %v10559_v35, %v8849_v8 }
 0x250   :  { %v9010_v53 = vor.u32 %v10599_v41, %v9009_v46  ;;  %v11498_v38 = vpack.c.bf16 %v3844_v19, %v3836_v18  ;;  %v3269_v1 = vadd.f32 %v3268_v39, %v3250_v17  ;;  %v8978_v16 = vor.u32 %v10591_v3, %v8977_v24  ;;  %v8577_v30 = vld [vmem:[#allocation7 + $0x20] sm:$0xf]  ;;  %v10491_v46 = vld [vmem:[#allocation7 + $0x2c] sm:$0xf0] }
 0x251   :  { %5478 = vmatpush.bf16.msra.mxu1 %v8786_v7  ;;  %5498 = vmatpush.bf16.msra.mxu2 %v8898_v32  ;;  %v8609_v7 = vld [vmem:[#allocation7 + $0x60] sm:$0xf]  ;;  %v8594_v32 = vor.u32 %v10495_v45, %v8593_v22  ;;  %v3232_v37 = vpop.f32.mrf.mxu0  ;;  %v3251_v57 = vpop.f32.mrf.mxu1  ;;  %v10523_v52 = vld [vmem:[#allocation7 + $0x12c] sm:$0xf0] }
 0x252   :  { %v8610_v15 = vor.u32 %v10499_v31, %v8609_v7  ;;  %5518 = vmatpush.bf16.msra.mxu3 %v9010_v53  ;;  %v3233_v44 = vadd.f32 %v3232_v37, %v11479_v27  ;;  %v8705_v41 = vld [vmem:[#allocation7 + $0x120] sm:$0xf]  ;;  %v10555_v2 = vld [vmem:[#allocation7 + $0x22c] sm:$0xf0]  ;;  %vm3692_vm4 = vcmp.ge.f32.partialorder %v3269_v1, 0.0 }
 0x253   :  { %5460 = vmatpush.bf16.msra.mxu0 %v8642_v21  ;;  %v8866_v21 = vor.u32 %v10563_v59, %v8865_v36  ;;  %v8706_v53 = vor.u32 %v10523_v52, %v8705_v41  ;;  %v8833_v26 = vld [vmem:[#allocation7 + $0x220] sm:$0xf]  ;;  %v3724_v17 = vmul.f32 0.2, %v3269_v1  ;;  %v10587_v31 = vld [vmem:[#allocation7 + $0x32c] sm:$0xf0]  ;;  %v11503_v36 = vpop.f32.mrf.mxu3 }
 0x254   :  { %v8961_v7 = vld [vmem:[#allocation7 + $0x320] sm:$0xf]  ;;  %v8834_v27 = vor.u32 %v10555_v2, %v8833_v26  ;;  %v10487_v4 = vld [vmem:[#allocation7 + $0xc] sm:$0xf0] }
 0x255   :  { %5479 = vmatpush.bf16.msra.mxu1 %v8770_v10  ;;  %5499 = vmatpush.bf16.msra.mxu2 %v8882_v62  ;;  %v10595_v10 = vld [vmem:[#allocation7 + $0x36c] sm:$0xf0]  ;;  %v8578_v62 = vor.u32 %v10491_v46, %v8577_v30  ;;  %v8962_v5 = vor.u32 %v10587_v31, %v8961_v7  ;;  %v8561_v9 = vld [vmem:[#allocation7] sm:$0xf] }
 0x256   :  { %v8994_v33 = vor.u32 %v10595_v10, %v8993_v34  ;;  %v8562_v59 = vor.u32 %v10487_v4, %v8561_v9  ;;  %v10519_v34 = vld [vmem:[#allocation7 + $0x10c] sm:$0xf0]  ;;  %v8817_v18 = vld [vmem:[#allocation7 + $0x200] sm:$0xf] }
 0x257   :  { %5461 = vmatpush.bf16.msra.mxu0 %v8626_v29  ;;  %v8722_v29 = vor.u32 %v10527_v14, %v8721_v6  ;;  %v10551_v19 = vld [vmem:[#allocation7 + $0x20c] sm:$0xf0]  ;;  %v8945_v45 = vld [vmem:[#allocation7 + $0x300] sm:$0xf]  ;;  %v3756_v14 = vsel %vm3692_vm4, %v3269_v1, %v3724_v17 }
 0x258   :  { %5519 = vmatpush.bf16.msra.mxu3 %v8994_v33  ;;  %v10583_v6 = vld [vmem:[#allocation7 + $0x30c] sm:$0xf0]  ;;  %v8818_v39 = vor.u32 %v10551_v19, %v8817_v18  ;;  %v3852_v37 = vmul.f32 1.4285715, %v3756_v14  ;;  %v9185_v24 = vld [vmem:[#allocation7 + $0x4e0] sm:$0xf]  ;;  %3647 = vmatmul.bf16.gmra.mxu2 %v11238_v54 }
 0x259   :  { %5480 = vmatpush.bf16.msra.mxu1 %v8754_v48  ;;  %5500 = vmatpush.bf16.msra.mxu2 %v8866_v21  ;;  %v3252_v48 = vadd.f32 %v3251_v57, %v3233_v44  ;;  %v11505_v10 = vpop.f32.mrf.mxu0  ;;  %v11507_v33 = vpop.f32.mrf.mxu1  ;;  %v10643_v44 = vld [vmem:[#allocation7 + $0x4ec] sm:$0xf0]  ;;  %v9313_v49 = vld [vmem:[#allocation7 + $0x5e0] sm:$0xf]  ;;  %v3768_v18 = vld [vmem:[%s12579_s3] sm:$0xff] }
 0x25a   :  { %v10639_v30 = vld [vmem:[#allocation7 + $0x4cc] sm:$0xf0]  ;;  %v9297_v46 = vld [vmem:[#allocation7 + $0x5c0] sm:$0xf]  ;;  %3609 = vmatmul.bf16.gmra.mxu0 %v11183_v43  ;;  %v3776_v19 = vld [vmem:[%s12579_s3 + $0x40] sm:$0xff] }
 0x25b   :  { %5462 = vmatpush.bf16.msra.mxu0 %v8610_v15  ;;  %v8689_v15 = vld [vmem:[#allocation7 + $0x100] sm:$0xf]  ;;  %v11517_v1 = vpop.f32.mrf.mxu3  ;;  %v10671_v41 = vld [vmem:[#allocation7 + $0x5cc] sm:$0xf0]  ;;  %v9170_v52 = vor.u32 %v10639_v30, %v9169_v55  ;;  %vm3800_vm0 = vcmp.ge.f32.partialorder %v3768_v18, 0.3 }
 0x25c   :  { %5520 = vmatpush.bf16.msra.mxu3 %v8978_v16  ;;  %v8690_v22 = vor.u32 %v10519_v34, %v8689_v15  ;;  %v10675_v16 = vld [vmem:[#allocation7 + $0x5ec] sm:$0xf0]  ;;  %v9281_v2 = vld [vmem:[#allocation7 + $0x5a0] sm:$0xf]  ;;  %3628 = vmatmul.bf16.gmra.mxu1 %v11236_v51  ;;  %vm3808_vm6 = vcmp.ge.f32.partialorder %v3776_v19, 0.3 }
 0x25d   :  { %5481 = vmatpush.bf16.msra.mxu1 %v8738_v0  ;;  %5501 = vmatpush.bf16.msra.mxu2 %v8850_v42  ;;  %v3270_v0 = vpop.f32.mrf.mxu2  ;;  %v9186_v42 = vor.u32 %v10643_v44, %v9185_v24  ;;  %v10635_v26 = vld [vmem:[#allocation7 + $0x4ac] sm:$0xf0]  ;;  %v9137_v15 = vld [vmem:[#allocation7 + $0x480] sm:$0xf]  ;;  %vm11575_vm11 = vmpackc.low %vm3808_vm6, %vm3800_vm0  ;;  %v12609_v18 = vmov 0 }
 0x25e   :  { %v3271_v21 = vadd.f32 %v3270_v0, %v3252_v48  ;;  %v9314_v48 = vor.u32 %v10675_v16, %v9313_v49  ;;  %v10667_v7 = vld [vmem:[#allocation7 + $0x5ac] sm:$0xf0]  ;;  %v9121_v43 = vld [vmem:[#allocation7 + $0x460] sm:$0xf] }
 0x25f   :  { %5463 = vmatpush.bf16.msra.mxu0 %v8594_v32  ;;  %v8946_v32 = vor.u32 %v10583_v6, %v8945_v45  ;;  %v9282_v4 = vor.u32 %v10667_v7, %v9281_v2  ;;  %v10631_v0 = vld [vmem:[#allocation7 + $0x48c] sm:$0xf0]  ;;  %v9249_v51 = vld [vmem:[#allocation7 + $0x560] sm:$0xf] }
 0x260   :  { %5521 = vmatpush.bf16.msra.mxu3 %v8962_v5  ;;  %vm3700_vm5 = vcmp.ge.f32.partialorder %v3271_v21, 0.0  ;;  %v3732_v8 = vmul.f32 0.2, %v3271_v21  ;;  %v10663_v34 = vld [vmem:[#allocation7 + $0x58c] sm:$0xf0]  ;;  %v3769_v60 = vld [vmem:[%s12579_s3 + $0x8] sm:$0xff] }
 0x261   :  { %5482 = vmatpush.bf16.msra.mxu1 %v8722_v29  ;;  %5502 = vmatpush.bf16.msra.mxu2 %v8834_v27  ;;  %v11521_v56 = vpop.f32.mrf.mxu0  ;;  %v11523_v47 = vpop.f32.mrf.mxu1  ;;  %v10627_v45 = vld [vmem:[#allocation7 + $0x46c] sm:$0xf0]  ;;  %v9233_v55 = vld [vmem:[#allocation7 + $0x540] sm:$0xf]  ;;  %vm3801_vm7 = vcmp.ge.f32.partialorder %v3769_v60, 0.3 }
 0x262   :  { %v3764_v35 = vsel %vm3700_vm5, %v3271_v21, %v3732_v8  ;;  %v9138_v21 = vor.u32 %v10631_v0, %v9137_v15  ;;  %v3779_v24 = vld [vmem:[%s12579_s3 + $0x58] sm:$0xff]  ;;  %v9122_v44 = vor.u32 %v10627_v45, %v9121_v43  ;;  %v12605_v15 = vmov 0  ;;  %v9201_v43 = vld [vmem:[#allocation7 + $0x500] sm:$0xf] }
 0x263   :  { %5464 = vmatpush.bf16.msra.mxu0 %v8578_v62  ;;  %v3860_v57 = vmul.f32 1.4285715, %v3764_v35  ;;  %v9298_v62 = vor.u32 %v10671_v41, %v9297_v46  ;;  %v11527_v27 = vpop.f32.mrf.mxu3  ;;  %v3777_v35 = vld [vmem:[%s12579_s3 + $0x48] sm:$0xff]  ;;  %v10623_v16 = vld [vmem:[#allocation7 + $0x44c] sm:$0xf0] }
 0x264   :  { %5522 = vmatpush.bf16.msra.mxu3 %v8946_v32  ;;  %v11552_v32 = vperm.slane %v11453_v12, 5  ;;  %v3771_v12 = vld [vmem:[%s12579_s3 + $0x18] sm:$0xff]  ;;  %vm3809_vm8 = vcmp.ge.f32.partialorder %v3777_v35, 0.3  ;;  %vm3811_vm13 = vcmp.ge.f32.partialorder %v3779_v24, 0.3 }
 0x265   :  { %5483 = vmatpush.bf16.msra.mxu1 %v8706_v53  ;;  %5503 = vmatpush.bf16.msra.mxu2 %v8818_v39  ;;  %v11515_v29 = vpop.f32.mrf.mxu2  ;;  %v11519_v3 = vpack.c.bf16 %v3860_v57, %v3852_v37  ;;  %v9153_v53 = vld [vmem:[#allocation7 + $0x4a0] sm:$0xf]  ;;  %v10659_v39 = vld [vmem:[#allocation7 + $0x56c] sm:$0xf0]  ;;  %v3770_v37 = vld [vmem:[%s12579_s3 + $0x10] sm:$0xff] }
 0x266   :  { %v9154_v9 = vor.u32 %v10635_v26, %v9153_v53  ;;  %v3778_v57 = vld [vmem:[%s12579_s3 + $0x50] sm:$0xff]  ;;  %v9250_v49 = vor.u32 %v10659_v39, %v9249_v51  ;;  %v10655_v30 = vld [vmem:[#allocation7 + $0x54c] sm:$0xf0]  ;;  %vm3802_vm9 = vcmp.ge.f32.partialorder %v3770_v37, 0.3  ;;  %v3285_v7 = vadd.f32 %v11489_v40, %v11552_v32  ;;  %vm11589_vm14 = vmpackc.low %vm3809_vm8, %vm3801_vm7 }
 0x267   :  { %5465 = vmatpush.bf16.msra.mxu0 %v8562_v59  ;;  %v9265_v59 = vld [vmem:[#allocation7 + $0x580] sm:$0xf]  ;;  %vm3810_vm10 = vcmp.ge.f32.partialorder %v3778_v57, 0.3  ;;  %vm3803_vm12 = vcmp.ge.f32.partialorder %v3771_v12, 0.3  ;;  %v9234_v41 = vor.u32 %v10655_v30, %v9233_v55 }
 0x268   :  { %v10619_v53 = vld [vmem:[#allocation7 + $0x42c] sm:$0xf0]  ;;  %v9217_v26 = vld [vmem:[#allocation7 + $0x520] sm:$0xf]  ;;  %v12606_v15 = vsel %vm11589_vm14, 4294967295, %v12605_v15  ;;  %vm11600_vm15 = vmpackc.low %vm3810_vm10, %vm3802_vm9 }
 0x269   :  { %5484 = vmatpush.bf16.msra.mxu1 %v8690_v22  ;;  %v11529_v31 = vpop.f32.mrf.mxu0  ;;  %v11531_v5 = vpop.f32.mrf.mxu1  ;;  %v9266_v22 = vor.u32 %v10663_v34, %v9265_v59  ;;  %v10651_v2 = vld [vmem:[#allocation7 + $0x52c] sm:$0xf0]  ;;  %v3304_v34 = vadd.f32 %v11521_v56, %v3285_v7  ;;  %vm11607_vm1 = vmpackc.low %vm3811_vm13, %vm3803_vm12  ;;  %v10513_v56 = vld [vmem:[#allocation7 + $0xe4] sm:$0xf]  ;;  %9597 = vmatmul.msk.bf16.vlgmr.msra.gmra.mxu2 %vm11600_vm15, %v11418_v63 }
 0x26a   :  { %v12610_v18 = vsel %vm11607_vm1, 4294967295, %v12609_v18  ;;  %v9218_v19 = vor.u32 %v10651_v2, %v9217_v26  ;;  %v10647_v45 = vld [vmem:[#allocation7 + $0x50c] sm:$0xf0]  ;;  %9585 = vmatmul.msk.bf16.vlgmr.msra.gmra.mxu0 %vm11575_vm11, %v11308_v13  ;;  %9603 = vmatmul.msk.bf16.vlgmr.msra.gmra.mxu3 %vm11607_vm1, %v11450_v28  ;;  %v8675_v60 = vld [vmem:[#allocation7 + $0xf0] sm:$0xf0]  ;;  %v3786_v2 = vld [vmem:[%s12579_s3 + $0x90] sm:$0xff] }
 0x26b   :  { %5534 = vmatpush.bf16.msrb.mxu0 %v9186_v42  ;;  %v11546_v54 = vpop.f32.mrf.mxu3  ;;  %v9105_v42 = vld [vmem:[#allocation7 + $0x440] sm:$0xf]  ;;  %12611 = vst [vmem:[#allocation19_spill] sm:$0xff] %v12610_v18  ;;  %v10545_v39 = vld [vmem:[#allocation7 + $0x1e4] sm:$0xf]  ;;  %v3323_v35 = vadd.f32 %v11523_v47, %v3304_v34  ;;  %v3784_v37 = vld [vmem:[%s12579_s3 + $0x80] sm:$0xff]  ;;  %v9202_v12 = vor.u32 %v10647_v45, %v9201_v43 }
 0x26c   :  { %v9106_v46 = vor.u32 %v10623_v16, %v9105_v42  ;;  %9591 = vmatmul.msk.bf16.vlgmr.msra.gmra.mxu1 %vm11589_vm14, %v11364_v23  ;;  %v8803_v24 = vld [vmem:[#allocation7 + $0x1f0] sm:$0xf0]  ;;  %v3793_v47 = vld [vmem:[%s12579_s3 + $0xc8] sm:$0xff]  ;;  %v8678_v42 = vor.u32 %v10513_v56, %v8675_v60  ;;  %vm3816_vm2 = vcmp.ge.f32.partialorder %v3784_v37, 0.3  ;;  %v3290_v37 = vadd.f32 %v11503_v36, %v11552_v32 }
 0x26d   :  { %5553 = vmatpush.bf16.msrb.mxu1 %v9314_v48  ;;  %v11525_v17 = vpop.f32.mrf.mxu2  ;;  %v8806_v16 = vor.u32 %v10545_v39, %v8803_v24  ;;  %v10509_v55 = vld [vmem:[#allocation7 + $0xc4] sm:$0xf]  ;;  %vm3825_vm5 = vcmp.ge.f32.partialorder %v3793_v47, 0.3  ;;  %v3795_v34 = vld [vmem:[%s12579_s3 + $0xd8] sm:$0xff]  ;;  %v3288_v36 = vadd.f32 %v11500_v20, %v11552_v32 }
 0x26e   :  { %v3342_v30 = vadd.f32 %v11525_v17, %v3323_v35  ;;  %v3794_v17 = vld [vmem:[%s12579_s3 + $0xd0] sm:$0xff]  ;;  %v8643_v43 = vld [vmem:[#allocation7 + $0xb0] sm:$0xf0]  ;;  %vm3818_vm6 = vcmp.ge.f32.partialorder %v3786_v2, 0.3 }
 0x26f   :  { %5535 = vmatpush.bf16.msrb.mxu0 %v9170_v52  ;;  %v9089_v52 = vld [vmem:[#allocation7 + $0x420] sm:$0xf]  ;;  %v10537_v45 = vld [vmem:[#allocation7 + $0x1a4] sm:$0xf]  ;;  %v8771_v56 = vld [vmem:[#allocation7 + $0x1b0] sm:$0xf0] }
 0x270   :  { %vm3826_vm7 = vcmp.ge.f32.partialorder %v3794_v17, 0.3  ;;  %vm3827_vm10 = vcmp.ge.f32.partialorder %v3795_v34, 0.3  ;;  %v10501_v35 = vld [vmem:[#allocation7 + $0x84] sm:$0xf] }
 0x271   :  { %5554 = vmatpush.bf16.msrb.mxu1 %v9298_v62  ;;  %v11554_v14 = vpop.f32.mrf.mxu0  ;;  %v11556_v8 = vpop.f32.mrf.mxu1  ;;  %v3283_v62 = vadd.f32 %v11486_v58, %v11552_v32  ;;  %v10533_v24 = vld [vmem:[#allocation7 + $0x184] sm:$0xf]  ;;  %vm11685_vm12 = vmpackc.low %vm3826_vm7, %vm3818_vm6  ;;  %v9441_v20 = vld [vmem:[#allocation7 + $0x6e0] sm:$0xf] }
 0x272   :  { %v3780_v17 = vld [vmem:[%s12579_s3 + $0x60] sm:$0xff]  ;;  %v10649_v18 = vld [vmem:[#allocation7 + $0x524] sm:$0xf] }
 0x273   :  { %5536 = vmatpush.bf16.msrb.mxu0 %v9154_v9  ;;  %v3302_v0 = vadd.f32 %v11505_v10, %v3283_v62  ;;  %v9090_v10 = vor.u32 %v10619_v53, %v9089_v52  ;;  %v8659_v52 = vld [vmem:[#allocation7 + $0xd0] sm:$0xf0]  ;;  %v10541_v62 = vld [vmem:[#allocation7 + $0x1c4] sm:$0xf]  ;;  %v10724_v48 = vld [vmem:[#allocation7 + $0x774] sm:$0xf0] }
 0x274   :  { %v10752_v60 = vld [vmem:[#allocation10 + $0x54] sm:$0xf0] }
 0x275   :  { %5555 = vmatpush.bf16.msrb.mxu1 %v9282_v4  ;;  %v11544_v6 = vpop.f32.mrf.mxu2  ;;  %v11585_v4 = vpop.f32.mrf.mxu3  ;;  %v3321_v51 = vadd.f32 %v11507_v33, %v3302_v0  ;;  %v3792_v33 = vld [vmem:[%s12579_s3 + $0xc0] sm:$0xff]  ;;  %v3787_v0 = vld [vmem:[%s12579_s3 + $0x98] sm:$0xff] }
 0x276   :  { %vm3824_vm3 = vcmp.ge.f32.partialorder %v3792_v33, 0.3  ;;  %vm3819_vm9 = vcmp.ge.f32.partialorder %v3787_v0, 0.3  ;;  %v8611_v0 = vld [vmem:[#allocation7 + $0x70] sm:$0xf0] }
 0x277   :  { %5537 = vmatpush.bf16.msrb.mxu0 %v9138_v21  ;;  %v9073_v21 = vld [vmem:[#allocation7 + $0x400] sm:$0xf]  ;;  %vm11660_vm0 = vmpackc.low %vm3824_vm3, %vm3816_vm2  ;;  %v9067_v39 = vld [vmem:[#allocation7 + $0x3f8] sm:$0xf0] }
 0x278   :  { %vm11694_vm13 = vmpackc.low %vm3827_vm10, %vm3819_vm9 }
 0x279   :  { %5556 = vmatpush.bf16.msrb.mxu1 %v9266_v22  ;;  %v11594_v59 = vpop.f32.mrf.mxu0  ;;  %v11596_v58 = vpop.f32.mrf.mxu1  ;;  %v10615_v22 = vld [vmem:[#allocation7 + $0x40c] sm:$0xf0]  ;;  %9600 = vmatmul.msk.bf16.gmra.mxu2 %vm11685_vm12, %v11433_v50 }
 0x27a   :  { %v9074_v57 = vor.u32 %v10615_v22, %v9073_v21  ;;  %v10505_v21 = vld [vmem:[#allocation7 + $0xa4] sm:$0xf]  ;;  %v3361_v22 = vadd.f32 %v11527_v27, %v3342_v30  ;;  %9588 = vmatmul.msk.bf16.gmra.mxu0 %vm11660_vm0, %v11328_v61  ;;  %9606 = vmatmul.msk.bf16.gmra.mxu3 %vm11694_vm13, %v11464_v25 }
 0x27b   :  { %5538 = vmatpush.bf16.msrb.mxu0 %v9122_v44  ;;  %v3340_v44 = vadd.f32 %v11515_v29, %v3321_v51  ;;  %v8787_v29 = vld [vmem:[#allocation7 + $0x1d0] sm:$0xf0]  ;;  %v8646_v27 = vor.u32 %v10505_v21, %v8643_v43  ;;  %v9425_v21 = vld [vmem:[#allocation7 + $0x6c0] sm:$0xf] }
 0x27d   :  { %5557 = vmatpush.bf16.msrb.mxu1 %v9250_v49  ;;  %v11583_v9 = vpop.f32.mrf.mxu2  ;;  %v3785_v49 = vld [vmem:[%s12579_s3 + $0x88] sm:$0xff]  ;;  %v3359_v7 = vadd.f32 %v11517_v1, %v3340_v44  ;;  %v8755_v44 = vld [vmem:[#allocation7 + $0x190] sm:$0xf0] }
 0x27e   :  { %vm3817_vm4 = vcmp.ge.f32.partialorder %v3785_v49, 0.3 }
 0x27f   :  { %5539 = vmatpush.bf16.msrb.mxu0 %v9106_v46  ;;  %v3378_v1 = vadd.f32 %v11594_v59, %v3359_v7  ;;  %vm11666_vm8 = vmpackc.low %vm3825_vm5, %vm3817_vm4  ;;  %v8774_v59 = vor.u32 %v10537_v45, %v8771_v56  ;;  %vm3812_vm5 = vcmp.ge.f32.partialorder %v3780_v17, 0.3 }
 0x280   :  { %9594 = vmatmul.msk.bf16.gmra.mxu1 %vm11666_vm8, %v11381_v11 }
 0x281   :  { %5558 = vmatpush.bf16.msrb.mxu1 %v9234_v41  ;;  %v11641_v41 = vpop.f32.mrf.mxu3  ;;  %v3379_v53 = vpop.f32.mrf.mxu0  ;;  %v11677_v49 = vadd.f32 %v11596_v58, %v3378_v1  ;;  %v12618_v58 = vmov 0  ;;  %v10703_v1 = vld [vmem:[#allocation7 + $0x6cc] sm:$0xf0] }
 0x282   :  { %v3398_v26 = vpop.f32.mrf.mxu1  ;;  %v3380_v51 = vadd.f32 %v3379_v53, %v3361_v22  ;;  %v12619_v58 = vsel %vm11694_vm13, 4294967295, %v12618_v58  ;;  %v10497_v53 = vld [vmem:[#allocation7 + $0x64] sm:$0xf] }
 0x283   :  { %5540 = vmatpush.bf16.msrb.mxu0 %v9090_v10  ;;  %v8662_v10 = vor.u32 %v10509_v55, %v8659_v52  ;;  %v3309_v55 = vadd.f32 %v11554_v14, %v3290_v37  ;;  %12620 = vst [vmem:[#allocation20_spill] sm:$0xff] %v12619_v58  ;;  %v3709_v32 = vmul.f32 0.2, %v11677_v49  ;;  %v10707_v14 = vld [vmem:[#allocation7 + $0x6ec] sm:$0xf0]  ;;  %v8614_v34 = vor.u32 %v10497_v53, %v8611_v0  ;;  %v3773_v37 = vld [vmem:[%s12579_s3 + $0x28] sm:$0xff] }
 0x284   :  { %v3399_v30 = vadd.f32 %v3398_v26, %v3380_v51  ;;  %v9442_v7 = vor.u32 %v10707_v14, %v9441_v20  ;;  %v10493_v51 = vld [vmem:[#allocation7 + $0x44] sm:$0xf]  ;;  %vm3677_vm3 = vcmp.ge.f32.partialorder %v11677_v49, 0.0  ;;  %vm3805_vm6 = vcmp.ge.f32.partialorder %v3773_v37, 0.3 }
 0x285   :  { %5559 = vmatpush.bf16.msrb.mxu1 %v9218_v19  ;;  %v11639_v46 = vpop.f32.mrf.mxu2  ;;  %v8790_v19 = vor.u32 %v10541_v62, %v8787_v29  ;;  %v8758_v62 = vor.u32 %v10533_v24, %v8755_v44  ;;  %v3307_v29 = vadd.f32 %v11529_v31, %v3288_v36  ;;  %v3772_v31 = vld [vmem:[%s12579_s3 + $0x20] sm:$0xff]  ;;  %v3328_v26 = vadd.f32 %v11556_v8, %v3309_v55  ;;  %v9409_v44 = vld [vmem:[#allocation7 + $0x6a0] sm:$0xf]  ;;  %v10699_v36 = vld [vmem:[#allocation7 + $0x6ac] sm:$0xf0] }
 0x286   :  { %vm3685_vm2 = vcmp.ge.f32.partialorder %v3399_v30, 0.0  ;;  %v3717_v2 = vmul.f32 0.2, %v3399_v30  ;;  %5572 = vmatpush.bf16.msrb.mxu2 %v9442_v7  ;;  %vm3804_vm4 = vcmp.ge.f32.partialorder %v3772_v31, 0.3  ;;  %v9410_v53 = vor.u32 %v10699_v36, %v9409_v44 }
 0x287   :  { %5541 = vmatpush.bf16.msrb.mxu0 %v9074_v57  ;;  %v3326_v22 = vadd.f32 %v11531_v5, %v3307_v29  ;;  %v3347_v43 = vadd.f32 %v11583_v9, %v3328_v26  ;;  %v9426_v5 = vor.u32 %v10703_v1, %v9425_v21  ;;  %v8723_v9 = vld [vmem:[#allocation7 + $0x150] sm:$0xf0]  ;;  %v10489_v20 = vld [vmem:[#allocation7 + $0x24] sm:$0xf]  ;;  %vm11741_vm9 = vmpackc.low %vm3812_vm5, %vm3804_vm4 }
 0x288   :  { %v3749_v55 = vsel %vm3685_vm2, %v3399_v30, %v3717_v2  ;;  %v8579_v26 = vld [vmem:[#allocation7 + $0x30] sm:$0xf0]  ;;  %v10521_v30 = vld [vmem:[#allocation7 + $0x124] sm:$0xf]  ;;  %v10695_v21 = vld [vmem:[#allocation7 + $0x68c] sm:$0xf0] }
 0x289   :  { %5560 = vmatpush.bf16.msrb.mxu1 %v9202_v12  ;;  %v11674_v57 = vpop.f32.mrf.mxu3  ;;  %v8627_v12 = vld [vmem:[#allocation7 + $0x90] sm:$0xf0]  ;;  %v11679_v47 = vpop.f32.mrf.mxu0  ;;  %v3345_v24 = vadd.f32 %v11544_v6, %v3326_v22  ;;  %v3366_v14 = vadd.f32 %v11585_v4, %v3347_v43  ;;  %v3741_v6 = vsel %vm3677_vm3, %v11677_v49, %v3709_v32  ;;  %v3845_v7 = vmul.f32 1.4285715, %v3749_v55  ;;  %v10485_v22 = vld [vmem:[#allocation7 + $0x4] sm:$0xf] }
 0x28a   :  { %v8630_v52 = vor.u32 %v10501_v35, %v8627_v12  ;;  %v10525_v12 = vld [vmem:[#allocation7 + $0x144] sm:$0xf]  ;;  %5573 = vmatpush.bf16.msrb.mxu2 %v9426_v5  ;;  %v8707_v2 = vld [vmem:[#allocation7 + $0x130] sm:$0xf0]  ;;  %v8582_v49 = vor.u32 %v10489_v20, %v8579_v26  ;;  %v10691_v44 = vld [vmem:[#allocation7 + $0x66c] sm:$0xf0]  ;;  %9609 = vmatmul.msk.bf16.vlgmr.msrb.gmra.mxu0 %vm11741_vm9, %v11498_v38 }
 0x28b   :  { %5610 = vmatpush.bf16.msra.mxu0 %v8678_v42  ;;  %v11681_v42 = vpop.f32.mrf.mxu1  ;;  %v8726_v29 = vor.u32 %v10525_v12, %v8723_v9  ;;  %v8710_v32 = vor.u32 %v10521_v30, %v8707_v2  ;;  %v8563_v1 = vld [vmem:[#allocation7 + $0x10] sm:$0xf0]  ;;  %v10641_v55 = vld [vmem:[#allocation7 + $0x4e4] sm:$0xf]  ;;  %v9361_v26 = vld [vmem:[#allocation7 + $0x640] sm:$0xf] }
 0x28c   :  { %v8566_v36 = vor.u32 %v10485_v22, %v8563_v1  ;;  %v3788_v20 = vld [vmem:[%s12579_s3 + $0xa0] sm:$0xff]  ;;  %v10687_v30 = vld [vmem:[#allocation7 + $0x64c] sm:$0xf0]  ;;  %v10637_v2 = vld [vmem:[#allocation7 + $0x4c4] sm:$0xf] }
 0x28d   :  { %5629 = vmatpush.bf16.msra.mxu1 %v8806_v16  ;;  %v11672_v33 = vpop.f32.mrf.mxu2  ;;  %v12616_v16 = vmov 0  ;;  %vm3820_vm3 = vcmp.ge.f32.partialorder %v3788_v20, 0.3 }
 0x28e   :  { %v12617_v16 = vsel %vm11685_vm12, 4294967295, %v12616_v16  ;;  %5574 = vmatpush.bf16.msrb.mxu2 %v9410_v53 }
 0x28f   :  { %5611 = vmatpush.bf16.msra.mxu0 %v8662_v10  ;;  %v10529_v10 = vld [vmem:[#allocation7 + $0x164] sm:$0xf] }
 0x291   :  { %5630 = vmatpush.bf16.msra.mxu1 %v8790_v19  ;;  %v8739_v19 = vld [vmem:[#allocation7 + $0x170] sm:$0xf0]  ;;  %v11723_v8 = vpop.f32.mrf.mxu3 }
 0x292   :  { %v8742_v56 = vor.u32 %v10529_v10, %v8739_v19  ;;  %v3364_v10 = vadd.f32 %v11546_v54, %v3345_v24  ;;  %v3837_v19 = vmul.f32 1.4285715, %v3741_v6  ;;  %v10517_v54 = vld [vmem:[#allocation7 + $0x104] sm:$0xf]  ;;  %v9377_v24 = vld [vmem:[#allocation7 + $0x660] sm:$0xf] }
 0x293   :  { %5612 = vmatpush.bf16.msra.mxu0 %v8646_v27  ;;  %v8595_v27 = vld [vmem:[#allocation7 + $0x50] sm:$0xf0]  ;;  %v3403_v35 = vpop.f32.mrf.mxu1 }
 0x294   :  { %v3383_v31 = vadd.f32 %v11679_v47, %v3364_v10  ;;  %v11760_v12 = vpack.c.bf16 %v3845_v7, %v3837_v19  ;;  %v9171_v7 = vld [vmem:[#allocation7 + $0x4d0] sm:$0xf0] }
 0x295   :  { %5631 = vmatpush.bf16.msra.mxu1 %v8774_v59  ;;  %v11721_v45 = vpop.f32.mrf.mxu2  ;;  %v3384_v59 = vpop.f32.mrf.mxu0 }
 0x296   :  { %v3385_v0 = vadd.f32 %v3384_v59, %v3366_v14  ;;  %v9378_v14 = vor.u32 %v10691_v44, %v9377_v24  ;;  %v3797_v24 = vld [vmem:[%s12579_s3 + $0xe8] sm:$0xff] }
 0x297   :  { %5613 = vmatpush.bf16.msra.mxu0 %v8630_v52  ;;  %v3781_v52 = vld [vmem:[%s12579_s3 + $0x68] sm:$0xff] }
 0x298   :  { %vm3813_vm7 = vcmp.ge.f32.partialorder %v3781_v52, 0.3  ;;  %v3404_v9 = vadd.f32 %v3403_v35, %v3385_v0  ;;  %v9315_v52 = vld [vmem:[#allocation7 + $0x5f0] sm:$0xf0]  ;;  %v3402_v35 = vadd.f32 %v11681_v42, %v3383_v31  ;;  %v10669_v0 = vld [vmem:[#allocation7 + $0x5c4] sm:$0xf]  ;;  %v9362_v31 = vor.u32 %v10687_v30, %v9361_v26 }
 0x299   :  { %5632 = vmatpush.bf16.msra.mxu1 %v8758_v62  ;;  %v8598_v62 = vor.u32 %v10493_v51, %v8595_v27  ;;  %v8691_v51 = vld [vmem:[#allocation7 + $0x110] sm:$0xf0]  ;;  %vm11756_vm10 = vmpackc.low %vm3813_vm7, %vm3805_vm6  ;;  %v9345_v44 = vld [vmem:[#allocation7 + $0x620] sm:$0xf]  ;;  %vm3829_vm7 = vcmp.ge.f32.partialorder %v3797_v24, 0.3 }
 0x29a   :  { %v8694_v47 = vor.u32 %v10517_v54, %v8691_v51  ;;  %9615 = vmatmul.msk.bf16.vlgmr.msrb.gmra.mxu1 %vm11756_vm10, %v11760_v12  ;;  %v3733_v53 = vmul.f32 0.2, %v3404_v9  ;;  %vm3701_vm2 = vcmp.ge.f32.partialorder %v3404_v9, 0.0  ;;  %v3796_v54 = vld [vmem:[%s12579_s3 + $0xe0] sm:$0xff]  ;;  %v3789_v51 = vld [vmem:[%s12579_s3 + $0xa8] sm:$0xff]  ;;  %vm3693_vm4 = vcmp.ge.f32.partialorder %v3402_v35, 0.0 }
 0x29b   :  { %5614 = vmatpush.bf16.msra.mxu0 %v8614_v34  ;;  %v9393_v34 = vld [vmem:[#allocation7 + $0x680] sm:$0xf]  ;;  %v11752_v27 = vpop.f32.mrf.mxu1  ;;  %vm3828_vm5 = vcmp.ge.f32.partialorder %v3796_v54, 0.3  ;;  %vm3821_vm6 = vcmp.ge.f32.partialorder %v3789_v51, 0.3 }
 0x29c   :  { %v9394_v5 = vor.u32 %v10695_v21, %v9393_v34  ;;  %v11772_v34 = vld [vmem:[#allocation5] sm:$0xff]  ;;  %v3725_v21 = vmul.f32 0.2, %v3402_v35  ;;  %v9123_v24 = vld [vmem:[#allocation7 + $0x470] sm:$0xf0] }
 0x29d   :  { %5633 = vmatpush.bf16.msra.mxu1 %v8742_v56  ;;  %v11745_v43 = vpop.f32.mrf.mxu2  ;;  %v11747_v56 = vpop.f32.mrf.mxu3  ;;  %v11775_v10 = vperm.slane %v11772_v34, 6 }
 0x29e   :  { %v11750_v17 = vpop.f32.mrf.mxu0  ;;  %5575 = vmatpush.bf16.msrb.mxu2 %v9394_v5 }
 0x29f   :  { %5615 = vmatpush.bf16.msra.mxu0 %v8598_v62  ;;  %v9187_v62 = vld [vmem:[#allocation7 + $0x4f0] sm:$0xf0] }
 0x2a0   :  { %v9190_v37 = vor.u32 %v10641_v55, %v9187_v62  ;;  %v10633_v55 = vld [vmem:[#allocation7 + $0x4a4] sm:$0xf]  ;;  %v9155_v62 = vld [vmem:[#allocation7 + $0x4b0] sm:$0xf0] }
 0x2a1   :  { %5634 = vmatpush.bf16.msra.mxu1 %v8726_v29  ;;  %v10673_v29 = vld [vmem:[#allocation7 + $0x5e4] sm:$0xf] }
 0x2a2   :  { %v9318_v6 = vor.u32 %v10673_v29, %v9315_v52  ;;  %5576 = vmatpush.bf16.msrb.mxu2 %v9378_v14  ;;  %v10665_v29 = vld [vmem:[#allocation7 + $0x5a4] sm:$0xf]  ;;  %v9283_v52 = vld [vmem:[#allocation7 + $0x5b0] sm:$0xf0]  ;;  %v3757_v14 = vsel %vm3693_vm4, %v3402_v35, %v3725_v21  ;;  %vm11813_vm4 = vmpackc.low %vm3829_vm7, %vm3821_vm6 }
 0x2a3   :  { %5616 = vmatpush.bf16.msra.mxu0 %v8582_v49  ;;  %v9174_v49 = vor.u32 %v10637_v2, %v9171_v7  ;;  %v11783_v1 = vpop.f32.mrf.mxu1  ;;  %v9286_v26 = vor.u32 %v10665_v29, %v9283_v52  ;;  %v9329_v2 = vld [vmem:[#allocation7 + $0x600] sm:$0xf]  ;;  %v10679_v7 = vld [vmem:[#allocation7 + $0x60c] sm:$0xf0]  ;;  %v3853_v58 = vmul.f32 1.4285715, %v3757_v14 }
 0x2a4   :  { %v9267_v21 = vld [vmem:[#allocation7 + $0x590] sm:$0xf0]  ;;  %v9330_v20 = vor.u32 %v10679_v7, %v9329_v2  ;;  %v10621_v2 = vld [vmem:[#allocation7 + $0x444] sm:$0xf] }
 0x2a5   :  { %5635 = vmatpush.bf16.msra.mxu1 %v8710_v32  ;;  %v11777_v42 = vpop.f32.mrf.mxu2  ;;  %v11779_v19 = vpop.f32.mrf.mxu3  ;;  %v9299_v32 = vld [vmem:[#allocation7 + $0x5d0] sm:$0xf0] }
 0x2a6   :  { %v11781_v22 = vpop.f32.mrf.mxu0  ;;  %v9302_v5 = vor.u32 %v10669_v0, %v9299_v32  ;;  %5577 = vmatpush.bf16.msrb.mxu2 %v9362_v31  ;;  %v10629_v0 = vld [vmem:[#allocation7 + $0x484] sm:$0xf]  ;;  %v9139_v32 = vld [vmem:[#allocation7 + $0x490] sm:$0xf0] }
 0x2a7   :  { %5617 = vmatpush.bf16.msra.mxu0 %v8566_v36  ;;  %v10683_v36 = vld [vmem:[#allocation7 + $0x62c] sm:$0xf0]  ;;  %v9142_v54 = vor.u32 %v10629_v0, %v9139_v32  ;;  %v9251_v52 = vld [vmem:[#allocation7 + $0x570] sm:$0xf0]  ;;  %v10653_v0 = vld [vmem:[#allocation7 + $0x544] sm:$0xf]  ;;  %v3418_v32 = vadd.f32 %v11672_v33, %v11775_v10 }
 0x2a8   :  { %v9107_v7 = vld [vmem:[#allocation7 + $0x450] sm:$0xf0] }
 0x2a9   :  { %5636 = vmatpush.bf16.msra.mxu1 %v8694_v47  ;;  %v3765_v47 = vsel %vm3701_vm2, %v3404_v9, %v3733_v53  ;;  %v10661_v9 = vld [vmem:[#allocation7 + $0x584] sm:$0xf]  ;;  %v3416_v53 = vadd.f32 %v11639_v46, %v11775_v10  ;;  %vm11803_vm2 = vmpackc.low %vm3828_vm5, %vm3820_vm3  ;;  %v12627_v46 = vmov 0 }
 0x2aa   :  { %v3861_v30 = vmul.f32 1.4285715, %v3765_v47  ;;  %v12628_v46 = vsel %vm11813_vm4, 4294967295, %v12627_v46  ;;  %v10577_v47 = vld [vmem:[#allocation7 + $0x2e4] sm:$0xf]  ;;  %9612 = vmatmul.msk.bf16.gmra.mxu0 %vm11803_vm2, %v11519_v3 }
 0x2ab   :  { %5686 = vmatpush.bf16.msrb.mxu0 %v9190_v37  ;;  %v9158_v37 = vor.u32 %v10633_v55, %v9155_v62  ;;  %v8931_v55 = vld [vmem:[#allocation7 + $0x2f0] sm:$0xf0]  ;;  %v10625_v62 = vld [vmem:[#allocation7 + $0x464] sm:$0xf]  ;;  %v3435_v29 = vadd.f32 %v11641_v41, %v3416_v53 }
 0x2ac   :  { %v8934_v51 = vor.u32 %v10577_v47, %v8931_v55  ;;  %v9569_v55 = vld [vmem:[#allocation7 + $0x7e0] sm:$0xf] }
 0x2ad   :  { %5705 = vmatpush.bf16.msrb.mxu1 %v9318_v6  ;;  %v9346_v6 = vor.u32 %v10683_v36, %v9345_v44  ;;  %v11797_v25 = vpop.f32.mrf.mxu2  ;;  %v11817_v44 = vpack.c.bf16 %v3861_v30, %v3853_v58  ;;  %v9270_v36 = vor.u32 %v10661_v9, %v9267_v21  ;;  %v9126_v58 = vor.u32 %v10625_v62, %v9123_v24  ;;  %v9235_v21 = vld [vmem:[#allocation7 + $0x550] sm:$0xf0]  ;;  %v10739_v62 = vld [vmem:[#allocation7 + $0x7ec] sm:$0xf0]  ;;  %v10617_v24 = vld [vmem:[#allocation7 + $0x424] sm:$0xf] }
 0x2ae   :  { %v11807_v31 = vpop.f32.mrf.mxu0  ;;  %v3454_v14 = vadd.f32 %v11750_v17, %v3435_v29  ;;  %v9238_v47 = vor.u32 %v10653_v0, %v9235_v21  ;;  %v10569_v29 = vld [vmem:[#allocation7 + $0x2a4] sm:$0xf]  ;;  %v9570_v33 = vor.u32 %v10739_v62, %v9569_v55  ;;  %v3421_v0 = vadd.f32 %v11721_v45, %v11775_v10  ;;  %v9075_v21 = vld [vmem:[#allocation7 + $0x410] sm:$0xf0] }
 0x2af   :  { %5687 = vmatpush.bf16.msrb.mxu0 %v9174_v49  ;;  %v11799_v49 = vpop.f32.mrf.mxu3  ;;  %5578 = vmatpush.bf16.msrb.mxu2 %v9346_v6  ;;  %v10573_v6 = vld [vmem:[#allocation7 + $0x2c4] sm:$0xf]  ;;  %v9203_v62 = vld [vmem:[#allocation7 + $0x510] sm:$0xf0] }
 0x2b0   :  { %9618 = vmatmul.msk.bf16.gmra.mxu1 %vm11813_vm4, %v11817_v44  ;;  %5591 = vmatpush.bf16.msrb.mxu3 %v9570_v33 }
 0x2b1   :  { %5706 = vmatpush.bf16.msrb.mxu1 %v9302_v5  ;;  %v11809_v5 = vpop.f32.mrf.mxu1 }
 0x2b3   :  { %5688 = vmatpush.bf16.msrb.mxu0 %v9158_v37  ;;  %v10657_v37 = vld [vmem:[#allocation7 + $0x564] sm:$0xf]  ;;  %5579 = vmatpush.bf16.msrb.mxu2 %v9330_v20 }
 0x2b4   :  { %v9254_v41 = vor.u32 %v10657_v37, %v9251_v52  ;;  %v9091_v37 = vld [vmem:[#allocation7 + $0x430] sm:$0xf0]  ;;  %v3437_v52 = vadd.f32 %v11674_v57, %v3418_v32 }
 0x2b5   :  { %5707 = vmatpush.bf16.msrb.mxu1 %v9286_v26  ;;  %v8915_v26 = vld [vmem:[#allocation7 + $0x2d0] sm:$0xf0]  ;;  %v11829_v9 = vpop.f32.mrf.mxu2 }
 0x2b6   :  { %v8918_v30 = vor.u32 %v10573_v6, %v8915_v26  ;;  %v11833_v20 = vpop.f32.mrf.mxu0  ;;  %v8883_v32 = vld [vmem:[#allocation7 + $0x290] sm:$0xf0] }
 0x2b7   :  { %5689 = vmatpush.bf16.msrb.mxu0 %v9142_v54  ;;  %5648 = vmatpush.bf16.msra.mxu2 %v8934_v51  ;;  %v11831_v53 = vpop.f32.mrf.mxu3  ;;  %v9110_v54 = vor.u32 %v10621_v2, %v9107_v7  ;;  %v8899_v51 = vld [vmem:[#allocation7 + $0x2b0] sm:$0xf0]  ;;  %v10735_v2 = vld [vmem:[#allocation7 + $0x7cc] sm:$0xf0]  ;;  %v10565_v7 = vld [vmem:[#allocation7 + $0x284] sm:$0xf] }
 0x2b8   :  { %v8902_v26 = vor.u32 %v10569_v29, %v8899_v51 }
 0x2b9   :  { %5708 = vmatpush.bf16.msrb.mxu1 %v9270_v36  ;;  %v11835_v17 = vpop.f32.mrf.mxu1  ;;  %v3473_v36 = vadd.f32 %v11752_v27, %v3454_v14  ;;  %v9094_v27 = vor.u32 %v10617_v24, %v9091_v37  ;;  %v3456_v14 = vadd.f32 %v11781_v22, %v3437_v52  ;;  %v8886_v22 = vor.u32 %v10565_v7, %v8883_v32  ;;  %v10731_v52 = vld [vmem:[#allocation7 + $0x7ac] sm:$0xf0]  ;;  %v8809_v7 = vld [vmem:[#allocation7 + $0x1e8] sm:$0xf]  ;;  %v9521_v32 = vld [vmem:[#allocation7 + $0x780] sm:$0xf] }
 0x2ba   :  { %v3440_v37 = vadd.f32 %v11723_v8, %v3421_v0  ;;  %9633 = vmatmul.msk.bf16.vlgmr.msra.gmra.mxu0 %vm11575_vm11, %v11308_v13  ;;  %v11867_v8 = vld [vmem:[%s12579_s3 + $0x70] sm:$0xff] }
 0x2bb   :  { %5690 = vmatpush.bf16.msrb.mxu0 %v9126_v58  ;;  %5649 = vmatpush.bf16.msra.mxu2 %v8918_v30  ;;  %v3492_v6 = vadd.f32 %v11777_v42, %v3473_v36  ;;  %v9219_v58 = vld [vmem:[#allocation7 + $0x530] sm:$0xf0]  ;;  %v9553_v30 = vld [vmem:[#allocation7 + $0x7c0] sm:$0xf]  ;;  %v10613_v42 = vld [vmem:[#allocation7 + $0x404] sm:$0xf]  ;;  %v3475_v45 = vadd.f32 %v11783_v1, %v3456_v14 }
 0x2bc   :  { %v9554_v57 = vor.u32 %v10735_v2, %v9553_v30  ;;  %v9078_v33 = vor.u32 %v10613_v42, %v9075_v21  ;;  %v11862_v1 = vld [vmem:[%s12579_s3 + $0x30] sm:$0xff]  ;;  %v3459_v14 = vadd.f32 %v11807_v31, %v3440_v37  ;;  %v10516_v2 = vld [vmem:[#allocation7 + $0xf4] sm:$0xf0]  ;;  %v10727_v42 = vld [vmem:[#allocation7 + $0x78c] sm:$0xf0]  ;;  %v3423_v21 = vadd.f32 %v11745_v43, %v11775_v10 }
 0x2bd   :  { %5709 = vmatpush.bf16.msrb.mxu1 %v9254_v41  ;;  %v9222_v41 = vor.u32 %v10649_v18, %v9219_v58  ;;  %v3511_v36 = vadd.f32 %v11779_v19, %v3492_v6  ;;  %v9537_v19 = vld [vmem:[#allocation7 + $0x7a0] sm:$0xf]  ;;  %v10561_v6 = vld [vmem:[#allocation7 + $0x264] sm:$0xf]  ;;  %v8681_v30 = vld [vmem:[#allocation7 + $0xe8] sm:$0xf] }
 0x2be   :  { %v3529_v18 = vpop.f32.mrf.mxu0  ;;  %5592 = vmatpush.bf16.msrb.mxu3 %v9554_v57  ;;  %v8682_v0 = vor.u32 %v10516_v2, %v8681_v30  ;;  %v10548_v57 = vld [vmem:[#allocation7 + $0x1f4] sm:$0xf0]  ;;  %v8851_v31 = vld [vmem:[#allocation7 + $0x250] sm:$0xf0]  ;;  %v8793_v37 = vld [vmem:[#allocation7 + $0x1c8] sm:$0xf] }
 0x2bf   :  { %5691 = vmatpush.bf16.msrb.mxu0 %v9110_v54  ;;  %5650 = vmatpush.bf16.msra.mxu2 %v8902_v26  ;;  %v11844_v54 = vpop.f32.mrf.mxu2  ;;  %v11846_v55 = vpop.f32.mrf.mxu3  ;;  %v3530_v51 = vadd.f32 %v3529_v18, %v3511_v36  ;;  %v3494_v26 = vadd.f32 %v11797_v25, %v3475_v45  ;;  %v9538_v25 = vor.u32 %v10731_v52, %v9537_v19  ;;  %v10512_v19 = vld [vmem:[#allocation7 + $0xd4] sm:$0xf0]  ;;  %vm3806_vm5 = vcmp.ge.f32.partialorder %v11862_v1, 0.3  ;;  %v10723_v30 = vld [vmem:[#allocation7 + $0x76c] sm:$0xf0] }
 0x2c0   :  { %9639 = vmatmul.msk.bf16.vlgmr.msra.gmra.mxu1 %vm11589_vm14, %v11364_v23  ;;  %v8810_v36 = vor.u32 %v10548_v57, %v8809_v7  ;;  %v3478_v52 = vadd.f32 %v11809_v5, %v3459_v14  ;;  %vm3814_vm6 = vcmp.ge.f32.partialorder %v11867_v8, 0.3  ;;  %v10553_v2 = vld [vmem:[#allocation7 + $0x224] sm:$0xf]  ;;  %v3442_v5 = vadd.f32 %v11747_v56, %v3423_v21  ;;  %v8649_v57 = vld [vmem:[#allocation7 + $0xa8] sm:$0xf] }
 0x2c1   :  { %5710 = vmatpush.bf16.msrb.mxu1 %v9238_v47  ;;  %v10645_v47 = vld [vmem:[#allocation7 + $0x504] sm:$0xf]  ;;  %v11848_v29 = vpop.f32.mrf.mxu1  ;;  %v3710_v58 = vmul.f32 0.2, %v3530_v51  ;;  %vm3678_vm3 = vcmp.ge.f32.partialorder %v3530_v51, 0.0 }
 0x2c2   :  { %v9206_v24 = vor.u32 %v10645_v47, %v9203_v62  ;;  %5593 = vmatpush.bf16.msrb.mxu3 %v9538_v25  ;;  %v10557_v47 = vld [vmem:[#allocation7 + $0x244] sm:$0xf]  ;;  %v3513_v62 = vadd.f32 %v11799_v49, %v3494_v26  ;;  %v3497_v14 = vadd.f32 %v11829_v9, %v3478_v52  ;;  %v9489_v9 = vld [vmem:[#allocation7 + $0x740] sm:$0xf]  ;;  %v10719_v21 = vld [vmem:[#allocation7 + $0x74c] sm:$0xf0] }
 0x2c3   :  { %5692 = vmatpush.bf16.msrb.mxu0 %v9094_v27  ;;  %5651 = vmatpush.bf16.msra.mxu2 %v8886_v22  ;;  %v8867_v27 = vld [vmem:[#allocation7 + $0x270] sm:$0xf0]  ;;  %v9522_v22 = vor.u32 %v10727_v42, %v9521_v32  ;;  %v8854_v45 = vor.u32 %v10557_v47, %v8851_v31  ;;  %v3742_v26 = vsel %vm3678_vm3, %v3530_v51, %v3710_v58  ;;  %v10508_v32 = vld [vmem:[#allocation7 + $0xb4] sm:$0xf0]  ;;  %v8777_v58 = vld [vmem:[#allocation7 + $0x1a8] sm:$0xf] }
 0x2c4   :  { %v8650_v51 = vor.u32 %v10508_v32, %v8649_v57  ;;  %v10540_v47 = vld [vmem:[#allocation7 + $0x1b4] sm:$0xf0]  ;;  %v3461_v31 = vadd.f32 %v11833_v20, %v3442_v5  ;;  %vm11890_vm3 = vmpackc.low %vm3814_vm6, %vm3806_vm5  ;;  %v8819_v52 = vld [vmem:[#allocation7 + $0x210] sm:$0xf0]  ;;  %v3516_v20 = vadd.f32 %v11831_v53, %v3497_v14 }
 0x2c5   :  { %5711 = vmatpush.bf16.msrb.mxu1 %v9222_v41  ;;  %v8870_v41 = vor.u32 %v10561_v6, %v8867_v27  ;;  %v10544_v6 = vld [vmem:[#allocation7 + $0x1d4] sm:$0xf0]  ;;  %v8778_v56 = vor.u32 %v10540_v47, %v8777_v58  ;;  %v9473_v14 = vld [vmem:[#allocation7 + $0x720] sm:$0xf]  ;;  %v10705_v57 = vld [vmem:[#allocation7 + $0x6e4] sm:$0xf] }
 0x2c6   :  { %v3531_v43 = vpop.f32.mrf.mxu0  ;;  %5594 = vmatpush.bf16.msrb.mxu3 %v9522_v22  ;;  %v8794_v27 = vor.u32 %v10544_v6, %v8793_v37  ;;  %v3838_v22 = vmul.f32 1.4285715, %v3742_v26  ;;  %v9490_v37 = vor.u32 %v10719_v21, %v9489_v9  ;;  %v10504_v26 = vld [vmem:[#allocation7 + $0x94] sm:$0xf0]  ;;  %v3480_v5 = vadd.f32 %v11835_v17, %v3461_v31  ;;  %v8745_v47 = vld [vmem:[#allocation7 + $0x168] sm:$0xf] }
 0x2c7   :  { %5693 = vmatpush.bf16.msrb.mxu0 %v9078_v33  ;;  %5652 = vmatpush.bf16.msra.mxu2 %v8870_v41  ;;  %v11873_v18 = vpop.f32.mrf.mxu2  ;;  %v11875_v33 = vpop.f32.mrf.mxu3  ;;  %v3532_v25 = vadd.f32 %v3531_v43, %v3513_v62  ;;  %v9505_v41 = vld [vmem:[#allocation7 + $0x760] sm:$0xf]  ;;  %v8633_v43 = vld [vmem:[#allocation7 + $0x88] sm:$0xf]  ;;  %v10536_v1 = vld [vmem:[#allocation7 + $0x194] sm:$0xf0] }
 0x2c8   :  { %v9506_v7 = vor.u32 %v10723_v30, %v9505_v41  ;;  %v3499_v58 = vadd.f32 %v11844_v54, %v3480_v5  ;;  %v11915_v31 = vperm.slane %v11772_v34, 7  ;;  %v9457_v21 = vld [vmem:[#allocation7 + $0x700] sm:$0xf]  ;;  %v3798_v34 = vld [vmem:[%s12579_s3 + $0xf0] sm:$0xff]  ;;  %v10528_v5 = vld [vmem:[#allocation7 + $0x154] sm:$0xf0] }
 0x2c9   :  { %5712 = vmatpush.bf16.msrb.mxu1 %v9206_v24  ;;  %v8665_v24 = vld [vmem:[#allocation7 + $0xc8] sm:$0xf]  ;;  %v11878_v10 = vpop.f32.mrf.mxu1  ;;  %vm3686_vm7 = vcmp.ge.f32.partialorder %v3532_v25, 0.0  ;;  %v3718_v42 = vmul.f32 0.2, %v3532_v25 }
 0x2ca   :  { %v8666_v49 = vor.u32 %v10512_v19, %v8665_v24  ;;  %5595 = vmatpush.bf16.msrb.mxu3 %v9506_v7  ;;  %9636 = vmatmul.msk.bf16.gmra.mxu0 %vm11660_vm0, %v11328_v61  ;;  %v6122_v19 = vld [vmem:[%s12582_s6 + $0x40] sm:$0xff] }
 0x2cb   :  { %5762 = vmatpush.bf16.msra.mxu0 %v8682_v0  ;;  %5653 = vmatpush.bf16.msra.mxu2 %v8854_v45  ;;  %v8835_v0 = vld [vmem:[#allocation7 + $0x230] sm:$0xf0]  ;;  %v3750_v62 = vsel %vm3686_vm7, %v3532_v25, %v3718_v42  ;;  %v10549_v45 = vld [vmem:[#allocation7 + $0x204] sm:$0xf]  ;;  %v8761_v25 = vld [vmem:[#allocation7 + $0x188] sm:$0xf] }
 0x2cc   :  { %v3846_v24 = vmul.f32 1.4285715, %v3750_v62  ;;  %v8822_v30 = vor.u32 %v10549_v45, %v8819_v52  ;;  %v8762_v53 = vor.u32 %v10536_v1, %v8761_v25  ;;  %v9443_v42 = vld [vmem:[#allocation7 + $0x6f0] sm:$0xf0]  ;;  %v11920_v62 = vld [vmem:[%s12579_s3 + $0xb0] sm:$0xff] }
 0x2cd   :  { %5781 = vmatpush.bf16.msra.mxu1 %v8810_v36  ;;  %v8838_v36 = vor.u32 %v10553_v2, %v8835_v0  ;;  %v8634_v2 = vor.u32 %v10504_v26, %v8633_v43  ;;  %v10715_v0 = vld [vmem:[#allocation7 + $0x72c] sm:$0xf0]  ;;  %v9446_v17 = vor.u32 %v10705_v57, %v9443_v42  ;;  %v9427_v52 = vld [vmem:[#allocation7 + $0x6d0] sm:$0xf0]  ;;  %v8601_v43 = vld [vmem:[#allocation7 + $0x48] sm:$0xf] }
 0x2ce   :  { %v3534_v8 = vpop.f32.mrf.mxu0  ;;  %5596 = vmatpush.bf16.msrb.mxu3 %v9490_v37  ;;  %v9474_v32 = vor.u32 %v10715_v0, %v9473_v14  ;;  %v10711_v45 = vld [vmem:[#allocation7 + $0x70c] sm:$0xf0]  ;;  %vm3822_vm6 = vcmp.ge.f32.partialorder %v11920_v62, 0.3  ;;  %vm3830_vm7 = vcmp.ge.f32.partialorder %v3798_v34, 0.3 }
 0x2cf   :  { %5763 = vmatpush.bf16.msra.mxu0 %v8666_v49  ;;  %5654 = vmatpush.bf16.msra.mxu2 %v8838_v36  ;;  %v11895_v49 = vpop.f32.mrf.mxu2  ;;  %v11897_v6 = vpop.f32.mrf.mxu3  ;;  %v3535_v7 = vadd.f32 %v3534_v8, %v3516_v20  ;;  %v8617_v36 = vld [vmem:[#allocation7 + $0x68] sm:$0xf]  ;;  %v9458_v37 = vor.u32 %v10711_v45, %v9457_v21  ;;  %v3518_v20 = vadd.f32 %v11846_v55, %v3499_v58  ;;  %v10601_v34 = vld [vmem:[#allocation7 + $0x3a4] sm:$0xf] }
 0x2d0   :  { %9642 = vmatmul.msk.bf16.gmra.mxu1 %vm11666_vm8, %v11381_v11  ;;  %v8713_v21 = vld [vmem:[#allocation7 + $0x128] sm:$0xf] }
 0x2d1   :  { %5782 = vmatpush.bf16.msra.mxu1 %v8794_v27  ;;  %v11899_v27 = vpack.c.bf16 %v3846_v24, %v3838_v22  ;;  %v11901_v41 = vpop.f32.mrf.mxu1  ;;  %v3726_v22 = vmul.f32 0.2, %v3535_v7  ;;  %vm3694_vm5 = vcmp.ge.f32.partialorder %v3535_v7, 0.0  ;;  %v10701_v24 = vld [vmem:[#allocation7 + $0x6c4] sm:$0xf] }
 0x2d2   :  { %5597 = vmatpush.bf16.msrb.mxu3 %v9474_v32  ;;  %v9430_v8 = vor.u32 %v10701_v24, %v9427_v52  ;;  %v10524_v24 = vld [vmem:[#allocation7 + $0x134] sm:$0xf0]  ;;  %v9043_v52 = vld [vmem:[#allocation7 + $0x3d0] sm:$0xf0] }
 0x2d3   :  { %5764 = vmatpush.bf16.msra.mxu0 %v8650_v51  ;;  %9621 = vmatmul.msk.bf16.vlgmr.msrb.gmra.mxu2 %vm11890_vm3, %v11899_v27  ;;  %v10500_v51 = vld [vmem:[#allocation7 + $0x74] sm:$0xf0]  ;;  %v3758_v26 = vsel %vm3694_vm5, %v3535_v7, %v3726_v22  ;;  %v10609_v7 = vld [vmem:[#allocation7 + $0x3e4] sm:$0xf]  ;;  %v9411_v22 = vld [vmem:[#allocation7 + $0x6b0] sm:$0xf0] }
 0x2d4   :  { %5655 = vmatpush.bf16.msra.mxu2 %v8822_v30  ;;  %v8618_v54 = vor.u32 %v10500_v51, %v8617_v36  ;;  %v10496_v30 = vld [vmem:[#allocation7 + $0x54] sm:$0xf0]  ;;  %v3854_v42 = vmul.f32 1.4285715, %v3758_v26  ;;  %v9059_v36 = vld [vmem:[#allocation7 + $0x3f0] sm:$0xf0] }
 0x2d5   :  { %5783 = vmatpush.bf16.msra.mxu1 %v8778_v56  ;;  %v10532_v56 = vld [vmem:[#allocation7 + $0x174] sm:$0xf0]  ;;  %v8602_v57 = vor.u32 %v10496_v30, %v8601_v43  ;;  %v10697_v51 = vld [vmem:[#allocation7 + $0x6a4] sm:$0xf]  ;;  %v9395_v30 = vld [vmem:[#allocation7 + $0x690] sm:$0xf0] }
 0x2d6   :  { %v8746_v9 = vor.u32 %v10532_v56, %v8745_v47  ;;  %v3536_v14 = vpop.f32.mrf.mxu0  ;;  %5598 = vmatpush.bf16.msrb.mxu3 %v9458_v37  ;;  %v9414_v47 = vor.u32 %v10697_v51, %v9411_v22  ;;  %v10492_v56 = vld [vmem:[#allocation7 + $0x34] sm:$0xf0]  ;;  %v10605_v37 = vld [vmem:[#allocation7 + $0x3c4] sm:$0xf]  ;;  %v9027_v22 = vld [vmem:[#allocation7 + $0x3b0] sm:$0xf0] }
 0x2d7   :  { %5765 = vmatpush.bf16.msra.mxu0 %v8634_v2  ;;  %v11927_v25 = vpop.f32.mrf.mxu2  ;;  %v11929_v1 = vpop.f32.mrf.mxu3  ;;  %v8729_v2 = vld [vmem:[#allocation7 + $0x148] sm:$0xf]  ;;  %v3537_v32 = vadd.f32 %v3536_v14, %v3518_v20  ;;  %v8714_v20 = vor.u32 %v10524_v24, %v8713_v21  ;;  %v9046_v26 = vor.u32 %v10605_v37, %v9043_v52  ;;  %v10488_v14 = vld [vmem:[#allocation7 + $0x14] sm:$0xf0] }
 0x2d8   :  { %5724 = vmatpush.bf16.msrb.mxu2 %v9446_v17  ;;  %v8730_v55 = vor.u32 %v10528_v5, %v8729_v2  ;;  %v10644_v21 = vld [vmem:[#allocation7 + $0x4f4] sm:$0xf0] }
 0x2d9   :  { %5784 = vmatpush.bf16.msra.mxu1 %v8762_v53  ;;  %v3549_v53 = vadd.f32 %v11848_v29, %v11915_v31  ;;  %v11933_v0 = vpop.f32.mrf.mxu1  ;;  %vm3702_vm5 = vcmp.ge.f32.partialorder %v3537_v32, 0.0  ;;  %v3734_v58 = vmul.f32 0.2, %v3537_v32  ;;  %v9062_v29 = vor.u32 %v10609_v7, %v9059_v36 }
 0x2da   :  { %9657 = vmatmul.msk.bf16.vlgmr.msrb.gmra.mxu0 %vm11741_vm9, %v11498_v38 }
 0x2db   :  { %5766 = vmatpush.bf16.msra.mxu0 %v8618_v54  ;;  %v3568_v17 = vadd.f32 %v11873_v18, %v3549_v53  ;;  %v8585_v54 = vld [vmem:[#allocation7 + $0x28] sm:$0xf]  ;;  %v3766_v45 = vsel %vm3702_vm5, %v3537_v32, %v3734_v58  ;;  %5667 = vmatpush.bf16.msra.mxu3 %v9062_v29  ;;  %vm11944_vm5 = vmpackc.low %vm3830_vm7, %vm3822_vm6  ;;  %v10520_v29 = vld [vmem:[#allocation7 + $0x114] sm:$0xf0] }
 0x2dc   :  { %5725 = vmatpush.bf16.msrb.mxu2 %v9430_v8  ;;  %v3862_v43 = vmul.f32 1.4285715, %v3766_v45  ;;  %v10693_v8 = vld [vmem:[#allocation7 + $0x684] sm:$0xf]  ;;  %v8569_v53 = vld [vmem:[#allocation7 + $0x8] sm:$0xf] }
 0x2dd   :  { %5785 = vmatpush.bf16.msra.mxu1 %v8746_v9  ;;  %v8586_v9 = vor.u32 %v10492_v56, %v8585_v54  ;;  %v9398_v36 = vor.u32 %v10693_v8, %v9395_v30  ;;  %v8570_v51 = vor.u32 %v10488_v14, %v8569_v53  ;;  %v8697_v58 = vld [vmem:[#allocation7 + $0x108] sm:$0xf]  ;;  %v3551_v54 = vadd.f32 %v11878_v10, %v11915_v31  ;;  %v10676_v10 = vld [vmem:[#allocation7 + $0x5f4] sm:$0xf0]  ;;  %v9363_v53 = vld [vmem:[#allocation7 + $0x650] sm:$0xf0] }
 0x2de   :  { %v3605_v32 = vpop.f32.mrf.mxu0  ;;  %v11949_v7 = vpack.c.bf16 %v3862_v43, %v3854_v42  ;;  %v8698_v62 = vor.u32 %v10520_v29, %v8697_v58  ;;  %v9379_v42 = vld [vmem:[#allocation7 + $0x670] sm:$0xf0]  ;;  %v10597_v43 = vld [vmem:[#allocation7 + $0x384] sm:$0xf]  ;;  %v9177_v14 = vld [vmem:[#allocation7 + $0x4c8] sm:$0xf] }
 0x2df   :  { %5767 = vmatpush.bf16.msra.mxu0 %v8602_v57  ;;  %v11937_v2 = vpop.f32.mrf.mxu2  ;;  %v11939_v18 = vpop.f32.mrf.mxu3  ;;  %v3587_v57 = vadd.f32 %v11875_v33, %v3568_v17  ;;  %5668 = vmatpush.bf16.msra.mxu3 %v9046_v26  ;;  %v9030_v33 = vor.u32 %v10601_v34, %v9027_v22  ;;  %v9193_v17 = vld [vmem:[#allocation7 + $0x4e8] sm:$0xf]  ;;  %v3570_v24 = vadd.f32 %v11895_v49, %v3551_v54  ;;  %v10685_v26 = vld [vmem:[#allocation7 + $0x644] sm:$0xf]  ;;  %v10672_v29 = vld [vmem:[#allocation7 + $0x5d4] sm:$0xf0] }
 0x2e0   :  { %5726 = vmatpush.bf16.msrb.mxu2 %v9414_v47  ;;  %v10689_v47 = vld [vmem:[#allocation7 + $0x664] sm:$0xf]  ;;  %9663 = vmatmul.msk.bf16.vlgmr.msrb.gmra.mxu1 %vm11756_vm10, %v11760_v12  ;;  %v9194_v45 = vor.u32 %v10644_v21, %v9193_v17  ;;  %v9305_v58 = vld [vmem:[#allocation7 + $0x5c8] sm:$0xf] }
 0x2e1   :  { %5786 = vmatpush.bf16.msra.mxu1 %v8730_v55  ;;  %v3624_v55 = vpop.f32.mrf.mxu1  ;;  %v3606_v56 = vadd.f32 %v3605_v32, %v3587_v57  ;;  %v9382_v37 = vor.u32 %v10689_v47, %v9379_v42  ;;  %v10640_v57 = vld [vmem:[#allocation7 + $0x4d4] sm:$0xf0]  ;;  %v3554_v32 = vadd.f32 %v11901_v41, %v11915_v31  ;;  %v9306_v47 = vor.u32 %v10672_v29, %v9305_v58  ;;  %v8995_v41 = vld [vmem:[#allocation7 + $0x370] sm:$0xf0]  ;;  %v10681_v17 = vld [vmem:[#allocation7 + $0x624] sm:$0xf] }
 0x2e2   :  { %v10632_v29 = vld [vmem:[#allocation7 + $0x494] sm:$0xf0] }
 0x2e3   :  { %5768 = vmatpush.bf16.msra.mxu0 %v8586_v9  ;;  %9624 = vmatmul.msk.bf16.gmra.mxu2 %vm11944_vm5, %v11949_v7  ;;  %v9321_v9 = vld [vmem:[#allocation7 + $0x5e8] sm:$0xf]  ;;  %v3625_v8 = vadd.f32 %v3624_v55, %v3606_v56  ;;  %v9366_v55 = vor.u32 %v10685_v26, %v9363_v53  ;;  %v10593_v56 = vld [vmem:[#allocation7 + $0x364] sm:$0xf]  ;;  %v3573_v21 = vadd.f32 %v11927_v25, %v3554_v32  ;;  %v10668_v26 = vld [vmem:[#allocation7 + $0x5b4] sm:$0xf0] }
 0x2e4   :  { %5727 = vmatpush.bf16.msrb.mxu2 %v9398_v36  ;;  %v9322_v52 = vor.u32 %v10676_v10, %v9321_v9  ;;  %5669 = vmatpush.bf16.msra.mxu3 %v9030_v33  ;;  %v9347_v9 = vld [vmem:[#allocation7 + $0x630] sm:$0xf0]  ;;  %v9161_v10 = vld [vmem:[#allocation7 + $0x4a8] sm:$0xf] }
 0x2e5   :  { %5787 = vmatpush.bf16.msra.mxu1 %v8714_v20  ;;  %v9011_v20 = vld [vmem:[#allocation7 + $0x390] sm:$0xf0] }
 0x2e6   :  { %v9014_v30 = vor.u32 %v10597_v43, %v9011_v20  ;;  %v3607_v22 = vpop.f32.mrf.mxu0  ;;  %v9289_v20 = vld [vmem:[#allocation7 + $0x5a8] sm:$0xf]  ;;  %v9331_v32 = vld [vmem:[#allocation7 + $0x610] sm:$0xf0] }
 0x2e7   :  { %5769 = vmatpush.bf16.msra.mxu0 %v8570_v51  ;;  %v3643_v49 = vpop.f32.mrf.mxu2  ;;  %v3662_v36 = vpop.f32.mrf.mxu3  ;;  %v9178_v51 = vor.u32 %v10640_v57, %v9177_v14  ;;  %v9290_v53 = vor.u32 %v10668_v26, %v9289_v20  ;;  %v10677_v57 = vld [vmem:[#allocation7 + $0x604] sm:$0xf]  ;;  %v10628_v20 = vld [vmem:[#allocation7 + $0x474] sm:$0xf0]  ;;  %v9257_v26 = vld [vmem:[#allocation7 + $0x568] sm:$0xf] }
 0x2e8   :  { %v3644_v34 = vadd.f32 %v3643_v49, %v3625_v8  ;;  %5728 = vmatpush.bf16.msrb.mxu2 %v9382_v37  ;;  %5670 = vmatpush.bf16.msra.mxu3 %v9014_v30  ;;  %v11970_v37 = vld [vmem:[%s12579_s3 + $0x38] sm:$0xff]  ;;  %v10589_v8 = vld [vmem:[#allocation7 + $0x344] sm:$0xf]  ;;  %v9145_v49 = vld [vmem:[#allocation7 + $0x488] sm:$0xf] }
 0x2e9   :  { %5788 = vmatpush.bf16.msra.mxu1 %v8698_v62  ;;  %v3589_v62 = vadd.f32 %v11897_v6, %v3570_v24  ;;  %v3626_v54 = vpop.f32.mrf.mxu1  ;;  %v10636_v6 = vld [vmem:[#allocation7 + $0x4b4] sm:$0xf0]  ;;  %v8979_v30 = vld [vmem:[#allocation7 + $0x350] sm:$0xf0] }
 0x2ea   :  { %v3663_v33 = vadd.f32 %v3662_v36, %v3644_v34  ;;  %v9162_v43 = vor.u32 %v10636_v6, %v9161_v10  ;;  %v8982_v14 = vor.u32 %v10589_v8, %v8979_v30  ;;  %v3592_v36 = vadd.f32 %v11929_v1, %v3573_v21  ;;  %v8963_v21 = vld [vmem:[#allocation7 + $0x330] sm:$0xf0]  ;;  %9660 = vmatmul.msk.bf16.gmra.mxu0 %vm11803_vm2, %v11519_v3  ;;  %v10660_v8 = vld [vmem:[#allocation7 + $0x574] sm:$0xf0] }
 0x2eb   :  { %5838 = vmatpush.bf16.msrb.mxu0 %v9194_v45  ;;  %v3608_v42 = vadd.f32 %v3607_v22, %v3589_v62  ;;  %v8998_v45 = vor.u32 %v10593_v56, %v8995_v41  ;;  %v9273_v62 = vld [vmem:[#allocation7 + $0x588] sm:$0xf]  ;;  %v10664_v56 = vld [vmem:[#allocation7 + $0x594] sm:$0xf0]  ;;  %v3556_v1 = vadd.f32 %v11933_v0, %v11915_v31 }
 0x2ec   :  { %vm3679_vm6 = vcmp.ge.f32.partialorder %v3663_v33, 0.0  ;;  %v3711_v24 = vmul.f32 0.2, %v3663_v33  ;;  %5729 = vmatpush.bf16.msrb.mxu2 %v9366_v55  ;;  %v3783_v55 = vld [vmem:[%s12579_s3 + $0x78] sm:$0xff]  ;;  %v9274_v41 = vor.u32 %v10664_v56, %v9273_v62 }
 0x2ed   :  { %5857 = vmatpush.bf16.msrb.mxu1 %v9322_v52  ;;  %v9350_v52 = vor.u32 %v10681_v17, %v9347_v9  ;;  %5671 = vmatpush.bf16.msra.mxu3 %v8998_v45  ;;  %v3627_v25 = vadd.f32 %v3626_v54, %v3608_v42  ;;  %v9146_v54 = vor.u32 %v10632_v29, %v9145_v49  ;;  %v10585_v17 = vld [vmem:[#allocation7 + $0x324] sm:$0xf]  ;;  %v8937_v45 = vld [vmem:[#allocation7 + $0x2e8] sm:$0xf]  ;;  %v10624_v29 = vld [vmem:[#allocation7 + $0x454] sm:$0xf0] }
 0x2ee   :  { %v3610_v22 = vpop.f32.mrf.mxu0  ;;  %v3743_v42 = vsel %vm3679_vm6, %v3663_v33, %v3711_v24  ;;  %v8966_v6 = vor.u32 %v10585_v17, %v8963_v21  ;;  %v3575_v31 = vadd.f32 %v11937_v2, %v3556_v1  ;;  %v9258_v2 = vor.u32 %v10660_v8, %v9257_v26  ;;  %v10656_v1 = vld [vmem:[#allocation7 + $0x554] sm:$0xf0]  ;;  %v12006_v8 = vld [vmem:[%s12579_s3 + $0xb8] sm:$0xff] }
 0x2ef   :  { %5839 = vmatpush.bf16.msrb.mxu0 %v9178_v51  ;;  %v3645_v51 = vpop.f32.mrf.mxu2  ;;  %v3664_v58 = vpop.f32.mrf.mxu3  ;;  %v3611_v10 = vadd.f32 %v3610_v22, %v3592_v36  ;;  %v3839_v30 = vmul.f32 1.4285715, %v3743_v42  ;;  %vm12633_vm6 = vcmp.ge.f32.partialorder %v11970_v37, 0.3  ;;  %v10620_v37 = vld [vmem:[#allocation7 + $0x434] sm:$0xf0] }
 0x2f0   :  { %v3646_v34 = vadd.f32 %v3645_v51, %v3627_v25  ;;  %5730 = vmatpush.bf16.msrb.mxu2 %v9350_v52  ;;  %v10580_v52 = vld [vmem:[#allocation7 + $0x2f4] sm:$0xf0]  ;;  %9666 = vmatmul.msk.bf16.gmra.mxu1 %vm11813_vm4, %v11817_v44  ;;  %v3594_v42 = vadd.f32 %v11939_v18, %v3575_v31  ;;  %v9097_v31 = vld [vmem:[#allocation7 + $0x428] sm:$0xf] }
 0x2f1   :  { %5858 = vmatpush.bf16.msrb.mxu1 %v9306_v47  ;;  %v9334_v47 = vor.u32 %v10677_v57, %v9331_v32  ;;  %5672 = vmatpush.bf16.msra.mxu3 %v8982_v14  ;;  %v3629_v0 = vpop.f32.mrf.mxu1  ;;  %v8938_v33 = vor.u32 %v10580_v52, %v8937_v45  ;;  %v8947_v14 = vld [vmem:[#allocation7 + $0x310] sm:$0xf0]  ;;  %v8921_v57 = vld [vmem:[#allocation7 + $0x2c8] sm:$0xf]  ;;  %v10576_v51 = vld [vmem:[#allocation7 + $0x2d4] sm:$0xf0] }
 0x2f2   :  { %v3665_v9 = vadd.f32 %v3664_v58, %v3646_v34  ;;  %v3630_v49 = vadd.f32 %v3629_v0, %v3611_v10  ;;  %v9113_v58 = vld [vmem:[#allocation7 + $0x448] sm:$0xf]  ;;  %v10737_v10 = vld [vmem:[#allocation7 + $0x7e4] sm:$0xf]  ;;  %v9098_v0 = vor.u32 %v10620_v37, %v9097_v31  ;;  %v10546_v37 = vld [vmem:[#allocation7 + $0x1ec] sm:$0xf] }
 0x2f3   :  { %5840 = vmatpush.bf16.msrb.mxu0 %v9162_v43  ;;  %9645 = vmatmul.msk.bf16.vlgmr.msra.gmra.mxu2 %vm11600_vm15, %v11418_v63  ;;  %v9129_v43 = vld [vmem:[#allocation7 + $0x468] sm:$0xf]  ;;  %v9114_v56 = vor.u32 %v10624_v29, %v9113_v58 }
 0x2f4   :  { %v9130_v24 = vor.u32 %v10628_v20, %v9129_v43  ;;  %vm3687_vm7 = vcmp.ge.f32.partialorder %v3665_v9, 0.0  ;;  %v3719_v25 = vmul.f32 0.2, %v3665_v9  ;;  %5731 = vmatpush.bf16.msrb.mxu2 %v9334_v47  ;;  %v9241_v47 = vld [vmem:[#allocation7 + $0x548] sm:$0xf] }
 0x2f5   :  { %5859 = vmatpush.bf16.msrb.mxu1 %v9290_v53  ;;  %5673 = vmatpush.bf16.msra.mxu3 %v8966_v6  ;;  %v10581_v53 = vld [vmem:[#allocation7 + $0x304] sm:$0xf]  ;;  %v9242_v45 = vor.u32 %v10656_v1, %v9241_v47  ;;  %v9571_v6 = vld [vmem:[#allocation7 + $0x7f0] sm:$0xf0]  ;;  %v8905_v52 = vld [vmem:[#allocation7 + $0x2a8] sm:$0xf] }
 0x2f6   :  { %v3751_v32 = vsel %vm3687_vm7, %v3665_v9, %v3719_v25  ;;  %v8950_v36 = vor.u32 %v10581_v53, %v8947_v14  ;;  %v3612_v17 = vpop.f32.mrf.mxu0  ;;  %vm12634_vm7 = vcmp.ge.f32.partialorder %v3783_v55, 0.3  ;;  %v9574_v18 = vor.u32 %v10737_v10, %v9571_v6  ;;  %v10572_v20 = vld [vmem:[#allocation7 + $0x2b4] sm:$0xf0]  ;;  %v9555_v53 = vld [vmem:[#allocation7 + $0x7d0] sm:$0xf0] }
 0x2f7   :  { %5841 = vmatpush.bf16.msrb.mxu0 %v9146_v54  ;;  %v3847_v62 = vmul.f32 1.4285715, %v3751_v32  ;;  %v3648_v34 = vpop.f32.mrf.mxu2  ;;  %v3667_v22 = vpop.f32.mrf.mxu3  ;;  %v8922_v54 = vor.u32 %v10576_v51, %v8921_v57  ;;  %vm11994_vm4 = vmpackc.low %vm12634_vm7, %vm12633_vm6  ;;  %v3613_v43 = vadd.f32 %v3612_v17, %v3594_v42  ;;  %v8906_v55 = vor.u32 %v10572_v20, %v8905_v52  ;;  %v8889_v14 = vld [vmem:[#allocation7 + $0x288] sm:$0xf]  ;;  %v10616_v51 = vld [vmem:[#allocation7 + $0x414] sm:$0xf0] }
 0x2f8   :  { %5800 = vmatpush.bf16.msra.mxu2 %v8938_v33  ;;  %v9225_v33 = vld [vmem:[#allocation7 + $0x528] sm:$0xf]  ;;  %v3799_v47 = vld [vmem:[%s12579_s3 + $0xf8] sm:$0xff]  ;;  %v10564_v52 = vld [vmem:[#allocation7 + $0x274] sm:$0xf0] }
 0x2f9   :  { %5860 = vmatpush.bf16.msrb.mxu1 %v9274_v41  ;;  %v3649_v41 = vadd.f32 %v3648_v34, %v3630_v49  ;;  %v11998_v9 = vpack.c.bf16 %v3847_v62, %v3839_v30  ;;  %5674 = vmatpush.bf16.msra.mxu3 %v8950_v36  ;;  %v3631_v25 = vpop.f32.mrf.mxu1  ;;  %v10568_v49 = vld [vmem:[#allocation7 + $0x294] sm:$0xf0]  ;;  %v9081_v36 = vld [vmem:[#allocation7 + $0x408] sm:$0xf]  ;;  %v9539_v17 = vld [vmem:[#allocation7 + $0x7b0] sm:$0xf0] }
 0x2fa   :  { %v3632_v57 = vadd.f32 %v3631_v25, %v3613_v43  ;;  %v8890_v29 = vor.u32 %v10568_v49, %v8889_v14  ;;  %v9082_v62 = vor.u32 %v10616_v51, %v9081_v36  ;;  %v9209_v34 = vld [vmem:[#allocation7 + $0x508] sm:$0xf]  ;;  %v10514_v43 = vld [vmem:[#allocation7 + $0xec] sm:$0xf]  ;;  %9681 = vmatmul.msk.bf16.vlgmr.msra.gmra.mxu0 %vm11575_vm11, %v11308_v13  ;;  %v9523_v25 = vld [vmem:[#allocation7 + $0x790] sm:$0xf0] }
 0x2fb   :  { %5842 = vmatpush.bf16.msrb.mxu0 %v9130_v24  ;;  %9627 = vmatmul.msk.bf16.vlgmr.msrb.gmra.mxu3 %vm11994_vm4, %v11998_v9  ;;  %v10652_v24 = vld [vmem:[#allocation7 + $0x534] sm:$0xf0]  ;;  %v3668_v26 = vadd.f32 %v3667_v22, %v3649_v41  ;;  %v10729_v41 = vld [vmem:[#allocation7 + $0x7a4] sm:$0xf]  ;;  %v10510_v49 = vld [vmem:[#allocation7 + $0xcc] sm:$0xf] }
 0x2fc   :  { %5801 = vmatpush.bf16.msra.mxu2 %v8922_v54  ;;  %v9226_v30 = vor.u32 %v10652_v24, %v9225_v33  ;;  %v10648_v22 = vld [vmem:[#allocation7 + $0x514] sm:$0xf0]  ;;  %v9542_v6 = vor.u32 %v10729_v41, %v9539_v17  ;;  %v8667_v36 = vld [vmem:[#allocation7 + $0xd8] sm:$0xf0]  ;;  %v10542_v51 = vld [vmem:[#allocation7 + $0x1cc] sm:$0xf] }
 0x2fd   :  { %5861 = vmatpush.bf16.msrb.mxu1 %v9258_v2  ;;  %5743 = vmatpush.bf16.msrb.mxu3 %v9574_v18  ;;  %v10733_v2 = vld [vmem:[#allocation7 + $0x7c4] sm:$0xf]  ;;  %vm3695_vm7 = vcmp.ge.f32.partialorder %v3668_v26, 0.0  ;;  %v3727_v54 = vmul.f32 0.2, %v3668_v26  ;;  %v9210_v1 = vor.u32 %v10648_v22, %v9209_v34 }
 0x2fe   :  { %v9558_v32 = vor.u32 %v10733_v2, %v9555_v53  ;;  %v8683_v18 = vld [vmem:[#allocation7 + $0xf8] sm:$0xf0]  ;;  %v8857_v53 = vld [vmem:[#allocation7 + $0x248] sm:$0xf]  ;;  %v10560_v14 = vld [vmem:[#allocation7 + $0x254] sm:$0xf0] }
 0x2ff   :  { %5843 = vmatpush.bf16.msrb.mxu0 %v9114_v56  ;;  %v3650_v58 = vpop.f32.mrf.mxu2  ;;  %v3669_v42 = vpop.f32.mrf.mxu3  ;;  %v8686_v31 = vor.u32 %v10514_v43, %v8683_v18  ;;  %v3759_v33 = vsel %vm3695_vm7, %v3668_v26, %v3727_v54  ;;  %vm12637_vm7 = vcmp.ge.f32.partialorder %v12006_v8, 0.3  ;;  %v10556_v17 = vld [vmem:[#allocation7 + $0x234] sm:$0xf0]  ;;  %v10717_v43 = vld [vmem:[#allocation7 + $0x744] sm:$0xf] }
 0x300   :  { %5802 = vmatpush.bf16.msra.mxu2 %v8906_v55  ;;  %v3651_v56 = vadd.f32 %v3650_v58, %v3632_v57  ;;  %9687 = vmatmul.msk.bf16.vlgmr.msra.gmra.mxu1 %vm11589_vm14, %v11364_v23  ;;  %v8811_v55 = vld [vmem:[#allocation7 + $0x1f8] sm:$0xf0]  ;;  %v3855_v58 = vmul.f32 1.4285715, %v3759_v33  ;;  %v10502_v33 = vld [vmem:[#allocation7 + $0x8c] sm:$0xf] }
 0x301   :  { %5862 = vmatpush.bf16.msrb.mxu1 %v9242_v45  ;;  %5744 = vmatpush.bf16.msrb.mxu3 %v9558_v32  ;;  %v8873_v45 = vld [vmem:[#allocation7 + $0x268] sm:$0xf]  ;;  %v8858_v32 = vor.u32 %v10560_v14, %v8857_v53  ;;  %v10713_v14 = vld [vmem:[#allocation7 + $0x724] sm:$0xf]  ;;  %v10788_v34 = vld [vmem:[#allocation10 + $0x174] sm:$0xf0] }
 0x302   :  { %v3670_v10 = vadd.f32 %v3669_v42, %v3651_v56  ;;  %v8874_v20 = vor.u32 %v10564_v52, %v8873_v45  ;;  %v10721_v56 = vld [vmem:[#allocation7 + $0x764] sm:$0xf]  ;;  %v8841_v42 = vld [vmem:[#allocation7 + $0x228] sm:$0xf]  ;;  %v10506_v45 = vld [vmem:[#allocation7 + $0xac] sm:$0xf] }
 0x303   :  { %5844 = vmatpush.bf16.msrb.mxu0 %v9098_v0  ;;  %9648 = vmatmul.msk.bf16.gmra.mxu2 %vm11685_vm12, %v11433_v50  ;;  %v10725_v0 = vld [vmem:[#allocation7 + $0x784] sm:$0xf]  ;;  %vm3831_vm12 = vcmp.ge.f32.partialorder %v3799_v47, 0.3  ;;  %v8842_v8 = vor.u32 %v10556_v17, %v8841_v42  ;;  %v8779_v52 = vld [vmem:[#allocation7 + $0x1b8] sm:$0xf0] }
 0x304   :  { %5803 = vmatpush.bf16.msra.mxu2 %v8890_v29  ;;  %vm3703_vm6 = vcmp.ge.f32.partialorder %v3670_v10, 0.0  ;;  %v3735_v24 = vmul.f32 0.2, %v3670_v10  ;;  %v9526_v2 = vor.u32 %v10725_v0, %v9523_v25  ;;  %v8670_v29 = vor.u32 %v10510_v49, %v8667_v36  ;;  %vm12025_vm14 = vmpackc.low %vm3831_vm12, %vm12637_vm7  ;;  %v10708_v36 = vld [vmem:[#allocation7 + $0x6f4] sm:$0xf0] }
 0x305   :  { %5863 = vmatpush.bf16.msrb.mxu1 %v9226_v30  ;;  %5745 = vmatpush.bf16.msrb.mxu3 %v9542_v6  ;;  %v8814_v30 = vor.u32 %v10546_v37, %v8811_v55  ;;  %v10538_v6 = vld [vmem:[#allocation7 + $0x1ac] sm:$0xf]  ;;  %v10552_v37 = vld [vmem:[#allocation7 + $0x214] sm:$0xf0]  ;;  %v9459_v42 = vld [vmem:[#allocation7 + $0x710] sm:$0xf0]  ;;  %vm12643_vm12 = vnez %v12628_v46  ;;  %vm12645_vm7 = vnez %v12606_v15 }
 0x306   :  { %v3767_v57 = vsel %vm3703_vm6, %v3670_v10, %v3735_v24  ;;  %v8651_v10 = vld [vmem:[#allocation7 + $0xb8] sm:$0xf0]  ;;  %v8782_v18 = vor.u32 %v10538_v6, %v8779_v52  ;;  %v10704_v17 = vld [vmem:[#allocation7 + $0x6d4] sm:$0xf0]  ;;  %v10526_v52 = vld [vmem:[#allocation7 + $0x14c] sm:$0xf]  ;;  %vm12644_vm6 = vnez %v12617_v16 }
 0x307   :  { %5845 = vmatpush.bf16.msrb.mxu0 %v9082_v62  ;;  %v3863_v26 = vmul.f32 1.4285715, %v3767_v57  ;;  %v8795_v62 = vld [vmem:[#allocation7 + $0x1d8] sm:$0xf0]  ;;  %v8654_v47 = vor.u32 %v10506_v45, %v8651_v10  ;;  %v9475_v57 = vld [vmem:[#allocation7 + $0x730] sm:$0xf0] }
 0x308   :  { %5804 = vmatpush.bf16.msra.mxu2 %v8874_v20  ;;  %v8798_v22 = vor.u32 %v10542_v51, %v8795_v62  ;;  %v9491_v20 = vld [vmem:[#allocation7 + $0x750] sm:$0xf0]  ;;  %v8635_v24 = vld [vmem:[#allocation7 + $0x98] sm:$0xf0]  ;;  %v9478_v49 = vor.u32 %v10713_v14, %v9475_v57  ;;  %v10498_v51 = vld [vmem:[#allocation7 + $0x6c] sm:$0xf] }
 0x309   :  { %5864 = vmatpush.bf16.msrb.mxu1 %v9210_v1  ;;  %5746 = vmatpush.bf16.msrb.mxu3 %v9526_v2  ;;  %v12029_v54 = vpack.c.bf16 %v3863_v26, %v3855_v58  ;;  %v9507_v1 = vld [vmem:[#allocation7 + $0x770] sm:$0xf0]  ;;  %v9494_v55 = vor.u32 %v10717_v43, %v9491_v20  ;;  %v8638_v25 = vor.u32 %v10502_v33, %v8635_v24  ;;  %v8763_v2 = vld [vmem:[#allocation7 + $0x198] sm:$0xf0]  ;;  %v10530_v62 = vld [vmem:[#allocation7 + $0x16c] sm:$0xf] }
 0x30a   :  { %v9510_v41 = vor.u32 %v10721_v56, %v9507_v1  ;;  %v8619_v58 = vld [vmem:[#allocation7 + $0x78] sm:$0xf0]  ;;  %9684 = vmatmul.msk.bf16.gmra.mxu0 %vm11660_vm0, %v11328_v61  ;;  %v10709_v56 = vld [vmem:[#allocation7 + $0x704] sm:$0xf]  ;;  %v10700_v24 = vld [vmem:[#allocation7 + $0x6b4] sm:$0xf0] }
 0x30b   :  { %5914 = vmatpush.bf16.msra.mxu0 %v8686_v31  ;;  %9630 = vmatmul.msk.bf16.gmra.mxu3 %vm12025_vm14, %v12029_v54  ;;  %v8825_v31 = vld [vmem:[#allocation7 + $0x208] sm:$0xf]  ;;  %v9462_v45 = vor.u32 %v10709_v56, %v9459_v42  ;;  %v8603_v6 = vld [vmem:[#allocation7 + $0x58] sm:$0xf0]  ;;  %v10522_v57 = vld [vmem:[#allocation7 + $0x12c] sm:$0xf] }
 0x30c   :  { %5805 = vmatpush.bf16.msra.mxu2 %v8858_v32  ;;  %v8826_v0 = vor.u32 %v10552_v37, %v8825_v31  ;;  %v9449_v32 = vld [vmem:[#allocation7 + $0x6e8] sm:$0xf]  ;;  %v10612_v37 = vld [vmem:[#allocation7 + $0x3f4] sm:$0xf0]  ;;  %v8571_v56 = vld [vmem:[#allocation7 + $0x18] sm:$0xf0] }
 0x30d   :  { %5933 = vmatpush.bf16.msra.mxu1 %v8814_v30  ;;  %5747 = vmatpush.bf16.msrb.mxu3 %v9510_v41  ;;  %v10534_v30 = vld [vmem:[#allocation7 + $0x18c] sm:$0xf]  ;;  %v9450_v26 = vor.u32 %v10708_v36, %v9449_v32  ;;  %v9433_v41 = vld [vmem:[#allocation7 + $0x6c8] sm:$0xf]  ;;  %v8715_v32 = vld [vmem:[#allocation7 + $0x138] sm:$0xf0] }
 0x30e   :  { %v8766_v53 = vor.u32 %v10534_v30, %v8763_v2  ;;  %v9434_v10 = vor.u32 %v10704_v17, %v9433_v41  ;;  %v9065_v31 = vld [vmem:[#allocation7 + $0x3e8] sm:$0xf]  ;;  %v10490_v30 = vld [vmem:[#allocation7 + $0x2c] sm:$0xf]  ;;  %v8718_v36 = vor.u32 %v10522_v57, %v8715_v32  ;;  %v8699_v41 = vld [vmem:[#allocation7 + $0x118] sm:$0xf0] }
 0x30f   :  { %5915 = vmatpush.bf16.msra.mxu0 %v8670_v29  ;;  %v8622_v29 = vor.u32 %v10498_v51, %v8619_v58  ;;  %v9066_v33 = vor.u32 %v10612_v37, %v9065_v31  ;;  %v10608_v51 = vld [vmem:[#allocation7 + $0x3d4] sm:$0xf0]  ;;  %v9401_v58 = vld [vmem:[#allocation7 + $0x688] sm:$0xf]  ;;  %v9857_v2 = vld [vmem:[#allocation10 + $0xa0] sm:$0xf] }
 0x310   :  { %5806 = vmatpush.bf16.msra.mxu2 %v8842_v8  ;;  %9690 = vmatmul.msk.bf16.gmra.mxu1 %vm11666_vm8, %v11381_v11  ;;  %v12043_v8 = vpop.f32.mrf.mxu0  ;;  %v10688_v57 = vld [vmem:[#allocation7 + $0x654] sm:$0xf0] }
 0x311   :  { %5934 = vmatpush.bf16.msra.mxu1 %v8798_v22  ;;  %5748 = vmatpush.bf16.msrb.mxu3 %v9494_v55  ;;  %v8747_v22 = vld [vmem:[#allocation7 + $0x178] sm:$0xf0]  ;;  %v9417_v55 = vld [vmem:[#allocation7 + $0x6a8] sm:$0xf] }
 0x312   :  { %v8750_v1 = vor.u32 %v10530_v62, %v8747_v22  ;;  %v10486_v22 = vld [vmem:[#allocation7 + $0xc] sm:$0xf] }
 0x313   :  { %5916 = vmatpush.bf16.msra.mxu0 %v8654_v47  ;;  %9669 = vmatmul.msk.bf16.vlgmr.msrb.gmra.mxu2 %vm11890_vm3, %v11899_v27  ;;  %v10494_v47 = vld [vmem:[#allocation7 + $0x4c] sm:$0xf]  ;;  %v8574_v42 = vor.u32 %v10486_v22, %v8571_v56  ;;  %v9001_v22 = vld [vmem:[#allocation7 + $0x368] sm:$0xf]  ;;  %v10596_v56 = vld [vmem:[#allocation7 + $0x374] sm:$0xf0] }
 0x314   :  { %5807 = vmatpush.bf16.msra.mxu2 %v8826_v0  ;;  %v8606_v43 = vor.u32 %v10494_v47, %v8603_v6  ;;  %v12045_v0 = vpop.f32.mrf.mxu1  ;;  %v10604_v47 = vld [vmem:[#allocation7 + $0x3b4] sm:$0xf0]  ;;  %v9385_v6 = vld [vmem:[#allocation7 + $0x668] sm:$0xf] }
 0x315   :  { %5935 = vmatpush.bf16.msra.mxu1 %v8782_v18  ;;  %5749 = vmatpush.bf16.msrb.mxu3 %v9478_v49  ;;  %v8731_v18 = vld [vmem:[#allocation7 + $0x158] sm:$0xf0]  ;;  %v9049_v49 = vld [vmem:[#allocation7 + $0x3c8] sm:$0xf] }
 0x316   :  { %v8734_v20 = vor.u32 %v10526_v52, %v8731_v18  ;;  %v10642_v18 = vld [vmem:[#allocation7 + $0x4ec] sm:$0xf] }
 0x317   :  { %5917 = vmatpush.bf16.msra.mxu0 %v8638_v25  ;;  %v8587_v25 = vld [vmem:[#allocation7 + $0x38] sm:$0xf0] }
 0x318   :  { %5876 = vmatpush.bf16.msrb.mxu2 %v9450_v26  ;;  %v8590_v14 = vor.u32 %v10490_v30, %v8587_v25  ;;  %v10696_v26 = vld [vmem:[#allocation7 + $0x694] sm:$0xf0]  ;;  %v12050_v17 = vpop.f32.mrf.mxu0 }
 0x319   :  { %5936 = vmatpush.bf16.msra.mxu1 %v8766_v53  ;;  %5750 = vmatpush.bf16.msrb.mxu3 %v9462_v45  ;;  %v9418_v53 = vor.u32 %v10700_v24, %v9417_v55  ;;  %v9402_v62 = vor.u32 %v10696_v26, %v9401_v58  ;;  %v10674_v55 = vld [vmem:[#allocation7 + $0x5ec] sm:$0xf]  ;;  %v9017_v24 = vld [vmem:[#allocation7 + $0x388] sm:$0xf] }
 0x31a   :  { %9705 = vmatmul.msk.bf16.vlgmr.msrb.gmra.mxu0 %vm11741_vm9, %v11498_v38  ;;  %v10670_v58 = vld [vmem:[#allocation7 + $0x5cc] sm:$0xf] }
 0x31b   :  { %5918 = vmatpush.bf16.msra.mxu0 %v8622_v29  ;;  %9651 = vmatmul.msk.bf16.vlgmr.msra.gmra.mxu3 %vm11607_vm1, %v11450_v28  ;;  %v9050_v29 = vor.u32 %v10608_v51, %v9049_v49  ;;  %v9179_v51 = vld [vmem:[#allocation7 + $0x4d8] sm:$0xf0] }
 0x31c   :  { %5877 = vmatpush.bf16.msrb.mxu2 %v9434_v10  ;;  %v9033_v10 = vld [vmem:[#allocation7 + $0x3a8] sm:$0xf]  ;;  %v12061_v30 = vpop.f32.mrf.mxu1 }
 0x31d   :  { %5937 = vmatpush.bf16.msra.mxu1 %v8750_v1  ;;  %5819 = vmatpush.bf16.msra.mxu3 %v9066_v33  ;;  %v10518_v1 = vld [vmem:[#allocation7 + $0x10c] sm:$0xf]  ;;  %v9034_v52 = vor.u32 %v10604_v47, %v9033_v10  ;;  %v9323_v33 = vld [vmem:[#allocation7 + $0x5f8] sm:$0xf0] }
 0x31e   :  { %v8702_v45 = vor.u32 %v10518_v1, %v8699_v41  ;;  %v9326_v25 = vor.u32 %v10674_v55, %v9323_v33  ;;  %v9353_v1 = vld [vmem:[#allocation7 + $0x628] sm:$0xf]  ;;  %v9002_v41 = vor.u32 %v10596_v56, %v9001_v22  ;;  %v10634_v10 = vld [vmem:[#allocation7 + $0x4ac] sm:$0xf]  ;;  %v9163_v47 = vld [vmem:[#allocation7 + $0x4b8] sm:$0xf0] }
 0x31f   :  { %5919 = vmatpush.bf16.msra.mxu0 %v8606_v43  ;;  %v10692_v43 = vld [vmem:[#allocation7 + $0x674] sm:$0xf0]  ;;  %v10578_v56 = vld [vmem:[#allocation7 + $0x2ec] sm:$0xf] }
 0x320   :  { %5878 = vmatpush.bf16.msrb.mxu2 %v9418_v53  ;;  %9711 = vmatmul.msk.bf16.vlgmr.msrb.gmra.mxu1 %vm11756_vm10, %v11760_v12  ;;  %v9386_v31 = vor.u32 %v10692_v43, %v9385_v6  ;;  %v10600_v53 = vld [vmem:[#allocation7 + $0x394] sm:$0xf0]  ;;  %v12641_v6 = vld [vmem:[#allocation18_spill] sm:$0xff] }
 0x321   :  { %5938 = vmatpush.bf16.msra.mxu1 %v8734_v20  ;;  %5820 = vmatpush.bf16.msra.mxu3 %v9050_v29  ;;  %v9195_v20 = vld [vmem:[#allocation7 + $0x4f8] sm:$0xf0]  ;;  %v9018_v32 = vor.u32 %v10600_v53, %v9017_v24  ;;  %v10592_v33 = vld [vmem:[#allocation7 + $0x354] sm:$0xf0]  ;;  %v9337_v24 = vld [vmem:[#allocation7 + $0x608] sm:$0xf] }
 0x322   :  { %v9198_v37 = vor.u32 %v10642_v18, %v9195_v20  ;;  %v9307_v29 = vld [vmem:[#allocation7 + $0x5d8] sm:$0xf0]  ;;  %v9166_v18 = vor.u32 %v10634_v10, %v9163_v47  ;;  %v10666_v20 = vld [vmem:[#allocation7 + $0x5ac] sm:$0xf]  ;;  %v10588_v22 = vld [vmem:[#allocation7 + $0x334] sm:$0xf0] }
 0x323   :  { %5920 = vmatpush.bf16.msra.mxu0 %v8590_v14  ;;  %9672 = vmatmul.msk.bf16.gmra.mxu2 %vm11944_vm5, %v11949_v7  ;;  %v9369_v14 = vld [vmem:[#allocation7 + $0x648] sm:$0xf]  ;;  %v9131_v10 = vld [vmem:[#allocation7 + $0x478] sm:$0xf0] }
 0x324   :  { %5879 = vmatpush.bf16.msrb.mxu2 %v9402_v62  ;;  %v9370_v49 = vor.u32 %v10688_v57, %v9369_v14  ;;  %v9310_v62 = vor.u32 %v10670_v58, %v9307_v29  ;;  %v12068_v57 = vpop.f32.mrf.mxu1 }
 0x325   :  { %5939 = vmatpush.bf16.msra.mxu1 %v8718_v36  ;;  %5821 = vmatpush.bf16.msra.mxu3 %v9034_v52  ;;  %v10638_v36 = vld [vmem:[#allocation7 + $0x4cc] sm:$0xf]  ;;  %v10755_v52 = vld [vmem:[#allocation10 + $0x74] sm:$0xf] }
 0x326   :  { %v9182_v26 = vor.u32 %v10638_v36, %v9179_v51  ;;  %v10662_v36 = vld [vmem:[#allocation7 + $0x58c] sm:$0xf]  ;;  %v12070_v51 = vpop.f32.mrf.mxu2 }
 0x327   :  { %5921 = vmatpush.bf16.msra.mxu0 %v8574_v42  ;;  %v12063_v42 = vpop.f32.mrf.mxu0 }
 0x328   :  { %5880 = vmatpush.bf16.msrb.mxu2 %v9386_v31  ;;  %v9291_v31 = vld [vmem:[#allocation7 + $0x5b8] sm:$0xf0] }
 0x329   :  { %5940 = vmatpush.bf16.msra.mxu1 %v8702_v45  ;;  %5822 = vmatpush.bf16.msra.mxu3 %v9018_v32  ;;  %v10684_v45 = vld [vmem:[#allocation7 + $0x634] sm:$0xf0]  ;;  %v9294_v55 = vor.u32 %v10666_v20, %v9291_v31  ;;  %v10630_v32 = vld [vmem:[#allocation7 + $0x48c] sm:$0xf]  ;;  %v9259_v20 = vld [vmem:[#allocation7 + $0x578] sm:$0xf0] }
 0x32a   :  { %v9354_v43 = vor.u32 %v10684_v45, %v9353_v1  ;;  %v10626_v45 = vld [vmem:[#allocation7 + $0x46c] sm:$0xf]  ;;  %9708 = vmatmul.msk.bf16.gmra.mxu0 %vm11803_vm2, %v11519_v3 }
 0x32b   :  { %5990 = vmatpush.bf16.msrb.mxu0 %v9198_v37  ;;  %9654 = vmatmul.msk.bf16.gmra.mxu3 %vm11694_vm13, %v12641_v6  ;;  %v8985_v37 = vld [vmem:[#allocation7 + $0x348] sm:$0xf] }
 0x32c   :  { %5881 = vmatpush.bf16.msrb.mxu2 %v9370_v49  ;;  %v8986_v53 = vor.u32 %v10592_v33, %v8985_v37  ;;  %v9147_v49 = vld [vmem:[#allocation7 + $0x498] sm:$0xf0]  ;;  %v10584_v33 = vld [vmem:[#allocation7 + $0x314] sm:$0xf0] }
 0x32d   :  { %6009 = vmatpush.bf16.msrb.mxu1 %v9326_v25  ;;  %5823 = vmatpush.bf16.msra.mxu3 %v9002_v41  ;;  %v10680_v25 = vld [vmem:[#allocation7 + $0x614] sm:$0xf0]  ;;  %v9150_v58 = vor.u32 %v10630_v32, %v9147_v49  ;;  %v8939_v41 = vld [vmem:[#allocation7 + $0x2f8] sm:$0xf0] }
 0x32e   :  { %v9338_v14 = vor.u32 %v10680_v25, %v9337_v24  ;;  %v8942_v47 = vor.u32 %v10578_v56, %v8939_v41  ;;  %v10574_v24 = vld [vmem:[#allocation7 + $0x2cc] sm:$0xf]  ;;  %v9115_v32 = vld [vmem:[#allocation7 + $0x458] sm:$0xf0]  ;;  %v9577_v56 = vld [vmem:[#allocation7 + $0x7e8] sm:$0xf] }
 0x32f   :  { %5991 = vmatpush.bf16.msrb.mxu0 %v9182_v26  ;;  %v9275_v26 = vld [vmem:[#allocation7 + $0x598] sm:$0xf0]  ;;  %v12081_v31 = vpop.f32.mrf.mxu0  ;;  %v10570_v41 = vld [vmem:[#allocation7 + $0x2ac] sm:$0xf] }
 0x330   :  { %5882 = vmatpush.bf16.msrb.mxu2 %v9354_v43  ;;  %v9278_v29 = vor.u32 %v10662_v36, %v9275_v26  ;;  %9714 = vmatmul.msk.bf16.gmra.mxu1 %vm12643_vm12, %v11817_v44  ;;  %v9134_v43 = vor.u32 %v10626_v45, %v9131_v10  ;;  %v9243_v26 = vld [vmem:[#allocation7 + $0x558] sm:$0xf0] }
 0x331   :  { %6010 = vmatpush.bf16.msrb.mxu1 %v9310_v62  ;;  %5824 = vmatpush.bf16.msra.mxu3 %v8986_v53  ;;  %v8969_v62 = vld [vmem:[#allocation7 + $0x328] sm:$0xf]  ;;  %v8923_v53 = vld [vmem:[#allocation7 + $0x2d8] sm:$0xf0] }
 0x332   :  { %v8970_v1 = vor.u32 %v10588_v22, %v8969_v62  ;;  %v8926_v49 = vor.u32 %v10574_v24, %v8923_v53  ;;  %v12085_v22 = vpop.f32.mrf.mxu2  ;;  %v8907_v10 = vld [vmem:[#allocation7 + $0x2b8] sm:$0xf0]  ;;  %v9561_v24 = vld [vmem:[#allocation7 + $0x7c8] sm:$0xf]  ;;  %v10566_v53 = vld [vmem:[#allocation7 + $0x28c] sm:$0xf] }
 0x333   :  { %5992 = vmatpush.bf16.msrb.mxu0 %v9166_v18  ;;  %9693 = vmatmul.msk.bf16.vlgmr.msra.gmra.mxu2 %vm11600_vm15, %v11418_v63  ;;  %v10658_v18 = vld [vmem:[#allocation7 + $0x56c] sm:$0xf] }
 0x334   :  { %5883 = vmatpush.bf16.msrb.mxu2 %v9338_v14  ;;  %v9262_v37 = vor.u32 %v10658_v18, %v9259_v20  ;;  %v10622_v14 = vld [vmem:[#allocation7 + $0x44c] sm:$0xf]  ;;  %v8910_v18 = vor.u32 %v10570_v41, %v8907_v10  ;;  %v10732_v10 = vld [vmem:[#allocation7 + $0x7b4] sm:$0xf0] }
 0x335   :  { %6011 = vmatpush.bf16.msrb.mxu1 %v9294_v55  ;;  %5825 = vmatpush.bf16.msra.mxu3 %v8970_v1  ;;  %v8953_v55 = vld [vmem:[#allocation7 + $0x308] sm:$0xf]  ;;  %v9118_v36 = vor.u32 %v10622_v14, %v9115_v32  ;;  %v10740_v1 = vld [vmem:[#allocation7 + $0x7f4] sm:$0xf0] }
 0x336   :  { %v8954_v25 = vor.u32 %v10584_v33, %v8953_v55  ;;  %v9578_v45 = vor.u32 %v10740_v1, %v9577_v56  ;;  %v9227_v55 = vld [vmem:[#allocation7 + $0x538] sm:$0xf0]  ;;  %v10646_v56 = vld [vmem:[#allocation7 + $0x50c] sm:$0xf] }
 0x337   :  { %5993 = vmatpush.bf16.msrb.mxu0 %v9150_v58  ;;  %v10654_v58 = vld [vmem:[#allocation7 + $0x54c] sm:$0xf]  ;;  %v12090_v14 = vpop.f32.mrf.mxu0  ;;  %v9211_v1 = vld [vmem:[#allocation7 + $0x518] sm:$0xf0] }
 0x338   :  { %5952 = vmatpush.bf16.msra.mxu2 %v8942_v47  ;;  %v9246_v62 = vor.u32 %v10654_v58, %v9243_v26  ;;  %v10618_v47 = vld [vmem:[#allocation7 + $0x42c] sm:$0xf]  ;;  %v9083_v58 = vld [vmem:[#allocation7 + $0x418] sm:$0xf0]  ;;  %v9214_v41 = vor.u32 %v10646_v56, %v9211_v1  ;;  %v9497_v1 = vld [vmem:[#allocation7 + $0x748] sm:$0xf] }
 0x339   :  { %6012 = vmatpush.bf16.msrb.mxu1 %v9278_v29  ;;  %v12083_v29 = vpop.f32.mrf.mxu1  ;;  %5826 = vmatpush.bf16.msra.mxu3 %v8954_v25  ;;  %v10736_v25 = vld [vmem:[#allocation7 + $0x7d4] sm:$0xf0] }
 0x33a   :  { %v9562_v32 = vor.u32 %v10736_v25, %v9561_v24  ;;  %9729 = vmatmul.msk.bf16.vlgmr.msra.gmra.mxu0 %vm11575_vm11, %v11308_v13  ;;  %v10728_v24 = vld [vmem:[#allocation7 + $0x794] sm:$0xf0]  ;;  %v10558_v25 = vld [vmem:[#allocation7 + $0x24c] sm:$0xf] }
 0x33b   :  { %5994 = vmatpush.bf16.msrb.mxu0 %v9134_v43  ;;  %v9099_v43 = vld [vmem:[#allocation7 + $0x438] sm:$0xf0]  ;;  %9675 = vmatmul.msk.bf16.vlgmr.msrb.gmra.mxu3 %vm11994_vm4, %v11998_v9  ;;  %v10554_v13 = vld [vmem:[#allocation7 + $0x22c] sm:$0xf] }
 0x33c   :  { %5953 = vmatpush.bf16.msra.mxu2 %v8926_v49  ;;  %v9102_v20 = vor.u32 %v10618_v47, %v9099_v43  ;;  %v8891_v49 = vld [vmem:[#allocation7 + $0x298] sm:$0xf0]  ;;  %v10562_v47 = vld [vmem:[#allocation7 + $0x26c] sm:$0xf] }
 0x33d   :  { %6013 = vmatpush.bf16.msrb.mxu1 %v9262_v37  ;;  %v10650_v37 = vld [vmem:[#allocation7 + $0x52c] sm:$0xf]  ;;  %5895 = vmatpush.bf16.msrb.mxu3 %v9578_v45  ;;  %v8894_v26 = vor.u32 %v10566_v53, %v8891_v49  ;;  %v9545_v45 = vld [vmem:[#allocation7 + $0x7a8] sm:$0xf] }
 0x33e   :  { %v9230_v33 = vor.u32 %v10650_v37, %v9227_v55  ;;  %v12097_v37 = vpop.f32.mrf.mxu2 }
 0x33f   :  { %5995 = vmatpush.bf16.msrb.mxu0 %v9118_v36  ;;  %v10614_v36 = vld [vmem:[#allocation7 + $0x40c] sm:$0xf] }
 0x340   :  { %5954 = vmatpush.bf16.msra.mxu2 %v8910_v18  ;;  %v9546_v18 = vor.u32 %v10732_v10, %v9545_v45  ;;  %9735 = vmatmul.msk.bf16.vlgmr.msra.gmra.mxu1 %vm12645_vm7, %v11364_v23  ;;  %v10550_v45 = vld [vmem:[#allocation7 + $0x20c] sm:$0xf] }
 0x341   :  { %6014 = vmatpush.bf16.msrb.mxu1 %v9246_v62  ;;  %v9086_v62 = vor.u32 %v10614_v36, %v9083_v58  ;;  %5896 = vmatpush.bf16.msrb.mxu3 %v9562_v32  ;;  %v12092_v43 = vpop.f32.mrf.mxu1  ;;  %v8859_v32 = vld [vmem:[#allocation7 + $0x258] sm:$0xf0]  ;;  %v12105_v36 = vpop.f32.mrf.mxu0  ;;  %v9513_v58 = vld [vmem:[#allocation7 + $0x768] sm:$0xf] }
 0x342   :  { %v8862_v49 = vor.u32 %v10558_v25, %v8859_v32  ;;  %v10716_v25 = vld [vmem:[#allocation7 + $0x734] sm:$0xf0]  ;;  %v10706_v32 = vld [vmem:[#allocation7 + $0x6ec] sm:$0xf] }
 0x343   :  { %5996 = vmatpush.bf16.msrb.mxu0 %v9102_v20  ;;  %9696 = vmatmul.msk.bf16.gmra.mxu2 %vm12644_vm6, %v11433_v50  ;;  %v8875_v20 = vld [vmem:[#allocation7 + $0x278] sm:$0xf0] }
 0x344   :  { %5955 = vmatpush.bf16.msra.mxu2 %v8894_v26  ;;  %v8878_v55 = vor.u32 %v10562_v47, %v8875_v20  ;;  %v9514_v26 = vor.u32 %v10724_v48, %v9513_v58  ;;  %v8827_v47 = vld [vmem:[#allocation7 + $0x218] sm:$0xf0] }
 0x345   :  { %6015 = vmatpush.bf16.msrb.mxu1 %v9230_v33  ;;  %5897 = vmatpush.bf16.msrb.mxu3 %v9546_v18  ;;  %v9529_v33 = vld [vmem:[#allocation7 + $0x788] sm:$0xf]  ;;  %v9833_v18 = vld [vmem:[#allocation10 + $0x70] sm:$0xf]  ;;  %v10756_v20 = vld [vmem:[#allocation10 + $0x74] sm:$0xf0] }
 0x346   :  { %v9530_v53 = vor.u32 %v10728_v24, %v9529_v33  ;;  %v12112_v56 = vpop.f32.mrf.mxu2  ;;  %v9834_v33 = vor.u32 %v10756_v20, %v9833_v18  ;;  %v9481_v24 = vld [vmem:[#allocation7 + $0x728] sm:$0xf]  ;;  %v9435_v18 = vld [vmem:[#allocation7 + $0x6d8] sm:$0xf0]  ;;  %v9817_v20 = vld [vmem:[#allocation10 + $0x50] sm:$0xf] }
 0x347   :  { %5997 = vmatpush.bf16.msrb.mxu0 %v9086_v62  ;;  %v8843_v62 = vld [vmem:[#allocation7 + $0x238] sm:$0xf0] }
 0x348   :  { %5956 = vmatpush.bf16.msra.mxu2 %v8878_v55  ;;  %v8846_v23 = vor.u32 %v10554_v13, %v8843_v62  ;;  %v8830_v55 = vor.u32 %v10550_v45, %v8827_v47  ;;  %v9825_v13 = vld [vmem:[#allocation10 + $0x60] sm:$0xf]  ;;  %v10702_v45 = vld [vmem:[#allocation7 + $0x6cc] sm:$0xf] }
 0x349   :  { %6016 = vmatpush.bf16.msrb.mxu1 %v9214_v41  ;;  %5898 = vmatpush.bf16.msrb.mxu3 %v9530_v53  ;;  %v12110_v15 = vpop.f32.mrf.mxu1  ;;  %v10720_v41 = vld [vmem:[#allocation7 + $0x754] sm:$0xf0]  ;;  %v9482_v53 = vor.u32 %v10716_v25, %v9481_v24  ;;  %v12114_v58 = vpop.f32.mrf.mxu0  ;;  %v10698_v24 = vld [vmem:[#allocation7 + $0x6ac] sm:$0xf] }
 0x34a   :  { %v9498_v10 = vor.u32 %v10720_v41, %v9497_v1  ;;  %9732 = vmatmul.msk.bf16.gmra.mxu0 %vm11660_vm0, %v11328_v61  ;;  %v9465_v1 = vld [vmem:[#allocation7 + $0x708] sm:$0xf]  ;;  %v10712_v41 = vld [vmem:[#allocation7 + $0x714] sm:$0xf0]  ;;  %v9438_v61 = vor.u32 %v10702_v45, %v9435_v18  ;;  %v10694_v45 = vld [vmem:[#allocation7 + $0x68c] sm:$0xf] }
 0x34b   :  { %9678 = vmatmul.msk.bf16.gmra.mxu3 %vm12025_vm14, %v12029_v54  ;;  %6576 = vmatpush.bf16.msra.mxu0 %v9834_v33  ;;  %v9466_v47 = vor.u32 %v10712_v41, %v9465_v1  ;;  %v12129_v33 = vpop.f32.mrf.mxu3  ;;  %v10606_v1 = vld [vmem:[#allocation7 + $0x3cc] sm:$0xf]  ;;  %v9051_v41 = vld [vmem:[#allocation7 + $0x3d8] sm:$0xf0] }
 0x34c   :  { %5957 = vmatpush.bf16.msra.mxu2 %v8862_v49  ;;  %v9451_v49 = vld [vmem:[#allocation7 + $0x6f8] sm:$0xf0] }
 0x34d   :  { %5899 = vmatpush.bf16.msrb.mxu3 %v9514_v26  ;;  %v9454_v48 = vor.u32 %v10706_v32, %v9451_v49  ;;  %v10754_v26 = vld [vmem:[#allocation10 + $0x64] sm:$0xf0]  ;;  %v9809_v32 = vld [vmem:[#allocation10 + $0x40] sm:$0xf]  ;;  %v9403_v18 = vld [vmem:[#allocation7 + $0x698] sm:$0xf0] }
 0x34e   :  { %v9826_v62 = vor.u32 %v10754_v26, %v9825_v13  ;;  %v10750_v49 = vld [vmem:[#allocation10 + $0x44] sm:$0xf0] }
 0x34f   :  { %v9810_v13 = vor.u32 %v10750_v49, %v9809_v32  ;;  %v9387_v49 = vld [vmem:[#allocation7 + $0x678] sm:$0xf0] }
 0x350   :  { %5958 = vmatpush.bf16.msra.mxu2 %v8846_v23  ;;  %9738 = vmatmul.msk.bf16.gmra.mxu1 %vm11666_vm8, %v11381_v11  ;;  %v10610_v11 = vld [vmem:[#allocation7 + $0x3ec] sm:$0xf] }
 0x351   :  { %5900 = vmatpush.bf16.msrb.mxu3 %v9498_v10  ;;  %6577 = vmatpush.bf16.msra.mxu0 %v9826_v62  ;;  %v12127_v10 = vpop.f32.mrf.mxu1  ;;  %v9070_v25 = vor.u32 %v10610_v11, %v9067_v39  ;;  %v12134_v26 = vpop.f32.mrf.mxu0  ;;  %v10602_v39 = vld [vmem:[#allocation7 + $0x3ac] sm:$0xf] }
 0x353   :  { %9717 = vmatmul.msk.bf16.vlgmr.msrb.gmra.mxu2 %vm11890_vm3, %v11899_v27 }
 0x354   :  { %5959 = vmatpush.bf16.msra.mxu2 %v8830_v55  ;;  %v9818_v55 = vor.u32 %v10752_v60, %v9817_v20  ;;  %v9801_v20 = vld [vmem:[#allocation10 + $0x30] sm:$0xf]  ;;  %v10748_v60 = vld [vmem:[#allocation10 + $0x34] sm:$0xf0] }
 0x355   :  { %5901 = vmatpush.bf16.msrb.mxu3 %v9482_v53  ;;  %v9419_v53 = vld [vmem:[#allocation7 + $0x6b8] sm:$0xf0] }
 0x356   :  { %v12125_v23 = vpop.f32.mrf.mxu2  ;;  %6578 = vmatpush.bf16.msra.mxu0 %v9818_v55  ;;  %v9802_v55 = vor.u32 %v10748_v60, %v9801_v20  ;;  %v9019_v20 = vld [vmem:[#allocation7 + $0x398] sm:$0xf0]  ;;  %v10686_v60 = vld [vmem:[#allocation7 + $0x64c] sm:$0xf] }
 0x358   :  { %6028 = vmatpush.bf16.msrb.mxu2 %v9454_v48  ;;  %v9422_v48 = vor.u32 %v10698_v24, %v9419_v53  ;;  %v9035_v24 = vld [vmem:[#allocation7 + $0x3b8] sm:$0xf0]  ;;  %v12140_v53 = vpop.f32.mrf.mxu3 }
 0x359   :  { %5902 = vmatpush.bf16.msrb.mxu3 %v9466_v47  ;;  %v9054_v47 = vor.u32 %v10606_v1, %v9051_v41  ;;  %v12138_v11 = vpop.f32.mrf.mxu1  ;;  %v9038_v32 = vor.u32 %v10602_v39, %v9035_v24  ;;  %v10744_v39 = vld [vmem:[#allocation10 + $0x14] sm:$0xf0] }
 0x35a   :  { %6579 = vmatpush.bf16.msra.mxu0 %v9810_v13  ;;  %v10746_v13 = vld [vmem:[#allocation10 + $0x24] sm:$0xf0] }
 0x35b   :  { %9699 = vmatmul.msk.bf16.vlgmr.msra.gmra.mxu3 %vm11607_vm1, %v11450_v28  ;;  %9753 = vmatmul.msk.bf16.vlgmr.msrb.gmra.mxu0 %vm11741_vm9, %v11498_v38  ;;  %v9371_v38 = vld [vmem:[#allocation7 + $0x658] sm:$0xf0] }
 0x35c   :  { %6029 = vmatpush.bf16.msrb.mxu2 %v9438_v61  ;;  %v9406_v61 = vor.u32 %v10694_v45, %v9403_v18  ;;  %v12151_v45 = vld [vmem:[#allocation8] sm:$0xf]  ;;  %v10598_v18 = vld [vmem:[#allocation7 + $0x38c] sm:$0xf]  ;;  %v9374_v59 = vor.u32 %v10686_v60, %v9371_v38 }
 0x35d   :  { %5971 = vmatpush.bf16.msra.mxu3 %v9070_v25  ;;  %v10690_v25 = vld [vmem:[#allocation7 + $0x66c] sm:$0xf]  ;;  %v9022_v4 = vor.u32 %v10598_v18, %v9019_v20  ;;  %v12158_v24 = vperm.slane %v12151_v45, 0 }
 0x35e   :  { %v12136_v62 = vpop.f32.mrf.mxu2  ;;  %6580 = vmatpush.bf16.msra.mxu0 %v9802_v55  ;;  %v9390_v1 = vor.u32 %v10690_v25, %v9387_v49  ;;  %v9785_v55 = vld [vmem:[#allocation10 + $0x10] sm:$0xf]  ;;  %v10594_v25 = vld [vmem:[#allocation7 + $0x36c] sm:$0xf] }
 0x35f   :  { %v10682_v49 = vld [vmem:[#allocation7 + $0x62c] sm:$0xf] }
 0x360   :  { %6030 = vmatpush.bf16.msrb.mxu2 %v9422_v48  ;;  %v9793_v48 = vld [vmem:[#allocation10 + $0x20] sm:$0xf]  ;;  %9759 = vmatmul.msk.bf16.vlgmr.msrb.gmra.mxu1 %vm11756_vm10, %v11760_v12  ;;  %v9786_v12 = vor.u32 %v10744_v39, %v9785_v55  ;;  %v10742_v18 = vld [vmem:[#allocation10 + $0x4] sm:$0xf0]  ;;  %v12165_v38 = vpop.f32.mrf.mxu3 }
 0x361   :  { %5972 = vmatpush.bf16.msra.mxu3 %v9054_v47  ;;  %v9794_v41 = vor.u32 %v10746_v13, %v9793_v48  ;;  %v12160_v48 = vpop.f32.mrf.mxu1  ;;  %v10590_v39 = vld [vmem:[#allocation7 + $0x34c] sm:$0xf] }
 0x362   :  { %12646 = vst [vmem:[#allocation19_spill] sm:$0xff] %v12160_v48 }
 0x363   :  { %9720 = vmatmul.msk.bf16.gmra.mxu2 %vm11944_vm5, %v11949_v7  ;;  %6581 = vmatpush.bf16.msra.mxu0 %v9794_v41  ;;  %v9777_v41 = vld [vmem:[#allocation10] sm:$0xf] }
 0x364   :  { %6031 = vmatpush.bf16.msrb.mxu2 %v9406_v61  ;;  %v12155_v61 = vpop.f32.mrf.mxu0  ;;  %v9778_v60 = vor.u32 %v10742_v18, %v9777_v41  ;;  %v8971_v41 = vld [vmem:[#allocation7 + $0x338] sm:$0xf0] }
 0x365   :  { %5973 = vmatpush.bf16.msra.mxu3 %v9038_v32  ;;  %v9003_v32 = vld [vmem:[#allocation7 + $0x378] sm:$0xf0] }
 0x366   :  { %v12153_v47 = vpop.f32.mrf.mxu2  ;;  %v9006_v13 = vor.u32 %v10594_v25, %v9003_v32  ;;  %v9339_v32 = vld [vmem:[#allocation7 + $0x618] sm:$0xf0] }
 0x367   :  { %6582 = vmatpush.bf16.msra.mxu0 %v9786_v12  ;;  %v10678_v12 = vld [vmem:[#allocation7 + $0x60c] sm:$0xf] }
 0x368   :  { %6032 = vmatpush.bf16.msrb.mxu2 %v9390_v1  ;;  %v9355_v1 = vld [vmem:[#allocation7 + $0x638] sm:$0xf0]  ;;  %v9342_v48 = vor.u32 %v10678_v12, %v9339_v32  ;;  %v9819_v12 = vld [vmem:[#allocation10 + $0x58] sm:$0xf0]  ;;  %v10738_v32 = vld [vmem:[#allocation7 + $0x7ec] sm:$0xf] }
 0x369   :  { %5974 = vmatpush.bf16.msra.mxu3 %v9022_v4  ;;  %v9358_v20 = vor.u32 %v10682_v49, %v9355_v1  ;;  %v5468_v4 = vadd.f32 %v12043_v8, %v12158_v24  ;;  %v9835_v49 = vld [vmem:[#allocation10 + $0x78] sm:$0xf0]  ;;  %v10586_v8 = vld [vmem:[#allocation7 + $0x32c] sm:$0xf] }
 0x36a   :  { %v9838_v1 = vor.u32 %v10755_v52, %v9835_v49  ;;  %v8974_v18 = vor.u32 %v10586_v8, %v8971_v41  ;;  %v10582_v52 = vld [vmem:[#allocation7 + $0x30c] sm:$0xf]  ;;  %v9579_v49 = vld [vmem:[#allocation7 + $0x7f8] sm:$0xf0]  ;;  %v10749_v8 = vld [vmem:[#allocation10 + $0x44] sm:$0xf] }
 0x36b   :  { %9702 = vmatmul.msk.bf16.gmra.mxu3 %vm11694_vm13, %v12641_v6  ;;  %6583 = vmatpush.bf16.msra.mxu0 %v9778_v60  ;;  %v9827_v60 = vld [vmem:[#allocation10 + $0x68] sm:$0xf0] }
 0x36c   :  { %6033 = vmatpush.bf16.msrb.mxu2 %v9374_v59  ;;  %v8987_v59 = vld [vmem:[#allocation7 + $0x358] sm:$0xf0]  ;;  %v12171_v6 = vpop.f32.mrf.mxu0  ;;  %9756 = vmatmul.msk.bf16.gmra.mxu0 %vm11803_vm2, %v11519_v3  ;;  %v9811_v41 = vld [vmem:[#allocation10 + $0x48] sm:$0xf0] }
 0x36d   :  { %5975 = vmatpush.bf16.msra.mxu3 %v9006_v13  ;;  %v8990_v25 = vor.u32 %v10590_v39, %v8987_v59  ;;  %v5487_v13 = vadd.f32 %v12045_v0, %v5468_v4  ;;  %v5470_v59 = vadd.f32 %v12050_v17, %v12158_v24  ;;  %v12186_v0 = vpop.f32.mrf.mxu1  ;;  %v10751_v4 = vld [vmem:[#allocation10 + $0x54] sm:$0xf] }
 0x36e   :  { %v12169_v55 = vpop.f32.mrf.mxu2  ;;  %v9822_v46 = vor.u32 %v10751_v4, %v9819_v12  ;;  %v9803_v4 = vld [vmem:[#allocation10 + $0x38] sm:$0xf0]  ;;  %v10730_v12 = vld [vmem:[#allocation7 + $0x7ac] sm:$0xf] }
 0x36f   :  { %v5506_v39 = vadd.f32 %v12070_v51, %v5487_v13  ;;  %6652 = vmatpush.bf16.msrb.mxu0 %v9838_v1  ;;  %v8955_v51 = vld [vmem:[#allocation7 + $0x318] sm:$0xf0]  ;;  %v5489_v35 = vadd.f32 %v12061_v30, %v5470_v59  ;;  %v9582_v1 = vor.u32 %v10738_v32, %v9579_v49  ;;  %v9814_v30 = vor.u32 %v10749_v8, %v9811_v41 }
 0x370   :  { %6034 = vmatpush.bf16.msrb.mxu2 %v9358_v20  ;;  %v10753_v20 = vld [vmem:[#allocation10 + $0x64] sm:$0xf]  ;;  %9762 = vmatmul.msk.bf16.gmra.mxu1 %vm12643_vm12, %v11817_v44  ;;  %v8958_v17 = vor.u32 %v10582_v52, %v8955_v51  ;;  %v10747_v52 = vld [vmem:[#allocation10 + $0x34] sm:$0xf] }
 0x371   :  { %5976 = vmatpush.bf16.msra.mxu3 %v8990_v25  ;;  %v5525_v3 = vadd.f32 %v12129_v33, %v5506_v39  ;;  %v5508_v44 = vadd.f32 %v12085_v22, %v5489_v35  ;;  %v5473_v22 = vadd.f32 %v12063_v42, %v12158_v24  ;;  %v9547_v35 = vld [vmem:[#allocation7 + $0x7b8] sm:$0xf0] }
 0x373   :  { %9741 = vmatmul.msk.bf16.vlgmr.msra.gmra.mxu2 %vm11600_vm15, %v11418_v63  ;;  %v9830_v63 = vor.u32 %v10753_v20, %v9827_v60  ;;  %v5544_v25 = vadd.f32 %v12090_v14, %v5525_v3  ;;  %v5527_v33 = vadd.f32 %v12140_v53, %v5508_v44  ;;  %v10734_v20 = vld [vmem:[#allocation7 + $0x7cc] sm:$0xf]  ;;  %v9563_v60 = vld [vmem:[#allocation7 + $0x7d8] sm:$0xf0]  ;;  %v9806_v53 = vor.u32 %v10747_v52, %v9803_v4  ;;  %v9779_v4 = vld [vmem:[#allocation10 + $0x8] sm:$0xf0] }
 0x374   :  { %6035 = vmatpush.bf16.msrb.mxu2 %v9342_v48  ;;  %v12190_v48 = vpop.f32.mrf.mxu3  ;;  %v12196_v13 = vpop.f32.mrf.mxu0  ;;  %v5492_v42 = vadd.f32 %v12068_v57, %v5473_v22  ;;  %v5475_v3 = vadd.f32 %v12081_v31, %v12158_v24  ;;  %v6114_v57 = vld [vmem:[%s12582_s6] sm:$0xff]  ;;  %v10722_v52 = vld [vmem:[#allocation7 + $0x76c] sm:$0xf] }
 0x375   :  { %5977 = vmatpush.bf16.msra.mxu3 %v8974_v18  ;;  %6653 = vmatpush.bf16.msrb.mxu0 %v9830_v63  ;;  %v5563_v14 = vadd.f32 %v12092_v43, %v5544_v25  ;;  %v12207_v39 = vpop.f32.mrf.mxu1  ;;  %v9566_v63 = vor.u32 %v10734_v20, %v9563_v60  ;;  %v5546_v51 = vadd.f32 %v12105_v36, %v5527_v33  ;;  %v9795_v36 = vld [vmem:[#allocation10 + $0x28] sm:$0xf0]  ;;  %v6118_v31 = vld [vmem:[%s12582_s6 + $0x20] sm:$0xff]  ;;  %v9787_v33 = vld [vmem:[#allocation10 + $0x18] sm:$0xf0] }
 0x376   :  { %v12188_v40 = vpop.f32.mrf.mxu2  ;;  %v9550_v25 = vor.u32 %v10730_v12, %v9547_v35  ;;  %vm6130_vm15 = vcmp.ge.f32.partialorder %v6114_v57, 0.3  ;;  %vm6134_vm0 = vcmp.ge.f32.partialorder %v6118_v31, 0.3 }
 0x377   :  { %v5565_v44 = vadd.f32 %v12110_v15, %v5546_v51  ;;  %v9531_v15 = vld [vmem:[#allocation7 + $0x798] sm:$0xf0]  ;;  %vm12245_vm9 = vmpackc.low %vm6134_vm0, %vm6130_vm15 }
 0x378   :  { %v9515_v51 = vld [vmem:[#allocation7 + $0x778] sm:$0xf0] }
 0x379   :  { %5978 = vmatpush.bf16.msra.mxu3 %v8958_v17  ;;  %6654 = vmatpush.bf16.msrb.mxu0 %v9822_v46  ;;  %v5582_v17 = vadd.f32 %v12125_v23, %v5563_v14  ;;  %v10745_v46 = vld [vmem:[#allocation10 + $0x24] sm:$0xf]  ;;  %v5511_v23 = vadd.f32 %v12097_v37, %v5492_v42  ;;  %v5584_v16 = vadd.f32 %v12136_v62, %v5565_v44  ;;  %v10726_v37 = vld [vmem:[#allocation7 + $0x78c] sm:$0xf] }
 0x37a   :  { %v9534_v41 = vor.u32 %v10726_v37, %v9531_v15  ;;  %v10714_v37 = vld [vmem:[#allocation7 + $0x72c] sm:$0xf] }
 0x37b   :  { %9723 = vmatmul.msk.bf16.vlgmr.msrb.gmra.mxu3 %vm11994_vm4, %v11998_v9  ;;  %v5530_v22 = vadd.f32 %v12165_v38, %v5511_v23 }
 0x37c   :  { %v12219_v32 = vpop.f32.mrf.mxu0 }
 0x37d   :  { %6047 = vmatpush.bf16.msrb.mxu3 %v9582_v1  ;;  %6655 = vmatpush.bf16.msrb.mxu0 %v9814_v30  ;;  %v5494_v1 = vadd.f32 %v12083_v29, %v5475_v3  ;;  %v10743_v30 = vld [vmem:[#allocation10 + $0x14] sm:$0xf]  ;;  %v12233_v60 = vpop.f32.mrf.mxu1 }
 0x37e   :  { %v12205_v18 = vpop.f32.mrf.mxu2  ;;  %v5600_v59 = vpop.f32.mrf.mxu3  ;;  %v9790_v62 = vor.u32 %v10743_v30, %v9787_v33  ;;  %v10767_v3 = vld [vmem:[#allocation10 + $0xd4] sm:$0xf] }
 0x37f   :  { %v5601_v43 = vadd.f32 %v5600_v59, %v5582_v17  ;;  %v5513_v20 = vadd.f32 %v12112_v56, %v5494_v1  ;;  %v5549_v59 = vadd.f32 %v12114_v58, %v5530_v22  ;;  %v10741_v17 = vld [vmem:[#allocation10 + $0x4] sm:$0xf]  ;;  %v9518_v56 = vor.u32 %v10722_v52, %v9515_v51  ;;  %v9483_v1 = vld [vmem:[#allocation7 + $0x738] sm:$0xf0] }
 0x380   :  { %v9782_v35 = vor.u32 %v10741_v17, %v9779_v4 }
 0x381   :  { %6048 = vmatpush.bf16.msrb.mxu3 %v9566_v63  ;;  %6656 = vmatpush.bf16.msrb.mxu0 %v9806_v53  ;;  %v6082_v24 = vmul.f32 0.2, %v5601_v43  ;;  %vm6066_vm11 = vcmp.ge.f32.partialorder %v5601_v43, 0.0  ;;  %v5532_v12 = vadd.f32 %v12190_v48, %v5513_v20  ;;  %v5568_v58 = vadd.f32 %v12127_v10, %v5549_v59  ;;  %v10772_v10 = vld [vmem:[#allocation10 + $0xf4] sm:$0xf0] }
 0x382   :  { %v9467_v20 = vld [vmem:[#allocation7 + $0x718] sm:$0xf0] }
 0x383   :  { %9744 = vmatmul.msk.bf16.gmra.mxu2 %vm12644_vm6, %v11433_v50  ;;  %v9798_v50 = vor.u32 %v10745_v46, %v9795_v36  ;;  %v6098_v63 = vsel %vm6066_vm11, %v5601_v43, %v6082_v24  ;;  %v10718_v46 = vld [vmem:[#allocation7 + $0x74c] sm:$0xf]  ;;  %v9499_v36 = vld [vmem:[#allocation7 + $0x758] sm:$0xf0]  ;;  %v5587_v57 = vadd.f32 %v12153_v47, %v5568_v58 }
 0x384   :  { %v6146_v53 = vmul.f32 1.4285715, %v6098_v63  ;;  %v12249_v23 = vpop.f32.mrf.mxu0  ;;  %v9502_v48 = vor.u32 %v10718_v46, %v9499_v36  ;;  %v9881_v63 = vld [vmem:[#allocation10 + $0xd0] sm:$0xf] }
 0x385   :  { %6049 = vmatpush.bf16.msrb.mxu3 %v9550_v25  ;;  %6657 = vmatpush.bf16.msrb.mxu0 %v9798_v50  ;;  %v9897_v50 = vld [vmem:[#allocation10 + $0xf0] sm:$0xf]  ;;  %v12258_v15 = vpop.f32.mrf.mxu1 }
 0x386   :  { %v12228_v49 = vpop.f32.mrf.mxu2  ;;  %v5602_v8 = vpop.f32.mrf.mxu3  ;;  %v9898_v31 = vor.u32 %v10772_v10, %v9897_v50  ;;  %v10764_v50 = vld [vmem:[#allocation10 + $0xb4] sm:$0xf0] }
 0x387   :  { %v5603_v14 = vadd.f32 %v5602_v8, %v5584_v16  ;;  %v5551_v16 = vadd.f32 %v12134_v26, %v5532_v12  ;;  %v9889_v26 = vld [vmem:[#allocation10 + $0xe0] sm:$0xf]  ;;  %v10770_v8 = vld [vmem:[#allocation10 + $0xe4] sm:$0xf0] }
 0x388   :  { %6595 = vmatpush.bf16.msra.mxu1 %v9898_v31  ;;  %v9890_v30 = vor.u32 %v10770_v8, %v9889_v26  ;;  %v10760_v26 = vld [vmem:[#allocation10 + $0x94] sm:$0xf0]  ;;  %v4171_v8 = vperm.slane %v12151_v45, 1 }
 0x389   :  { %vm6070_vm8 = vcmp.ge.f32.partialorder %v5603_v14, 0.0  ;;  %v6086_v29 = vmul.f32 0.2, %v5603_v14  ;;  %6050 = vmatpush.bf16.msrb.mxu3 %v9534_v41  ;;  %6658 = vmatpush.bf16.msrb.mxu0 %v9790_v62  ;;  %v5570_v47 = vadd.f32 %v12138_v11, %v5551_v16  ;;  %v9486_v41 = vor.u32 %v10714_v37, %v9483_v1  ;;  %v10768_v11 = vld [vmem:[#allocation10 + $0xd4] sm:$0xf0] }
 0x38a   :  { %v9882_v52 = vor.u32 %v10768_v11, %v9881_v63  ;;  %v9849_v1 = vld [vmem:[#allocation10 + $0x90] sm:$0xf]  ;;  %v5620_v5 = vadd.f32 %v12155_v61, %v4171_v8  ;;  %v9899_v11 = vld [vmem:[#allocation10 + $0xf8] sm:$0xf0] }
 0x38b   :  { %v6102_v38 = vsel %vm6070_vm8, %v5603_v14, %v6086_v29  ;;  %9726 = vmatmul.msk.bf16.gmra.mxu3 %vm12025_vm14, %v12029_v54  ;;  %v5589_v33 = vadd.f32 %v12169_v55, %v5570_v47  ;;  %v10710_v14 = vld [vmem:[#allocation7 + $0x70c] sm:$0xf]  ;;  %v6126_v55 = vld [vmem:[%s12582_s6 + $0x60] sm:$0xff]  ;;  %v9850_v47 = vor.u32 %v10760_v26, %v9849_v1 }
 0x38c   :  { %v6150_v42 = vmul.f32 1.4285715, %v6102_v38  ;;  %6596 = vmatpush.bf16.msra.mxu1 %v9890_v30  ;;  %v12273_v51 = vpop.f32.mrf.mxu0  ;;  %vm6142_vm12 = vcmp.ge.f32.partialorder %v6126_v55, 0.3  ;;  %v9873_v38 = vld [vmem:[#allocation10 + $0xc0] sm:$0xf]  ;;  %v5622_v55 = vadd.f32 %v12171_v6, %v4171_v8 }
 0x38d   :  { %6051 = vmatpush.bf16.msrb.mxu3 %v9518_v56  ;;  %6659 = vmatpush.bf16.msrb.mxu0 %v9782_v35  ;;  %v10766_v56 = vld [vmem:[#allocation10 + $0xc4] sm:$0xf0]  ;;  %v12278_v12 = vpop.f32.mrf.mxu1  ;;  %v9841_v30 = vld [vmem:[#allocation10 + $0x80] sm:$0xf] }
 0x38e   :  { %v12241_v43 = vpop.f32.mrf.mxu2  ;;  %v12251_v44 = vpack.c.bf16 %v6150_v42, %v6146_v53  ;;  %v5605_v25 = vpop.f32.mrf.mxu3  ;;  %v9874_v42 = vor.u32 %v10766_v56, %v9873_v38 }
 0x38f   :  { %v5606_v24 = vadd.f32 %v5605_v25, %v5587_v57  ;;  %v10762_v57 = vld [vmem:[#allocation10 + $0xa4] sm:$0xf0] }
 0x390   :  { %10033 = vmatmul.msk.bf16.vlgmr.msra.gmra.mxu0 %vm12245_vm9, %v12251_v44  ;;  %6597 = vmatpush.bf16.msra.mxu1 %v9882_v52  ;;  %v9858_v31 = vor.u32 %v10762_v57, %v9857_v2  ;;  %v9875_v2 = vld [vmem:[#allocation10 + $0xc8] sm:$0xf0]  ;;  %v5625_v57 = vadd.f32 %v12196_v13, %v4171_v8 }
 0x391   :  { %6052 = vmatpush.bf16.msrb.mxu3 %v9502_v48  ;;  %v6090_v22 = vmul.f32 0.2, %v5606_v24  ;;  %vm6074_vm10 = vcmp.ge.f32.partialorder %v5606_v24, 0.0  ;;  %v9865_v48 = vld [vmem:[#allocation10 + $0xb0] sm:$0xf] }
 0x392   :  { %v9866_v10 = vor.u32 %v10764_v50, %v9865_v48  ;;  %v5644_v26 = vadd.f32 %v12207_v39, %v5625_v57  ;;  %v9859_v39 = vld [vmem:[#allocation10 + $0xa8] sm:$0xf0]  ;;  %v10786_v57 = vld [vmem:[#allocation10 + $0x164] sm:$0xf0] }
 0x393   :  { %9765 = vmatmul.msk.bf16.vlgmr.msrb.gmra.mxu2 %vm11890_vm3, %v11899_v27  ;;  %v9470_v27 = vor.u32 %v10710_v14, %v9467_v20  ;;  %v6106_v17 = vsel %vm6074_vm10, %v5606_v24, %v6090_v22  ;;  %vm6138_vm3 = vcmp.ge.f32.partialorder %v6122_v19, 0.3  ;;  %v10771_v19 = vld [vmem:[#allocation10 + $0xf4] sm:$0xf] }
 0x394   :  { %v6154_v58 = vmul.f32 1.4285715, %v6106_v17  ;;  %vm12280_vm6 = vmpackc.low %vm6142_vm12, %vm6138_vm3  ;;  %6598 = vmatpush.bf16.msra.mxu1 %v9874_v42  ;;  %v9902_v61 = vor.u32 %v10771_v19, %v9899_v11  ;;  %v10769_v17 = vld [vmem:[#allocation10 + $0xe4] sm:$0xf]  ;;  %v5641_v42 = vadd.f32 %v12186_v0, %v5622_v55 }
 0x395   :  { %6053 = vmatpush.bf16.msrb.mxu3 %v9486_v41  ;;  %v12296_v24 = vpop.f32.mrf.mxu1 }
 0x396   :  { %v5607_v62 = vpop.f32.mrf.mxu3  ;;  %v12265_v59 = vpop.f32.mrf.mxu2  ;;  %v5660_v48 = vadd.f32 %v12205_v18, %v5641_v42 }
 0x397   :  { %v5608_v29 = vadd.f32 %v5607_v62, %v5589_v33  ;;  %v10758_v33 = vld [vmem:[#allocation10 + $0x84] sm:$0xf0] }
 0x398   :  { %6599 = vmatpush.bf16.msra.mxu1 %v9866_v10  ;;  %v9842_v14 = vor.u32 %v10758_v33, %v9841_v30  ;;  %v9867_v30 = vld [vmem:[#allocation10 + $0xb8] sm:$0xf0] }
 0x399   :  { %vm6078_vm2 = vcmp.ge.f32.partialorder %v5608_v29, 0.0  ;;  %v6094_v4 = vmul.f32 0.2, %v5608_v29  ;;  %6054 = vmatpush.bf16.msrb.mxu3 %v9470_v27  ;;  %v12653_v27 = vld [vmem:[#allocation19_spill] sm:$0xff] }
 0x39a   :  { %v5639_v63 = vadd.f32 %v12653_v27, %v5620_v5  ;;  %v10761_v5 = vld [vmem:[#allocation10 + $0xa4] sm:$0xf] }
 0x39b   :  { %v6110_v53 = vsel %vm6078_vm2, %v5608_v29, %v6094_v4  ;;  %9747 = vmatmul.msk.bf16.vlgmr.msra.gmra.mxu3 %vm11607_vm1, %v11450_v28  ;;  %v12291_v28 = vpop.f32.mrf.mxu0  ;;  %v9891_v4 = vld [vmem:[#allocation10 + $0xe8] sm:$0xf0] }
 0x39c   :  { %v6158_v35 = vmul.f32 1.4285715, %v6110_v53  ;;  %6600 = vmatpush.bf16.msra.mxu1 %v9858_v31  ;;  %v5658_v52 = vadd.f32 %v12188_v40, %v5639_v63  ;;  %v9894_v56 = vor.u32 %v10769_v17, %v9891_v4 }
 0x39d   :  { %v12308_v29 = vpop.f32.mrf.mxu1 }
 0x39e   :  { %v5676_v36 = vpop.f32.mrf.mxu3  ;;  %v12284_v25 = vpack.c.bf16 %v6158_v35, %v6154_v58  ;;  %v12286_v16 = vpop.f32.mrf.mxu2 }
 0x39f   :  { %v5677_v38 = vadd.f32 %v5676_v36, %v5658_v52  ;;  %v10765_v36 = vld [vmem:[#allocation10 + $0xc4] sm:$0xf] }
 0x3a0   :  { %10036 = vmatmul.msk.bf16.gmra.mxu0 %vm12280_vm6, %v12284_v25  ;;  %6601 = vmatpush.bf16.msra.mxu1 %v9850_v47  ;;  %v9878_v31 = vor.u32 %v10765_v36, %v9875_v2  ;;  %v10757_v52 = vld [vmem:[#allocation10 + $0x84] sm:$0xf]  ;;  %v9953_v36 = vld [vmem:[#allocation10 + $0x160] sm:$0xf] }
 0x3a1   :  { %v5696_v6 = vadd.f32 %v12249_v23, %v5677_v38 }
 0x3a3   :  { %9768 = vmatmul.msk.bf16.gmra.mxu2 %vm11944_vm5, %v11949_v7  ;;  %v12651_v7 = vld [vmem:[#allocation18_spill] sm:$0xff]  ;;  %v12305_v20 = vpop.f32.mrf.mxu0  ;;  %v5715_v0 = vadd.f32 %v12258_v15, %v5696_v6  ;;  %v5663_v15 = vadd.f32 %v12228_v49, %v5644_v26  ;;  %v9851_v49 = vld [vmem:[#allocation10 + $0x98] sm:$0xf0]  ;;  %v10784_v26 = vld [vmem:[#allocation10 + $0x154] sm:$0xf0] }
 0x3a4   :  { %6602 = vmatpush.bf16.msra.mxu1 %v9842_v14 }
 0x3a5   :  { %v12322_v10 = vpop.f32.mrf.mxu1  ;;  %v5734_v47 = vadd.f32 %v12265_v59, %v5715_v0  ;;  %v9862_v59 = vor.u32 %v10761_v5, %v9859_v39  ;;  %v9954_v0 = vor.u32 %v10786_v57, %v9953_v36 }
 0x3a6   :  { %v5678_v37 = vpop.f32.mrf.mxu3  ;;  %v12299_v41 = vpop.f32.mrf.mxu2 }
 0x3a7   :  { %v5679_v50 = vadd.f32 %v5678_v37, %v5660_v48  ;;  %v10763_v37 = vld [vmem:[#allocation10 + $0xb4] sm:$0xf] }
 0x3a8   :  { %6671 = vmatpush.bf16.msrb.mxu1 %v9902_v61  ;;  %v9870_v21 = vor.u32 %v10763_v37, %v9867_v30  ;;  %v9945_v37 = vld [vmem:[#allocation10 + $0x150] sm:$0xf]  ;;  %v6127_v30 = vld [vmem:[%s12582_s6 + $0x68] sm:$0xff] }
 0x3a9   :  { %v5698_v18 = vadd.f32 %v12273_v51, %v5679_v50  ;;  %vm6143_vm0 = vcmp.ge.f32.partialorder %v6127_v30, 0.3  ;;  %v10781_v30 = vld [vmem:[#allocation10 + $0x144] sm:$0xf] }
 0x3ab   :  { %9750 = vmatmul.msk.bf16.gmra.mxu3 %vm11694_vm13, %v12651_v7  ;;  %v12318_v58 = vpop.f32.mrf.mxu0  ;;  %v5717_v33 = vadd.f32 %v12278_v12, %v5698_v18 }
 0x3ac   :  { %6672 = vmatpush.bf16.msrb.mxu1 %v9894_v56 }
 0x3ad   :  { %v12342_v22 = vpop.f32.mrf.mxu1  ;;  %v5736_v46 = vadd.f32 %v12286_v16, %v5717_v33  ;;  %v10782_v33 = vld [vmem:[#allocation10 + $0x144] sm:$0xf0] }
 0x3ae   :  { %v5681_v62 = vpop.f32.mrf.mxu3  ;;  %v12315_v53 = vpop.f32.mrf.mxu2 }
 0x3af   :  { %v5682_v7 = vadd.f32 %v5681_v62, %v5663_v15  ;;  %v6115_v62 = vld [vmem:[%s12582_s6 + $0x8] sm:$0xff] }
 0x3b0   :  { %10057 = vmatmul.msk.bf16.vlgmr.msrb.gmra.mxu0 %vm12245_vm9, %v12251_v44  ;;  %v9883_v44 = vld [vmem:[#allocation10 + $0xd8] sm:$0xf0] }
 0x3b1   :  { %v9886_v40 = vor.u32 %v10767_v3, %v9883_v44  ;;  %v5701_v12 = vadd.f32 %v12291_v28, %v5682_v7  ;;  %v9843_v28 = vld [vmem:[#allocation10 + $0x88] sm:$0xf0]  ;;  %v9947_v3 = vld [vmem:[#allocation10 + $0x158] sm:$0xf0] }
 0x3b2   :  { %v9846_v38 = vor.u32 %v10757_v52, %v9843_v28  ;;  %v10776_v52 = vld [vmem:[#allocation10 + $0x114] sm:$0xf0]  ;;  %v4172_v28 = vperm.slane %v12151_v45, 2 }
 0x3b3   :  { %6673 = vmatpush.bf16.msrb.mxu1 %v9886_v40  ;;  %v12334_v13 = vpop.f32.mrf.mxu0  ;;  %v5720_v4 = vadd.f32 %v12296_v24, %v5701_v12  ;;  %v9961_v40 = vld [vmem:[#allocation10 + $0x170] sm:$0xf] }
 0x3b4   :  { %v9962_v24 = vor.u32 %v10788_v34, %v9961_v40  ;;  %v10787_v34 = vld [vmem:[#allocation10 + $0x174] sm:$0xf] }
 0x3b5   :  { %v12367_v44 = vpop.f32.mrf.mxu1 }
 0x3b6   :  { %v5683_v35 = vpop.f32.mrf.mxu3  ;;  %v12330_v1 = vpop.f32.mrf.mxu2  ;;  %6614 = vmatpush.bf16.msra.mxu2 %v9962_v24  ;;  %v9963_v24 = vld [vmem:[#allocation10 + $0x178] sm:$0xf0] }
 0x3b7   :  { %6674 = vmatpush.bf16.msrb.mxu1 %v9878_v31  ;;  %v9966_v45 = vor.u32 %v10787_v34, %v9963_v24  ;;  %v9907_v34 = vld [vmem:[#allocation10 + $0x108] sm:$0xf0] }
 0x3ba   :  { %6615 = vmatpush.bf16.msra.mxu2 %v9954_v0  ;;  %v9955_v0 = vld [vmem:[#allocation10 + $0x168] sm:$0xf0] }
 0x3bb   :  { %9771 = vmatmul.msk.bf16.vlgmr.msrb.gmra.mxu3 %vm11994_vm4, %v11998_v9  ;;  %v5627_v9 = vadd.f32 %v12219_v32, %v4171_v8  ;;  %6675 = vmatpush.bf16.msrb.mxu1 %v9870_v21  ;;  %v10759_v32 = vld [vmem:[#allocation10 + $0x94] sm:$0xf]  ;;  %vm6131_vm4 = vcmp.ge.f32.partialorder %v6115_v62, 0.3  ;;  %v9946_v21 = vor.u32 %v10784_v26, %v9945_v37  ;;  %v9921_v62 = vld [vmem:[#allocation10 + $0x120] sm:$0xf] }
 0x3bc   :  { %v9854_v63 = vor.u32 %v10759_v32, %v9851_v49  ;;  %v9929_v49 = vld [vmem:[#allocation10 + $0x130] sm:$0xf]  ;;  %v10783_v26 = vld [vmem:[#allocation10 + $0x154] sm:$0xf] }
 0x3bd   :  { %v5646_v14 = vadd.f32 %v12233_v60, %v5627_v9  ;;  %v6119_v60 = vld [vmem:[%s12582_s6 + $0x28] sm:$0xff]  ;;  %v12387_v9 = vpop.f32.mrf.mxu1 }
 0x3be   :  { %v5752_v23 = vpop.f32.mrf.mxu3  ;;  %v12354_v16 = vpop.f32.mrf.mxu2  ;;  %vm6135_vm5 = vcmp.ge.f32.partialorder %v6119_v60, 0.3  ;;  %6616 = vmatpush.bf16.msra.mxu2 %v9946_v21  ;;  %v10778_v60 = vld [vmem:[#allocation10 + $0x124] sm:$0xf0]  ;;  %v9939_v21 = vld [vmem:[#allocation10 + $0x148] sm:$0xf0] }
 0x3bf   :  { %v5753_v51 = vadd.f32 %v5752_v23, %v5734_v47  ;;  %6676 = vmatpush.bf16.msrb.mxu1 %v9862_v59  ;;  %v5665_v8 = vadd.f32 %v12241_v43, %v5646_v14  ;;  %v12356_v43 = vpop.f32.mrf.mxu0  ;;  %vm12363_vm7 = vmpackc.low %vm6135_vm5, %vm6131_vm4 }
 0x3c0   :  { %10060 = vmatmul.msk.bf16.gmra.mxu0 %vm12280_vm6, %v12284_v25 }
 0x3c1   :  { %v6083_v19 = vmul.f32 0.2, %v5753_v51  ;;  %vm6067_vm1 = vcmp.ge.f32.partialorder %v5753_v51, 0.0  ;;  %v5684_v11 = vadd.f32 %v5683_v35, %v5665_v8  ;;  %v10780_v8 = vld [vmem:[#allocation10 + $0x134] sm:$0xf0] }
 0x3c2   :  { %v9930_v12 = vor.u32 %v10780_v8, %v9929_v49 }
 0x3c3   :  { %v6099_v61 = vsel %vm6067_vm1, %v5753_v51, %v6083_v19  ;;  %6677 = vmatpush.bf16.msrb.mxu1 %v9854_v63  ;;  %v5703_v35 = vadd.f32 %v12305_v20, %v5684_v11  ;;  %v9937_v51 = vld [vmem:[#allocation10 + $0x140] sm:$0xf]  ;;  %v9922_v63 = vor.u32 %v10778_v60, %v9921_v62  ;;  %v9923_v62 = vld [vmem:[#allocation10 + $0x128] sm:$0xf0] }
 0x3c4   :  { %v6147_v56 = vmul.f32 1.4285715, %v6099_v61  ;;  %v9938_v39 = vor.u32 %v10782_v33, %v9937_v51  ;;  %v6116_v19 = vld [vmem:[%s12582_s6 + $0x10] sm:$0xff] }
 0x3c5   :  { %v5722_v50 = vadd.f32 %v12308_v29, %v5703_v35  ;;  %v6123_v29 = vld [vmem:[%s12582_s6 + $0x48] sm:$0xff]  ;;  %vm6132_vm10 = vcmp.ge.f32.partialorder %v6116_v19, 0.3 }
 0x3c6   :  { %v5754_v25 = vpop.f32.mrf.mxu3  ;;  %v12376_v2 = vpop.f32.mrf.mxu2  ;;  %vm6139_vm15 = vcmp.ge.f32.partialorder %v6123_v29, 0.3  ;;  %6617 = vmatpush.bf16.msra.mxu2 %v9938_v39  ;;  %v10779_v39 = vld [vmem:[#allocation10 + $0x134] sm:$0xf]  ;;  %v9985_v19 = vld [vmem:[#allocation10 + $0x1a0] sm:$0xf] }
 0x3c7   :  { %v5755_v27 = vadd.f32 %v5754_v25, %v5736_v46  ;;  %6678 = vmatpush.bf16.msrb.mxu1 %v9846_v38  ;;  %v12378_v31 = vpop.f32.mrf.mxu0  ;;  %v5741_v23 = vadd.f32 %v12315_v53, %v5722_v50  ;;  %vm12391_vm8 = vmpackc.low %vm6143_vm0, %vm6139_vm15  ;;  %v9905_v38 = vld [vmem:[#allocation10 + $0x100] sm:$0xf]  ;;  %v5774_v50 = vadd.f32 %v12334_v13, %v4172_v28  ;;  %v9950_v13 = vor.u32 %v10783_v26, %v9947_v3 }
 0x3c8   :  { %v5779_v49 = vadd.f32 %v12378_v31, %v4172_v28  ;;  %v10775_v31 = vld [vmem:[#allocation10 + $0x114] sm:$0xf] }
 0x3c9   :  { %vm6071_vm13 = vcmp.ge.f32.partialorder %v5755_v27, 0.0  ;;  %v6087_v55 = vmul.f32 0.2, %v5755_v27 }
 0x3ca   :  { %6618 = vmatpush.bf16.msra.mxu2 %v9930_v12 }
 0x3cb   :  { %v6103_v17 = vsel %vm6071_vm13, %v5755_v27, %v6087_v55  ;;  %9774 = vmatmul.msk.bf16.gmra.mxu3 %vm12025_vm14, %v12029_v54  ;;  %v5739_v54 = vadd.f32 %v12299_v41, %v5720_v4  ;;  %v5866_v27 = vpop.f32.mrf.mxu1  ;;  %v9913_v55 = vld [vmem:[#allocation10 + $0x110] sm:$0xf] }
 0x3cc   :  { %v6151_v42 = vmul.f32 1.4285715, %v6103_v17  ;;  %v9914_v17 = vor.u32 %v10776_v52, %v9913_v55  ;;  %v9915_v52 = vld [vmem:[#allocation10 + $0x118] sm:$0xf0] }
 0x3ce   :  { %v12369_v48 = vpack.c.bf16 %v6151_v42, %v6147_v56  ;;  %v5757_v6 = vpop.f32.mrf.mxu3  ;;  %v12389_v59 = vpop.f32.mrf.mxu2  ;;  %6619 = vmatpush.bf16.msra.mxu2 %v9922_v63  ;;  %v10774_v56 = vld [vmem:[#allocation10 + $0x104] sm:$0xf0]  ;;  %v5772_v42 = vadd.f32 %v12318_v58, %v4172_v28  ;;  %v10785_v58 = vld [vmem:[#allocation10 + $0x164] sm:$0xf] }
 0x3cf   :  { %v5758_v20 = vadd.f32 %v5757_v6, %v5739_v54  ;;  %v5847_v46 = vpop.f32.mrf.mxu0  ;;  %v9906_v35 = vor.u32 %v10774_v56, %v9905_v38  ;;  %v9918_v38 = vor.u32 %v10775_v31, %v9915_v52 }
 0x3d0   :  { %10039 = vmatmul.msk.bf16.vlgmr.msra.gmra.mxu1 %vm12363_vm7, %v12369_v48  ;;  %v5791_v54 = vadd.f32 %v12322_v10, %v5772_v42 }
 0x3d1   :  { %v6091_v18 = vmul.f32 0.2, %v5758_v20  ;;  %vm6075_vm14 = vcmp.ge.f32.partialorder %v5758_v20, 0.0 }
 0x3d2   :  { %6620 = vmatpush.bf16.msra.mxu2 %v9914_v17  ;;  %v5810_v36 = vadd.f32 %v12330_v1, %v5791_v54 }
 0x3d3   :  { %v6107_v15 = vsel %vm6075_vm14, %v5758_v20, %v6091_v18  ;;  %v5868_v6 = vpop.f32.mrf.mxu1 }
 0x3d4   :  { %v6155_v7 = vmul.f32 1.4285715, %v6107_v15  ;;  %v5777_v15 = vadd.f32 %v12356_v43, %v4172_v28 }
 0x3d6   :  { %v5759_v41 = vpop.f32.mrf.mxu3  ;;  %v5885_v11 = vpop.f32.mrf.mxu2  ;;  %6621 = vmatpush.bf16.msra.mxu2 %v9906_v35 }
 0x3d7   :  { %v5760_v47 = vadd.f32 %v5759_v41, %v5741_v23  ;;  %v5849_v4 = vpop.f32.mrf.mxu0  ;;  %v9958_v23 = vor.u32 %v10785_v58, %v9955_v0  ;;  %v5793_v41 = vadd.f32 %v12342_v22, %v5774_v50  ;;  %v9942_v22 = vor.u32 %v10781_v30, %v9939_v21 }
 0x3d9   :  { %vm6079_vm11 = vcmp.ge.f32.partialorder %v5760_v47, 0.0  ;;  %v6095_v53 = vmul.f32 0.2, %v5760_v47 }
 0x3da   :  { %6690 = vmatpush.bf16.msrb.mxu2 %v9966_v45 }
 0x3db   :  { %v6111_v5 = vsel %vm6079_vm11, %v5760_v47, %v6095_v53  ;;  %v12409_v10 = vpop.f32.mrf.mxu1 }
 0x3dc   :  { %v6159_v14 = vmul.f32 1.4285715, %v6111_v5 }
 0x3de   :  { %v5828_v25 = vpop.f32.mrf.mxu3  ;;  %v12395_v32 = vpack.c.bf16 %v6159_v14, %v6155_v7  ;;  %v5887_v20 = vpop.f32.mrf.mxu2  ;;  %6691 = vmatpush.bf16.msrb.mxu2 %v9958_v23  ;;  %v5796_v7 = vadd.f32 %v12367_v44, %v5777_v15  ;;  %v9931_v14 = vld [vmem:[#allocation10 + $0x138] sm:$0xf0]  ;;  %v10804_v23 = vld [vmem:[#allocation10 + $0x1f4] sm:$0xf0]  ;;  %v10009_v15 = vld [vmem:[#allocation10 + $0x1d0] sm:$0xf] }
 0x3df   :  { %v5852_v57 = vpop.f32.mrf.mxu0  ;;  %v5829_v18 = vadd.f32 %v5828_v25, %v5810_v36  ;;  %v9934_v25 = vor.u32 %v10779_v39, %v9931_v14  ;;  %v10001_v14 = vld [vmem:[#allocation10 + $0x1c0] sm:$0xf] }
 0x3e0   :  { %10042 = vmatmul.msk.bf16.gmra.mxu1 %vm12391_vm8, %v12395_v32  ;;  %v5815_v43 = vadd.f32 %v12376_v2, %v5796_v7 }
 0x3e1   :  { %v5848_v47 = vadd.f32 %v5847_v46, %v5829_v18  ;;  %v10025_v18 = vld [vmem:[#allocation10 + $0x1f0] sm:$0xf] }
 0x3e2   :  { %6692 = vmatpush.bf16.msrb.mxu2 %v9950_v13 }
 0x3e3   :  { %v5867_v53 = vadd.f32 %v5866_v27, %v5848_v47  ;;  %v5873_v46 = vpop.f32.mrf.mxu1  ;;  %v10777_v27 = vld [vmem:[#allocation10 + $0x124] sm:$0xf]  ;;  %v10802_v47 = vld [vmem:[#allocation10 + $0x1e4] sm:$0xf0] }
 0x3e4   :  { %v9926_v63 = vor.u32 %v10777_v27, %v9923_v62  ;;  %v6117_v27 = vld [vmem:[%s12582_s6 + $0x18] sm:$0xff] }
 0x3e5   :  { %vm6133_vm11 = vcmp.ge.f32.partialorder %v6117_v27, 0.3 }
 0x3e6   :  { %v5830_v61 = vpop.f32.mrf.mxu3  ;;  %v12412_v1 = vpop.f32.mrf.mxu2  ;;  %6693 = vmatpush.bf16.msrb.mxu2 %v9942_v22 }
 0x3e7   :  { %v5854_v51 = vpop.f32.mrf.mxu0 }
 0x3ea   :  { %6694 = vmatpush.bf16.msrb.mxu2 %v9934_v25  ;;  %v10798_v25 = vld [vmem:[#allocation10 + $0x1c4] sm:$0xf0] }
 0x3ee   :  { %v5833_v40 = vpop.f32.mrf.mxu3  ;;  %v5892_v44 = vpop.f32.mrf.mxu2  ;;  %6695 = vmatpush.bf16.msrb.mxu2 %v9926_v63 }
 0x3ef   :  { %v5834_v60 = vadd.f32 %v5833_v40, %v5815_v43  ;;  %v10773_v40 = vld [vmem:[#allocation10 + $0x104] sm:$0xf]  ;;  %v10002_v43 = vor.u32 %v10798_v25, %v10001_v14 }
 0x3f0   :  { %10063 = vmatmul.msk.bf16.vlgmr.msrb.gmra.mxu1 %vm12363_vm7, %v12369_v48  ;;  %v5812_v48 = vadd.f32 %v12354_v16, %v5793_v41  ;;  %v5886_v16 = vadd.f32 %v5885_v11, %v5867_v53  ;;  %v5798_v11 = vadd.f32 %v12387_v9, %v5779_v49  ;;  %v6120_v9 = vld [vmem:[%s12582_s6 + $0x30] sm:$0xff]  ;;  %v9910_v24 = vor.u32 %v10773_v40, %v9907_v34  ;;  %v10800_v53 = vld [vmem:[#allocation10 + $0x1d4] sm:$0xf0] }
 0x3f1   :  { %v5853_v17 = vadd.f32 %v5852_v57, %v5834_v60  ;;  %vm6136_vm3 = vcmp.ge.f32.partialorder %v6120_v9, 0.3  ;;  %v10838_v9 = vld [vmem:[#allocation8] sm:$0xf]  ;;  %v10790_v40 = vld [vmem:[#allocation10 + $0x184] sm:$0xf0] }
 0x3f2   :  { %v5831_v29 = vadd.f32 %v5830_v61, %v5812_v48  ;;  %v5817_v28 = vadd.f32 %v12389_v59, %v5798_v11  ;;  %6696 = vmatpush.bf16.msrb.mxu2 %v9918_v38  ;;  %vm12435_vm12 = vmpackc.low %vm6136_vm3, %vm6132_vm10  ;;  %v10017_v48 = vld [vmem:[#allocation10 + $0x1e0] sm:$0xf]  ;;  %v10796_v11 = vld [vmem:[#allocation10 + $0x1b4] sm:$0xf0]  ;;  %v4173_v38 = vperm.slane %v10838_v9, 3 }
 0x3f3   :  { %v5872_v59 = vadd.f32 %v12409_v10, %v5853_v17  ;;  %v10026_v10 = vor.u32 %v10804_v23, %v10025_v18  ;;  %v10018_v13 = vor.u32 %v10802_v47, %v10017_v48  ;;  %v9977_v17 = vld [vmem:[#allocation10 + $0x190] sm:$0xf] }
 0x3f4   :  { %v5850_v33 = vadd.f32 %v5849_v4, %v5831_v29 }
 0x3f5   :  { %v5891_v41 = vadd.f32 %v12412_v1, %v5872_v59  ;;  %6633 = vmatpush.bf16.msra.mxu3 %v10026_v10  ;;  %v10801_v10 = vld [vmem:[#allocation10 + $0x1e4] sm:$0xf] }
 0x3f6   :  { %v5835_v37 = vpop.f32.mrf.mxu3  ;;  %v5869_v12 = vadd.f32 %v5868_v6, %v5850_v33  ;;  %v12431_v6 = vpop.f32.mrf.mxu1  ;;  %6697 = vmatpush.bf16.msrb.mxu2 %v9910_v24  ;;  %v6128_v33 = vld [vmem:[%s12582_s6 + $0x70] sm:$0xff] }
 0x3f7   :  { %v5836_v56 = vadd.f32 %v5835_v37, %v5817_v28  ;;  %v12439_v57 = vpop.f32.mrf.mxu2  ;;  %vm6144_vm4 = vcmp.ge.f32.partialorder %v6128_v33, 0.3 }
 0x3f8   :  { %v5888_v55 = vadd.f32 %v5887_v20, %v5869_v12 }
 0x3f9   :  { %v5855_v50 = vadd.f32 %v5854_v51, %v5836_v56  ;;  %6634 = vmatpush.bf16.msra.mxu3 %v10018_v13  ;;  %v6124_v51 = vld [vmem:[%s12582_s6 + $0x50] sm:$0xff] }
 0x3fa   :  { %vm6140_vm13 = vcmp.ge.f32.partialorder %v6124_v51, 0.3 }
 0x3fb   :  { %v5874_v3 = vadd.f32 %v5873_v46, %v5855_v50  ;;  %vm12461_vm5 = vmpackc.low %vm6144_vm4, %vm6140_vm13 }
 0x3fd   :  { %v5893_v21 = vadd.f32 %v5892_v44, %v5874_v3  ;;  %v9993_v44 = vld [vmem:[#allocation10 + $0x1b0] sm:$0xf] }
 0x3fe   :  { %v5904_v5 = vpop.f32.mrf.mxu3  ;;  %v12449_v29 = vpop.f32.mrf.mxu1 }
 0x3ff   :  { %v5905_v8 = vadd.f32 %v5904_v5, %v5886_v16  ;;  %v10010_v5 = vor.u32 %v10800_v53, %v10009_v15  ;;  %v12457_v39 = vpop.f32.mrf.mxu2  ;;  %v10003_v53 = vld [vmem:[#allocation10 + $0x1c8] sm:$0xf0] }
 0x400   :  { %10066 = vmatmul.msk.bf16.gmra.mxu1 %vm12391_vm8, %v12395_v32  ;;  %v12425_v32 = vpop.f32.mrf.mxu0 }
 0x401   :  { %v6084_v61 = vmul.f32 0.2, %v5905_v8  ;;  %vm6068_vm9 = vcmp.ge.f32.partialorder %v5905_v8, 0.0  ;;  %6635 = vmatpush.bf16.msra.mxu3 %v10010_v5  ;;  %v5924_v34 = vadd.f32 %v12425_v32, %v4173_v38 }
 0x403   :  { %v6100_v42 = vsel %vm6068_vm9, %v5905_v8, %v6084_v61  ;;  %v9994_v61 = vor.u32 %v10796_v11, %v9993_v44  ;;  %v5943_v50 = vadd.f32 %v12431_v6, %v5924_v34 }
 0x404   :  { %v6148_v20 = vmul.f32 1.4285715, %v6100_v42 }
 0x405   :  { %6636 = vmatpush.bf16.msra.mxu3 %v10002_v43 }
 0x406   :  { %v5906_v2 = vpop.f32.mrf.mxu3  ;;  %v12465_v62 = vpop.f32.mrf.mxu1 }
 0x407   :  { %v5907_v4 = vadd.f32 %v5906_v2, %v5888_v55  ;;  %v12472_v55 = vpop.f32.mrf.mxu2  ;;  %v10794_v2 = vld [vmem:[#allocation10 + $0x1a4] sm:$0xf0] }
 0x408   :  { %v12444_v37 = vpop.f32.mrf.mxu0  ;;  %v9986_v31 = vor.u32 %v10794_v2, %v9985_v19 }
 0x409   :  { %vm6072_vm2 = vcmp.ge.f32.partialorder %v5907_v4, 0.0  ;;  %v6088_v35 = vmul.f32 0.2, %v5907_v4  ;;  %6637 = vmatpush.bf16.msra.mxu3 %v9994_v61  ;;  %v5926_v23 = vadd.f32 %v12444_v37, %v4173_v38 }
 0x40b   :  { %v6104_v54 = vsel %vm6072_vm2, %v5907_v4, %v6088_v35  ;;  %v10792_v4 = vld [vmem:[#allocation10 + $0x194] sm:$0xf0]  ;;  %v9969_v35 = vld [vmem:[#allocation10 + $0x180] sm:$0xf]  ;;  %v5945_v47 = vadd.f32 %v12449_v29, %v5926_v23 }
 0x40c   :  { %v6152_v45 = vmul.f32 1.4285715, %v6104_v54  ;;  %v9978_v56 = vor.u32 %v10792_v4, %v9977_v17  ;;  %v9970_v54 = vor.u32 %v10790_v40, %v9969_v35  ;;  %v10789_v35 = vld [vmem:[#allocation10 + $0x184] sm:$0xf]  ;;  %v9971_v40 = vld [vmem:[#allocation10 + $0x188] sm:$0xf0] }
 0x40d   :  { %6638 = vmatpush.bf16.msra.mxu3 %v9986_v31  ;;  %v5964_v36 = vadd.f32 %v12457_v39, %v5945_v47  ;;  %v9995_v39 = vld [vmem:[#allocation10 + $0x1b8] sm:$0xf0] }
 0x40e   :  { %v12441_v58 = vpack.c.bf16 %v6152_v45, %v6148_v20  ;;  %v5909_v0 = vpop.f32.mrf.mxu3  ;;  %v5949_v42 = vpop.f32.mrf.mxu1  ;;  %v10803_v45 = vld [vmem:[#allocation10 + $0x1f4] sm:$0xf] }
 0x40f   :  { %v5910_v26 = vadd.f32 %v5909_v0, %v5891_v41  ;;  %v12475_v59 = vpop.f32.mrf.mxu2  ;;  %v10027_v0 = vld [vmem:[#allocation10 + $0x1f8] sm:$0xf0]  ;;  %v5962_v41 = vadd.f32 %v12439_v57, %v5943_v50  ;;  %v10797_v57 = vld [vmem:[#allocation10 + $0x1c4] sm:$0xf] }
 0x410   :  { %10045 = vmatmul.msk.bf16.vlgmr.msra.gmra.mxu2 %vm12435_vm12, %v12441_v58  ;;  %v12459_v46 = vpop.f32.mrf.mxu0  ;;  %v10030_v18 = vor.u32 %v10803_v45, %v10027_v0  ;;  %v10006_v33 = vor.u32 %v10797_v57, %v10003_v53  ;;  %v9974_v45 = vor.u32 %v10789_v35, %v9971_v40 }
 0x411   :  { %v6092_v30 = vmul.f32 0.2, %v5910_v26  ;;  %vm6076_vm6 = vcmp.ge.f32.partialorder %v5910_v26, 0.0  ;;  %6639 = vmatpush.bf16.msra.mxu3 %v9978_v56  ;;  %v6121_v56 = vld [vmem:[%s12582_s6 + $0x38] sm:$0xff] }
 0x412   :  { %vm6137_vm15 = vcmp.ge.f32.partialorder %v6121_v56, 0.3 }
 0x413   :  { %v6108_v7 = vsel %vm6076_vm6, %v5910_v26, %v6092_v30  ;;  %v10019_v26 = vld [vmem:[#allocation10 + $0x1e8] sm:$0xf0]  ;;  %v10799_v30 = vld [vmem:[#allocation10 + $0x1d4] sm:$0xf]  ;;  %vm12498_vm0 = vmpackc.low %vm6137_vm15, %vm6133_vm11 }
 0x414   :  { %v6156_v8 = vmul.f32 1.4285715, %v6108_v7  ;;  %v10022_v48 = vor.u32 %v10801_v10, %v10019_v26 }
 0x415   :  { %6640 = vmatpush.bf16.msra.mxu3 %v9970_v54 }
 0x416   :  { %v5911_v1 = vpop.f32.mrf.mxu3  ;;  %v6018_v32 = vpop.f32.mrf.mxu1 }
 0x417   :  { %v5912_v22 = vadd.f32 %v5911_v1, %v5893_v21  ;;  %v6037_v13 = vpop.f32.mrf.mxu2  ;;  %v10011_v21 = vld [vmem:[#allocation10 + $0x1d8] sm:$0xf0] }
 0x418   :  { %v5930_v52 = vpop.f32.mrf.mxu0  ;;  %v10014_v1 = vor.u32 %v10799_v30, %v10011_v21 }
 0x419   :  { %vm6080_vm1 = vcmp.ge.f32.partialorder %v5912_v22, 0.0  ;;  %v6096_v16 = vmul.f32 0.2, %v5912_v22  ;;  %6709 = vmatpush.bf16.msrb.mxu3 %v10030_v18 }
 0x41b   :  { %v6112_v49 = vsel %vm6080_vm1, %v5912_v22, %v6096_v16  ;;  %v5929_v22 = vadd.f32 %v12459_v46, %v4173_v38  ;;  %v10795_v16 = vld [vmem:[#allocation10 + $0x1b4] sm:$0xf]  ;;  %v5931_v46 = vadd.f32 %v5930_v52, %v4173_v38  ;;  %v9979_v52 = vld [vmem:[#allocation10 + $0x198] sm:$0xf0] }
 0x41c   :  { %v6160_v12 = vmul.f32 1.4285715, %v6112_v49  ;;  %v9998_v43 = vor.u32 %v10795_v16, %v9995_v39 }
 0x41d   :  { %6710 = vmatpush.bf16.msrb.mxu3 %v10022_v48  ;;  %v5948_v14 = vadd.f32 %v12465_v62, %v5929_v22  ;;  %v5950_v62 = vadd.f32 %v5949_v42, %v5931_v46 }
 0x41e   :  { %v12467_v60 = vpack.c.bf16 %v6160_v12, %v6156_v8  ;;  %v5980_v63 = vpop.f32.mrf.mxu3  ;;  %v6020_v5 = vpop.f32.mrf.mxu1  ;;  %v10793_v8 = vld [vmem:[#allocation10 + $0x1a4] sm:$0xf]  ;;  %v9987_v12 = vld [vmem:[#allocation10 + $0x1a8] sm:$0xf0] }
 0x41f   :  { %v5981_v3 = vadd.f32 %v5980_v63, %v5962_v41  ;;  %v6039_v49 = vpop.f32.mrf.mxu2  ;;  %v5967_v63 = vadd.f32 %v12472_v55, %v5948_v14  ;;  %v9990_v19 = vor.u32 %v10793_v8, %v9987_v12  ;;  %v5969_v55 = vadd.f32 %v12475_v59, %v5950_v62 }
 0x420   :  { %10048 = vmatmul.msk.bf16.gmra.mxu2 %vm12461_vm5, %v12467_v60  ;;  %v5999_v24 = vpop.f32.mrf.mxu0 }
 0x421   :  { %6711 = vmatpush.bf16.msrb.mxu3 %v10014_v1  ;;  %v6125_v1 = vld [vmem:[%s12582_s6 + $0x58] sm:$0xff] }
 0x422   :  { %vm6141_vm10 = vcmp.ge.f32.partialorder %v6125_v1, 0.3 }
 0x425   :  { %6712 = vmatpush.bf16.msrb.mxu3 %v10006_v33 }
 0x426   :  { %v5982_v28 = vpop.f32.mrf.mxu3  ;;  %v6023_v17 = vpop.f32.mrf.mxu1 }
 0x427   :  { %v5983_v15 = vadd.f32 %v5982_v28, %v5964_v36 }
 0x428   :  { %v6001_v37 = vpop.f32.mrf.mxu0 }
 0x429   :  { %v6002_v29 = vadd.f32 %v6001_v37, %v5983_v15  ;;  %6713 = vmatpush.bf16.msrb.mxu3 %v9998_v43  ;;  %v6129_v37 = vld [vmem:[%s12582_s6 + $0x78] sm:$0xff] }
 0x42a   :  { %vm6145_vm2 = vcmp.ge.f32.partialorder %v6129_v37, 0.3 }
 0x42b   :  { %v6021_v11 = vadd.f32 %v6020_v5, %v6002_v29  ;;  %vm10052_vm3 = vmpackc.low %vm6145_vm2, %vm6141_vm10 }
 0x42d   :  { %v6040_v28 = vadd.f32 %v6039_v49, %v6021_v11  ;;  %6714 = vmatpush.bf16.msrb.mxu3 %v9990_v19 }
 0x42e   :  { %v5985_v20 = vpop.f32.mrf.mxu3  ;;  %v6025_v48 = vpop.f32.mrf.mxu1 }
 0x42f   :  { %v5986_v2 = vadd.f32 %v5985_v20, %v5967_v63  ;;  %v6042_v20 = vpop.f32.mrf.mxu2 }
 0x430   :  { %10069 = vmatmul.msk.bf16.vlgmr.msrb.gmra.mxu2 %vm12435_vm12, %v12441_v58  ;;  %v6000_v58 = vadd.f32 %v5999_v24, %v5981_v3  ;;  %v6004_v61 = vpop.f32.mrf.mxu0 }
 0x431   :  { %v6005_v9 = vadd.f32 %v6004_v61, %v5986_v2 }
 0x432   :  { %v6019_v51 = vadd.f32 %v6018_v32, %v6000_v58 }
 0x433   :  { %v6024_v59 = vadd.f32 %v6023_v17, %v6005_v9 }
 0x434   :  { %v6038_v25 = vadd.f32 %v6037_v13, %v6019_v51 }
 0x435   :  { %v6043_v3 = vadd.f32 %v6042_v20, %v6024_v59 }
 0x436   :  { %v5987_v6 = vpop.f32.mrf.mxu3 }
 0x437   :  { %v5988_v34 = vadd.f32 %v5987_v6, %v5969_v55  ;;  %v6044_v6 = vpop.f32.mrf.mxu2 }
 0x438   :  { %v6006_v0 = vpop.f32.mrf.mxu0 }
 0x439   :  { %v6007_v41 = vadd.f32 %v6006_v0, %v5988_v34  ;;  %v6752_v0 = vld [vmem:[%s12585_s9] sm:$0xff] }
 0x43a   :  { %vm6760_vm1 = vcmp.ge.f32.partialorder %v6752_v0, 0.3 }
 0x43b   :  { %v6026_v13 = vadd.f32 %v6025_v48, %v6007_v41 }
 0x43d   :  { %v6045_v21 = vadd.f32 %v6044_v6, %v6026_v13  ;;  %v6796_v6 = vld [vmem:[#allocation13] sm:$0x3] }
 0x43e   :  { %v6056_v7 = vpop.f32.mrf.mxu3 }
 0x43f   :  { %v6057_v44 = vadd.f32 %v6056_v7, %v6038_v25 }
 0x440   :  { %10072 = vmatmul.msk.bf16.gmra.mxu2 %vm12461_vm5, %v12467_v60  ;;  %v10791_v60 = vld [vmem:[#allocation10 + $0x194] sm:$0xf]  ;;  %v6585_v5 = vpop.f32.mrf.mxu0 }
 0x441   :  { %v6085_v31 = vmul.f32 0.2, %v6057_v44  ;;  %vm6069_vm7 = vcmp.ge.f32.partialorder %v6057_v44, 0.0  ;;  %v9982_v42 = vor.u32 %v10791_v60, %v9979_v52 }
 0x443   :  { %v6101_v54 = vsel %vm6069_vm7, %v6057_v44, %v6085_v31  ;;  %6715 = vmatpush.bf16.msrb.mxu3 %v9982_v42  ;;  %v6250_v44 = vld [vmem:[#allocation11] sm:$0x3] }
 0x444   :  { %v6149_v18 = vmul.f32 1.4285715, %v6101_v54  ;;  %v6252_v61 = vperm.slane %v6250_v44, 0 }
 0x446   :  { %v6058_v4 = vpop.f32.mrf.mxu3  ;;  %v6586_v62 = vadd.f32 %v6585_v5, %v6252_v61 }
 0x447   :  { %v6059_v38 = vadd.f32 %v6058_v4, %v6040_v28  ;;  %6716 = vmatpush.bf16.msrb.mxu3 %v9974_v45  ;;  %v12514_v4 = vperm.slane %v6250_v44, 1 }
 0x448   :  { %v6587_v16 = vpop.f32.mrf.mxu0 }
 0x449   :  { %vm6073_vm14 = vcmp.ge.f32.partialorder %v6059_v38, 0.0  ;;  %v6089_v24 = vmul.f32 0.2, %v6059_v38  ;;  %v6588_v55 = vadd.f32 %v6587_v16, %v6252_v61 }
 0x44b   :  { %v6105_v50 = vsel %vm6073_vm14, %v6059_v38, %v6089_v24 }
 0x44c   :  { %v6153_v23 = vmul.f32 1.4285715, %v6105_v50 }
 0x44d   :  { %v6604_v29 = vpop.f32.mrf.mxu1 }
 0x44e   :  { %v10050_v10 = vpack.c.bf16 %v6153_v23, %v6149_v18  ;;  %v6061_v26 = vpop.f32.mrf.mxu3  ;;  %v6605_v28 = vadd.f32 %v6604_v29, %v6586_v62  ;;  %v6753_v23 = vld [vmem:[%s12585_s9 + $0x8] sm:$0xff] }
 0x44f   :  { %v6062_v47 = vadd.f32 %v6061_v26, %v6043_v3  ;;  %vm6761_vm13 = vcmp.ge.f32.partialorder %v6753_v23, 0.3 }
 0x450   :  { %10051 = vmatmul.msk.bf16.vlgmr.msra.gmra.mxu3 %vm12498_vm0, %v10050_v10  ;;  %v6590_v39 = vpop.f32.mrf.mxu0 }
 0x451   :  { %v6093_v30 = vmul.f32 0.2, %v6062_v47  ;;  %vm6077_vm8 = vcmp.ge.f32.partialorder %v6062_v47, 0.0  ;;  %v6591_v18 = vadd.f32 %v6590_v39, %v6252_v61 }
 0x453   :  { %v6109_v15 = vsel %vm6077_vm8, %v6062_v47, %v6093_v30 }
 0x454   :  { %v6157_v22 = vmul.f32 1.4285715, %v6109_v15 }
 0x455   :  { %v6606_v14 = vpop.f32.mrf.mxu1 }
 0x456   :  { %v6063_v36 = vpop.f32.mrf.mxu3  ;;  %v6607_v56 = vadd.f32 %v6606_v14, %v6588_v55 }
 0x457   :  { %v6064_v58 = vadd.f32 %v6063_v36, %v6045_v21 }
 0x458   :  { %v6592_v12 = vpop.f32.mrf.mxu0 }
 0x459   :  { %vm6081_vm9 = vcmp.ge.f32.partialorder %v6064_v58, 0.0  ;;  %v6097_v57 = vmul.f32 0.2, %v6064_v58  ;;  %v6593_v21 = vadd.f32 %v6592_v12, %v6252_v61 }
 0x45b   :  { %v6113_v53 = vsel %vm6081_vm9, %v6064_v58, %v6097_v57 }
 0x45c   :  { %v6161_v51 = vmul.f32 1.4285715, %v6113_v53  ;;  %v12526_v53 = vperm.slane %v6796_v6, 0 }
 0x45d   :  { %v6609_v49 = vpop.f32.mrf.mxu1 }
 0x45e   :  { %v10053_v33 = vpack.c.bf16 %v6161_v51, %v6157_v22  ;;  %v12528_v22 = vperm.slane %v6796_v6, 1 }
 0x460   :  { %10054 = vmatmul.msk.bf16.gmra.mxu3 %vm10052_vm3, %v10053_v33  ;;  %v6661_v2 = vpop.f32.mrf.mxu0 }
 0x461   :  { %v6662_v9 = vadd.f32 %v6661_v2, %v12514_v4 }
 0x465   :  { %v6611_v63 = vpop.f32.mrf.mxu1 }
 0x468   :  { %v6663_v38 = vpop.f32.mrf.mxu0 }
 0x469   :  { %v6664_v41 = vadd.f32 %v6663_v38, %v12514_v4 }
 0x46d   :  { %v6680_v31 = vpop.f32.mrf.mxu1 }
 0x46e   :  { %v6681_v42 = vadd.f32 %v6680_v31, %v6662_v9 }
 0x470   :  { %10075 = vmatmul.msk.bf16.vlgmr.msrb.gmra.mxu3 %vm12498_vm0, %v10050_v10  ;;  %v6610_v10 = vadd.f32 %v6609_v49, %v6591_v18  ;;  %v6666_v3 = vpop.f32.mrf.mxu0 }
 0x471   :  { %v6667_v14 = vadd.f32 %v6666_v3, %v12514_v4 }
 0x475   :  { %v6682_v35 = vpop.f32.mrf.mxu1 }
 0x476   :  { %v6683_v48 = vadd.f32 %v6682_v35, %v6664_v41 }
 0x478   :  { %v6668_v31 = vpop.f32.mrf.mxu0 }
 0x47d   :  { %v6685_v36 = vpop.f32.mrf.mxu1 }
 0x47e   :  { %v6686_v12 = vadd.f32 %v6685_v36, %v6667_v14 }
 0x480   :  { %10078 = vmatmul.msk.bf16.gmra.mxu3 %vm10052_vm3, %v10053_v33  ;;  %v6754_v33 = vld [vmem:[%s12585_s9 + $0x10] sm:$0xff] }
 0x481   :  { %vm6762_vm7 = vcmp.ge.f32.partialorder %v6754_v33, 0.3 }
 0x485   :  { %v6687_v9 = vpop.f32.mrf.mxu1 }
 0x493   :  { %v6623_v7 = vpop.f32.mrf.mxu2 }
 0x494   :  { %v6624_v27 = vadd.f32 %v6623_v7, %v6605_v28  ;;  %v6755_v7 = vld [vmem:[%s12585_s9 + $0x18] sm:$0xff] }
 0x495   :  { %vm6763_vm14 = vcmp.ge.f32.partialorder %v6755_v7, 0.3 }
 0x49b   :  { %v6625_v25 = vpop.f32.mrf.mxu2 }
 0x49c   :  { %v6626_v34 = vadd.f32 %v6625_v25, %v6607_v56  ;;  %v6612_v25 = vadd.f32 %v6611_v63, %v6593_v21 }
 0x4a3   :  { %v6628_v8 = vpop.f32.mrf.mxu2 }
 0x4a4   :  { %v6629_v58 = vadd.f32 %v6628_v8, %v6610_v10 }
 0x4ab   :  { %v12512_v11 = vpop.f32.mrf.mxu2 }
 0x4ac   :  { %v6631_v63 = vadd.f32 %v12512_v11, %v6612_v25  ;;  %v6757_v11 = vld [vmem:[%s12585_s9 + $0x28] sm:$0xff] }
 0x4ad   :  { %vm6765_vm8 = vcmp.ge.f32.partialorder %v6757_v11, 0.3 }
 0x4b3   :  { %v6699_v17 = vpop.f32.mrf.mxu2 }
 0x4b4   :  { %v6700_v54 = vadd.f32 %v6699_v17, %v6681_v42 }
 0x4bb   :  { %v6701_v24 = vpop.f32.mrf.mxu2 }
 0x4bc   :  { %v6702_v1 = vadd.f32 %v6701_v24, %v6683_v48 }
 0x4c3   :  { %v6704_v39 = vpop.f32.mrf.mxu2 }
 0x4c4   :  { %v6705_v28 = vadd.f32 %v6704_v39, %v6686_v12 }
 0x4d3   :  { %v6642_v43 = vpop.f32.mrf.mxu3 }
 0x4d4   :  { %v6643_v52 = vadd.f32 %v6642_v43, %v6624_v27 }
 0x4d6   :  { %v6736_v40 = vmul.f32 0.2, %v6643_v52  ;;  %vm6728_vm12 = vcmp.ge.f32.partialorder %v6643_v52, 0.0 }
 0x4d8   :  { %v6744_v45 = vsel %vm6728_vm12, %v6643_v52, %v6736_v40  ;;  %v6756_v40 = vld [vmem:[%s12585_s9 + $0x20] sm:$0xff] }
 0x4d9   :  { %v6768_v26 = vmul.f32 1.4285715, %v6744_v45  ;;  %vm6764_vm0 = vcmp.ge.f32.partialorder %v6756_v40, 0.3 }
 0x4db   :  { %v6644_v46 = vpop.f32.mrf.mxu3  ;;  %v6776_v15 = vsel %vm6760_vm1, %v6768_v26, 0.0  ;;  %vm6906_vm1 = vcmask 7168  }
 0x4dc   :  { %v6645_v50 = vadd.f32 %v6644_v46, %v6626_v34  ;;  %v6669_v34 = vadd.f32 %v6668_v31, %v12514_v4 }
 0x4de   :  { %v6738_v47 = vmul.f32 0.2, %v6645_v50  ;;  %vm6730_vm4 = vcmp.ge.f32.partialorder %v6645_v50, 0.0  ;;  %v6688_v45 = vadd.f32 %v6687_v9, %v6669_v34 }
 0x4e0   :  { %v6746_v51 = vsel %vm6730_vm4, %v6645_v50, %v6738_v47  ;;  %v6706_v50 = vpop.f32.mrf.mxu2  ;;  %v6758_v47 = vld [vmem:[%s12585_s9 + $0x30] sm:$0xff] }
 0x4e1   :  { %v6770_v46 = vmul.f32 1.4285715, %v6746_v51  ;;  %vm6766_vm2 = vcmp.ge.f32.partialorder %v6758_v47, 0.3 }
 0x4e3   :  { %v6647_v19 = vpop.f32.mrf.mxu3  ;;  %v6778_v27 = vsel %vm6762_vm7, %v6770_v46, 0.0 }
 0x4e4   :  { %v6648_v5 = vadd.f32 %v6647_v19, %v6629_v58 }
 0x4e6   :  { %v6740_v44 = vmul.f32 0.2, %v6648_v5  ;;  %vm6732_vm11 = vcmp.ge.f32.partialorder %v6648_v5, 0.0 }
 0x4e8   :  { %v6748_v38 = vsel %vm6732_vm11, %v6648_v5, %v6740_v44 }
 0x4eb   :  { %v12516_v60 = vpop.f32.mrf.mxu3 }
 0x4ec   :  { %v6650_v56 = vadd.f32 %v12516_v60, %v6631_v63  ;;  %v6772_v60 = vmul.f32 1.4285715, %v6748_v38 }
 0x4ee   :  { %vm6734_vm9 = vcmp.ge.f32.partialorder %v6650_v56, 0.0  ;;  %v6780_v26 = vsel %vm6764_vm0, %v6772_v60, 0.0 }
 0x4f3   :  { %v6718_v20 = vpop.f32.mrf.mxu3 }
 0x4f4   :  { %v6719_v59 = vadd.f32 %v6718_v20, %v6700_v54 }
 0x4f6   :  { %vm6729_vm6 = vcmp.ge.f32.partialorder %v6719_v59, 0.0  ;;  %v6737_v32 = vmul.f32 0.2, %v6719_v59 }
 0x4f8   :  { %v6745_v13 = vsel %vm6729_vm6, %v6719_v59, %v6737_v32  ;;  %v6742_v59 = vmul.f32 0.2, %v6650_v56  ;;  %v6707_v32 = vadd.f32 %v6706_v50, %v6688_v45 }
 0x4f9   :  { %v6769_v30 = vmul.f32 1.4285715, %v6745_v13 }
 0x4fa   :  { %v6750_v48 = vsel %vm6734_vm9, %v6650_v56, %v6742_v59 }
 0x4fb   :  { %v6720_v37 = vpop.f32.mrf.mxu3  ;;  %v6777_v57 = vsel %vm6761_vm13, %v6769_v30, 0.0  ;;  %v6759_v30 = vld [vmem:[%s12585_s9 + $0x38] sm:$0xff] }
 0x4fc   :  { %v6721_v29 = vadd.f32 %v6720_v37, %v6702_v1  ;;  %v6784_v16 = vpack.c.bf16 %v6777_v57, %v6776_v15  ;;  %v6774_v1 = vmul.f32 1.4285715, %v6750_v48  ;;  %vm6767_vm3 = vcmp.ge.f32.partialorder %v6759_v30, 0.3 }
 0x4fe   :  { %vm6731_vm5 = vcmp.ge.f32.partialorder %v6721_v29, 0.0  ;;  %v6739_v49 = vmul.f32 0.2, %v6721_v29  ;;  %v6788_v43 = vunpack.c.l.bf16 %v6784_v16  ;;  %v6789_v8 = vunpack.c.h.bf16 %v6784_v16 }
 0x4ff   :  { %v6782_v5 = vsel %vm6766_vm2, %v6774_v1, 0.0 }
 0x500   :  { %v6747_v61 = vsel %vm6731_vm5, %v6721_v29, %v6739_v49  ;;  %v6802_v19 = vmul.f32 %v12526_v53, %v6788_v43  ;;  %v6803_v2 = vmul.f32 %v12528_v22, %v6789_v8  ;;  %v10818_v43 = vld [vmem:[#allocation2] ss:$0 sm:$0xff] }
 0x501   :  { %v6771_v62 = vmul.f32 1.4285715, %v6747_v61 }
 0x502   :  { %v6810_v17 = vadd.f32 %v6803_v2, %v6802_v19 }
 0x503   :  { %v6779_v52 = vsel %vm6763_vm14, %v6771_v62, 0.0  ;;  %v6723_v55 = vpop.f32.mrf.mxu3 }
 0x504   :  { %v6724_v42 = vadd.f32 %v6723_v55, %v6705_v28  ;;  %6811 = vadd.xlane.f32.xlu0 %v6810_v17  ;;  %v6785_v35 = vpack.c.bf16 %v6779_v52, %v6778_v27 }
 0x506   :  { %vm6733_vm15 = vcmp.ge.f32.partialorder %v6724_v42, 0.0  ;;  %v6741_v54 = vmul.f32 0.2, %v6724_v42  ;;  %v6790_v24 = vunpack.c.l.bf16 %v6785_v35  ;;  %v6791_v20 = vunpack.c.h.bf16 %v6785_v35 }
 0x508   :  { %v6749_v0 = vsel %vm6733_vm15, %v6724_v42, %v6741_v54  ;;  %v6804_v18 = vmul.f32 %v12526_v53, %v6790_v24  ;;  %v6805_v23 = vmul.f32 %v12528_v22, %v6791_v20 }
 0x509   :  { %v6773_v41 = vmul.f32 1.4285715, %v6749_v0 }
 0x50a   :  { %v6813_v10 = vadd.f32 %v6805_v23, %v6804_v18 }
 0x50b   :  { %v6725_v4 = vpop.f32.mrf.mxu3  ;;  %v6781_v3 = vsel %vm6765_vm8, %v6773_v41, 0.0 }
 0x50c   :  { %v6726_v13 = vadd.f32 %v6725_v4, %v6707_v32  ;;  %6814 = vadd.xlane.f32.xlu0 %v6813_v10  ;;  %v6786_v6 = vpack.c.bf16 %v6781_v3, %v6780_v26 }
 0x50e   :  { %vm6735_vm10 = vcmp.ge.f32.partialorder %v6726_v13, 0.0  ;;  %v6743_v21 = vmul.f32 0.2, %v6726_v13  ;;  %v6792_v36 = vunpack.c.l.bf16 %v6786_v6  ;;  %v6793_v58 = vunpack.c.h.bf16 %v6786_v6 }
 0x510   :  { %v6751_v37 = vsel %vm6735_vm10, %v6726_v13, %v6743_v21  ;;  %v6806_v15 = vmul.f32 %v12526_v53, %v6792_v36  ;;  %v6807_v57 = vmul.f32 %v12528_v22, %v6793_v58 }
 0x511   :  { %v6775_v51 = vmul.f32 1.4285715, %v6751_v37 }
 0x512   :  { %v6816_v33 = vadd.f32 %v6807_v57, %v6806_v15 }
 0x513   :  { %v6783_v29 = vsel %vm6767_vm3, %v6775_v51, 0.0 }
 0x514   :  { %6817 = vadd.xlane.f32.xlu1 %v6816_v33  ;;  %v6787_v7 = vpack.c.bf16 %v6783_v29, %v6782_v5 }
 0x516   :  { %v6794_v16 = vunpack.c.l.bf16 %v6787_v7  ;;  %v6795_v14 = vunpack.c.h.bf16 %v6787_v7 }
 0x518   :  { %v6808_v25 = vmul.f32 %v12526_v53, %v6794_v16  ;;  %v6809_v39 = vmul.f32 %v12528_v22, %v6795_v14 }
 0x51a   :  { %v6819_v49 = vadd.f32 %v6809_v39, %v6808_v25 }
 0x51c   :  { %6820 = vadd.xlane.f32.xlu1 %v6819_v49 }
 0x577   :  { %v6812_v8 = vpop.xlane.xlu0 %6811 }
 0x578   :  { %v6826_v12 = vadd.f32 %v10818_v43, %v6812_v8 }
 0x57a   :  { %v6830_v46 = vsub.f32 0.0, %v6826_v12 }
 0x57c   :  { %v6834_v44 = vmul.f32 1.442695, %v6830_v46 }
 0x57e   :  { %10819 = vpow2.f32 %v6834_v44 }
 0x57f   :  { %v6815_v61 = vpop.xlane.xlu0 %6814 }
 0x580   :  { %v6827_v19 = vadd.f32 %v10818_v43, %v6815_v61 }
 0x582   :  { %v6831_v2 = vsub.f32 0.0, %v6827_v19 }
 0x584   :  { %v10820_v62 = vpop.eup %10819  ;;  %v6836_v31 = vmul.f32 1.442695, %v6831_v2 }
 0x585   :  { %v6842_v63 = vadd.f32 1.0, %v10820_v62 }
 0x586   :  { %10821 = vpow2.f32 %v6836_v31 }
 0x587   :  { %10823 = vrcp.f32 %v6842_v63  ;;  %v6818_v28 = vpop.xlane.xlu1 %6817  ;;  %v6857_v35 = vand.u32 2147483648, %v6842_v63  ;;  %v6855_v11 = vand.u32 2147483647, %v6842_v63  ;;  %vm6851_vm6 = vweird.f32 %v6842_v63 }
 0x588   :  { %v6828_v53 = vadd.f32 %v10818_v43, %v6818_v28 }
 0x589   :  { %v6858_v50 = vor.u32 1.1754944e-38, %v6857_v35  ;;  %vm6856_vm4 = vcmp.eq.f32.partialorder %v6855_v11, 8.507059e+37 }
 0x58a   :  { %v6832_v17 = vsub.f32 0.0, %v6828_v53 }
 0x58c   :  { %v10822_v22 = vpop.eup %10821  ;;  %v6838_v27 = vmul.f32 1.442695, %v6832_v17 }
 0x58d   :  { %v10824_v52 = vpop.eup %10823  ;;  %v6843_v55 = vadd.f32 1.0, %v10822_v22 }
 0x58e   :  { %v6847_v9 = vmul.f32 %v10824_v52, %v6842_v63  ;;  %10825 = vpow2.f32 %v6838_v27  ;;  %vm6852_vm12 = vweird.f32 %v10824_v52 }
 0x58f   :  { %10827 = vrcp.f32 %v6843_v55  ;;  %v6821_v38 = vpop.xlane.xlu1 %6820  ;;  %vm6853_vm13 = vmor %vm6851_vm6, %vm6852_vm12  ;;  %v6872_v41 = vand.u32 2147483648, %v6843_v55  ;;  %v6870_v10 = vand.u32 2147483647, %v6843_v55  ;;  %vm6866_vm7 = vweird.f32 %v6843_v55 }
 0x590   :  { %v6848_v56 = vsub.f32 1.0, %v6847_v9  ;;  %v6829_v42 = vadd.f32 %v10818_v43, %v6821_v38 }
 0x591   :  { %v6873_v48 = vor.u32 1.1754944e-38, %v6872_v41  ;;  %vm6871_vm11 = vcmp.eq.f32.partialorder %v6870_v10, 8.507059e+37 }
 0x592   :  { %v6849_v40 = vmul.f32 %v10824_v52, %v6848_v56  ;;  %v6833_v34 = vsub.f32 0.0, %v6829_v42 }
 0x594   :  { %v10826_v54 = vpop.eup %10825  ;;  %v6850_v24 = vadd.f32 %v10824_v52, %v6849_v40  ;;  %v6840_v20 = vmul.f32 1.442695, %v6833_v34 }
 0x595   :  { %v10828_v45 = vpop.eup %10827  ;;  %v6844_v60 = vadd.f32 1.0, %v10826_v54 }
 0x596   :  { %v6854_v59 = vsel %vm6853_vm13, %v10824_v52, %v6850_v24  ;;  %v6862_v0 = vmul.f32 %v10828_v45, %v6843_v55  ;;  %10829 = vpow2.f32 %v6840_v20  ;;  %vm6867_vm5 = vweird.f32 %v10828_v45 }
 0x597   :  { %v6859_v18 = vsel %vm6856_vm4, %v6858_v50, %v6854_v59  ;;  %10831 = vrcp.f32 %v6844_v60  ;;  %vm6868_vm14 = vmor %vm6866_vm7, %vm6867_vm5  ;;  %v6887_v36 = vand.u32 2147483648, %v6844_v60  ;;  %v6885_v1 = vand.u32 2147483647, %v6844_v60 }
 0x598   :  { %6907 = vst.msk [vmem:[%s12588_s12] sm:$0xff] %vm6906_vm1, %v6859_v18  ;;  %v6863_v23 = vsub.f32 1.0, %v6862_v0  ;;  %vm6881_vm0 = vweird.f32 %v6844_v60 }
 0x599   :  { %v6888_v57 = vor.u32 1.1754944e-38, %v6887_v36  ;;  %vm6886_vm9 = vcmp.eq.f32.partialorder %v6885_v1, 8.507059e+37 }
 0x59a   :  { %v6864_v32 = vmul.f32 %v10828_v45, %v6863_v23 }
 0x59c   :  { %v10830_v4 = vpop.eup %10829  ;;  %v6865_v26 = vadd.f32 %v10828_v45, %v6864_v32 }
 0x59d   :  { %v10832_v3 = vpop.eup %10831  ;;  %v6845_v47 = vadd.f32 1.0, %v10830_v4 }
 0x59e   :  { %v6869_v13 = vsel %vm6868_vm14, %v10828_v45, %v6865_v26  ;;  %v6877_v6 = vmul.f32 %v10832_v3, %v6844_v60  ;;  %vm6882_vm15 = vweird.f32 %v10832_v3 }
 0x59f   :  { %v6874_v30 = vsel %vm6871_vm11, %v6873_v48, %v6869_v13  ;;  %10833 = vrcp.f32 %v6845_v47  ;;  %vm6883_vm8 = vmor %vm6881_vm0, %vm6882_vm15  ;;  %v6902_v7 = vand.u32 2147483648, %v6845_v47  ;;  %v6900_v14 = vand.u32 2147483647, %v6845_v47 }
 0x5a0   :  { %6908 = vst.msk [vmem:[%s12588_s12 + $0x8] sm:$0xff] %vm6906_vm1, %v6874_v30  ;;  %v6878_v21 = vsub.f32 1.0, %v6877_v6  ;;  %vm6896_vm2 = vweird.f32 %v6845_v47 }
 0x5a1   :  { %v6903_v39 = vor.u32 1.1754944e-38, %v6902_v7  ;;  %vm6901_vm12 = vcmp.eq.f32.partialorder %v6900_v14, 8.507059e+37 }
 0x5a2   :  { %v6879_v58 = vmul.f32 %v10832_v3, %v6878_v21 }
 0x5a4   :  { %v6880_v37 = vadd.f32 %v10832_v3, %v6879_v58 }
 0x5a5   :  { %v10834_v15 = vpop.eup %10833 }
 0x5a6   :  { %v6884_v51 = vsel %vm6883_vm8, %v10832_v3, %v6880_v37  ;;  %v6892_v33 = vmul.f32 %v10834_v15, %v6845_v47  ;;  %vm6897_vm10 = vweird.f32 %v10834_v15 }
 0x5a7   :  { %v6889_v5 = vsel %vm6886_vm9, %v6888_v57, %v6884_v51  ;;  %vm6898_vm3 = vmor %vm6896_vm2, %vm6897_vm10 }
 0x5a8   :  { %6909 = vst.msk [vmem:[%s12588_s12 + $0x10] sm:$0xff] %vm6906_vm1, %v6889_v5  ;;  %v6893_v29 = vsub.f32 1.0, %v6892_v33 }
 0x5aa   :  { %v6894_v16 = vmul.f32 %v10834_v15, %v6893_v29 }
 0x5ac   :  { %v6895_v25 = vadd.f32 %v10834_v15, %v6894_v16 }
 0x5ae   :  { %v6899_v49 = vsel %vm6898_vm3, %v10834_v15, %v6895_v25 }
 0x5af   :  { %v6904_v43 = vsel %vm6901_vm12, %v6903_v39, %v6899_v49 }
 0x5b0   :  { %6910 = vst.msk [vmem:[%s12588_s12 + $0x18] sm:$0xff] %vm6906_vm1, %v6904_v43 }
 0x5b1   :  { %6915 = vsyncpa [#allocation4], 1 }
 0x5b2   :  { %6916 = vsyncpa [#allocation6], 1 }
 0x5b3   :  { %6917 = vsyncpa [#allocation9], 1 }
 0x5b4   :  { %6918 = vsyncpa [#allocation12], 1 }

</bundles_post_ra>
